<compile_context>
chip_gen: v7x
topology: tpu7x:2x2x1
jax: 0.10.0
libtpu: 0.0.40
codegen_flags: <defaults>
</compile_context>

<pallas_src>
import functools

import jax
import jax.numpy as jnp
from jax import lax
from jax.experimental import pallas as pl
from jax.experimental.pallas import tpu as pltpu

_H = 16          # hidden size per direction of the bidirectional stack
_D = 2 * _H      # packed state / feature width  [fwd | bwd] = 32
_G = 8 * _H      # packed gate width (4 gates x 2 directions x 16) = 128
_BP = 8          # batch rows per chunk (= one sublane tile)


# --------------------------------------------------------------------------
# Parameter init (PyTorch layout) and packing for the fused kernel
# --------------------------------------------------------------------------
def _init_lstm_params(key, num_layers, input_size, hidden_size, bidirectional):
    """PyTorch-style U(-1/sqrt(H), 1/sqrt(H)) init, torch weight layout."""
    k = 1.0 / (hidden_size ** 0.5)
    num_dir = 2 if bidirectional else 1
    layers = []
    for layer in range(num_layers):
        d_in = input_size if layer == 0 else hidden_size * num_dir
        dirs = []
        for _ in range(num_dir):
            key, k1, k2, k3, k4 = jax.random.split(key, 5)
            w_ih = jax.random.uniform(k1, (4 * hidden_size, d_in), jnp.float32, -k, k)
            w_hh = jax.random.uniform(k2, (4 * hidden_size, hidden_size), jnp.float32, -k, k)
            b_ih = jax.random.uniform(k3, (4 * hidden_size,), jnp.float32, -k, k)
            b_hh = jax.random.uniform(k4, (4 * hidden_size,), jnp.float32, -k, k)
            dirs.append((w_ih, w_hh, b_ih, b_hh))
        layers.append(dirs)
    return key, layers


def init_params(key):
    key, bid = _init_lstm_params(key, num_layers=4, input_size=16, hidden_size=16,
                                 bidirectional=True)
    key, uni = _init_lstm_params(key, num_layers=4, input_size=32, hidden_size=1,
                                 bidirectional=False)
    # NOTE: pitch_bid_linear (Linear(16, 6)) exists in __init__ but is never
    # used in forward, so it is not materialized here.
    return {"bid": bid, "uni": [d[0] for d in uni]}


def _pack_bid_layer(fwd, bwd):
    """Pack one bidirectional layer into MXU-friendly (32, 128) operands."""
    w_ih_f, w_hh_f, b_ih_f, b_hh_f = fwd
    w_ih_b, w_hh_b, b_ih_b, b_hh_b = bwd
    d_in = w_ih_f.shape[1]
    b_f = b_ih_f + b_hh_f
    b_b = b_ih_b + b_hh_b
    ih_blocks, hh_top, hh_bot, b_blocks = [], [], [], []
    zero = jnp.zeros((_H, _H), jnp.float32)
    for k in range(4):                                  # torch gate order i, f, g, o
        sl = slice(k * _H, (k + 1) * _H)
        ih_blocks += [w_ih_f[sl].T, w_ih_b[sl].T]       # (d_in, 16) each
        hh_top += [w_hh_f[sl].T, zero]                  # fwd h only feeds fwd gates
        hh_bot += [zero, w_hh_b[sl].T]                  # bwd h only feeds bwd gates
        b_blocks += [b_f[sl], b_b[sl]]
    p_ih = jnp.concatenate(ih_blocks, axis=1)           # (d_in, 128)
    if d_in < _D:                                       # layer 0: pad features 16 -> 32
        p_ih = jnp.concatenate(
            [p_ih, jnp.zeros((_D - d_in, _G), jnp.float32)], axis=0)
    p_hh = jnp.concatenate([jnp.concatenate(hh_top, axis=1),
                            jnp.concatenate(hh_bot, axis=1)], axis=0)   # (32, 128)
    p_b = jnp.concatenate(b_blocks)[None, :]            # (1, 128)
    return p_ih, p_hh, p_b


def pack_params(raw):
    p_ih, p_hh, p_b = [], [], []
    for fwd, bwd in raw["bid"]:
        a, b, c = _pack_bid_layer(fwd, bwd)
        p_ih.append(a); p_hh.append(b); p_b.append(c)
    uni = raw["uni"]
    return {
        "p_ih": jnp.stack(p_ih),                                           # (4, 32, 128)
        "p_hh": jnp.stack(p_hh),                                           # (4, 32, 128)
        "p_b": jnp.stack(p_b),                                             # (4, 1, 128)
        "u_ih0": uni[0][0].T,                                              # (32, 4)
        "u_ih_r": jnp.stack([uni[l][0].T for l in range(1, 4)]),           # (3, 1, 4)
        "u_hh": jnp.stack([uni[l][1].T for l in range(4)]),                # (4, 1, 4)
        "u_b": jnp.stack([(uni[l][2] + uni[l][3])[None, :] for l in range(4)]),  # (4,1,4)
    }


# --------------------------------------------------------------------------
# Fused Pallas kernel: bid 4x2 LSTM stack + subsample + H=1 tail (per chunk)
# --------------------------------------------------------------------------
def _fused_pitch_kernel(x_ref, pih_ref, phh_ref, pb_ref,
                        uih0_ref, uihr_ref, uhh_ref, ub_ref,
                        out_ref, xp_sc, xm_sc, act_sc, pk_sc, *, T):
    """One batch chunk of 8 sequences (sublane tile).
    x_ref:  (T*8, 32) time-major input (features zero-padded 16 -> 32).
    out_ref:(8, T//8) lane-dense output.
    xp_sc:  (T*8, 128) hoisted per-layer input projection.
    xm_sc:  (T*8, 128) fwd/bwd time-merged gate input.
    act_sc: (T*8, 32)  time-aligned layer activations (next-layer input).
    pk_sc:  (T*8, 32)  packed per-step hidden [h_f(t) | h_b(T-1-t)]."""
    BP = _BP
    t_sub = T // 8

    # Gate lane layout: [i_f,i_b,f_f,f_b,g_f,g_b,o_f,o_b] (16 lanes each).
    # Inside every 32-lane gate group, lanes 0:16 belong to the forward
    # direction (time t) and lanes 16:32 to the backward direction (time T-1-t).
    gcol = lax.broadcasted_iota(jnp.int32, (BP, _G), 1)
    gate_fwd_mask = (gcol % _D) < _H                       # (8, 128)
    fcol = lax.broadcasted_iota(jnp.int32, (BP, _D), 1)
    feat_fwd_mask = fcol < _H                              # (8, 32)

    # ---- 4-layer bidirectional LSTM, both directions fused per step --------
    src = x_ref
    for l in range(4):
        # Hoisted non-recurrent input projection (+ bias) for the whole
        # sequence: one (T*8,32)@(32,128) MXU call, off the serial chain.
        # TODO(synk): keep default MXU f32 precision; reference uses HIGHEST,
        # drift is covered by the documented 2e-2 tolerance.
        xp_sc[...] = (jnp.dot(src[...], pih_ref[l],
                              preferred_element_type=jnp.float32) + pb_ref[l])

        # Hoisted fwd/bwd time merge of the projection (off the serial chain).
        for t in range(T):
            tr = T - 1 - t
            xm_sc[t * BP:(t + 1) * BP, :] = jnp.where(
                gate_fwd_mask,
                xp_sc[t * BP:(t + 1) * BP, :],
                xp_sc[tr * BP:(tr + 1) * BP, :])

        # Serial recurrence: per step one aligned load, one (8,32)@(32,128)
        # recurrent dot, TWO full-vreg EUP pushes, elementwise, one store.
        # TODO(synk): for production-length T, switch to
        # lax.fori_loop(..., unroll=8) and tile the time axis with a grid
        # ("arbitrary") so xp_sc/xm_sc fit v7x's 64 MiB VMEM; at T=16 the fully
        # unrolled, whole-sequence-resident plan is trivially within budget.
        w_hh = phh_ref[l]                                  # hoisted (32, 128)
        h = jnp.zeros((BP, _D), jnp.float32)               # [h_fwd | h_bwd]
        c = jnp.zeros((BP, _D), jnp.float32)
        for t in range(T):                                 # fully unrolled
            gates = xm_sc[t * BP:(t + 1) * BP, :] + jnp.dot(
                h, w_hh, preferred_element_type=jnp.float32)
            sg = jax.nn.sigmoid(gates)                     # one 128-lane EUP push
            th = jnp.tanh(gates)                           # one 128-lane EUP push
            c = sg[:, 1 * _D:2 * _D] * c + sg[:, 0 * _D:1 * _D] * th[:, 2 * _D:3 * _D]
            h = sg[:, 3 * _D:4 * _D] * jnp.tanh(c)
            pk_sc[t * BP:(t + 1) * BP, :] = h              # packed [h_f(t)|h_b(T-1-t)]

        # Un-pack into a time-aligned activation slab for the next layer
        # (off the serial chain).  The last layer is consumed packed below.
        if l < 3:
            for t in range(T):
                tr = T - 1 - t
                act_sc[t * BP:(t + 1) * BP, :] = jnp.where(
                    feat_fwd_mask,
                    pk_sc[t * BP:(t + 1) * BP, :],
                    pk_sc[tr * BP:(tr + 1) * BP, :])
            src = act_sc

    # ---- p[:, 7::8, :] subsample straight out of the packed last-layer slab --
    # (p[:, :, 32:] in the torch code is an empty slice, so _p == p[:, 7::8, :])
    xs = []
    for s in range(t_sub):
        t = 8 * s + 7
        tr = T - 1 - t
        xs.append(jnp.where(feat_fwd_mask,
                            pk_sc[t * BP:(t + 1) * BP, :],
                            pk_sc[tr * BP:(tr + 1) * BP, :]))   # (8, 32)

    # ---- 4-layer unidirectional (H = 1) tail --------------------------------
    w_ih0 = uih0_ref[...]                                    # (32, 4)
    for l in range(4):
        w_hh_u = uhh_ref[l]                                  # (1, 4)
        b_u = ub_ref[l]                                      # (1, 4)
        h = jnp.zeros((BP, 1), jnp.float32)
        c = jnp.zeros((BP, 1), jnp.float32)
        ys = []
        for s in range(t_sub):
            if l == 0:
                xproj = jnp.dot(xs[s], w_ih0, preferred_element_type=jnp.float32)
            else:
                xproj = xs[s] * uihr_ref[l - 1]              # (8,1)*(1,4) -> (8,4)
            gates = xproj + h * w_hh_u + b_u
            sg = jax.nn.sigmoid(gates)
            th = jnp.tanh(gates)
            c = sg[:, 1:2] * c + sg[:, 0:1] * th[:, 2:3]
            h = sg[:, 3:4] * jnp.tanh(c)
            ys.append(h)
        xs = ys

    # ---- single lane-dense output store: (8, T//8) --------------------------
    scol = lax.broadcasted_iota(jnp.int32, (BP, t_sub), 1)
    out_val = jnp.zeros((BP, t_sub), jnp.float32)
    for s in range(t_sub):
        out_val = jnp.where(scol == s,
                            jnp.broadcast_to(xs[s], (BP, t_sub)), out_val)
    out_ref[...] = out_val


def pitch_predictor_without_content(packed, r_c_s):
    x = jnp.asarray(r_c_s, dtype=jnp.float32)                # (B, T, 16)
    B, T, F = x.shape
    if T % 8 != 0:
        raise ValueError("T must be a multiple of 8 (as required by the torch model)")
    t_sub = T // 8

    # Pad batch to a multiple of 8 (full sublane tiles) and features 16 -> 32 so
    # every bidirectional layer shares the same packed (32, 128) input projection.
    n_chunks = -(-B // _BP)
    b_pad = n_chunks * _BP
    x = jnp.pad(x, ((0, b_pad - B), (0, 0), (0, _D - F)))
    # (n_chunks, T*8, 32), time-major inside each chunk, sublane = batch row.
    x = x.reshape(n_chunks, _BP, T, _D).transpose(0, 2, 1, 3).reshape(n_chunks, T * _BP, _D)

    def _full_spec(arr):
        nd = arr.ndim
        return pl.BlockSpec(tuple(arr.shape), lambda i, nd=nd: (0,) * nd)

    weights = (packed["p_ih"], packed["p_hh"], packed["p_b"],
               packed["u_ih0"], packed["u_ih_r"], packed["u_hh"], packed["u_b"])

    out = pl.pallas_call(
        functools.partial(_fused_pitch_kernel, T=T),
        grid=(n_chunks,),
        out_shape=jax.ShapeDtypeStruct((n_chunks, _BP, t_sub), jnp.float32),
        in_specs=[pl.BlockSpec((None, T * _BP, _D), lambda i: (i, 0, 0))]
                 + [_full_spec(w) for w in weights],
        out_specs=pl.BlockSpec((None, _BP, t_sub), lambda i: (i, 0, 0)),
        scratch_shapes=[
            pltpu.VMEM((T * _BP, _G), jnp.float32),   # xp_sc: hoisted projection
            pltpu.VMEM((T * _BP, _G), jnp.float32),   # xm_sc: fwd/bwd-merged gate input
            pltpu.VMEM((T * _BP, _D), jnp.float32),   # act_sc: time-aligned layer acts
            pltpu.VMEM((T * _BP, _D), jnp.float32),   # pk_sc: packed per-step hidden
        ],
        compiler_params=pltpu.CompilerParams(
            # Batch-chunk axis is independent -> v7x can split chunks (8 seqs
            # each) across its two TensorCores; harmless on v5e/v6e (1 TC).
            dimension_semantics=("parallel",)),
    )(x, *weights)

    out = out.reshape(b_pad, t_sub)[:B]                      # drop padded batch rows
    return out[:, :, None]                                   # (B, T//8, 1)


# --------------------------------------------------------------------------
# Pure-JAX reference (straightforward per-direction LSTM, torch layout)
# --------------------------------------------------------------------------
def _ref_lstm_cell(x_t, h, c, p):
    w_ih, w_hh, b_ih, b_hh = p
    hs = w_hh.shape[1]
    gates = (jnp.dot(x_t, w_ih.T, precision=lax.Precision.HIGHEST)
             + jnp.dot(h, w_hh.T, precision=lax.Precision.HIGHEST)
             + b_ih + b_hh)
    i = jax.nn.sigmoid(gates[:, 0 * hs:1 * hs])
    f = jax.nn.sigmoid(gates[:, 1 * hs:2 * hs])
    g = jnp.tanh(gates[:, 2 * hs:3 * hs])
    o = jax.nn.sigmoid(gates[:, 3 * hs:4 * hs])
    c_new = f * c + i * g
    h_new = o * jnp.tanh(c_new)
    return h_new, c_new


def pitch_predictor_ref(raw, r_c_s):
    x = jnp.asarray(r_c_s, jnp.float32)
    bn, tn, _ = x.shape
    h_seq = x
    for fwd, bwd in raw["bid"]:
        outs = []
        for d, p in enumerate((fwd, bwd)):
            hs = p[1].shape[1]
            h = jnp.zeros((bn, hs), jnp.float32)
            c = jnp.zeros((bn, hs), jnp.float32)
            seq = []
            order = range(tn) if d == 0 else range(tn - 1, -1, -1)
            for t in order:
                h, c = _ref_lstm_cell(h_seq[:, t], h, c, p)
                seq.append(h)
            if d == 1:
                seq = seq[::-1]
            outs.append(jnp.stack(seq, axis=1))
        h_seq = jnp.concatenate(outs, axis=-1)

    p_out = h_seq                                   # (B, T, 32)
    p_forward = p_out[:, :, :32]
    p_backward = p_out[:, :, 32:]                   # empty slice, mirrors torch code
    _p = jnp.concatenate([p_forward[:, 7::8, :], p_backward[:, ::8, :]], axis=-1)

    h_seq = _p
    for p in raw["uni"]:
        hs = p[1].shape[1]
        h = jnp.zeros((bn, hs), jnp.float32)
        c = jnp.zeros((bn, hs), jnp.float32)
        seq = []
        for t in range(h_seq.shape[1]):
            h, c = _ref_lstm_cell(h_seq[:, t], h, c, p)
            seq.append(h)
        h_seq = jnp.stack(seq, axis=1)
    return h_seq


if __name__ == "__main__":
    key = jax.random.PRNGKey(0)
    key, pkey, xkey = jax.random.split(key, 3)
    raw = init_params(pkey)
    packed = pack_params(raw)

    B, T, F = 2, 16, 16                    # nn.LSTM input_size=16; T multiple of 8
    r_c_s = jax.random.normal(xkey, (B, T, F), dtype=jnp.float32)

    out = jax.jit(pitch_predictor_without_content)(packed, r_c_s)
    out = jax.block_until_ready(out)

    assert out.shape == (B, T // 8, 1), out.shape
    assert out.dtype == jnp.float32

    ref = jax.jit(pitch_predictor_ref)(raw, r_c_s)
    ref = jax.block_until_ready(ref)
    max_err = float(jnp.max(jnp.abs(out - ref)))
    assert max_err < 2e-2, f"kernel/reference mismatch: max |diff| = {max_err}"

    print("KERNEL_OK")
</pallas_src>

<mosaic_0001>
module attributes {stable_mosaic.version = 11 : i64} {
  func.func @_fused_pitch_kernel(%arg0: i32, %arg1: memref<1x128x32xf32, #tpu.memory_space<vmem>>, %arg2: memref<4x32x128xf32, #tpu.memory_space<vmem>>, %arg3: memref<4x32x128xf32, #tpu.memory_space<vmem>>, %arg4: memref<4x1x128xf32, #tpu.memory_space<vmem>>, %arg5: memref<32x4xf32, #tpu.memory_space<vmem>>, %arg6: memref<3x1x4xf32, #tpu.memory_space<vmem>>, %arg7: memref<4x1x4xf32, #tpu.memory_space<vmem>>, %arg8: memref<4x1x4xf32, #tpu.memory_space<vmem>>, %arg9: memref<1x8x2xf32, #tpu.memory_space<vmem>>, %arg10: memref<128x128xf32, #tpu.memory_space<vmem>>, %arg11: memref<128x128xf32, #tpu.memory_space<vmem>>, %arg12: memref<128x32xf32, #tpu.memory_space<vmem>>, %arg13: memref<128x32xf32, #tpu.memory_space<vmem>>) attributes {dimension_semantics = [#tpu.dimension_semantics<parallel>], iteration_bounds = array<i64: 1>, scalar_prefetch = 0 : i64, scratch_operands = 4 : i64, tpu.core_type = #tpu.core_type<tc>, window_params = [{transform_indices = @transform_0, window_bounds = array<i64: 1, 128, 32>}, {pipeline_mode = #tpu.pipeline_mode<synchronous>, transform_indices = @transform_1, window_bounds = array<i64: 4, 32, 128>}, {pipeline_mode = #tpu.pipeline_mode<synchronous>, transform_indices = @transform_2, window_bounds = array<i64: 4, 32, 128>}, {pipeline_mode = #tpu.pipeline_mode<synchronous>, transform_indices = @transform_3, window_bounds = array<i64: 4, 1, 128>}, {pipeline_mode = #tpu.pipeline_mode<synchronous>, transform_indices = @transform_4, window_bounds = array<i64: 32, 4>}, {pipeline_mode = #tpu.pipeline_mode<synchronous>, transform_indices = @transform_5, window_bounds = array<i64: 3, 1, 4>}, {pipeline_mode = #tpu.pipeline_mode<synchronous>, transform_indices = @transform_6, window_bounds = array<i64: 4, 1, 4>}, {pipeline_mode = #tpu.pipeline_mode<synchronous>, transform_indices = @transform_7, window_bounds = array<i64: 4, 1, 4>}, {transform_indices = @transform_8, window_bounds = array<i64: 1, 8, 2>}]} {
    %0 = tpu.iota {dimensions = array<i32: 1>} : vector<8x128xi32>
    %c32_i32 = arith.constant 32 : i32
    %c0_i32 = arith.constant 0 : i32
    %1 = arith.cmpi eq, %c32_i32, %c0_i32 : i32
    %c1_i32 = arith.constant 1 : i32
    %2 = arith.select %1, %c1_i32, %c32_i32 : i32
    %3 = vector.broadcast %2 : i32 to vector<8x128xi32>
    %4 = arith.remsi %0, %3 : vector<8x128xi32>
    %c0_i32_0 = arith.constant 0 : i32
    %5 = vector.broadcast %c0_i32_0 : i32 to vector<8x128xi32>
    %6 = arith.cmpi ne, %4, %5 : vector<8x128xi32>
    %c0_i32_1 = arith.constant 0 : i32
    %7 = vector.broadcast %c0_i32_1 : i32 to vector<8x128xi32>
    %8 = arith.cmpi slt, %4, %7 : vector<8x128xi32>
    %c0_i32_2 = arith.constant 0 : i32
    %9 = arith.cmpi slt, %2, %c0_i32_2 : i32
    %10 = vector.broadcast %9 : i1 to vector<8x128xi1>
    %11 = vector.broadcast %10 : vector<8x128xi1> to vector<8x128xi1>
    %12 = arith.xori %8, %11 : vector<8x128xi1>
    %13 = arith.andi %12, %6 : vector<8x128xi1>
    %14 = vector.broadcast %2 : i32 to vector<8x128xi32>
    %15 = arith.addi %4, %14 : vector<8x128xi32>
    %16 = arith.select %13, %15, %4 : vector<8x128xi1>, vector<8x128xi32>
    %c16_i32 = arith.constant 16 : i32
    %17 = vector.broadcast %c16_i32 : i32 to vector<8x128xi32>
    %18 = arith.cmpi slt, %16, %17 : vector<8x128xi32>
    %19 = tpu.iota {dimensions = array<i32: 1>} : vector<8x32xi32>
    %c16_i32_3 = arith.constant 16 : i32
    %20 = vector.broadcast %c16_i32_3 : i32 to vector<8x32xi32>
    %21 = arith.cmpi slt, %19, %20 : vector<8x32xi32>
    %c0 = arith.constant 0 : index
    %c0_4 = arith.constant 0 : index
    %c0_5 = arith.constant 0 : index
    %22 = vector.load %arg1[%c0, %c0_4, %c0_5] : memref<1x128x32xf32, #tpu.memory_space<vmem>>, vector<1x128x32xf32>
    %23 = vector.shape_cast %22 : vector<1x128x32xf32> to vector<128x32xf32>
    %c0_6 = arith.constant 0 : index
    %c0_7 = arith.constant 0 : index
    %c0_8 = arith.constant 0 : index
    %24 = vector.load %arg2[%c0_6, %c0_7, %c0_8] : memref<4x32x128xf32, #tpu.memory_space<vmem>>, vector<1x32x128xf32>
    %25 = vector.shape_cast %24 : vector<1x32x128xf32> to vector<32x128xf32>
    %cst = arith.constant dense<0.000000e+00> : vector<128x128xf32>
    %26 = tpu.matmul %23, %25, %cst {dimension_numbers = #tpu.dot_dimension_numbers<[1], [0], [0], [1], [0, 0, 1, 1], [], []>} : vector<128x32xf32>, vector<32x128xf32>, vector<128x128xf32> -> vector<128x128xf32>
    %c0_9 = arith.constant 0 : index
    %c0_10 = arith.constant 0 : index
    %c0_11 = arith.constant 0 : index
    %27 = vector.load %arg4[%c0_9, %c0_10, %c0_11] : memref<4x1x128xf32, #tpu.memory_space<vmem>>, vector<1x1x128xf32>
    %28 = vector.shape_cast %27 : vector<1x1x128xf32> to vector<1x128xf32>
    %29 = vector.broadcast %28 : vector<1x128xf32> to vector<128x128xf32>
    %30 = arith.addf %26, %29 : vector<128x128xf32>
    %c0_12 = arith.constant 0 : index
    %c0_13 = arith.constant 0 : index
    %31 = vector.load %arg10[%c0_12, %c0_13] : memref<128x128xf32, #tpu.memory_space<vmem>>, vector<128x128xf32>
    tpu.vector_store %arg10[%c0_12, %c0_13], %30 {strides = array<i32>} : memref<128x128xf32, #tpu.memory_space<vmem>>, vector<128x128xf32>,
    %c0_14 = arith.constant 0 : index
    %c0_15 = arith.constant 0 : index
    %32 = vector.load %arg10[%c0_14, %c0_15] : memref<128x128xf32, #tpu.memory_space<vmem>>, vector<8x128xf32>
    %c120 = arith.constant 120 : index
    %c0_16 = arith.constant 0 : index
    %33 = vector.load %arg10[%c120, %c0_16] : memref<128x128xf32, #tpu.memory_space<vmem>>, vector<8x128xf32>
    %34 = arith.select %18, %32, %33 : vector<8x128xi1>, vector<8x128xf32>
    %c0_17 = arith.constant 0 : index
    %c0_18 = arith.constant 0 : index
    %35 = vector.load %arg11[%c0_17, %c0_18] : memref<128x128xf32, #tpu.memory_space<vmem>>, vector<8x128xf32>
    tpu.vector_store %arg11[%c0_17, %c0_18], %34 {strides = array<i32>} : memref<128x128xf32, #tpu.memory_space<vmem>>, vector<8x128xf32>,
    %c8 = arith.constant 8 : index
    %c0_19 = arith.constant 0 : index
    %36 = vector.load %arg10[%c8, %c0_19] : memref<128x128xf32, #tpu.memory_space<vmem>>, vector<8x128xf32>
    %c112 = arith.constant 112 : index
    %c0_20 = arith.constant 0 : index
    %37 = vector.load %arg10[%c112, %c0_20] : memref<128x128xf32, #tpu.memory_space<vmem>>, vector<8x128xf32>
    %38 = arith.select %18, %36, %37 : vector<8x128xi1>, vector<8x128xf32>
    %c8_21 = arith.constant 8 : index
    %c0_22 = arith.constant 0 : index
    %39 = vector.load %arg11[%c8_21, %c0_22] : memref<128x128xf32, #tpu.memory_space<vmem>>, vector<8x128xf32>
    tpu.vector_store %arg11[%c8_21, %c0_22], %38 {strides = array<i32>} : memref<128x128xf32, #tpu.memory_space<vmem>>, vector<8x128xf32>,
    %c16 = arith.constant 16 : index
    %c0_23 = arith.constant 0 : index
    %40 = vector.load %arg10[%c16, %c0_23] : memref<128x128xf32, #tpu.memory_space<vmem>>, vector<8x128xf32>
    %c104 = arith.constant 104 : index
    %c0_24 = arith.constant 0 : index
    %41 = vector.load %arg10[%c104, %c0_24] : memref<128x128xf32, #tpu.memory_space<vmem>>, vector<8x128xf32>
    %42 = arith.select %18, %40, %41 : vector<8x128xi1>, vector<8x128xf32>
    %c16_25 = arith.constant 16 : index
    %c0_26 = arith.constant 0 : index
    %43 = vector.load %arg11[%c16_25, %c0_26] : memref<128x128xf32, #tpu.memory_space<vmem>>, vector<8x128xf32>
    tpu.vector_store %arg11[%c16_25, %c0_26], %42 {strides = array<i32>} : memref<128x128xf32, #tpu.memory_space<vmem>>, vector<8x128xf32>,
    %c24 = arith.constant 24 : index
    %c0_27 = arith.constant 0 : index
    %44 = vector.load %arg10[%c24, %c0_27] : memref<128x128xf32, #tpu.memory_space<vmem>>, vector<8x128xf32>
    %c96 = arith.constant 96 : index
    %c0_28 = arith.constant 0 : index
    %45 = vector.load %arg10[%c96, %c0_28] : memref<128x128xf32, #tpu.memory_space<vmem>>, vector<8x128xf32>
    %46 = arith.select %18, %44, %45 : vector<8x128xi1>, vector<8x128xf32>
    %c24_29 = arith.constant 24 : index
    %c0_30 = arith.constant 0 : index
    %47 = vector.load %arg11[%c24_29, %c0_30] : memref<128x128xf32, #tpu.memory_space<vmem>>, vector<8x128xf32>
    tpu.vector_store %arg11[%c24_29, %c0_30], %46 {strides = array<i32>} : memref<128x128xf32, #tpu.memory_space<vmem>>, vector<8x128xf32>,
    %c32 = arith.constant 32 : index
    %c0_31 = arith.constant 0 : index
    %48 = vector.load %arg10[%c32, %c0_31] : memref<128x128xf32, #tpu.memory_space<vmem>>, vector<8x128xf32>
    %c88 = arith.constant 88 : index
    %c0_32 = arith.constant 0 : index
    %49 = vector.load %arg10[%c88, %c0_32] : memref<128x128xf32, #tpu.memory_space<vmem>>, vector<8x128xf32>
    %50 = arith.select %18, %48, %49 : vector<8x128xi1>, vector<8x128xf32>
    %c32_33 = arith.constant 32 : index
    %c0_34 = arith.constant 0 : index
    %51 = vector.load %arg11[%c32_33, %c0_34] : memref<128x128xf32, #tpu.memory_space<vmem>>, vector<8x128xf32>
    tpu.vector_store %arg11[%c32_33, %c0_34], %50 {strides = array<i32>} : memref<128x128xf32, #tpu.memory_space<vmem>>, vector<8x128xf32>,
    %c40 = arith.constant 40 : index
    %c0_35 = arith.constant 0 : index
    %52 = vector.load %arg10[%c40, %c0_35] : memref<128x128xf32, #tpu.memory_space<vmem>>, vector<8x128xf32>
    %c80 = arith.constant 80 : index
    %c0_36 = arith.constant 0 : index
    %53 = vector.load %arg10[%c80, %c0_36] : memref<128x128xf32, #tpu.memory_space<vmem>>, vector<8x128xf32>
    %54 = arith.select %18, %52, %53 : vector<8x128xi1>, vector<8x128xf32>
    %c40_37 = arith.constant 40 : index
    %c0_38 = arith.constant 0 : index
    %55 = vector.load %arg11[%c40_37, %c0_38] : memref<128x128xf32, #tpu.memory_space<vmem>>, vector<8x128xf32>
    tpu.vector_store %arg11[%c40_37, %c0_38], %54 {strides = array<i32>} : memref<128x128xf32, #tpu.memory_space<vmem>>, vector<8x128xf32>,
    %c48 = arith.constant 48 : index
    %c0_39 = arith.constant 0 : index
    %56 = vector.load %arg10[%c48, %c0_39] : memref<128x128xf32, #tpu.memory_space<vmem>>, vector<8x128xf32>
    %c72 = arith.constant 72 : index
    %c0_40 = arith.constant 0 : index
    %57 = vector.load %arg10[%c72, %c0_40] : memref<128x128xf32, #tpu.memory_space<vmem>>, vector<8x128xf32>
    %58 = arith.select %18, %56, %57 : vector<8x128xi1>, vector<8x128xf32>
    %c48_41 = arith.constant 48 : index
    %c0_42 = arith.constant 0 : index
    %59 = vector.load %arg11[%c48_41, %c0_42] : memref<128x128xf32, #tpu.memory_space<vmem>>, vector<8x128xf32>
    tpu.vector_store %arg11[%c48_41, %c0_42], %58 {strides = array<i32>} : memref<128x128xf32, #tpu.memory_space<vmem>>, vector<8x128xf32>,
    %c56 = arith.constant 56 : index
    %c0_43 = arith.constant 0 : index
    %60 = vector.load %arg10[%c56, %c0_43] : memref<128x128xf32, #tpu.memory_space<vmem>>, vector<8x128xf32>
    %c64 = arith.constant 64 : index
    %c0_44 = arith.constant 0 : index
    %61 = vector.load %arg10[%c64, %c0_44] : memref<128x128xf32, #tpu.memory_space<vmem>>, vector<8x128xf32>
    %62 = arith.select %18, %60, %61 : vector<8x128xi1>, vector<8x128xf32>
    %c56_45 = arith.constant 56 : index
    %c0_46 = arith.constant 0 : index
    %63 = vector.load %arg11[%c56_45, %c0_46] : memref<128x128xf32, #tpu.memory_space<vmem>>, vector<8x128xf32>
    tpu.vector_store %arg11[%c56_45, %c0_46], %62 {strides = array<i32>} : memref<128x128xf32, #tpu.memory_space<vmem>>, vector<8x128xf32>,
    %c64_47 = arith.constant 64 : index
    %c0_48 = arith.constant 0 : index
    %64 = vector.load %arg10[%c64_47, %c0_48] : memref<128x128xf32, #tpu.memory_space<vmem>>, vector<8x128xf32>
    %c56_49 = arith.constant 56 : index
    %c0_50 = arith.constant 0 : index
    %65 = vector.load %arg10[%c56_49, %c0_50] : memref<128x128xf32, #tpu.memory_space<vmem>>, vector<8x128xf32>
    %66 = arith.select %18, %64, %65 : vector<8x128xi1>, vector<8x128xf32>
    %c64_51 = arith.constant 64 : index
    %c0_52 = arith.constant 0 : index
    %67 = vector.load %arg11[%c64_51, %c0_52] : memref<128x128xf32, #tpu.memory_space<vmem>>, vector<8x128xf32>
    tpu.vector_store %arg11[%c64_51, %c0_52], %66 {strides = array<i32>} : memref<128x128xf32, #tpu.memory_space<vmem>>, vector<8x128xf32>,
    %c72_53 = arith.constant 72 : index
    %c0_54 = arith.constant 0 : index
    %68 = vector.load %arg10[%c72_53, %c0_54] : memref<128x128xf32, #tpu.memory_space<vmem>>, vector<8x128xf32>
    %c48_55 = arith.constant 48 : index
    %c0_56 = arith.constant 0 : index
    %69 = vector.load %arg10[%c48_55, %c0_56] : memref<128x128xf32, #tpu.memory_space<vmem>>, vector<8x128xf32>
    %70 = arith.select %18, %68, %69 : vector<8x128xi1>, vector<8x128xf32>
    %c72_57 = arith.constant 72 : index
    %c0_58 = arith.constant 0 : index
    %71 = vector.load %arg11[%c72_57, %c0_58] : memref<128x128xf32, #tpu.memory_space<vmem>>, vector<8x128xf32>
    tpu.vector_store %arg11[%c72_57, %c0_58], %70 {strides = array<i32>} : memref<128x128xf32, #tpu.memory_space<vmem>>, vector<8x128xf32>,
    %c80_59 = arith.constant 80 : index
    %c0_60 = arith.constant 0 : index
    %72 = vector.load %arg10[%c80_59, %c0_60] : memref<128x128xf32, #tpu.memory_space<vmem>>, vector<8x128xf32>
    %c40_61 = arith.constant 40 : index
    %c0_62 = arith.constant 0 : index
    %73 = vector.load %arg10[%c40_61, %c0_62] : memref<128x128xf32, #tpu.memory_space<vmem>>, vector<8x128xf32>
    %74 = arith.select %18, %72, %73 : vector<8x128xi1>, vector<8x128xf32>
    %c80_63 = arith.constant 80 : index
    %c0_64 = arith.constant 0 : index
    %75 = vector.load %arg11[%c80_63, %c0_64] : memref<128x128xf32, #tpu.memory_space<vmem>>, vector<8x128xf32>
    tpu.vector_store %arg11[%c80_63, %c0_64], %74 {strides = array<i32>} : memref<128x128xf32, #tpu.memory_space<vmem>>, vector<8x128xf32>,
    %c88_65 = arith.constant 88 : index
    %c0_66 = arith.constant 0 : index
    %76 = vector.load %arg10[%c88_65, %c0_66] : memref<128x128xf32, #tpu.memory_space<vmem>>, vector<8x128xf32>
    %c32_67 = arith.constant 32 : index
    %c0_68 = arith.constant 0 : index
    %77 = vector.load %arg10[%c32_67, %c0_68] : memref<128x128xf32, #tpu.memory_space<vmem>>, vector<8x128xf32>
    %78 = arith.select %18, %76, %77 : vector<8x128xi1>, vector<8x128xf32>
    %c88_69 = arith.constant 88 : index
    %c0_70 = arith.constant 0 : index
    %79 = vector.load %arg11[%c88_69, %c0_70] : memref<128x128xf32, #tpu.memory_space<vmem>>, vector<8x128xf32>
    tpu.vector_store %arg11[%c88_69, %c0_70], %78 {strides = array<i32>} : memref<128x128xf32, #tpu.memory_space<vmem>>, vector<8x128xf32>,
    %c96_71 = arith.constant 96 : index
    %c0_72 = arith.constant 0 : index
    %80 = vector.load %arg10[%c96_71, %c0_72] : memref<128x128xf32, #tpu.memory_space<vmem>>, vector<8x128xf32>
    %c24_73 = arith.constant 24 : index
    %c0_74 = arith.constant 0 : index
    %81 = vector.load %arg10[%c24_73, %c0_74] : memref<128x128xf32, #tpu.memory_space<vmem>>, vector<8x128xf32>
    %82 = arith.select %18, %80, %81 : vector<8x128xi1>, vector<8x128xf32>
    %c96_75 = arith.constant 96 : index
    %c0_76 = arith.constant 0 : index
    %83 = vector.load %arg11[%c96_75, %c0_76] : memref<128x128xf32, #tpu.memory_space<vmem>>, vector<8x128xf32>
    tpu.vector_store %arg11[%c96_75, %c0_76], %82 {strides = array<i32>} : memref<128x128xf32, #tpu.memory_space<vmem>>, vector<8x128xf32>,
    %c104_77 = arith.constant 104 : index
    %c0_78 = arith.constant 0 : index
    %84 = vector.load %arg10[%c104_77, %c0_78] : memref<128x128xf32, #tpu.memory_space<vmem>>, vector<8x128xf32>
    %c16_79 = arith.constant 16 : index
    %c0_80 = arith.constant 0 : index
    %85 = vector.load %arg10[%c16_79, %c0_80] : memref<128x128xf32, #tpu.memory_space<vmem>>, vector<8x128xf32>
    %86 = arith.select %18, %84, %85 : vector<8x128xi1>, vector<8x128xf32>
    %c104_81 = arith.constant 104 : index
    %c0_82 = arith.constant 0 : index
    %87 = vector.load %arg11[%c104_81, %c0_82] : memref<128x128xf32, #tpu.memory_space<vmem>>, vector<8x128xf32>
    tpu.vector_store %arg11[%c104_81, %c0_82], %86 {strides = array<i32>} : memref<128x128xf32, #tpu.memory_space<vmem>>, vector<8x128xf32>,
    %c112_83 = arith.constant 112 : index
    %c0_84 = arith.constant 0 : index
    %88 = vector.load %arg10[%c112_83, %c0_84] : memref<128x128xf32, #tpu.memory_space<vmem>>, vector<8x128xf32>
    %c8_85 = arith.constant 8 : index
    %c0_86 = arith.constant 0 : index
    %89 = vector.load %arg10[%c8_85, %c0_86] : memref<128x128xf32, #tpu.memory_space<vmem>>, vector<8x128xf32>
    %90 = arith.select %18, %88, %89 : vector<8x128xi1>, vector<8x128xf32>
    %c112_87 = arith.constant 112 : index
    %c0_88 = arith.constant 0 : index
    %91 = vector.load %arg11[%c112_87, %c0_88] : memref<128x128xf32, #tpu.memory_space<vmem>>, vector<8x128xf32>
    tpu.vector_store %arg11[%c112_87, %c0_88], %90 {strides = array<i32>} : memref<128x128xf32, #tpu.memory_space<vmem>>, vector<8x128xf32>,
    %c120_89 = arith.constant 120 : index
    %c0_90 = arith.constant 0 : index
    %92 = vector.load %arg10[%c120_89, %c0_90] : memref<128x128xf32, #tpu.memory_space<vmem>>, vector<8x128xf32>
    %c0_91 = arith.constant 0 : index
    %c0_92 = arith.constant 0 : index
    %93 = vector.load %arg10[%c0_91, %c0_92] : memref<128x128xf32, #tpu.memory_space<vmem>>, vector<8x128xf32>
    %94 = arith.select %18, %92, %93 : vector<8x128xi1>, vector<8x128xf32>
    %c120_93 = arith.constant 120 : index
    %c0_94 = arith.constant 0 : index
    %95 = vector.load %arg11[%c120_93, %c0_94] : memref<128x128xf32, #tpu.memory_space<vmem>>, vector<8x128xf32>
    tpu.vector_store %arg11[%c120_93, %c0_94], %94 {strides = array<i32>} : memref<128x128xf32, #tpu.memory_space<vmem>>, vector<8x128xf32>,
    %c0_95 = arith.constant 0 : index
    %c0_96 = arith.constant 0 : index
    %c0_97 = arith.constant 0 : index
    %96 = vector.load %arg3[%c0_95, %c0_96, %c0_97] : memref<4x32x128xf32, #tpu.memory_space<vmem>>, vector<1x32x128xf32>
    %97 = vector.shape_cast %96 : vector<1x32x128xf32> to vector<32x128xf32>
    %cst_98 = arith.constant 0.000000e+00 : f32
    %98 = vector.broadcast %cst_98 : f32 to vector<8x32xf32>
    %cst_99 = arith.constant 0.000000e+00 : f32
    %99 = vector.broadcast %cst_99 : f32 to vector<8x32xf32>
    %c0_100 = arith.constant 0 : index
    %c0_101 = arith.constant 0 : index
    %100 = vector.load %arg11[%c0_100, %c0_101] : memref<128x128xf32, #tpu.memory_space<vmem>>, vector<8x128xf32>
    %cst_102 = arith.constant dense<0.000000e+00> : vector<8x128xf32>
    %101 = tpu.matmul %98, %97, %cst_102 {dimension_numbers = #tpu.dot_dimension_numbers<[1], [0], [0], [1], [0, 0, 1, 1], [], []>} : vector<8x32xf32>, vector<32x128xf32>, vector<8x128xf32> -> vector<8x128xf32>
    %102 = arith.addf %100, %101 : vector<8x128xf32>
    %103 = arith.negf %102 : vector<8x128xf32>
    %104 = math.exp %103 : vector<8x128xf32>
    %cst_103 = arith.constant 1.000000e+00 : f32
    %105 = vector.broadcast %cst_103 : f32 to vector<8x128xf32>
    %106 = arith.addf %105, %104 : vector<8x128xf32>
    %107 = arith.divf %105, %106 : vector<8x128xf32>
    %108 = math.tanh %102 : vector<8x128xf32>
    %109 = vector.extract_strided_slice %107 {offsets = [0, 32], sizes = [8, 32], strides = [1, 1]} : vector<8x128xf32> to vector<8x32xf32>
    %110 = arith.mulf %109, %99 : vector<8x32xf32>
    %111 = vector.extract_strided_slice %107 {offsets = [0, 0], sizes = [8, 32], strides = [1, 1]} : vector<8x128xf32> to vector<8x32xf32>
    %112 = vector.extract_strided_slice %108 {offsets = [0, 64], sizes = [8, 32], strides = [1, 1]} : vector<8x128xf32> to vector<8x32xf32>
    %113 = arith.mulf %111, %112 : vector<8x32xf32>
    %114 = arith.addf %110, %113 : vector<8x32xf32>
    %115 = vector.extract_strided_slice %107 {offsets = [0, 96], sizes = [8, 32], strides = [1, 1]} : vector<8x128xf32> to vector<8x32xf32>
    %116 = math.tanh %114 : vector<8x32xf32>
    %117 = arith.mulf %115, %116 : vector<8x32xf32>
    %c0_104 = arith.constant 0 : index
    %c0_105 = arith.constant 0 : index
    %118 = vector.load %arg13[%c0_104, %c0_105] : memref<128x32xf32, #tpu.memory_space<vmem>>, vector<8x32xf32>
    tpu.vector_store %arg13[%c0_104, %c0_105], %117 {strides = array<i32>} : memref<128x32xf32, #tpu.memory_space<vmem>>, vector<8x32xf32>,
    %c8_106 = arith.constant 8 : index
    %c0_107 = arith.constant 0 : index
    %119 = vector.load %arg11[%c8_106, %c0_107] : memref<128x128xf32, #tpu.memory_space<vmem>>, vector<8x128xf32>
    %cst_108 = arith.constant dense<0.000000e+00> : vector<8x128xf32>
    %120 = tpu.matmul %117, %97, %cst_108 {dimension_numbers = #tpu.dot_dimension_numbers<[1], [0], [0], [1], [0, 0, 1, 1], [], []>} : vector<8x32xf32>, vector<32x128xf32>, vector<8x128xf32> -> vector<8x128xf32>
    %121 = arith.addf %119, %120 : vector<8x128xf32>
    %122 = arith.negf %121 : vector<8x128xf32>
    %123 = math.exp %122 : vector<8x128xf32>
    %cst_109 = arith.constant 1.000000e+00 : f32
    %124 = vector.broadcast %cst_109 : f32 to vector<8x128xf32>
    %125 = arith.addf %124, %123 : vector<8x128xf32>
    %126 = arith.divf %124, %125 : vector<8x128xf32>
    %127 = math.tanh %121 : vector<8x128xf32>
    %128 = vector.extract_strided_slice %126 {offsets = [0, 32], sizes = [8, 32], strides = [1, 1]} : vector<8x128xf32> to vector<8x32xf32>
    %129 = arith.mulf %128, %114 : vector<8x32xf32>
    %130 = vector.extract_strided_slice %126 {offsets = [0, 0], sizes = [8, 32], strides = [1, 1]} : vector<8x128xf32> to vector<8x32xf32>
    %131 = vector.extract_strided_slice %127 {offsets = [0, 64], sizes = [8, 32], strides = [1, 1]} : vector<8x128xf32> to vector<8x32xf32>
    %132 = arith.mulf %130, %131 : vector<8x32xf32>
    %133 = arith.addf %129, %132 : vector<8x32xf32>
    %134 = vector.extract_strided_slice %126 {offsets = [0, 96], sizes = [8, 32], strides = [1, 1]} : vector<8x128xf32> to vector<8x32xf32>
    %135 = math.tanh %133 : vector<8x32xf32>
    %136 = arith.mulf %134, %135 : vector<8x32xf32>
    %c8_110 = arith.constant 8 : index
    %c0_111 = arith.constant 0 : index
    %137 = vector.load %arg13[%c8_110, %c0_111] : memref<128x32xf32, #tpu.memory_space<vmem>>, vector<8x32xf32>
    tpu.vector_store %arg13[%c8_110, %c0_111], %136 {strides = array<i32>} : memref<128x32xf32, #tpu.memory_space<vmem>>, vector<8x32xf32>,
    %c16_112 = arith.constant 16 : index
    %c0_113 = arith.constant 0 : index
    %138 = vector.load %arg11[%c16_112, %c0_113] : memref<128x128xf32, #tpu.memory_space<vmem>>, vector<8x128xf32>
    %cst_114 = arith.constant dense<0.000000e+00> : vector<8x128xf32>
    %139 = tpu.matmul %136, %97, %cst_114 {dimension_numbers = #tpu.dot_dimension_numbers<[1], [0], [0], [1], [0, 0, 1, 1], [], []>} : vector<8x32xf32>, vector<32x128xf32>, vector<8x128xf32> -> vector<8x128xf32>
    %140 = arith.addf %138, %139 : vector<8x128xf32>
    %141 = arith.negf %140 : vector<8x128xf32>
    %142 = math.exp %141 : vector<8x128xf32>
    %cst_115 = arith.constant 1.000000e+00 : f32
    %143 = vector.broadcast %cst_115 : f32 to vector<8x128xf32>
    %144 = arith.addf %143, %142 : vector<8x128xf32>
    %145 = arith.divf %143, %144 : vector<8x128xf32>
    %146 = math.tanh %140 : vector<8x128xf32>
    %147 = vector.extract_strided_slice %145 {offsets = [0, 32], sizes = [8, 32], strides = [1, 1]} : vector<8x128xf32> to vector<8x32xf32>
    %148 = arith.mulf %147, %133 : vector<8x32xf32>
    %149 = vector.extract_strided_slice %145 {offsets = [0, 0], sizes = [8, 32], strides = [1, 1]} : vector<8x128xf32> to vector<8x32xf32>
    %150 = vector.extract_strided_slice %146 {offsets = [0, 64], sizes = [8, 32], strides = [1, 1]} : vector<8x128xf32> to vector<8x32xf32>
    %151 = arith.mulf %149, %150 : vector<8x32xf32>
    %152 = arith.addf %148, %151 : vector<8x32xf32>
    %153 = vector.extract_strided_slice %145 {offsets = [0, 96], sizes = [8, 32], strides = [1, 1]} : vector<8x128xf32> to vector<8x32xf32>
    %154 = math.tanh %152 : vector<8x32xf32>
    %155 = arith.mulf %153, %154 : vector<8x32xf32>
    %c16_116 = arith.constant 16 : index
    %c0_117 = arith.constant 0 : index
    %156 = vector.load %arg13[%c16_116, %c0_117] : memref<128x32xf32, #tpu.memory_space<vmem>>, vector<8x32xf32>
    tpu.vector_store %arg13[%c16_116, %c0_117], %155 {strides = array<i32>} : memref<128x32xf32, #tpu.memory_space<vmem>>, vector<8x32xf32>,
    %c24_118 = arith.constant 24 : index
    %c0_119 = arith.constant 0 : index
    %157 = vector.load %arg11[%c24_118, %c0_119] : memref<128x128xf32, #tpu.memory_space<vmem>>, vector<8x128xf32>
    %cst_120 = arith.constant dense<0.000000e+00> : vector<8x128xf32>
    %158 = tpu.matmul %155, %97, %cst_120 {dimension_numbers = #tpu.dot_dimension_numbers<[1], [0], [0], [1], [0, 0, 1, 1], [], []>} : vector<8x32xf32>, vector<32x128xf32>, vector<8x128xf32> -> vector<8x128xf32>
    %159 = arith.addf %157, %158 : vector<8x128xf32>
    %160 = arith.negf %159 : vector<8x128xf32>
    %161 = math.exp %160 : vector<8x128xf32>
    %cst_121 = arith.constant 1.000000e+00 : f32
    %162 = vector.broadcast %cst_121 : f32 to vector<8x128xf32>
    %163 = arith.addf %162, %161 : vector<8x128xf32>
    %164 = arith.divf %162, %163 : vector<8x128xf32>
    %165 = math.tanh %159 : vector<8x128xf32>
    %166 = vector.extract_strided_slice %164 {offsets = [0, 32], sizes = [8, 32], strides = [1, 1]} : vector<8x128xf32> to vector<8x32xf32>
    %167 = arith.mulf %166, %152 : vector<8x32xf32>
    %168 = vector.extract_strided_slice %164 {offsets = [0, 0], sizes = [8, 32], strides = [1, 1]} : vector<8x128xf32> to vector<8x32xf32>
    %169 = vector.extract_strided_slice %165 {offsets = [0, 64], sizes = [8, 32], strides = [1, 1]} : vector<8x128xf32> to vector<8x32xf32>
    %170 = arith.mulf %168, %169 : vector<8x32xf32>
    %171 = arith.addf %167, %170 : vector<8x32xf32>
    %172 = vector.extract_strided_slice %164 {offsets = [0, 96], sizes = [8, 32], strides = [1, 1]} : vector<8x128xf32> to vector<8x32xf32>
    %173 = math.tanh %171 : vector<8x32xf32>
    %174 = arith.mulf %172, %173 : vector<8x32xf32>
    %c24_122 = arith.constant 24 : index
    %c0_123 = arith.constant 0 : index
    %175 = vector.load %arg13[%c24_122, %c0_123] : memref<128x32xf32, #tpu.memory_space<vmem>>, vector<8x32xf32>
    tpu.vector_store %arg13[%c24_122, %c0_123], %174 {strides = array<i32>} : memref<128x32xf32, #tpu.memory_space<vmem>>, vector<8x32xf32>,
    %c32_124 = arith.constant 32 : index
    %c0_125 = arith.constant 0 : index
    %176 = vector.load %arg11[%c32_124, %c0_125] : memref<128x128xf32, #tpu.memory_space<vmem>>, vector<8x128xf32>
    %cst_126 = arith.constant dense<0.000000e+00> : vector<8x128xf32>
    %177 = tpu.matmul %174, %97, %cst_126 {dimension_numbers = #tpu.dot_dimension_numbers<[1], [0], [0], [1], [0, 0, 1, 1], [], []>} : vector<8x32xf32>, vector<32x128xf32>, vector<8x128xf32> -> vector<8x128xf32>
    %178 = arith.addf %176, %177 : vector<8x128xf32>
    %179 = arith.negf %178 : vector<8x128xf32>
    %180 = math.exp %179 : vector<8x128xf32>
    %cst_127 = arith.constant 1.000000e+00 : f32
    %181 = vector.broadcast %cst_127 : f32 to vector<8x128xf32>
    %182 = arith.addf %181, %180 : vector<8x128xf32>
    %183 = arith.divf %181, %182 : vector<8x128xf32>
    %184 = math.tanh %178 : vector<8x128xf32>
    %185 = vector.extract_strided_slice %183 {offsets = [0, 32], sizes = [8, 32], strides = [1, 1]} : vector<8x128xf32> to vector<8x32xf32>
    %186 = arith.mulf %185, %171 : vector<8x32xf32>
    %187 = vector.extract_strided_slice %183 {offsets = [0, 0], sizes = [8, 32], strides = [1, 1]} : vector<8x128xf32> to vector<8x32xf32>
    %188 = vector.extract_strided_slice %184 {offsets = [0, 64], sizes = [8, 32], strides = [1, 1]} : vector<8x128xf32> to vector<8x32xf32>
    %189 = arith.mulf %187, %188 : vector<8x32xf32>
    %190 = arith.addf %186, %189 : vector<8x32xf32>
    %191 = vector.extract_strided_slice %183 {offsets = [0, 96], sizes = [8, 32], strides = [1, 1]} : vector<8x128xf32> to vector<8x32xf32>
    %192 = math.tanh %190 : vector<8x32xf32>
    %193 = arith.mulf %191, %192 : vector<8x32xf32>
    %c32_128 = arith.constant 32 : index
    %c0_129 = arith.constant 0 : index
    %194 = vector.load %arg13[%c32_128, %c0_129] : memref<128x32xf32, #tpu.memory_space<vmem>>, vector<8x32xf32>
    tpu.vector_store %arg13[%c32_128, %c0_129], %193 {strides = array<i32>} : memref<128x32xf32, #tpu.memory_space<vmem>>, vector<8x32xf32>,
    %c40_130 = arith.constant 40 : index
    %c0_131 = arith.constant 0 : index
    %195 = vector.load %arg11[%c40_130, %c0_131] : memref<128x128xf32, #tpu.memory_space<vmem>>, vector<8x128xf32>
    %cst_132 = arith.constant dense<0.000000e+00> : vector<8x128xf32>
    %196 = tpu.matmul %193, %97, %cst_132 {dimension_numbers = #tpu.dot_dimension_numbers<[1], [0], [0], [1], [0, 0, 1, 1], [], []>} : vector<8x32xf32>, vector<32x128xf32>, vector<8x128xf32> -> vector<8x128xf32>
    %197 = arith.addf %195, %196 : vector<8x128xf32>
    %198 = arith.negf %197 : vector<8x128xf32>
    %199 = math.exp %198 : vector<8x128xf32>
    %cst_133 = arith.constant 1.000000e+00 : f32
    %200 = vector.broadcast %cst_133 : f32 to vector<8x128xf32>
    %201 = arith.addf %200, %199 : vector<8x128xf32>
    %202 = arith.divf %200, %201 : vector<8x128xf32>
    %203 = math.tanh %197 : vector<8x128xf32>
    %204 = vector.extract_strided_slice %202 {offsets = [0, 32], sizes = [8, 32], strides = [1, 1]} : vector<8x128xf32> to vector<8x32xf32>
    %205 = arith.mulf %204, %190 : vector<8x32xf32>
    %206 = vector.extract_strided_slice %202 {offsets = [0, 0], sizes = [8, 32], strides = [1, 1]} : vector<8x128xf32> to vector<8x32xf32>
    %207 = vector.extract_strided_slice %203 {offsets = [0, 64], sizes = [8, 32], strides = [1, 1]} : vector<8x128xf32> to vector<8x32xf32>
    %208 = arith.mulf %206, %207 : vector<8x32xf32>
    %209 = arith.addf %205, %208 : vector<8x32xf32>
    %210 = vector.extract_strided_slice %202 {offsets = [0, 96], sizes = [8, 32], strides = [1, 1]} : vector<8x128xf32> to vector<8x32xf32>
    %211 = math.tanh %209 : vector<8x32xf32>
    %212 = arith.mulf %210, %211 : vector<8x32xf32>
    %c40_134 = arith.constant 40 : index
    %c0_135 = arith.constant 0 : index
    %213 = vector.load %arg13[%c40_134, %c0_135] : memref<128x32xf32, #tpu.memory_space<vmem>>, vector<8x32xf32>
    tpu.vector_store %arg13[%c40_134, %c0_135], %212 {strides = array<i32>} : memref<128x32xf32, #tpu.memory_space<vmem>>, vector<8x32xf32>,
    %c48_136 = arith.constant 48 : index
    %c0_137 = arith.constant 0 : index
    %214 = vector.load %arg11[%c48_136, %c0_137] : memref<128x128xf32, #tpu.memory_space<vmem>>, vector<8x128xf32>
    %cst_138 = arith.constant dense<0.000000e+00> : vector<8x128xf32>
    %215 = tpu.matmul %212, %97, %cst_138 {dimension_numbers = #tpu.dot_dimension_numbers<[1], [0], [0], [1], [0, 0, 1, 1], [], []>} : vector<8x32xf32>, vector<32x128xf32>, vector<8x128xf32> -> vector<8x128xf32>
    %216 = arith.addf %214, %215 : vector<8x128xf32>
    %217 = arith.negf %216 : vector<8x128xf32>
    %218 = math.exp %217 : vector<8x128xf32>
    %cst_139 = arith.constant 1.000000e+00 : f32
    %219 = vector.broadcast %cst_139 : f32 to vector<8x128xf32>
    %220 = arith.addf %219, %218 : vector<8x128xf32>
    %221 = arith.divf %219, %220 : vector<8x128xf32>
    %222 = math.tanh %216 : vector<8x128xf32>
    %223 = vector.extract_strided_slice %221 {offsets = [0, 32], sizes = [8, 32], strides = [1, 1]} : vector<8x128xf32> to vector<8x32xf32>
    %224 = arith.mulf %223, %209 : vector<8x32xf32>
    %225 = vector.extract_strided_slice %221 {offsets = [0, 0], sizes = [8, 32], strides = [1, 1]} : vector<8x128xf32> to vector<8x32xf32>
    %226 = vector.extract_strided_slice %222 {offsets = [0, 64], sizes = [8, 32], strides = [1, 1]} : vector<8x128xf32> to vector<8x32xf32>
    %227 = arith.mulf %225, %226 : vector<8x32xf32>
    %228 = arith.addf %224, %227 : vector<8x32xf32>
    %229 = vector.extract_strided_slice %221 {offsets = [0, 96], sizes = [8, 32], strides = [1, 1]} : vector<8x128xf32> to vector<8x32xf32>
    %230 = math.tanh %228 : vector<8x32xf32>
    %231 = arith.mulf %229, %230 : vector<8x32xf32>
    %c48_140 = arith.constant 48 : index
    %c0_141 = arith.constant 0 : index
    %232 = vector.load %arg13[%c48_140, %c0_141] : memref<128x32xf32, #tpu.memory_space<vmem>>, vector<8x32xf32>
    tpu.vector_store %arg13[%c48_140, %c0_141], %231 {strides = array<i32>} : memref<128x32xf32, #tpu.memory_space<vmem>>, vector<8x32xf32>,
    %c56_142 = arith.constant 56 : index
    %c0_143 = arith.constant 0 : index
    %233 = vector.load %arg11[%c56_142, %c0_143] : memref<128x128xf32, #tpu.memory_space<vmem>>, vector<8x128xf32>
    %cst_144 = arith.constant dense<0.000000e+00> : vector<8x128xf32>
    %234 = tpu.matmul %231, %97, %cst_144 {dimension_numbers = #tpu.dot_dimension_numbers<[1], [0], [0], [1], [0, 0, 1, 1], [], []>} : vector<8x32xf32>, vector<32x128xf32>, vector<8x128xf32> -> vector<8x128xf32>
    %235 = arith.addf %233, %234 : vector<8x128xf32>
    %236 = arith.negf %235 : vector<8x128xf32>
    %237 = math.exp %236 : vector<8x128xf32>
    %cst_145 = arith.constant 1.000000e+00 : f32
    %238 = vector.broadcast %cst_145 : f32 to vector<8x128xf32>
    %239 = arith.addf %238, %237 : vector<8x128xf32>
    %240 = arith.divf %238, %239 : vector<8x128xf32>
    %241 = math.tanh %235 : vector<8x128xf32>
    %242 = vector.extract_strided_slice %240 {offsets = [0, 32], sizes = [8, 32], strides = [1, 1]} : vector<8x128xf32> to vector<8x32xf32>
    %243 = arith.mulf %242, %228 : vector<8x32xf32>
    %244 = vector.extract_strided_slice %240 {offsets = [0, 0], sizes = [8, 32], strides = [1, 1]} : vector<8x128xf32> to vector<8x32xf32>
    %245 = vector.extract_strided_slice %241 {offsets = [0, 64], sizes = [8, 32], strides = [1, 1]} : vector<8x128xf32> to vector<8x32xf32>
    %246 = arith.mulf %244, %245 : vector<8x32xf32>
    %247 = arith.addf %243, %246 : vector<8x32xf32>
    %248 = vector.extract_strided_slice %240 {offsets = [0, 96], sizes = [8, 32], strides = [1, 1]} : vector<8x128xf32> to vector<8x32xf32>
    %249 = math.tanh %247 : vector<8x32xf32>
    %250 = arith.mulf %248, %249 : vector<8x32xf32>
    %c56_146 = arith.constant 56 : index
    %c0_147 = arith.constant 0 : index
    %251 = vector.load %arg13[%c56_146, %c0_147] : memref<128x32xf32, #tpu.memory_space<vmem>>, vector<8x32xf32>
    tpu.vector_store %arg13[%c56_146, %c0_147], %250 {strides = array<i32>} : memref<128x32xf32, #tpu.memory_space<vmem>>, vector<8x32xf32>,
    %c64_148 = arith.constant 64 : index
    %c0_149 = arith.constant 0 : index
    %252 = vector.load %arg11[%c64_148, %c0_149] : memref<128x128xf32, #tpu.memory_space<vmem>>, vector<8x128xf32>
    %cst_150 = arith.constant dense<0.000000e+00> : vector<8x128xf32>
    %253 = tpu.matmul %250, %97, %cst_150 {dimension_numbers = #tpu.dot_dimension_numbers<[1], [0], [0], [1], [0, 0, 1, 1], [], []>} : vector<8x32xf32>, vector<32x128xf32>, vector<8x128xf32> -> vector<8x128xf32>
    %254 = arith.addf %252, %253 : vector<8x128xf32>
    %255 = arith.negf %254 : vector<8x128xf32>
    %256 = math.exp %255 : vector<8x128xf32>
    %cst_151 = arith.constant 1.000000e+00 : f32
    %257 = vector.broadcast %cst_151 : f32 to vector<8x128xf32>
    %258 = arith.addf %257, %256 : vector<8x128xf32>
    %259 = arith.divf %257, %258 : vector<8x128xf32>
    %260 = math.tanh %254 : vector<8x128xf32>
    %261 = vector.extract_strided_slice %259 {offsets = [0, 32], sizes = [8, 32], strides = [1, 1]} : vector<8x128xf32> to vector<8x32xf32>
    %262 = arith.mulf %261, %247 : vector<8x32xf32>
    %263 = vector.extract_strided_slice %259 {offsets = [0, 0], sizes = [8, 32], strides = [1, 1]} : vector<8x128xf32> to vector<8x32xf32>
    %264 = vector.extract_strided_slice %260 {offsets = [0, 64], sizes = [8, 32], strides = [1, 1]} : vector<8x128xf32> to vector<8x32xf32>
    %265 = arith.mulf %263, %264 : vector<8x32xf32>
    %266 = arith.addf %262, %265 : vector<8x32xf32>
    %267 = vector.extract_strided_slice %259 {offsets = [0, 96], sizes = [8, 32], strides = [1, 1]} : vector<8x128xf32> to vector<8x32xf32>
    %268 = math.tanh %266 : vector<8x32xf32>
    %269 = arith.mulf %267, %268 : vector<8x32xf32>
    %c64_152 = arith.constant 64 : index
    %c0_153 = arith.constant 0 : index
    %270 = vector.load %arg13[%c64_152, %c0_153] : memref<128x32xf32, #tpu.memory_space<vmem>>, vector<8x32xf32>
    tpu.vector_store %arg13[%c64_152, %c0_153], %269 {strides = array<i32>} : memref<128x32xf32, #tpu.memory_space<vmem>>, vector<8x32xf32>,
    %c72_154 = arith.constant 72 : index
    %c0_155 = arith.constant 0 : index
    %271 = vector.load %arg11[%c72_154, %c0_155] : memref<128x128xf32, #tpu.memory_space<vmem>>, vector<8x128xf32>
    %cst_156 = arith.constant dense<0.000000e+00> : vector<8x128xf32>
    %272 = tpu.matmul %269, %97, %cst_156 {dimension_numbers = #tpu.dot_dimension_numbers<[1], [0], [0], [1], [0, 0, 1, 1], [], []>} : vector<8x32xf32>, vector<32x128xf32>, vector<8x128xf32> -> vector<8x128xf32>
    %273 = arith.addf %271, %272 : vector<8x128xf32>
    %274 = arith.negf %273 : vector<8x128xf32>
    %275 = math.exp %274 : vector<8x128xf32>
    %cst_157 = arith.constant 1.000000e+00 : f32
    %276 = vector.broadcast %cst_157 : f32 to vector<8x128xf32>
    %277 = arith.addf %276, %275 : vector<8x128xf32>
    %278 = arith.divf %276, %277 : vector<8x128xf32>
    %279 = math.tanh %273 : vector<8x128xf32>
    %280 = vector.extract_strided_slice %278 {offsets = [0, 32], sizes = [8, 32], strides = [1, 1]} : vector<8x128xf32> to vector<8x32xf32>
    %281 = arith.mulf %280, %266 : vector<8x32xf32>
    %282 = vector.extract_strided_slice %278 {offsets = [0, 0], sizes = [8, 32], strides = [1, 1]} : vector<8x128xf32> to vector<8x32xf32>
    %283 = vector.extract_strided_slice %279 {offsets = [0, 64], sizes = [8, 32], strides = [1, 1]} : vector<8x128xf32> to vector<8x32xf32>
    %284 = arith.mulf %282, %283 : vector<8x32xf32>
    %285 = arith.addf %281, %284 : vector<8x32xf32>
    %286 = vector.extract_strided_slice %278 {offsets = [0, 96], sizes = [8, 32], strides = [1, 1]} : vector<8x128xf32> to vector<8x32xf32>
    %287 = math.tanh %285 : vector<8x32xf32>
    %288 = arith.mulf %286, %287 : vector<8x32xf32>
    %c72_158 = arith.constant 72 : index
    %c0_159 = arith.constant 0 : index
    %289 = vector.load %arg13[%c72_158, %c0_159] : memref<128x32xf32, #tpu.memory_space<vmem>>, vector<8x32xf32>
    tpu.vector_store %arg13[%c72_158, %c0_159], %288 {strides = array<i32>} : memref<128x32xf32, #tpu.memory_space<vmem>>, vector<8x32xf32>,
    %c80_160 = arith.constant 80 : index
    %c0_161 = arith.constant 0 : index
    %290 = vector.load %arg11[%c80_160, %c0_161] : memref<128x128xf32, #tpu.memory_space<vmem>>, vector<8x128xf32>
    %cst_162 = arith.constant dense<0.000000e+00> : vector<8x128xf32>
    %291 = tpu.matmul %288, %97, %cst_162 {dimension_numbers = #tpu.dot_dimension_numbers<[1], [0], [0], [1], [0, 0, 1, 1], [], []>} : vector<8x32xf32>, vector<32x128xf32>, vector<8x128xf32> -> vector<8x128xf32>
    %292 = arith.addf %290, %291 : vector<8x128xf32>
    %293 = arith.negf %292 : vector<8x128xf32>
    %294 = math.exp %293 : vector<8x128xf32>
    %cst_163 = arith.constant 1.000000e+00 : f32
    %295 = vector.broadcast %cst_163 : f32 to vector<8x128xf32>
    %296 = arith.addf %295, %294 : vector<8x128xf32>
    %297 = arith.divf %295, %296 : vector<8x128xf32>
    %298 = math.tanh %292 : vector<8x128xf32>
    %299 = vector.extract_strided_slice %297 {offsets = [0, 32], sizes = [8, 32], strides = [1, 1]} : vector<8x128xf32> to vector<8x32xf32>
    %300 = arith.mulf %299, %285 : vector<8x32xf32>
    %301 = vector.extract_strided_slice %297 {offsets = [0, 0], sizes = [8, 32], strides = [1, 1]} : vector<8x128xf32> to vector<8x32xf32>
    %302 = vector.extract_strided_slice %298 {offsets = [0, 64], sizes = [8, 32], strides = [1, 1]} : vector<8x128xf32> to vector<8x32xf32>
    %303 = arith.mulf %301, %302 : vector<8x32xf32>
    %304 = arith.addf %300, %303 : vector<8x32xf32>
    %305 = vector.extract_strided_slice %297 {offsets = [0, 96], sizes = [8, 32], strides = [1, 1]} : vector<8x128xf32> to vector<8x32xf32>
    %306 = math.tanh %304 : vector<8x32xf32>
    %307 = arith.mulf %305, %306 : vector<8x32xf32>
    %c80_164 = arith.constant 80 : index
    %c0_165 = arith.constant 0 : index
    %308 = vector.load %arg13[%c80_164, %c0_165] : memref<128x32xf32, #tpu.memory_space<vmem>>, vector<8x32xf32>
    tpu.vector_store %arg13[%c80_164, %c0_165], %307 {strides = array<i32>} : memref<128x32xf32, #tpu.memory_space<vmem>>, vector<8x32xf32>,
    %c88_166 = arith.constant 88 : index
    %c0_167 = arith.constant 0 : index
    %309 = vector.load %arg11[%c88_166, %c0_167] : memref<128x128xf32, #tpu.memory_space<vmem>>, vector<8x128xf32>
    %cst_168 = arith.constant dense<0.000000e+00> : vector<8x128xf32>
    %310 = tpu.matmul %307, %97, %cst_168 {dimension_numbers = #tpu.dot_dimension_numbers<[1], [0], [0], [1], [0, 0, 1, 1], [], []>} : vector<8x32xf32>, vector<32x128xf32>, vector<8x128xf32> -> vector<8x128xf32>
    %311 = arith.addf %309, %310 : vector<8x128xf32>
    %312 = arith.negf %311 : vector<8x128xf32>
    %313 = math.exp %312 : vector<8x128xf32>
    %cst_169 = arith.constant 1.000000e+00 : f32
    %314 = vector.broadcast %cst_169 : f32 to vector<8x128xf32>
    %315 = arith.addf %314, %313 : vector<8x128xf32>
    %316 = arith.divf %314, %315 : vector<8x128xf32>
    %317 = math.tanh %311 : vector<8x128xf32>
    %318 = vector.extract_strided_slice %316 {offsets = [0, 32], sizes = [8, 32], strides = [1, 1]} : vector<8x128xf32> to vector<8x32xf32>
    %319 = arith.mulf %318, %304 : vector<8x32xf32>
    %320 = vector.extract_strided_slice %316 {offsets = [0, 0], sizes = [8, 32], strides = [1, 1]} : vector<8x128xf32> to vector<8x32xf32>
    %321 = vector.extract_strided_slice %317 {offsets = [0, 64], sizes = [8, 32], strides = [1, 1]} : vector<8x128xf32> to vector<8x32xf32>
    %322 = arith.mulf %320, %321 : vector<8x32xf32>
    %323 = arith.addf %319, %322 : vector<8x32xf32>
    %324 = vector.extract_strided_slice %316 {offsets = [0, 96], sizes = [8, 32], strides = [1, 1]} : vector<8x128xf32> to vector<8x32xf32>
    %325 = math.tanh %323 : vector<8x32xf32>
    %326 = arith.mulf %324, %325 : vector<8x32xf32>
    %c88_170 = arith.constant 88 : index
    %c0_171 = arith.constant 0 : index
    %327 = vector.load %arg13[%c88_170, %c0_171] : memref<128x32xf32, #tpu.memory_space<vmem>>, vector<8x32xf32>
    tpu.vector_store %arg13[%c88_170, %c0_171], %326 {strides = array<i32>} : memref<128x32xf32, #tpu.memory_space<vmem>>, vector<8x32xf32>,
    %c96_172 = arith.constant 96 : index
    %c0_173 = arith.constant 0 : index
    %328 = vector.load %arg11[%c96_172, %c0_173] : memref<128x128xf32, #tpu.memory_space<vmem>>, vector<8x128xf32>
    %cst_174 = arith.constant dense<0.000000e+00> : vector<8x128xf32>
    %329 = tpu.matmul %326, %97, %cst_174 {dimension_numbers = #tpu.dot_dimension_numbers<[1], [0], [0], [1], [0, 0, 1, 1], [], []>} : vector<8x32xf32>, vector<32x128xf32>, vector<8x128xf32> -> vector<8x128xf32>
    %330 = arith.addf %328, %329 : vector<8x128xf32>
    %331 = arith.negf %330 : vector<8x128xf32>
    %332 = math.exp %331 : vector<8x128xf32>
    %cst_175 = arith.constant 1.000000e+00 : f32
    %333 = vector.broadcast %cst_175 : f32 to vector<8x128xf32>
    %334 = arith.addf %333, %332 : vector<8x128xf32>
    %335 = arith.divf %333, %334 : vector<8x128xf32>
    %336 = math.tanh %330 : vector<8x128xf32>
    %337 = vector.extract_strided_slice %335 {offsets = [0, 32], sizes = [8, 32], strides = [1, 1]} : vector<8x128xf32> to vector<8x32xf32>
    %338 = arith.mulf %337, %323 : vector<8x32xf32>
    %339 = vector.extract_strided_slice %335 {offsets = [0, 0], sizes = [8, 32], strides = [1, 1]} : vector<8x128xf32> to vector<8x32xf32>
    %340 = vector.extract_strided_slice %336 {offsets = [0, 64], sizes = [8, 32], strides = [1, 1]} : vector<8x128xf32> to vector<8x32xf32>
    %341 = arith.mulf %339, %340 : vector<8x32xf32>
    %342 = arith.addf %338, %341 : vector<8x32xf32>
    %343 = vector.extract_strided_slice %335 {offsets = [0, 96], sizes = [8, 32], strides = [1, 1]} : vector<8x128xf32> to vector<8x32xf32>
    %344 = math.tanh %342 : vector<8x32xf32>
    %345 = arith.mulf %343, %344 : vector<8x32xf32>
    %c96_176 = arith.constant 96 : index
    %c0_177 = arith.constant 0 : index
    %346 = vector.load %arg13[%c96_176, %c0_177] : memref<128x32xf32, #tpu.memory_space<vmem>>, vector<8x32xf32>
    tpu.vector_store %arg13[%c96_176, %c0_177], %345 {strides = array<i32>} : memref<128x32xf32, #tpu.memory_space<vmem>>, vector<8x32xf32>,
    %c104_178 = arith.constant 104 : index
    %c0_179 = arith.constant 0 : index
    %347 = vector.load %arg11[%c104_178, %c0_179] : memref<128x128xf32, #tpu.memory_space<vmem>>, vector<8x128xf32>
    %cst_180 = arith.constant dense<0.000000e+00> : vector<8x128xf32>
    %348 = tpu.matmul %345, %97, %cst_180 {dimension_numbers = #tpu.dot_dimension_numbers<[1], [0], [0], [1], [0, 0, 1, 1], [], []>} : vector<8x32xf32>, vector<32x128xf32>, vector<8x128xf32> -> vector<8x128xf32>
    %349 = arith.addf %347, %348 : vector<8x128xf32>
    %350 = arith.negf %349 : vector<8x128xf32>
    %351 = math.exp %350 : vector<8x128xf32>
    %cst_181 = arith.constant 1.000000e+00 : f32
    %352 = vector.broadcast %cst_181 : f32 to vector<8x128xf32>
    %353 = arith.addf %352, %351 : vector<8x128xf32>
    %354 = arith.divf %352, %353 : vector<8x128xf32>
    %355 = math.tanh %349 : vector<8x128xf32>
    %356 = vector.extract_strided_slice %354 {offsets = [0, 32], sizes = [8, 32], strides = [1, 1]} : vector<8x128xf32> to vector<8x32xf32>
    %357 = arith.mulf %356, %342 : vector<8x32xf32>
    %358 = vector.extract_strided_slice %354 {offsets = [0, 0], sizes = [8, 32], strides = [1, 1]} : vector<8x128xf32> to vector<8x32xf32>
    %359 = vector.extract_strided_slice %355 {offsets = [0, 64], sizes = [8, 32], strides = [1, 1]} : vector<8x128xf32> to vector<8x32xf32>
    %360 = arith.mulf %358, %359 : vector<8x32xf32>
    %361 = arith.addf %357, %360 : vector<8x32xf32>
    %362 = vector.extract_strided_slice %354 {offsets = [0, 96], sizes = [8, 32], strides = [1, 1]} : vector<8x128xf32> to vector<8x32xf32>
    %363 = math.tanh %361 : vector<8x32xf32>
    %364 = arith.mulf %362, %363 : vector<8x32xf32>
    %c104_182 = arith.constant 104 : index
    %c0_183 = arith.constant 0 : index
    %365 = vector.load %arg13[%c104_182, %c0_183] : memref<128x32xf32, #tpu.memory_space<vmem>>, vector<8x32xf32>
    tpu.vector_store %arg13[%c104_182, %c0_183], %364 {strides = array<i32>} : memref<128x32xf32, #tpu.memory_space<vmem>>, vector<8x32xf32>,
    %c112_184 = arith.constant 112 : index
    %c0_185 = arith.constant 0 : index
    %366 = vector.load %arg11[%c112_184, %c0_185] : memref<128x128xf32, #tpu.memory_space<vmem>>, vector<8x128xf32>
    %cst_186 = arith.constant dense<0.000000e+00> : vector<8x128xf32>
    %367 = tpu.matmul %364, %97, %cst_186 {dimension_numbers = #tpu.dot_dimension_numbers<[1], [0], [0], [1], [0, 0, 1, 1], [], []>} : vector<8x32xf32>, vector<32x128xf32>, vector<8x128xf32> -> vector<8x128xf32>
    %368 = arith.addf %366, %367 : vector<8x128xf32>
    %369 = arith.negf %368 : vector<8x128xf32>
    %370 = math.exp %369 : vector<8x128xf32>
    %cst_187 = arith.constant 1.000000e+00 : f32
    %371 = vector.broadcast %cst_187 : f32 to vector<8x128xf32>
    %372 = arith.addf %371, %370 : vector<8x128xf32>
    %373 = arith.divf %371, %372 : vector<8x128xf32>
    %374 = math.tanh %368 : vector<8x128xf32>
    %375 = vector.extract_strided_slice %373 {offsets = [0, 32], sizes = [8, 32], strides = [1, 1]} : vector<8x128xf32> to vector<8x32xf32>
    %376 = arith.mulf %375, %361 : vector<8x32xf32>
    %377 = vector.extract_strided_slice %373 {offsets = [0, 0], sizes = [8, 32], strides = [1, 1]} : vector<8x128xf32> to vector<8x32xf32>
    %378 = vector.extract_strided_slice %374 {offsets = [0, 64], sizes = [8, 32], strides = [1, 1]} : vector<8x128xf32> to vector<8x32xf32>
    %379 = arith.mulf %377, %378 : vector<8x32xf32>
    %380 = arith.addf %376, %379 : vector<8x32xf32>
    %381 = vector.extract_strided_slice %373 {offsets = [0, 96], sizes = [8, 32], strides = [1, 1]} : vector<8x128xf32> to vector<8x32xf32>
    %382 = math.tanh %380 : vector<8x32xf32>
    %383 = arith.mulf %381, %382 : vector<8x32xf32>
    %c112_188 = arith.constant 112 : index
    %c0_189 = arith.constant 0 : index
    %384 = vector.load %arg13[%c112_188, %c0_189] : memref<128x32xf32, #tpu.memory_space<vmem>>, vector<8x32xf32>
    tpu.vector_store %arg13[%c112_188, %c0_189], %383 {strides = array<i32>} : memref<128x32xf32, #tpu.memory_space<vmem>>, vector<8x32xf32>,
    %c120_190 = arith.constant 120 : index
    %c0_191 = arith.constant 0 : index
    %385 = vector.load %arg11[%c120_190, %c0_191] : memref<128x128xf32, #tpu.memory_space<vmem>>, vector<8x128xf32>
    %cst_192 = arith.constant dense<0.000000e+00> : vector<8x128xf32>
    %386 = tpu.matmul %383, %97, %cst_192 {dimension_numbers = #tpu.dot_dimension_numbers<[1], [0], [0], [1], [0, 0, 1, 1], [], []>} : vector<8x32xf32>, vector<32x128xf32>, vector<8x128xf32> -> vector<8x128xf32>
    %387 = arith.addf %385, %386 : vector<8x128xf32>
    %388 = arith.negf %387 : vector<8x128xf32>
    %389 = math.exp %388 : vector<8x128xf32>
    %cst_193 = arith.constant 1.000000e+00 : f32
    %390 = vector.broadcast %cst_193 : f32 to vector<8x128xf32>
    %391 = arith.addf %390, %389 : vector<8x128xf32>
    %392 = arith.divf %390, %391 : vector<8x128xf32>
    %393 = math.tanh %387 : vector<8x128xf32>
    %394 = vector.extract_strided_slice %392 {offsets = [0, 32], sizes = [8, 32], strides = [1, 1]} : vector<8x128xf32> to vector<8x32xf32>
    %395 = arith.mulf %394, %380 : vector<8x32xf32>
    %396 = vector.extract_strided_slice %392 {offsets = [0, 0], sizes = [8, 32], strides = [1, 1]} : vector<8x128xf32> to vector<8x32xf32>
    %397 = vector.extract_strided_slice %393 {offsets = [0, 64], sizes = [8, 32], strides = [1, 1]} : vector<8x128xf32> to vector<8x32xf32>
    %398 = arith.mulf %396, %397 : vector<8x32xf32>
    %399 = arith.addf %395, %398 : vector<8x32xf32>
    %400 = vector.extract_strided_slice %392 {offsets = [0, 96], sizes = [8, 32], strides = [1, 1]} : vector<8x128xf32> to vector<8x32xf32>
    %401 = math.tanh %399 : vector<8x32xf32>
    %402 = arith.mulf %400, %401 : vector<8x32xf32>
    %c120_194 = arith.constant 120 : index
    %c0_195 = arith.constant 0 : index
    %403 = vector.load %arg13[%c120_194, %c0_195] : memref<128x32xf32, #tpu.memory_space<vmem>>, vector<8x32xf32>
    tpu.vector_store %arg13[%c120_194, %c0_195], %402 {strides = array<i32>} : memref<128x32xf32, #tpu.memory_space<vmem>>, vector<8x32xf32>,
    %c0_196 = arith.constant 0 : index
    %c0_197 = arith.constant 0 : index
    %404 = vector.load %arg13[%c0_196, %c0_197] : memref<128x32xf32, #tpu.memory_space<vmem>>, vector<8x32xf32>
    %c120_198 = arith.constant 120 : index
    %c0_199 = arith.constant 0 : index
    %405 = vector.load %arg13[%c120_198, %c0_199] : memref<128x32xf32, #tpu.memory_space<vmem>>, vector<8x32xf32>
    %406 = arith.select %21, %404, %405 : vector<8x32xi1>, vector<8x32xf32>
    %c0_200 = arith.constant 0 : index
    %c0_201 = arith.constant 0 : index
    %407 = vector.load %arg12[%c0_200, %c0_201] : memref<128x32xf32, #tpu.memory_space<vmem>>, vector<8x32xf32>
    tpu.vector_store %arg12[%c0_200, %c0_201], %406 {strides = array<i32>} : memref<128x32xf32, #tpu.memory_space<vmem>>, vector<8x32xf32>,
    %c8_202 = arith.constant 8 : index
    %c0_203 = arith.constant 0 : index
    %408 = vector.load %arg13[%c8_202, %c0_203] : memref<128x32xf32, #tpu.memory_space<vmem>>, vector<8x32xf32>
    %c112_204 = arith.constant 112 : index
    %c0_205 = arith.constant 0 : index
    %409 = vector.load %arg13[%c112_204, %c0_205] : memref<128x32xf32, #tpu.memory_space<vmem>>, vector<8x32xf32>
    %410 = arith.select %21, %408, %409 : vector<8x32xi1>, vector<8x32xf32>
    %c8_206 = arith.constant 8 : index
    %c0_207 = arith.constant 0 : index
    %411 = vector.load %arg12[%c8_206, %c0_207] : memref<128x32xf32, #tpu.memory_space<vmem>>, vector<8x32xf32>
    tpu.vector_store %arg12[%c8_206, %c0_207], %410 {strides = array<i32>} : memref<128x32xf32, #tpu.memory_space<vmem>>, vector<8x32xf32>,
    %c16_208 = arith.constant 16 : index
    %c0_209 = arith.constant 0 : index
    %412 = vector.load %arg13[%c16_208, %c0_209] : memref<128x32xf32, #tpu.memory_space<vmem>>, vector<8x32xf32>
    %c104_210 = arith.constant 104 : index
    %c0_211 = arith.constant 0 : index
    %413 = vector.load %arg13[%c104_210, %c0_211] : memref<128x32xf32, #tpu.memory_space<vmem>>, vector<8x32xf32>
    %414 = arith.select %21, %412, %413 : vector<8x32xi1>, vector<8x32xf32>
    %c16_212 = arith.constant 16 : index
    %c0_213 = arith.constant 0 : index
    %415 = vector.load %arg12[%c16_212, %c0_213] : memref<128x32xf32, #tpu.memory_space<vmem>>, vector<8x32xf32>
    tpu.vector_store %arg12[%c16_212, %c0_213], %414 {strides = array<i32>} : memref<128x32xf32, #tpu.memory_space<vmem>>, vector<8x32xf32>,
    %c24_214 = arith.constant 24 : index
    %c0_215 = arith.constant 0 : index
    %416 = vector.load %arg13[%c24_214, %c0_215] : memref<128x32xf32, #tpu.memory_space<vmem>>, vector<8x32xf32>
    %c96_216 = arith.constant 96 : index
    %c0_217 = arith.constant 0 : index
    %417 = vector.load %arg13[%c96_216, %c0_217] : memref<128x32xf32, #tpu.memory_space<vmem>>, vector<8x32xf32>
    %418 = arith.select %21, %416, %417 : vector<8x32xi1>, vector<8x32xf32>
    %c24_218 = arith.constant 24 : index
    %c0_219 = arith.constant 0 : index
    %419 = vector.load %arg12[%c24_218, %c0_219] : memref<128x32xf32, #tpu.memory_space<vmem>>, vector<8x32xf32>
    tpu.vector_store %arg12[%c24_218, %c0_219], %418 {strides = array<i32>} : memref<128x32xf32, #tpu.memory_space<vmem>>, vector<8x32xf32>,
    %c32_220 = arith.constant 32 : index
    %c0_221 = arith.constant 0 : index
    %420 = vector.load %arg13[%c32_220, %c0_221] : memref<128x32xf32, #tpu.memory_space<vmem>>, vector<8x32xf32>
    %c88_222 = arith.constant 88 : index
    %c0_223 = arith.constant 0 : index
    %421 = vector.load %arg13[%c88_222, %c0_223] : memref<128x32xf32, #tpu.memory_space<vmem>>, vector<8x32xf32>
    %422 = arith.select %21, %420, %421 : vector<8x32xi1>, vector<8x32xf32>
    %c32_224 = arith.constant 32 : index
    %c0_225 = arith.constant 0 : index
    %423 = vector.load %arg12[%c32_224, %c0_225] : memref<128x32xf32, #tpu.memory_space<vmem>>, vector<8x32xf32>
    tpu.vector_store %arg12[%c32_224, %c0_225], %422 {strides = array<i32>} : memref<128x32xf32, #tpu.memory_space<vmem>>, vector<8x32xf32>,
    %c40_226 = arith.constant 40 : index
    %c0_227 = arith.constant 0 : index
    %424 = vector.load %arg13[%c40_226, %c0_227] : memref<128x32xf32, #tpu.memory_space<vmem>>, vector<8x32xf32>
    %c80_228 = arith.constant 80 : index
    %c0_229 = arith.constant 0 : index
    %425 = vector.load %arg13[%c80_228, %c0_229] : memref<128x32xf32, #tpu.memory_space<vmem>>, vector<8x32xf32>
    %426 = arith.select %21, %424, %425 : vector<8x32xi1>, vector<8x32xf32>
    %c40_230 = arith.constant 40 : index
    %c0_231 = arith.constant 0 : index
    %427 = vector.load %arg12[%c40_230, %c0_231] : memref<128x32xf32, #tpu.memory_space<vmem>>, vector<8x32xf32>
    tpu.vector_store %arg12[%c40_230, %c0_231], %426 {strides = array<i32>} : memref<128x32xf32, #tpu.memory_space<vmem>>, vector<8x32xf32>,
    %c48_232 = arith.constant 48 : index
    %c0_233 = arith.constant 0 : index
    %428 = vector.load %arg13[%c48_232, %c0_233] : memref<128x32xf32, #tpu.memory_space<vmem>>, vector<8x32xf32>
    %c72_234 = arith.constant 72 : index
    %c0_235 = arith.constant 0 : index
    %429 = vector.load %arg13[%c72_234, %c0_235] : memref<128x32xf32, #tpu.memory_space<vmem>>, vector<8x32xf32>
    %430 = arith.select %21, %428, %429 : vector<8x32xi1>, vector<8x32xf32>
    %c48_236 = arith.constant 48 : index
    %c0_237 = arith.constant 0 : index
    %431 = vector.load %arg12[%c48_236, %c0_237] : memref<128x32xf32, #tpu.memory_space<vmem>>, vector<8x32xf32>
    tpu.vector_store %arg12[%c48_236, %c0_237], %430 {strides = array<i32>} : memref<128x32xf32, #tpu.memory_space<vmem>>, vector<8x32xf32>,
    %c56_238 = arith.constant 56 : index
    %c0_239 = arith.constant 0 : index
    %432 = vector.load %arg13[%c56_238, %c0_239] : memref<128x32xf32, #tpu.memory_space<vmem>>, vector<8x32xf32>
    %c64_240 = arith.constant 64 : index
    %c0_241 = arith.constant 0 : index
    %433 = vector.load %arg13[%c64_240, %c0_241] : memref<128x32xf32, #tpu.memory_space<vmem>>, vector<8x32xf32>
    %434 = arith.select %21, %432, %433 : vector<8x32xi1>, vector<8x32xf32>
    %c56_242 = arith.constant 56 : index
    %c0_243 = arith.constant 0 : index
    %435 = vector.load %arg12[%c56_242, %c0_243] : memref<128x32xf32, #tpu.memory_space<vmem>>, vector<8x32xf32>
    tpu.vector_store %arg12[%c56_242, %c0_243], %434 {strides = array<i32>} : memref<128x32xf32, #tpu.memory_space<vmem>>, vector<8x32xf32>,
    %c64_244 = arith.constant 64 : index
    %c0_245 = arith.constant 0 : index
    %436 = vector.load %arg13[%c64_244, %c0_245] : memref<128x32xf32, #tpu.memory_space<vmem>>, vector<8x32xf32>
    %c56_246 = arith.constant 56 : index
    %c0_247 = arith.constant 0 : index
    %437 = vector.load %arg13[%c56_246, %c0_247] : memref<128x32xf32, #tpu.memory_space<vmem>>, vector<8x32xf32>
    %438 = arith.select %21, %436, %437 : vector<8x32xi1>, vector<8x32xf32>
    %c64_248 = arith.constant 64 : index
    %c0_249 = arith.constant 0 : index
    %439 = vector.load %arg12[%c64_248, %c0_249] : memref<128x32xf32, #tpu.memory_space<vmem>>, vector<8x32xf32>
    tpu.vector_store %arg12[%c64_248, %c0_249], %438 {strides = array<i32>} : memref<128x32xf32, #tpu.memory_space<vmem>>, vector<8x32xf32>,
    %c72_250 = arith.constant 72 : index
    %c0_251 = arith.constant 0 : index
    %440 = vector.load %arg13[%c72_250, %c0_251] : memref<128x32xf32, #tpu.memory_space<vmem>>, vector<8x32xf32>
    %c48_252 = arith.constant 48 : index
    %c0_253 = arith.constant 0 : index
    %441 = vector.load %arg13[%c48_252, %c0_253] : memref<128x32xf32, #tpu.memory_space<vmem>>, vector<8x32xf32>
    %442 = arith.select %21, %440, %441 : vector<8x32xi1>, vector<8x32xf32>
    %c72_254 = arith.constant 72 : index
    %c0_255 = arith.constant 0 : index
    %443 = vector.load %arg12[%c72_254, %c0_255] : memref<128x32xf32, #tpu.memory_space<vmem>>, vector<8x32xf32>
    tpu.vector_store %arg12[%c72_254, %c0_255], %442 {strides = array<i32>} : memref<128x32xf32, #tpu.memory_space<vmem>>, vector<8x32xf32>,
    %c80_256 = arith.constant 80 : index
    %c0_257 = arith.constant 0 : index
    %444 = vector.load %arg13[%c80_256, %c0_257] : memref<128x32xf32, #tpu.memory_space<vmem>>, vector<8x32xf32>
    %c40_258 = arith.constant 40 : index
    %c0_259 = arith.constant 0 : index
    %445 = vector.load %arg13[%c40_258, %c0_259] : memref<128x32xf32, #tpu.memory_space<vmem>>, vector<8x32xf32>
    %446 = arith.select %21, %444, %445 : vector<8x32xi1>, vector<8x32xf32>
    %c80_260 = arith.constant 80 : index
    %c0_261 = arith.constant 0 : index
    %447 = vector.load %arg12[%c80_260, %c0_261] : memref<128x32xf32, #tpu.memory_space<vmem>>, vector<8x32xf32>
    tpu.vector_store %arg12[%c80_260, %c0_261], %446 {strides = array<i32>} : memref<128x32xf32, #tpu.memory_space<vmem>>, vector<8x32xf32>,
    %c88_262 = arith.constant 88 : index
    %c0_263 = arith.constant 0 : index
    %448 = vector.load %arg13[%c88_262, %c0_263] : memref<128x32xf32, #tpu.memory_space<vmem>>, vector<8x32xf32>
    %c32_264 = arith.constant 32 : index
    %c0_265 = arith.constant 0 : index
    %449 = vector.load %arg13[%c32_264, %c0_265] : memref<128x32xf32, #tpu.memory_space<vmem>>, vector<8x32xf32>
    %450 = arith.select %21, %448, %449 : vector<8x32xi1>, vector<8x32xf32>
    %c88_266 = arith.constant 88 : index
    %c0_267 = arith.constant 0 : index
    %451 = vector.load %arg12[%c88_266, %c0_267] : memref<128x32xf32, #tpu.memory_space<vmem>>, vector<8x32xf32>
    tpu.vector_store %arg12[%c88_266, %c0_267], %450 {strides = array<i32>} : memref<128x32xf32, #tpu.memory_space<vmem>>, vector<8x32xf32>,
    %c96_268 = arith.constant 96 : index
    %c0_269 = arith.constant 0 : index
    %452 = vector.load %arg13[%c96_268, %c0_269] : memref<128x32xf32, #tpu.memory_space<vmem>>, vector<8x32xf32>
    %c24_270 = arith.constant 24 : index
    %c0_271 = arith.constant 0 : index
    %453 = vector.load %arg13[%c24_270, %c0_271] : memref<128x32xf32, #tpu.memory_space<vmem>>, vector<8x32xf32>
    %454 = arith.select %21, %452, %453 : vector<8x32xi1>, vector<8x32xf32>
    %c96_272 = arith.constant 96 : index
    %c0_273 = arith.constant 0 : index
    %455 = vector.load %arg12[%c96_272, %c0_273] : memref<128x32xf32, #tpu.memory_space<vmem>>, vector<8x32xf32>
    tpu.vector_store %arg12[%c96_272, %c0_273], %454 {strides = array<i32>} : memref<128x32xf32, #tpu.memory_space<vmem>>, vector<8x32xf32>,
    %c104_274 = arith.constant 104 : index
    %c0_275 = arith.constant 0 : index
    %456 = vector.load %arg13[%c104_274, %c0_275] : memref<128x32xf32, #tpu.memory_space<vmem>>, vector<8x32xf32>
    %c16_276 = arith.constant 16 : index
    %c0_277 = arith.constant 0 : index
    %457 = vector.load %arg13[%c16_276, %c0_277] : memref<128x32xf32, #tpu.memory_space<vmem>>, vector<8x32xf32>
    %458 = arith.select %21, %456, %457 : vector<8x32xi1>, vector<8x32xf32>
    %c104_278 = arith.constant 104 : index
    %c0_279 = arith.constant 0 : index
    %459 = vector.load %arg12[%c104_278, %c0_279] : memref<128x32xf32, #tpu.memory_space<vmem>>, vector<8x32xf32>
    tpu.vector_store %arg12[%c104_278, %c0_279], %458 {strides = array<i32>} : memref<128x32xf32, #tpu.memory_space<vmem>>, vector<8x32xf32>,
    %c112_280 = arith.constant 112 : index
    %c0_281 = arith.constant 0 : index
    %460 = vector.load %arg13[%c112_280, %c0_281] : memref<128x32xf32, #tpu.memory_space<vmem>>, vector<8x32xf32>
    %c8_282 = arith.constant 8 : index
    %c0_283 = arith.constant 0 : index
    %461 = vector.load %arg13[%c8_282, %c0_283] : memref<128x32xf32, #tpu.memory_space<vmem>>, vector<8x32xf32>
    %462 = arith.select %21, %460, %461 : vector<8x32xi1>, vector<8x32xf32>
    %c112_284 = arith.constant 112 : index
    %c0_285 = arith.constant 0 : index
    %463 = vector.load %arg12[%c112_284, %c0_285] : memref<128x32xf32, #tpu.memory_space<vmem>>, vector<8x32xf32>
    tpu.vector_store %arg12[%c112_284, %c0_285], %462 {strides = array<i32>} : memref<128x32xf32, #tpu.memory_space<vmem>>, vector<8x32xf32>,
    %c120_286 = arith.constant 120 : index
    %c0_287 = arith.constant 0 : index
    %464 = vector.load %arg13[%c120_286, %c0_287] : memref<128x32xf32, #tpu.memory_space<vmem>>, vector<8x32xf32>
    %c0_288 = arith.constant 0 : index
    %c0_289 = arith.constant 0 : index
    %465 = vector.load %arg13[%c0_288, %c0_289] : memref<128x32xf32, #tpu.memory_space<vmem>>, vector<8x32xf32>
    %466 = arith.select %21, %464, %465 : vector<8x32xi1>, vector<8x32xf32>
    %c120_290 = arith.constant 120 : index
    %c0_291 = arith.constant 0 : index
    %467 = vector.load %arg12[%c120_290, %c0_291] : memref<128x32xf32, #tpu.memory_space<vmem>>, vector<8x32xf32>
    tpu.vector_store %arg12[%c120_290, %c0_291], %466 {strides = array<i32>} : memref<128x32xf32, #tpu.memory_space<vmem>>, vector<8x32xf32>,
    %c0_292 = arith.constant 0 : index
    %c0_293 = arith.constant 0 : index
    %468 = vector.load %arg12[%c0_292, %c0_293] : memref<128x32xf32, #tpu.memory_space<vmem>>, vector<128x32xf32>
    %c1 = arith.constant 1 : index
    %c0_294 = arith.constant 0 : index
    %c0_295 = arith.constant 0 : index
    %469 = vector.load %arg2[%c1, %c0_294, %c0_295] : memref<4x32x128xf32, #tpu.memory_space<vmem>>, vector<1x32x128xf32>
    %470 = vector.shape_cast %469 : vector<1x32x128xf32> to vector<32x128xf32>
    %cst_296 = arith.constant dense<0.000000e+00> : vector<128x128xf32>
    %471 = tpu.matmul %468, %470, %cst_296 {dimension_numbers = #tpu.dot_dimension_numbers<[1], [0], [0], [1], [0, 0, 1, 1], [], []>} : vector<128x32xf32>, vector<32x128xf32>, vector<128x128xf32> -> vector<128x128xf32>
    %c1_297 = arith.constant 1 : index
    %c0_298 = arith.constant 0 : index
    %c0_299 = arith.constant 0 : index
    %472 = vector.load %arg4[%c1_297, %c0_298, %c0_299] : memref<4x1x128xf32, #tpu.memory_space<vmem>>, vector<1x1x128xf32>
    %473 = vector.shape_cast %472 : vector<1x1x128xf32> to vector<1x128xf32>
    %474 = vector.broadcast %473 : vector<1x128xf32> to vector<128x128xf32>
    %475 = arith.addf %471, %474 : vector<128x128xf32>
    %c0_300 = arith.constant 0 : index
    %c0_301 = arith.constant 0 : index
    %476 = vector.load %arg10[%c0_300, %c0_301] : memref<128x128xf32, #tpu.memory_space<vmem>>, vector<128x128xf32>
    tpu.vector_store %arg10[%c0_300, %c0_301], %475 {strides = array<i32>} : memref<128x128xf32, #tpu.memory_space<vmem>>, vector<128x128xf32>,
    %c0_302 = arith.constant 0 : index
    %c0_303 = arith.constant 0 : index
    %477 = vector.load %arg10[%c0_302, %c0_303] : memref<128x128xf32, #tpu.memory_space<vmem>>, vector<8x128xf32>
    %c120_304 = arith.constant 120 : index
    %c0_305 = arith.constant 0 : index
    %478 = vector.load %arg10[%c120_304, %c0_305] : memref<128x128xf32, #tpu.memory_space<vmem>>, vector<8x128xf32>
    %479 = arith.select %18, %477, %478 : vector<8x128xi1>, vector<8x128xf32>
    %c0_306 = arith.constant 0 : index
    %c0_307 = arith.constant 0 : index
    %480 = vector.load %arg11[%c0_306, %c0_307] : memref<128x128xf32, #tpu.memory_space<vmem>>, vector<8x128xf32>
    tpu.vector_store %arg11[%c0_306, %c0_307], %479 {strides = array<i32>} : memref<128x128xf32, #tpu.memory_space<vmem>>, vector<8x128xf32>,
    %c8_308 = arith.constant 8 : index
    %c0_309 = arith.constant 0 : index
    %481 = vector.load %arg10[%c8_308, %c0_309] : memref<128x128xf32, #tpu.memory_space<vmem>>, vector<8x128xf32>
    %c112_310 = arith.constant 112 : index
    %c0_311 = arith.constant 0 : index
    %482 = vector.load %arg10[%c112_310, %c0_311] : memref<128x128xf32, #tpu.memory_space<vmem>>, vector<8x128xf32>
    %483 = arith.select %18, %481, %482 : vector<8x128xi1>, vector<8x128xf32>
    %c8_312 = arith.constant 8 : index
    %c0_313 = arith.constant 0 : index
    %484 = vector.load %arg11[%c8_312, %c0_313] : memref<128x128xf32, #tpu.memory_space<vmem>>, vector<8x128xf32>
    tpu.vector_store %arg11[%c8_312, %c0_313], %483 {strides = array<i32>} : memref<128x128xf32, #tpu.memory_space<vmem>>, vector<8x128xf32>,
    %c16_314 = arith.constant 16 : index
    %c0_315 = arith.constant 0 : index
    %485 = vector.load %arg10[%c16_314, %c0_315] : memref<128x128xf32, #tpu.memory_space<vmem>>, vector<8x128xf32>
    %c104_316 = arith.constant 104 : index
    %c0_317 = arith.constant 0 : index
    %486 = vector.load %arg10[%c104_316, %c0_317] : memref<128x128xf32, #tpu.memory_space<vmem>>, vector<8x128xf32>
    %487 = arith.select %18, %485, %486 : vector<8x128xi1>, vector<8x128xf32>
    %c16_318 = arith.constant 16 : index
    %c0_319 = arith.constant 0 : index
    %488 = vector.load %arg11[%c16_318, %c0_319] : memref<128x128xf32, #tpu.memory_space<vmem>>, vector<8x128xf32>
    tpu.vector_store %arg11[%c16_318, %c0_319], %487 {strides = array<i32>} : memref<128x128xf32, #tpu.memory_space<vmem>>, vector<8x128xf32>,
    %c24_320 = arith.constant 24 : index
    %c0_321 = arith.constant 0 : index
    %489 = vector.load %arg10[%c24_320, %c0_321] : memref<128x128xf32, #tpu.memory_space<vmem>>, vector<8x128xf32>
    %c96_322 = arith.constant 96 : index
    %c0_323 = arith.constant 0 : index
    %490 = vector.load %arg10[%c96_322, %c0_323] : memref<128x128xf32, #tpu.memory_space<vmem>>, vector<8x128xf32>
    %491 = arith.select %18, %489, %490 : vector<8x128xi1>, vector<8x128xf32>
    %c24_324 = arith.constant 24 : index
    %c0_325 = arith.constant 0 : index
    %492 = vector.load %arg11[%c24_324, %c0_325] : memref<128x128xf32, #tpu.memory_space<vmem>>, vector<8x128xf32>
    tpu.vector_store %arg11[%c24_324, %c0_325], %491 {strides = array<i32>} : memref<128x128xf32, #tpu.memory_space<vmem>>, vector<8x128xf32>,
    %c32_326 = arith.constant 32 : index
    %c0_327 = arith.constant 0 : index
    %493 = vector.load %arg10[%c32_326, %c0_327] : memref<128x128xf32, #tpu.memory_space<vmem>>, vector<8x128xf32>
    %c88_328 = arith.constant 88 : index
    %c0_329 = arith.constant 0 : index
    %494 = vector.load %arg10[%c88_328, %c0_329] : memref<128x128xf32, #tpu.memory_space<vmem>>, vector<8x128xf32>
    %495 = arith.select %18, %493, %494 : vector<8x128xi1>, vector<8x128xf32>
    %c32_330 = arith.constant 32 : index
    %c0_331 = arith.constant 0 : index
    %496 = vector.load %arg11[%c32_330, %c0_331] : memref<128x128xf32, #tpu.memory_space<vmem>>, vector<8x128xf32>
    tpu.vector_store %arg11[%c32_330, %c0_331], %495 {strides = array<i32>} : memref<128x128xf32, #tpu.memory_space<vmem>>, vector<8x128xf32>,
    %c40_332 = arith.constant 40 : index
    %c0_333 = arith.constant 0 : index
    %497 = vector.load %arg10[%c40_332, %c0_333] : memref<128x128xf32, #tpu.memory_space<vmem>>, vector<8x128xf32>
    %c80_334 = arith.constant 80 : index
    %c0_335 = arith.constant 0 : index
    %498 = vector.load %arg10[%c80_334, %c0_335] : memref<128x128xf32, #tpu.memory_space<vmem>>, vector<8x128xf32>
    %499 = arith.select %18, %497, %498 : vector<8x128xi1>, vector<8x128xf32>
    %c40_336 = arith.constant 40 : index
    %c0_337 = arith.constant 0 : index
    %500 = vector.load %arg11[%c40_336, %c0_337] : memref<128x128xf32, #tpu.memory_space<vmem>>, vector<8x128xf32>
    tpu.vector_store %arg11[%c40_336, %c0_337], %499 {strides = array<i32>} : memref<128x128xf32, #tpu.memory_space<vmem>>, vector<8x128xf32>,
    %c48_338 = arith.constant 48 : index
    %c0_339 = arith.constant 0 : index
    %501 = vector.load %arg10[%c48_338, %c0_339] : memref<128x128xf32, #tpu.memory_space<vmem>>, vector<8x128xf32>
    %c72_340 = arith.constant 72 : index
    %c0_341 = arith.constant 0 : index
    %502 = vector.load %arg10[%c72_340, %c0_341] : memref<128x128xf32, #tpu.memory_space<vmem>>, vector<8x128xf32>
    %503 = arith.select %18, %501, %502 : vector<8x128xi1>, vector<8x128xf32>
    %c48_342 = arith.constant 48 : index
    %c0_343 = arith.constant 0 : index
    %504 = vector.load %arg11[%c48_342, %c0_343] : memref<128x128xf32, #tpu.memory_space<vmem>>, vector<8x128xf32>
    tpu.vector_store %arg11[%c48_342, %c0_343], %503 {strides = array<i32>} : memref<128x128xf32, #tpu.memory_space<vmem>>, vector<8x128xf32>,
    %c56_344 = arith.constant 56 : index
    %c0_345 = arith.constant 0 : index
    %505 = vector.load %arg10[%c56_344, %c0_345] : memref<128x128xf32, #tpu.memory_space<vmem>>, vector<8x128xf32>
    %c64_346 = arith.constant 64 : index
    %c0_347 = arith.constant 0 : index
    %506 = vector.load %arg10[%c64_346, %c0_347] : memref<128x128xf32, #tpu.memory_space<vmem>>, vector<8x128xf32>
    %507 = arith.select %18, %505, %506 : vector<8x128xi1>, vector<8x128xf32>
    %c56_348 = arith.constant 56 : index
    %c0_349 = arith.constant 0 : index
    %508 = vector.load %arg11[%c56_348, %c0_349] : memref<128x128xf32, #tpu.memory_space<vmem>>, vector<8x128xf32>
    tpu.vector_store %arg11[%c56_348, %c0_349], %507 {strides = array<i32>} : memref<128x128xf32, #tpu.memory_space<vmem>>, vector<8x128xf32>,
    %c64_350 = arith.constant 64 : index
    %c0_351 = arith.constant 0 : index
    %509 = vector.load %arg10[%c64_350, %c0_351] : memref<128x128xf32, #tpu.memory_space<vmem>>, vector<8x128xf32>
    %c56_352 = arith.constant 56 : index
    %c0_353 = arith.constant 0 : index
    %510 = vector.load %arg10[%c56_352, %c0_353] : memref<128x128xf32, #tpu.memory_space<vmem>>, vector<8x128xf32>
    %511 = arith.select %18, %509, %510 : vector<8x128xi1>, vector<8x128xf32>
    %c64_354 = arith.constant 64 : index
    %c0_355 = arith.constant 0 : index
    %512 = vector.load %arg11[%c64_354, %c0_355] : memref<128x128xf32, #tpu.memory_space<vmem>>, vector<8x128xf32>
    tpu.vector_store %arg11[%c64_354, %c0_355], %511 {strides = array<i32>} : memref<128x128xf32, #tpu.memory_space<vmem>>, vector<8x128xf32>,
    %c72_356 = arith.constant 72 : index
    %c0_357 = arith.constant 0 : index
    %513 = vector.load %arg10[%c72_356, %c0_357] : memref<128x128xf32, #tpu.memory_space<vmem>>, vector<8x128xf32>
    %c48_358 = arith.constant 48 : index
    %c0_359 = arith.constant 0 : index
    %514 = vector.load %arg10[%c48_358, %c0_359] : memref<128x128xf32, #tpu.memory_space<vmem>>, vector<8x128xf32>
    %515 = arith.select %18, %513, %514 : vector<8x128xi1>, vector<8x128xf32>
    %c72_360 = arith.constant 72 : index
    %c0_361 = arith.constant 0 : index
    %516 = vector.load %arg11[%c72_360, %c0_361] : memref<128x128xf32, #tpu.memory_space<vmem>>, vector<8x128xf32>
    tpu.vector_store %arg11[%c72_360, %c0_361], %515 {strides = array<i32>} : memref<128x128xf32, #tpu.memory_space<vmem>>, vector<8x128xf32>,
    %c80_362 = arith.constant 80 : index
    %c0_363 = arith.constant 0 : index
    %517 = vector.load %arg10[%c80_362, %c0_363] : memref<128x128xf32, #tpu.memory_space<vmem>>, vector<8x128xf32>
    %c40_364 = arith.constant 40 : index
    %c0_365 = arith.constant 0 : index
    %518 = vector.load %arg10[%c40_364, %c0_365] : memref<128x128xf32, #tpu.memory_space<vmem>>, vector<8x128xf32>
    %519 = arith.select %18, %517, %518 : vector<8x128xi1>, vector<8x128xf32>
    %c80_366 = arith.constant 80 : index
    %c0_367 = arith.constant 0 : index
    %520 = vector.load %arg11[%c80_366, %c0_367] : memref<128x128xf32, #tpu.memory_space<vmem>>, vector<8x128xf32>
    tpu.vector_store %arg11[%c80_366, %c0_367], %519 {strides = array<i32>} : memref<128x128xf32, #tpu.memory_space<vmem>>, vector<8x128xf32>,
    %c88_368 = arith.constant 88 : index
    %c0_369 = arith.constant 0 : index
    %521 = vector.load %arg10[%c88_368, %c0_369] : memref<128x128xf32, #tpu.memory_space<vmem>>, vector<8x128xf32>
    %c32_370 = arith.constant 32 : index
    %c0_371 = arith.constant 0 : index
    %522 = vector.load %arg10[%c32_370, %c0_371] : memref<128x128xf32, #tpu.memory_space<vmem>>, vector<8x128xf32>
    %523 = arith.select %18, %521, %522 : vector<8x128xi1>, vector<8x128xf32>
    %c88_372 = arith.constant 88 : index
    %c0_373 = arith.constant 0 : index
    %524 = vector.load %arg11[%c88_372, %c0_373] : memref<128x128xf32, #tpu.memory_space<vmem>>, vector<8x128xf32>
    tpu.vector_store %arg11[%c88_372, %c0_373], %523 {strides = array<i32>} : memref<128x128xf32, #tpu.memory_space<vmem>>, vector<8x128xf32>,
    %c96_374 = arith.constant 96 : index
    %c0_375 = arith.constant 0 : index
    %525 = vector.load %arg10[%c96_374, %c0_375] : memref<128x128xf32, #tpu.memory_space<vmem>>, vector<8x128xf32>
    %c24_376 = arith.constant 24 : index
    %c0_377 = arith.constant 0 : index
    %526 = vector.load %arg10[%c24_376, %c0_377] : memref<128x128xf32, #tpu.memory_space<vmem>>, vector<8x128xf32>
    %527 = arith.select %18, %525, %526 : vector<8x128xi1>, vector<8x128xf32>
    %c96_378 = arith.constant 96 : index
    %c0_379 = arith.constant 0 : index
    %528 = vector.load %arg11[%c96_378, %c0_379] : memref<128x128xf32, #tpu.memory_space<vmem>>, vector<8x128xf32>
    tpu.vector_store %arg11[%c96_378, %c0_379], %527 {strides = array<i32>} : memref<128x128xf32, #tpu.memory_space<vmem>>, vector<8x128xf32>,
    %c104_380 = arith.constant 104 : index
    %c0_381 = arith.constant 0 : index
    %529 = vector.load %arg10[%c104_380, %c0_381] : memref<128x128xf32, #tpu.memory_space<vmem>>, vector<8x128xf32>
    %c16_382 = arith.constant 16 : index
    %c0_383 = arith.constant 0 : index
    %530 = vector.load %arg10[%c16_382, %c0_383] : memref<128x128xf32, #tpu.memory_space<vmem>>, vector<8x128xf32>
    %531 = arith.select %18, %529, %530 : vector<8x128xi1>, vector<8x128xf32>
    %c104_384 = arith.constant 104 : index
    %c0_385 = arith.constant 0 : index
    %532 = vector.load %arg11[%c104_384, %c0_385] : memref<128x128xf32, #tpu.memory_space<vmem>>, vector<8x128xf32>
    tpu.vector_store %arg11[%c104_384, %c0_385], %531 {strides = array<i32>} : memref<128x128xf32, #tpu.memory_space<vmem>>, vector<8x128xf32>,
    %c112_386 = arith.constant 112 : index
    %c0_387 = arith.constant 0 : index
    %533 = vector.load %arg10[%c112_386, %c0_387] : memref<128x128xf32, #tpu.memory_space<vmem>>, vector<8x128xf32>
    %c8_388 = arith.constant 8 : index
    %c0_389 = arith.constant 0 : index
    %534 = vector.load %arg10[%c8_388, %c0_389] : memref<128x128xf32, #tpu.memory_space<vmem>>, vector<8x128xf32>
    %535 = arith.select %18, %533, %534 : vector<8x128xi1>, vector<8x128xf32>
    %c112_390 = arith.constant 112 : index
    %c0_391 = arith.constant 0 : index
    %536 = vector.load %arg11[%c112_390, %c0_391] : memref<128x128xf32, #tpu.memory_space<vmem>>, vector<8x128xf32>
    tpu.vector_store %arg11[%c112_390, %c0_391], %535 {strides = array<i32>} : memref<128x128xf32, #tpu.memory_space<vmem>>, vector<8x128xf32>,
    %c120_392 = arith.constant 120 : index
    %c0_393 = arith.constant 0 : index
    %537 = vector.load %arg10[%c120_392, %c0_393] : memref<128x128xf32, #tpu.memory_space<vmem>>, vector<8x128xf32>
    %c0_394 = arith.constant 0 : index
    %c0_395 = arith.constant 0 : index
    %538 = vector.load %arg10[%c0_394, %c0_395] : memref<128x128xf32, #tpu.memory_space<vmem>>, vector<8x128xf32>
    %539 = arith.select %18, %537, %538 : vector<8x128xi1>, vector<8x128xf32>
    %c120_396 = arith.constant 120 : index
    %c0_397 = arith.constant 0 : index
    %540 = vector.load %arg11[%c120_396, %c0_397] : memref<128x128xf32, #tpu.memory_space<vmem>>, vector<8x128xf32>
    tpu.vector_store %arg11[%c120_396, %c0_397], %539 {strides = array<i32>} : memref<128x128xf32, #tpu.memory_space<vmem>>, vector<8x128xf32>,
    %c1_398 = arith.constant 1 : index
    %c0_399 = arith.constant 0 : index
    %c0_400 = arith.constant 0 : index
    %541 = vector.load %arg3[%c1_398, %c0_399, %c0_400] : memref<4x32x128xf32, #tpu.memory_space<vmem>>, vector<1x32x128xf32>
    %542 = vector.shape_cast %541 : vector<1x32x128xf32> to vector<32x128xf32>
    %cst_401 = arith.constant 0.000000e+00 : f32
    %543 = vector.broadcast %cst_401 : f32 to vector<8x32xf32>
    %cst_402 = arith.constant 0.000000e+00 : f32
    %544 = vector.broadcast %cst_402 : f32 to vector<8x32xf32>
    %c0_403 = arith.constant 0 : index
    %c0_404 = arith.constant 0 : index
    %545 = vector.load %arg11[%c0_403, %c0_404] : memref<128x128xf32, #tpu.memory_space<vmem>>, vector<8x128xf32>
    %cst_405 = arith.constant dense<0.000000e+00> : vector<8x128xf32>
    %546 = tpu.matmul %543, %542, %cst_405 {dimension_numbers = #tpu.dot_dimension_numbers<[1], [0], [0], [1], [0, 0, 1, 1], [], []>} : vector<8x32xf32>, vector<32x128xf32>, vector<8x128xf32> -> vector<8x128xf32>
    %547 = arith.addf %545, %546 : vector<8x128xf32>
    %548 = arith.negf %547 : vector<8x128xf32>
    %549 = math.exp %548 : vector<8x128xf32>
    %cst_406 = arith.constant 1.000000e+00 : f32
    %550 = vector.broadcast %cst_406 : f32 to vector<8x128xf32>
    %551 = arith.addf %550, %549 : vector<8x128xf32>
    %552 = arith.divf %550, %551 : vector<8x128xf32>
    %553 = math.tanh %547 : vector<8x128xf32>
    %554 = vector.extract_strided_slice %552 {offsets = [0, 32], sizes = [8, 32], strides = [1, 1]} : vector<8x128xf32> to vector<8x32xf32>
    %555 = arith.mulf %554, %544 : vector<8x32xf32>
    %556 = vector.extract_strided_slice %552 {offsets = [0, 0], sizes = [8, 32], strides = [1, 1]} : vector<8x128xf32> to vector<8x32xf32>
    %557 = vector.extract_strided_slice %553 {offsets = [0, 64], sizes = [8, 32], strides = [1, 1]} : vector<8x128xf32> to vector<8x32xf32>
    %558 = arith.mulf %556, %557 : vector<8x32xf32>
    %559 = arith.addf %555, %558 : vector<8x32xf32>
    %560 = vector.extract_strided_slice %552 {offsets = [0, 96], sizes = [8, 32], strides = [1, 1]} : vector<8x128xf32> to vector<8x32xf32>
    %561 = math.tanh %559 : vector<8x32xf32>
    %562 = arith.mulf %560, %561 : vector<8x32xf32>
    %c0_407 = arith.constant 0 : index
    %c0_408 = arith.constant 0 : index
    %563 = vector.load %arg13[%c0_407, %c0_408] : memref<128x32xf32, #tpu.memory_space<vmem>>, vector<8x32xf32>
    tpu.vector_store %arg13[%c0_407, %c0_408], %562 {strides = array<i32>} : memref<128x32xf32, #tpu.memory_space<vmem>>, vector<8x32xf32>,
    %c8_409 = arith.constant 8 : index
    %c0_410 = arith.constant 0 : index
    %564 = vector.load %arg11[%c8_409, %c0_410] : memref<128x128xf32, #tpu.memory_space<vmem>>, vector<8x128xf32>
    %cst_411 = arith.constant dense<0.000000e+00> : vector<8x128xf32>
    %565 = tpu.matmul %562, %542, %cst_411 {dimension_numbers = #tpu.dot_dimension_numbers<[1], [0], [0], [1], [0, 0, 1, 1], [], []>} : vector<8x32xf32>, vector<32x128xf32>, vector<8x128xf32> -> vector<8x128xf32>
    %566 = arith.addf %564, %565 : vector<8x128xf32>
    %567 = arith.negf %566 : vector<8x128xf32>
    %568 = math.exp %567 : vector<8x128xf32>
    %cst_412 = arith.constant 1.000000e+00 : f32
    %569 = vector.broadcast %cst_412 : f32 to vector<8x128xf32>
    %570 = arith.addf %569, %568 : vector<8x128xf32>
    %571 = arith.divf %569, %570 : vector<8x128xf32>
    %572 = math.tanh %566 : vector<8x128xf32>
    %573 = vector.extract_strided_slice %571 {offsets = [0, 32], sizes = [8, 32], strides = [1, 1]} : vector<8x128xf32> to vector<8x32xf32>
    %574 = arith.mulf %573, %559 : vector<8x32xf32>
    %575 = vector.extract_strided_slice %571 {offsets = [0, 0], sizes = [8, 32], strides = [1, 1]} : vector<8x128xf32> to vector<8x32xf32>
    %576 = vector.extract_strided_slice %572 {offsets = [0, 64], sizes = [8, 32], strides = [1, 1]} : vector<8x128xf32> to vector<8x32xf32>
    %577 = arith.mulf %575, %576 : vector<8x32xf32>
    %578 = arith.addf %574, %577 : vector<8x32xf32>
    %579 = vector.extract_strided_slice %571 {offsets = [0, 96], sizes = [8, 32], strides = [1, 1]} : vector<8x128xf32> to vector<8x32xf32>
    %580 = math.tanh %578 : vector<8x32xf32>
    %581 = arith.mulf %579, %580 : vector<8x32xf32>
    %c8_413 = arith.constant 8 : index
    %c0_414 = arith.constant 0 : index
    %582 = vector.load %arg13[%c8_413, %c0_414] : memref<128x32xf32, #tpu.memory_space<vmem>>, vector<8x32xf32>
    tpu.vector_store %arg13[%c8_413, %c0_414], %581 {strides = array<i32>} : memref<128x32xf32, #tpu.memory_space<vmem>>, vector<8x32xf32>,
    %c16_415 = arith.constant 16 : index
    %c0_416 = arith.constant 0 : index
    %583 = vector.load %arg11[%c16_415, %c0_416] : memref<128x128xf32, #tpu.memory_space<vmem>>, vector<8x128xf32>
    %cst_417 = arith.constant dense<0.000000e+00> : vector<8x128xf32>
    %584 = tpu.matmul %581, %542, %cst_417 {dimension_numbers = #tpu.dot_dimension_numbers<[1], [0], [0], [1], [0, 0, 1, 1], [], []>} : vector<8x32xf32>, vector<32x128xf32>, vector<8x128xf32> -> vector<8x128xf32>
    %585 = arith.addf %583, %584 : vector<8x128xf32>
    %586 = arith.negf %585 : vector<8x128xf32>
    %587 = math.exp %586 : vector<8x128xf32>
    %cst_418 = arith.constant 1.000000e+00 : f32
    %588 = vector.broadcast %cst_418 : f32 to vector<8x128xf32>
    %589 = arith.addf %588, %587 : vector<8x128xf32>
    %590 = arith.divf %588, %589 : vector<8x128xf32>
    %591 = math.tanh %585 : vector<8x128xf32>
    %592 = vector.extract_strided_slice %590 {offsets = [0, 32], sizes = [8, 32], strides = [1, 1]} : vector<8x128xf32> to vector<8x32xf32>
    %593 = arith.mulf %592, %578 : vector<8x32xf32>
    %594 = vector.extract_strided_slice %590 {offsets = [0, 0], sizes = [8, 32], strides = [1, 1]} : vector<8x128xf32> to vector<8x32xf32>
    %595 = vector.extract_strided_slice %591 {offsets = [0, 64], sizes = [8, 32], strides = [1, 1]} : vector<8x128xf32> to vector<8x32xf32>
    %596 = arith.mulf %594, %595 : vector<8x32xf32>
    %597 = arith.addf %593, %596 : vector<8x32xf32>
    %598 = vector.extract_strided_slice %590 {offsets = [0, 96], sizes = [8, 32], strides = [1, 1]} : vector<8x128xf32> to vector<8x32xf32>
    %599 = math.tanh %597 : vector<8x32xf32>
    %600 = arith.mulf %598, %599 : vector<8x32xf32>
    %c16_419 = arith.constant 16 : index
    %c0_420 = arith.constant 0 : index
    %601 = vector.load %arg13[%c16_419, %c0_420] : memref<128x32xf32, #tpu.memory_space<vmem>>, vector<8x32xf32>
    tpu.vector_store %arg13[%c16_419, %c0_420], %600 {strides = array<i32>} : memref<128x32xf32, #tpu.memory_space<vmem>>, vector<8x32xf32>,
    %c24_421 = arith.constant 24 : index
    %c0_422 = arith.constant 0 : index
    %602 = vector.load %arg11[%c24_421, %c0_422] : memref<128x128xf32, #tpu.memory_space<vmem>>, vector<8x128xf32>
    %cst_423 = arith.constant dense<0.000000e+00> : vector<8x128xf32>
    %603 = tpu.matmul %600, %542, %cst_423 {dimension_numbers = #tpu.dot_dimension_numbers<[1], [0], [0], [1], [0, 0, 1, 1], [], []>} : vector<8x32xf32>, vector<32x128xf32>, vector<8x128xf32> -> vector<8x128xf32>
    %604 = arith.addf %602, %603 : vector<8x128xf32>
    %605 = arith.negf %604 : vector<8x128xf32>
    %606 = math.exp %605 : vector<8x128xf32>
    %cst_424 = arith.constant 1.000000e+00 : f32
    %607 = vector.broadcast %cst_424 : f32 to vector<8x128xf32>
    %608 = arith.addf %607, %606 : vector<8x128xf32>
    %609 = arith.divf %607, %608 : vector<8x128xf32>
    %610 = math.tanh %604 : vector<8x128xf32>
    %611 = vector.extract_strided_slice %609 {offsets = [0, 32], sizes = [8, 32], strides = [1, 1]} : vector<8x128xf32> to vector<8x32xf32>
    %612 = arith.mulf %611, %597 : vector<8x32xf32>
    %613 = vector.extract_strided_slice %609 {offsets = [0, 0], sizes = [8, 32], strides = [1, 1]} : vector<8x128xf32> to vector<8x32xf32>
    %614 = vector.extract_strided_slice %610 {offsets = [0, 64], sizes = [8, 32], strides = [1, 1]} : vector<8x128xf32> to vector<8x32xf32>
    %615 = arith.mulf %613, %614 : vector<8x32xf32>
    %616 = arith.addf %612, %615 : vector<8x32xf32>
    %617 = vector.extract_strided_slice %609 {offsets = [0, 96], sizes = [8, 32], strides = [1, 1]} : vector<8x128xf32> to vector<8x32xf32>
    %618 = math.tanh %616 : vector<8x32xf32>
    %619 = arith.mulf %617, %618 : vector<8x32xf32>
    %c24_425 = arith.constant 24 : index
    %c0_426 = arith.constant 0 : index
    %620 = vector.load %arg13[%c24_425, %c0_426] : memref<128x32xf32, #tpu.memory_space<vmem>>, vector<8x32xf32>
    tpu.vector_store %arg13[%c24_425, %c0_426], %619 {strides = array<i32>} : memref<128x32xf32, #tpu.memory_space<vmem>>, vector<8x32xf32>,
    %c32_427 = arith.constant 32 : index
    %c0_428 = arith.constant 0 : index
    %621 = vector.load %arg11[%c32_427, %c0_428] : memref<128x128xf32, #tpu.memory_space<vmem>>, vector<8x128xf32>
    %cst_429 = arith.constant dense<0.000000e+00> : vector<8x128xf32>
    %622 = tpu.matmul %619, %542, %cst_429 {dimension_numbers = #tpu.dot_dimension_numbers<[1], [0], [0], [1], [0, 0, 1, 1], [], []>} : vector<8x32xf32>, vector<32x128xf32>, vector<8x128xf32> -> vector<8x128xf32>
    %623 = arith.addf %621, %622 : vector<8x128xf32>
    %624 = arith.negf %623 : vector<8x128xf32>
    %625 = math.exp %624 : vector<8x128xf32>
    %cst_430 = arith.constant 1.000000e+00 : f32
    %626 = vector.broadcast %cst_430 : f32 to vector<8x128xf32>
    %627 = arith.addf %626, %625 : vector<8x128xf32>
    %628 = arith.divf %626, %627 : vector<8x128xf32>
    %629 = math.tanh %623 : vector<8x128xf32>
    %630 = vector.extract_strided_slice %628 {offsets = [0, 32], sizes = [8, 32], strides = [1, 1]} : vector<8x128xf32> to vector<8x32xf32>
    %631 = arith.mulf %630, %616 : vector<8x32xf32>
    %632 = vector.extract_strided_slice %628 {offsets = [0, 0], sizes = [8, 32], strides = [1, 1]} : vector<8x128xf32> to vector<8x32xf32>
    %633 = vector.extract_strided_slice %629 {offsets = [0, 64], sizes = [8, 32], strides = [1, 1]} : vector<8x128xf32> to vector<8x32xf32>
    %634 = arith.mulf %632, %633 : vector<8x32xf32>
    %635 = arith.addf %631, %634 : vector<8x32xf32>
    %636 = vector.extract_strided_slice %628 {offsets = [0, 96], sizes = [8, 32], strides = [1, 1]} : vector<8x128xf32> to vector<8x32xf32>
    %637 = math.tanh %635 : vector<8x32xf32>
    %638 = arith.mulf %636, %637 : vector<8x32xf32>
    %c32_431 = arith.constant 32 : index
    %c0_432 = arith.constant 0 : index
    %639 = vector.load %arg13[%c32_431, %c0_432] : memref<128x32xf32, #tpu.memory_space<vmem>>, vector<8x32xf32>
    tpu.vector_store %arg13[%c32_431, %c0_432], %638 {strides = array<i32>} : memref<128x32xf32, #tpu.memory_space<vmem>>, vector<8x32xf32>,
    %c40_433 = arith.constant 40 : index
    %c0_434 = arith.constant 0 : index
    %640 = vector.load %arg11[%c40_433, %c0_434] : memref<128x128xf32, #tpu.memory_space<vmem>>, vector<8x128xf32>
    %cst_435 = arith.constant dense<0.000000e+00> : vector<8x128xf32>
    %641 = tpu.matmul %638, %542, %cst_435 {dimension_numbers = #tpu.dot_dimension_numbers<[1], [0], [0], [1], [0, 0, 1, 1], [], []>} : vector<8x32xf32>, vector<32x128xf32>, vector<8x128xf32> -> vector<8x128xf32>
    %642 = arith.addf %640, %641 : vector<8x128xf32>
    %643 = arith.negf %642 : vector<8x128xf32>
    %644 = math.exp %643 : vector<8x128xf32>
    %cst_436 = arith.constant 1.000000e+00 : f32
    %645 = vector.broadcast %cst_436 : f32 to vector<8x128xf32>
    %646 = arith.addf %645, %644 : vector<8x128xf32>
    %647 = arith.divf %645, %646 : vector<8x128xf32>
    %648 = math.tanh %642 : vector<8x128xf32>
    %649 = vector.extract_strided_slice %647 {offsets = [0, 32], sizes = [8, 32], strides = [1, 1]} : vector<8x128xf32> to vector<8x32xf32>
    %650 = arith.mulf %649, %635 : vector<8x32xf32>
    %651 = vector.extract_strided_slice %647 {offsets = [0, 0], sizes = [8, 32], strides = [1, 1]} : vector<8x128xf32> to vector<8x32xf32>
    %652 = vector.extract_strided_slice %648 {offsets = [0, 64], sizes = [8, 32], strides = [1, 1]} : vector<8x128xf32> to vector<8x32xf32>
    %653 = arith.mulf %651, %652 : vector<8x32xf32>
    %654 = arith.addf %650, %653 : vector<8x32xf32>
    %655 = vector.extract_strided_slice %647 {offsets = [0, 96], sizes = [8, 32], strides = [1, 1]} : vector<8x128xf32> to vector<8x32xf32>
    %656 = math.tanh %654 : vector<8x32xf32>
    %657 = arith.mulf %655, %656 : vector<8x32xf32>
    %c40_437 = arith.constant 40 : index
    %c0_438 = arith.constant 0 : index
    %658 = vector.load %arg13[%c40_437, %c0_438] : memref<128x32xf32, #tpu.memory_space<vmem>>, vector<8x32xf32>
    tpu.vector_store %arg13[%c40_437, %c0_438], %657 {strides = array<i32>} : memref<128x32xf32, #tpu.memory_space<vmem>>, vector<8x32xf32>,
    %c48_439 = arith.constant 48 : index
    %c0_440 = arith.constant 0 : index
    %659 = vector.load %arg11[%c48_439, %c0_440] : memref<128x128xf32, #tpu.memory_space<vmem>>, vector<8x128xf32>
    %cst_441 = arith.constant dense<0.000000e+00> : vector<8x128xf32>
    %660 = tpu.matmul %657, %542, %cst_441 {dimension_numbers = #tpu.dot_dimension_numbers<[1], [0], [0], [1], [0, 0, 1, 1], [], []>} : vector<8x32xf32>, vector<32x128xf32>, vector<8x128xf32> -> vector<8x128xf32>
    %661 = arith.addf %659, %660 : vector<8x128xf32>
    %662 = arith.negf %661 : vector<8x128xf32>
    %663 = math.exp %662 : vector<8x128xf32>
    %cst_442 = arith.constant 1.000000e+00 : f32
    %664 = vector.broadcast %cst_442 : f32 to vector<8x128xf32>
    %665 = arith.addf %664, %663 : vector<8x128xf32>
    %666 = arith.divf %664, %665 : vector<8x128xf32>
    %667 = math.tanh %661 : vector<8x128xf32>
    %668 = vector.extract_strided_slice %666 {offsets = [0, 32], sizes = [8, 32], strides = [1, 1]} : vector<8x128xf32> to vector<8x32xf32>
    %669 = arith.mulf %668, %654 : vector<8x32xf32>
    %670 = vector.extract_strided_slice %666 {offsets = [0, 0], sizes = [8, 32], strides = [1, 1]} : vector<8x128xf32> to vector<8x32xf32>
    %671 = vector.extract_strided_slice %667 {offsets = [0, 64], sizes = [8, 32], strides = [1, 1]} : vector<8x128xf32> to vector<8x32xf32>
    %672 = arith.mulf %670, %671 : vector<8x32xf32>
    %673 = arith.addf %669, %672 : vector<8x32xf32>
    %674 = vector.extract_strided_slice %666 {offsets = [0, 96], sizes = [8, 32], strides = [1, 1]} : vector<8x128xf32> to vector<8x32xf32>
    %675 = math.tanh %673 : vector<8x32xf32>
    %676 = arith.mulf %674, %675 : vector<8x32xf32>
    %c48_443 = arith.constant 48 : index
    %c0_444 = arith.constant 0 : index
    %677 = vector.load %arg13[%c48_443, %c0_444] : memref<128x32xf32, #tpu.memory_space<vmem>>, vector<8x32xf32>
    tpu.vector_store %arg13[%c48_443, %c0_444], %676 {strides = array<i32>} : memref<128x32xf32, #tpu.memory_space<vmem>>, vector<8x32xf32>,
    %c56_445 = arith.constant 56 : index
    %c0_446 = arith.constant 0 : index
    %678 = vector.load %arg11[%c56_445, %c0_446] : memref<128x128xf32, #tpu.memory_space<vmem>>, vector<8x128xf32>
    %cst_447 = arith.constant dense<0.000000e+00> : vector<8x128xf32>
    %679 = tpu.matmul %676, %542, %cst_447 {dimension_numbers = #tpu.dot_dimension_numbers<[1], [0], [0], [1], [0, 0, 1, 1], [], []>} : vector<8x32xf32>, vector<32x128xf32>, vector<8x128xf32> -> vector<8x128xf32>
    %680 = arith.addf %678, %679 : vector<8x128xf32>
    %681 = arith.negf %680 : vector<8x128xf32>
    %682 = math.exp %681 : vector<8x128xf32>
    %cst_448 = arith.constant 1.000000e+00 : f32
    %683 = vector.broadcast %cst_448 : f32 to vector<8x128xf32>
    %684 = arith.addf %683, %682 : vector<8x128xf32>
    %685 = arith.divf %683, %684 : vector<8x128xf32>
    %686 = math.tanh %680 : vector<8x128xf32>
    %687 = vector.extract_strided_slice %685 {offsets = [0, 32], sizes = [8, 32], strides = [1, 1]} : vector<8x128xf32> to vector<8x32xf32>
    %688 = arith.mulf %687, %673 : vector<8x32xf32>
    %689 = vector.extract_strided_slice %685 {offsets = [0, 0], sizes = [8, 32], strides = [1, 1]} : vector<8x128xf32> to vector<8x32xf32>
    %690 = vector.extract_strided_slice %686 {offsets = [0, 64], sizes = [8, 32], strides = [1, 1]} : vector<8x128xf32> to vector<8x32xf32>
    %691 = arith.mulf %689, %690 : vector<8x32xf32>
    %692 = arith.addf %688, %691 : vector<8x32xf32>
    %693 = vector.extract_strided_slice %685 {offsets = [0, 96], sizes = [8, 32], strides = [1, 1]} : vector<8x128xf32> to vector<8x32xf32>
    %694 = math.tanh %692 : vector<8x32xf32>
    %695 = arith.mulf %693, %694 : vector<8x32xf32>
    %c56_449 = arith.constant 56 : index
    %c0_450 = arith.constant 0 : index
    %696 = vector.load %arg13[%c56_449, %c0_450] : memref<128x32xf32, #tpu.memory_space<vmem>>, vector<8x32xf32>
    tpu.vector_store %arg13[%c56_449, %c0_450], %695 {strides = array<i32>} : memref<128x32xf32, #tpu.memory_space<vmem>>, vector<8x32xf32>,
    %c64_451 = arith.constant 64 : index
    %c0_452 = arith.constant 0 : index
    %697 = vector.load %arg11[%c64_451, %c0_452] : memref<128x128xf32, #tpu.memory_space<vmem>>, vector<8x128xf32>
    %cst_453 = arith.constant dense<0.000000e+00> : vector<8x128xf32>
    %698 = tpu.matmul %695, %542, %cst_453 {dimension_numbers = #tpu.dot_dimension_numbers<[1], [0], [0], [1], [0, 0, 1, 1], [], []>} : vector<8x32xf32>, vector<32x128xf32>, vector<8x128xf32> -> vector<8x128xf32>
    %699 = arith.addf %697, %698 : vector<8x128xf32>
    %700 = arith.negf %699 : vector<8x128xf32>
    %701 = math.exp %700 : vector<8x128xf32>
    %cst_454 = arith.constant 1.000000e+00 : f32
    %702 = vector.broadcast %cst_454 : f32 to vector<8x128xf32>
    %703 = arith.addf %702, %701 : vector<8x128xf32>
    %704 = arith.divf %702, %703 : vector<8x128xf32>
    %705 = math.tanh %699 : vector<8x128xf32>
    %706 = vector.extract_strided_slice %704 {offsets = [0, 32], sizes = [8, 32], strides = [1, 1]} : vector<8x128xf32> to vector<8x32xf32>
    %707 = arith.mulf %706, %692 : vector<8x32xf32>
    %708 = vector.extract_strided_slice %704 {offsets = [0, 0], sizes = [8, 32], strides = [1, 1]} : vector<8x128xf32> to vector<8x32xf32>
    %709 = vector.extract_strided_slice %705 {offsets = [0, 64], sizes = [8, 32], strides = [1, 1]} : vector<8x128xf32> to vector<8x32xf32>
    %710 = arith.mulf %708, %709 : vector<8x32xf32>
    %711 = arith.addf %707, %710 : vector<8x32xf32>
    %712 = vector.extract_strided_slice %704 {offsets = [0, 96], sizes = [8, 32], strides = [1, 1]} : vector<8x128xf32> to vector<8x32xf32>
    %713 = math.tanh %711 : vector<8x32xf32>
    %714 = arith.mulf %712, %713 : vector<8x32xf32>
    %c64_455 = arith.constant 64 : index
    %c0_456 = arith.constant 0 : index
    %715 = vector.load %arg13[%c64_455, %c0_456] : memref<128x32xf32, #tpu.memory_space<vmem>>, vector<8x32xf32>
    tpu.vector_store %arg13[%c64_455, %c0_456], %714 {strides = array<i32>} : memref<128x32xf32, #tpu.memory_space<vmem>>, vector<8x32xf32>,
    %c72_457 = arith.constant 72 : index
    %c0_458 = arith.constant 0 : index
    %716 = vector.load %arg11[%c72_457, %c0_458] : memref<128x128xf32, #tpu.memory_space<vmem>>, vector<8x128xf32>
    %cst_459 = arith.constant dense<0.000000e+00> : vector<8x128xf32>
    %717 = tpu.matmul %714, %542, %cst_459 {dimension_numbers = #tpu.dot_dimension_numbers<[1], [0], [0], [1], [0, 0, 1, 1], [], []>} : vector<8x32xf32>, vector<32x128xf32>, vector<8x128xf32> -> vector<8x128xf32>
    %718 = arith.addf %716, %717 : vector<8x128xf32>
    %719 = arith.negf %718 : vector<8x128xf32>
    %720 = math.exp %719 : vector<8x128xf32>
    %cst_460 = arith.constant 1.000000e+00 : f32
    %721 = vector.broadcast %cst_460 : f32 to vector<8x128xf32>
    %722 = arith.addf %721, %720 : vector<8x128xf32>
    %723 = arith.divf %721, %722 : vector<8x128xf32>
    %724 = math.tanh %718 : vector<8x128xf32>
    %725 = vector.extract_strided_slice %723 {offsets = [0, 32], sizes = [8, 32], strides = [1, 1]} : vector<8x128xf32> to vector<8x32xf32>
    %726 = arith.mulf %725, %711 : vector<8x32xf32>
    %727 = vector.extract_strided_slice %723 {offsets = [0, 0], sizes = [8, 32], strides = [1, 1]} : vector<8x128xf32> to vector<8x32xf32>
    %728 = vector.extract_strided_slice %724 {offsets = [0, 64], sizes = [8, 32], strides = [1, 1]} : vector<8x128xf32> to vector<8x32xf32>
    %729 = arith.mulf %727, %728 : vector<8x32xf32>
    %730 = arith.addf %726, %729 : vector<8x32xf32>
    %731 = vector.extract_strided_slice %723 {offsets = [0, 96], sizes = [8, 32], strides = [1, 1]} : vector<8x128xf32> to vector<8x32xf32>
    %732 = math.tanh %730 : vector<8x32xf32>
    %733 = arith.mulf %731, %732 : vector<8x32xf32>
    %c72_461 = arith.constant 72 : index
    %c0_462 = arith.constant 0 : index
    %734 = vector.load %arg13[%c72_461, %c0_462] : memref<128x32xf32, #tpu.memory_space<vmem>>, vector<8x32xf32>
    tpu.vector_store %arg13[%c72_461, %c0_462], %733 {strides = array<i32>} : memref<128x32xf32, #tpu.memory_space<vmem>>, vector<8x32xf32>,
    %c80_463 = arith.constant 80 : index
    %c0_464 = arith.constant 0 : index
    %735 = vector.load %arg11[%c80_463, %c0_464] : memref<128x128xf32, #tpu.memory_space<vmem>>, vector<8x128xf32>
    %cst_465 = arith.constant dense<0.000000e+00> : vector<8x128xf32>
    %736 = tpu.matmul %733, %542, %cst_465 {dimension_numbers = #tpu.dot_dimension_numbers<[1], [0], [0], [1], [0, 0, 1, 1], [], []>} : vector<8x32xf32>, vector<32x128xf32>, vector<8x128xf32> -> vector<8x128xf32>
    %737 = arith.addf %735, %736 : vector<8x128xf32>
    %738 = arith.negf %737 : vector<8x128xf32>
    %739 = math.exp %738 : vector<8x128xf32>
    %cst_466 = arith.constant 1.000000e+00 : f32
    %740 = vector.broadcast %cst_466 : f32 to vector<8x128xf32>
    %741 = arith.addf %740, %739 : vector<8x128xf32>
    %742 = arith.divf %740, %741 : vector<8x128xf32>
    %743 = math.tanh %737 : vector<8x128xf32>
    %744 = vector.extract_strided_slice %742 {offsets = [0, 32], sizes = [8, 32], strides = [1, 1]} : vector<8x128xf32> to vector<8x32xf32>
    %745 = arith.mulf %744, %730 : vector<8x32xf32>
    %746 = vector.extract_strided_slice %742 {offsets = [0, 0], sizes = [8, 32], strides = [1, 1]} : vector<8x128xf32> to vector<8x32xf32>
    %747 = vector.extract_strided_slice %743 {offsets = [0, 64], sizes = [8, 32], strides = [1, 1]} : vector<8x128xf32> to vector<8x32xf32>
    %748 = arith.mulf %746, %747 : vector<8x32xf32>
    %749 = arith.addf %745, %748 : vector<8x32xf32>
    %750 = vector.extract_strided_slice %742 {offsets = [0, 96], sizes = [8, 32], strides = [1, 1]} : vector<8x128xf32> to vector<8x32xf32>
    %751 = math.tanh %749 : vector<8x32xf32>
    %752 = arith.mulf %750, %751 : vector<8x32xf32>
    %c80_467 = arith.constant 80 : index
    %c0_468 = arith.constant 0 : index
    %753 = vector.load %arg13[%c80_467, %c0_468] : memref<128x32xf32, #tpu.memory_space<vmem>>, vector<8x32xf32>
    tpu.vector_store %arg13[%c80_467, %c0_468], %752 {strides = array<i32>} : memref<128x32xf32, #tpu.memory_space<vmem>>, vector<8x32xf32>,
    %c88_469 = arith.constant 88 : index
    %c0_470 = arith.constant 0 : index
    %754 = vector.load %arg11[%c88_469, %c0_470] : memref<128x128xf32, #tpu.memory_space<vmem>>, vector<8x128xf32>
    %cst_471 = arith.constant dense<0.000000e+00> : vector<8x128xf32>
    %755 = tpu.matmul %752, %542, %cst_471 {dimension_numbers = #tpu.dot_dimension_numbers<[1], [0], [0], [1], [0, 0, 1, 1], [], []>} : vector<8x32xf32>, vector<32x128xf32>, vector<8x128xf32> -> vector<8x128xf32>
    %756 = arith.addf %754, %755 : vector<8x128xf32>
    %757 = arith.negf %756 : vector<8x128xf32>
    %758 = math.exp %757 : vector<8x128xf32>
    %cst_472 = arith.constant 1.000000e+00 : f32
    %759 = vector.broadcast %cst_472 : f32 to vector<8x128xf32>
    %760 = arith.addf %759, %758 : vector<8x128xf32>
    %761 = arith.divf %759, %760 : vector<8x128xf32>
    %762 = math.tanh %756 : vector<8x128xf32>
    %763 = vector.extract_strided_slice %761 {offsets = [0, 32], sizes = [8, 32], strides = [1, 1]} : vector<8x128xf32> to vector<8x32xf32>
    %764 = arith.mulf %763, %749 : vector<8x32xf32>
    %765 = vector.extract_strided_slice %761 {offsets = [0, 0], sizes = [8, 32], strides = [1, 1]} : vector<8x128xf32> to vector<8x32xf32>
    %766 = vector.extract_strided_slice %762 {offsets = [0, 64], sizes = [8, 32], strides = [1, 1]} : vector<8x128xf32> to vector<8x32xf32>
    %767 = arith.mulf %765, %766 : vector<8x32xf32>
    %768 = arith.addf %764, %767 : vector<8x32xf32>
    %769 = vector.extract_strided_slice %761 {offsets = [0, 96], sizes = [8, 32], strides = [1, 1]} : vector<8x128xf32> to vector<8x32xf32>
    %770 = math.tanh %768 : vector<8x32xf32>
    %771 = arith.mulf %769, %770 : vector<8x32xf32>
    %c88_473 = arith.constant 88 : index
    %c0_474 = arith.constant 0 : index
    %772 = vector.load %arg13[%c88_473, %c0_474] : memref<128x32xf32, #tpu.memory_space<vmem>>, vector<8x32xf32>
    tpu.vector_store %arg13[%c88_473, %c0_474], %771 {strides = array<i32>} : memref<128x32xf32, #tpu.memory_space<vmem>>, vector<8x32xf32>,
    %c96_475 = arith.constant 96 : index
    %c0_476 = arith.constant 0 : index
    %773 = vector.load %arg11[%c96_475, %c0_476] : memref<128x128xf32, #tpu.memory_space<vmem>>, vector<8x128xf32>
    %cst_477 = arith.constant dense<0.000000e+00> : vector<8x128xf32>
    %774 = tpu.matmul %771, %542, %cst_477 {dimension_numbers = #tpu.dot_dimension_numbers<[1], [0], [0], [1], [0, 0, 1, 1], [], []>} : vector<8x32xf32>, vector<32x128xf32>, vector<8x128xf32> -> vector<8x128xf32>
    %775 = arith.addf %773, %774 : vector<8x128xf32>
    %776 = arith.negf %775 : vector<8x128xf32>
    %777 = math.exp %776 : vector<8x128xf32>
    %cst_478 = arith.constant 1.000000e+00 : f32
    %778 = vector.broadcast %cst_478 : f32 to vector<8x128xf32>
    %779 = arith.addf %778, %777 : vector<8x128xf32>
    %780 = arith.divf %778, %779 : vector<8x128xf32>
    %781 = math.tanh %775 : vector<8x128xf32>
    %782 = vector.extract_strided_slice %780 {offsets = [0, 32], sizes = [8, 32], strides = [1, 1]} : vector<8x128xf32> to vector<8x32xf32>
    %783 = arith.mulf %782, %768 : vector<8x32xf32>
    %784 = vector.extract_strided_slice %780 {offsets = [0, 0], sizes = [8, 32], strides = [1, 1]} : vector<8x128xf32> to vector<8x32xf32>
    %785 = vector.extract_strided_slice %781 {offsets = [0, 64], sizes = [8, 32], strides = [1, 1]} : vector<8x128xf32> to vector<8x32xf32>
    %786 = arith.mulf %784, %785 : vector<8x32xf32>
    %787 = arith.addf %783, %786 : vector<8x32xf32>
    %788 = vector.extract_strided_slice %780 {offsets = [0, 96], sizes = [8, 32], strides = [1, 1]} : vector<8x128xf32> to vector<8x32xf32>
    %789 = math.tanh %787 : vector<8x32xf32>
    %790 = arith.mulf %788, %789 : vector<8x32xf32>
    %c96_479 = arith.constant 96 : index
    %c0_480 = arith.constant 0 : index
    %791 = vector.load %arg13[%c96_479, %c0_480] : memref<128x32xf32, #tpu.memory_space<vmem>>, vector<8x32xf32>
    tpu.vector_store %arg13[%c96_479, %c0_480], %790 {strides = array<i32>} : memref<128x32xf32, #tpu.memory_space<vmem>>, vector<8x32xf32>,
    %c104_481 = arith.constant 104 : index
    %c0_482 = arith.constant 0 : index
    %792 = vector.load %arg11[%c104_481, %c0_482] : memref<128x128xf32, #tpu.memory_space<vmem>>, vector<8x128xf32>
    %cst_483 = arith.constant dense<0.000000e+00> : vector<8x128xf32>
    %793 = tpu.matmul %790, %542, %cst_483 {dimension_numbers = #tpu.dot_dimension_numbers<[1], [0], [0], [1], [0, 0, 1, 1], [], []>} : vector<8x32xf32>, vector<32x128xf32>, vector<8x128xf32> -> vector<8x128xf32>
    %794 = arith.addf %792, %793 : vector<8x128xf32>
    %795 = arith.negf %794 : vector<8x128xf32>
    %796 = math.exp %795 : vector<8x128xf32>
    %cst_484 = arith.constant 1.000000e+00 : f32
    %797 = vector.broadcast %cst_484 : f32 to vector<8x128xf32>
    %798 = arith.addf %797, %796 : vector<8x128xf32>
    %799 = arith.divf %797, %798 : vector<8x128xf32>
    %800 = math.tanh %794 : vector<8x128xf32>
    %801 = vector.extract_strided_slice %799 {offsets = [0, 32], sizes = [8, 32], strides = [1, 1]} : vector<8x128xf32> to vector<8x32xf32>
    %802 = arith.mulf %801, %787 : vector<8x32xf32>
    %803 = vector.extract_strided_slice %799 {offsets = [0, 0], sizes = [8, 32], strides = [1, 1]} : vector<8x128xf32> to vector<8x32xf32>
    %804 = vector.extract_strided_slice %800 {offsets = [0, 64], sizes = [8, 32], strides = [1, 1]} : vector<8x128xf32> to vector<8x32xf32>
    %805 = arith.mulf %803, %804 : vector<8x32xf32>
    %806 = arith.addf %802, %805 : vector<8x32xf32>
    %807 = vector.extract_strided_slice %799 {offsets = [0, 96], sizes = [8, 32], strides = [1, 1]} : vector<8x128xf32> to vector<8x32xf32>
    %808 = math.tanh %806 : vector<8x32xf32>
    %809 = arith.mulf %807, %808 : vector<8x32xf32>
    %c104_485 = arith.constant 104 : index
    %c0_486 = arith.constant 0 : index
    %810 = vector.load %arg13[%c104_485, %c0_486] : memref<128x32xf32, #tpu.memory_space<vmem>>, vector<8x32xf32>
    tpu.vector_store %arg13[%c104_485, %c0_486], %809 {strides = array<i32>} : memref<128x32xf32, #tpu.memory_space<vmem>>, vector<8x32xf32>,
    %c112_487 = arith.constant 112 : index
    %c0_488 = arith.constant 0 : index
    %811 = vector.load %arg11[%c112_487, %c0_488] : memref<128x128xf32, #tpu.memory_space<vmem>>, vector<8x128xf32>
    %cst_489 = arith.constant dense<0.000000e+00> : vector<8x128xf32>
    %812 = tpu.matmul %809, %542, %cst_489 {dimension_numbers = #tpu.dot_dimension_numbers<[1], [0], [0], [1], [0, 0, 1, 1], [], []>} : vector<8x32xf32>, vector<32x128xf32>, vector<8x128xf32> -> vector<8x128xf32>
    %813 = arith.addf %811, %812 : vector<8x128xf32>
    %814 = arith.negf %813 : vector<8x128xf32>
    %815 = math.exp %814 : vector<8x128xf32>
    %cst_490 = arith.constant 1.000000e+00 : f32
    %816 = vector.broadcast %cst_490 : f32 to vector<8x128xf32>
    %817 = arith.addf %816, %815 : vector<8x128xf32>
    %818 = arith.divf %816, %817 : vector<8x128xf32>
    %819 = math.tanh %813 : vector<8x128xf32>
    %820 = vector.extract_strided_slice %818 {offsets = [0, 32], sizes = [8, 32], strides = [1, 1]} : vector<8x128xf32> to vector<8x32xf32>
    %821 = arith.mulf %820, %806 : vector<8x32xf32>
    %822 = vector.extract_strided_slice %818 {offsets = [0, 0], sizes = [8, 32], strides = [1, 1]} : vector<8x128xf32> to vector<8x32xf32>
    %823 = vector.extract_strided_slice %819 {offsets = [0, 64], sizes = [8, 32], strides = [1, 1]} : vector<8x128xf32> to vector<8x32xf32>
    %824 = arith.mulf %822, %823 : vector<8x32xf32>
    %825 = arith.addf %821, %824 : vector<8x32xf32>
    %826 = vector.extract_strided_slice %818 {offsets = [0, 96], sizes = [8, 32], strides = [1, 1]} : vector<8x128xf32> to vector<8x32xf32>
    %827 = math.tanh %825 : vector<8x32xf32>
    %828 = arith.mulf %826, %827 : vector<8x32xf32>
    %c112_491 = arith.constant 112 : index
    %c0_492 = arith.constant 0 : index
    %829 = vector.load %arg13[%c112_491, %c0_492] : memref<128x32xf32, #tpu.memory_space<vmem>>, vector<8x32xf32>
    tpu.vector_store %arg13[%c112_491, %c0_492], %828 {strides = array<i32>} : memref<128x32xf32, #tpu.memory_space<vmem>>, vector<8x32xf32>,
    %c120_493 = arith.constant 120 : index
    %c0_494 = arith.constant 0 : index
    %830 = vector.load %arg11[%c120_493, %c0_494] : memref<128x128xf32, #tpu.memory_space<vmem>>, vector<8x128xf32>
    %cst_495 = arith.constant dense<0.000000e+00> : vector<8x128xf32>
    %831 = tpu.matmul %828, %542, %cst_495 {dimension_numbers = #tpu.dot_dimension_numbers<[1], [0], [0], [1], [0, 0, 1, 1], [], []>} : vector<8x32xf32>, vector<32x128xf32>, vector<8x128xf32> -> vector<8x128xf32>
    %832 = arith.addf %830, %831 : vector<8x128xf32>
    %833 = arith.negf %832 : vector<8x128xf32>
    %834 = math.exp %833 : vector<8x128xf32>
    %cst_496 = arith.constant 1.000000e+00 : f32
    %835 = vector.broadcast %cst_496 : f32 to vector<8x128xf32>
    %836 = arith.addf %835, %834 : vector<8x128xf32>
    %837 = arith.divf %835, %836 : vector<8x128xf32>
    %838 = math.tanh %832 : vector<8x128xf32>
    %839 = vector.extract_strided_slice %837 {offsets = [0, 32], sizes = [8, 32], strides = [1, 1]} : vector<8x128xf32> to vector<8x32xf32>
    %840 = arith.mulf %839, %825 : vector<8x32xf32>
    %841 = vector.extract_strided_slice %837 {offsets = [0, 0], sizes = [8, 32], strides = [1, 1]} : vector<8x128xf32> to vector<8x32xf32>
    %842 = vector.extract_strided_slice %838 {offsets = [0, 64], sizes = [8, 32], strides = [1, 1]} : vector<8x128xf32> to vector<8x32xf32>
    %843 = arith.mulf %841, %842 : vector<8x32xf32>
    %844 = arith.addf %840, %843 : vector<8x32xf32>
    %845 = vector.extract_strided_slice %837 {offsets = [0, 96], sizes = [8, 32], strides = [1, 1]} : vector<8x128xf32> to vector<8x32xf32>
    %846 = math.tanh %844 : vector<8x32xf32>
    %847 = arith.mulf %845, %846 : vector<8x32xf32>
    %c120_497 = arith.constant 120 : index
    %c0_498 = arith.constant 0 : index
    %848 = vector.load %arg13[%c120_497, %c0_498] : memref<128x32xf32, #tpu.memory_space<vmem>>, vector<8x32xf32>
    tpu.vector_store %arg13[%c120_497, %c0_498], %847 {strides = array<i32>} : memref<128x32xf32, #tpu.memory_space<vmem>>, vector<8x32xf32>,
    %c0_499 = arith.constant 0 : index
    %c0_500 = arith.constant 0 : index
    %849 = vector.load %arg13[%c0_499, %c0_500] : memref<128x32xf32, #tpu.memory_space<vmem>>, vector<8x32xf32>
    %c120_501 = arith.constant 120 : index
    %c0_502 = arith.constant 0 : index
    %850 = vector.load %arg13[%c120_501, %c0_502] : memref<128x32xf32, #tpu.memory_space<vmem>>, vector<8x32xf32>
    %851 = arith.select %21, %849, %850 : vector<8x32xi1>, vector<8x32xf32>
    %c0_503 = arith.constant 0 : index
    %c0_504 = arith.constant 0 : index
    %852 = vector.load %arg12[%c0_503, %c0_504] : memref<128x32xf32, #tpu.memory_space<vmem>>, vector<8x32xf32>
    tpu.vector_store %arg12[%c0_503, %c0_504], %851 {strides = array<i32>} : memref<128x32xf32, #tpu.memory_space<vmem>>, vector<8x32xf32>,
    %c8_505 = arith.constant 8 : index
    %c0_506 = arith.constant 0 : index
    %853 = vector.load %arg13[%c8_505, %c0_506] : memref<128x32xf32, #tpu.memory_space<vmem>>, vector<8x32xf32>
    %c112_507 = arith.constant 112 : index
    %c0_508 = arith.constant 0 : index
    %854 = vector.load %arg13[%c112_507, %c0_508] : memref<128x32xf32, #tpu.memory_space<vmem>>, vector<8x32xf32>
    %855 = arith.select %21, %853, %854 : vector<8x32xi1>, vector<8x32xf32>
    %c8_509 = arith.constant 8 : index
    %c0_510 = arith.constant 0 : index
    %856 = vector.load %arg12[%c8_509, %c0_510] : memref<128x32xf32, #tpu.memory_space<vmem>>, vector<8x32xf32>
    tpu.vector_store %arg12[%c8_509, %c0_510], %855 {strides = array<i32>} : memref<128x32xf32, #tpu.memory_space<vmem>>, vector<8x32xf32>,
    %c16_511 = arith.constant 16 : index
    %c0_512 = arith.constant 0 : index
    %857 = vector.load %arg13[%c16_511, %c0_512] : memref<128x32xf32, #tpu.memory_space<vmem>>, vector<8x32xf32>
    %c104_513 = arith.constant 104 : index
    %c0_514 = arith.constant 0 : index
    %858 = vector.load %arg13[%c104_513, %c0_514] : memref<128x32xf32, #tpu.memory_space<vmem>>, vector<8x32xf32>
    %859 = arith.select %21, %857, %858 : vector<8x32xi1>, vector<8x32xf32>
    %c16_515 = arith.constant 16 : index
    %c0_516 = arith.constant 0 : index
    %860 = vector.load %arg12[%c16_515, %c0_516] : memref<128x32xf32, #tpu.memory_space<vmem>>, vector<8x32xf32>
    tpu.vector_store %arg12[%c16_515, %c0_516], %859 {strides = array<i32>} : memref<128x32xf32, #tpu.memory_space<vmem>>, vector<8x32xf32>,
    %c24_517 = arith.constant 24 : index
    %c0_518 = arith.constant 0 : index
    %861 = vector.load %arg13[%c24_517, %c0_518] : memref<128x32xf32, #tpu.memory_space<vmem>>, vector<8x32xf32>
    %c96_519 = arith.constant 96 : index
    %c0_520 = arith.constant 0 : index
    %862 = vector.load %arg13[%c96_519, %c0_520] : memref<128x32xf32, #tpu.memory_space<vmem>>, vector<8x32xf32>
    %863 = arith.select %21, %861, %862 : vector<8x32xi1>, vector<8x32xf32>
    %c24_521 = arith.constant 24 : index
    %c0_522 = arith.constant 0 : index
    %864 = vector.load %arg12[%c24_521, %c0_522] : memref<128x32xf32, #tpu.memory_space<vmem>>, vector<8x32xf32>
    tpu.vector_store %arg12[%c24_521, %c0_522], %863 {strides = array<i32>} : memref<128x32xf32, #tpu.memory_space<vmem>>, vector<8x32xf32>,
    %c32_523 = arith.constant 32 : index
    %c0_524 = arith.constant 0 : index
    %865 = vector.load %arg13[%c32_523, %c0_524] : memref<128x32xf32, #tpu.memory_space<vmem>>, vector<8x32xf32>
    %c88_525 = arith.constant 88 : index
    %c0_526 = arith.constant 0 : index
    %866 = vector.load %arg13[%c88_525, %c0_526] : memref<128x32xf32, #tpu.memory_space<vmem>>, vector<8x32xf32>
    %867 = arith.select %21, %865, %866 : vector<8x32xi1>, vector<8x32xf32>
    %c32_527 = arith.constant 32 : index
    %c0_528 = arith.constant 0 : index
    %868 = vector.load %arg12[%c32_527, %c0_528] : memref<128x32xf32, #tpu.memory_space<vmem>>, vector<8x32xf32>
    tpu.vector_store %arg12[%c32_527, %c0_528], %867 {strides = array<i32>} : memref<128x32xf32, #tpu.memory_space<vmem>>, vector<8x32xf32>,
    %c40_529 = arith.constant 40 : index
    %c0_530 = arith.constant 0 : index
    %869 = vector.load %arg13[%c40_529, %c0_530] : memref<128x32xf32, #tpu.memory_space<vmem>>, vector<8x32xf32>
    %c80_531 = arith.constant 80 : index
    %c0_532 = arith.constant 0 : index
    %870 = vector.load %arg13[%c80_531, %c0_532] : memref<128x32xf32, #tpu.memory_space<vmem>>, vector<8x32xf32>
    %871 = arith.select %21, %869, %870 : vector<8x32xi1>, vector<8x32xf32>
    %c40_533 = arith.constant 40 : index
    %c0_534 = arith.constant 0 : index
    %872 = vector.load %arg12[%c40_533, %c0_534] : memref<128x32xf32, #tpu.memory_space<vmem>>, vector<8x32xf32>
    tpu.vector_store %arg12[%c40_533, %c0_534], %871 {strides = array<i32>} : memref<128x32xf32, #tpu.memory_space<vmem>>, vector<8x32xf32>,
    %c48_535 = arith.constant 48 : index
    %c0_536 = arith.constant 0 : index
    %873 = vector.load %arg13[%c48_535, %c0_536] : memref<128x32xf32, #tpu.memory_space<vmem>>, vector<8x32xf32>
    %c72_537 = arith.constant 72 : index
    %c0_538 = arith.constant 0 : index
    %874 = vector.load %arg13[%c72_537, %c0_538] : memref<128x32xf32, #tpu.memory_space<vmem>>, vector<8x32xf32>
    %875 = arith.select %21, %873, %874 : vector<8x32xi1>, vector<8x32xf32>
    %c48_539 = arith.constant 48 : index
    %c0_540 = arith.constant 0 : index
    %876 = vector.load %arg12[%c48_539, %c0_540] : memref<128x32xf32, #tpu.memory_space<vmem>>, vector<8x32xf32>
    tpu.vector_store %arg12[%c48_539, %c0_540], %875 {strides = array<i32>} : memref<128x32xf32, #tpu.memory_space<vmem>>, vector<8x32xf32>,
    %c56_541 = arith.constant 56 : index
    %c0_542 = arith.constant 0 : index
    %877 = vector.load %arg13[%c56_541, %c0_542] : memref<128x32xf32, #tpu.memory_space<vmem>>, vector<8x32xf32>
    %c64_543 = arith.constant 64 : index
    %c0_544 = arith.constant 0 : index
    %878 = vector.load %arg13[%c64_543, %c0_544] : memref<128x32xf32, #tpu.memory_space<vmem>>, vector<8x32xf32>
    %879 = arith.select %21, %877, %878 : vector<8x32xi1>, vector<8x32xf32>
    %c56_545 = arith.constant 56 : index
    %c0_546 = arith.constant 0 : index
    %880 = vector.load %arg12[%c56_545, %c0_546] : memref<128x32xf32, #tpu.memory_space<vmem>>, vector<8x32xf32>
    tpu.vector_store %arg12[%c56_545, %c0_546], %879 {strides = array<i32>} : memref<128x32xf32, #tpu.memory_space<vmem>>, vector<8x32xf32>,
    %c64_547 = arith.constant 64 : index
    %c0_548 = arith.constant 0 : index
    %881 = vector.load %arg13[%c64_547, %c0_548] : memref<128x32xf32, #tpu.memory_space<vmem>>, vector<8x32xf32>
    %c56_549 = arith.constant 56 : index
    %c0_550 = arith.constant 0 : index
    %882 = vector.load %arg13[%c56_549, %c0_550] : memref<128x32xf32, #tpu.memory_space<vmem>>, vector<8x32xf32>
    %883 = arith.select %21, %881, %882 : vector<8x32xi1>, vector<8x32xf32>
    %c64_551 = arith.constant 64 : index
    %c0_552 = arith.constant 0 : index
    %884 = vector.load %arg12[%c64_551, %c0_552] : memref<128x32xf32, #tpu.memory_space<vmem>>, vector<8x32xf32>
    tpu.vector_store %arg12[%c64_551, %c0_552], %883 {strides = array<i32>} : memref<128x32xf32, #tpu.memory_space<vmem>>, vector<8x32xf32>,
    %c72_553 = arith.constant 72 : index
    %c0_554 = arith.constant 0 : index
    %885 = vector.load %arg13[%c72_553, %c0_554] : memref<128x32xf32, #tpu.memory_space<vmem>>, vector<8x32xf32>
    %c48_555 = arith.constant 48 : index
    %c0_556 = arith.constant 0 : index
    %886 = vector.load %arg13[%c48_555, %c0_556] : memref<128x32xf32, #tpu.memory_space<vmem>>, vector<8x32xf32>
    %887 = arith.select %21, %885, %886 : vector<8x32xi1>, vector<8x32xf32>
    %c72_557 = arith.constant 72 : index
    %c0_558 = arith.constant 0 : index
    %888 = vector.load %arg12[%c72_557, %c0_558] : memref<128x32xf32, #tpu.memory_space<vmem>>, vector<8x32xf32>
    tpu.vector_store %arg12[%c72_557, %c0_558], %887 {strides = array<i32>} : memref<128x32xf32, #tpu.memory_space<vmem>>, vector<8x32xf32>,
    %c80_559 = arith.constant 80 : index
    %c0_560 = arith.constant 0 : index
    %889 = vector.load %arg13[%c80_559, %c0_560] : memref<128x32xf32, #tpu.memory_space<vmem>>, vector<8x32xf32>
    %c40_561 = arith.constant 40 : index
    %c0_562 = arith.constant 0 : index
    %890 = vector.load %arg13[%c40_561, %c0_562] : memref<128x32xf32, #tpu.memory_space<vmem>>, vector<8x32xf32>
    %891 = arith.select %21, %889, %890 : vector<8x32xi1>, vector<8x32xf32>
    %c80_563 = arith.constant 80 : index
    %c0_564 = arith.constant 0 : index
    %892 = vector.load %arg12[%c80_563, %c0_564] : memref<128x32xf32, #tpu.memory_space<vmem>>, vector<8x32xf32>
    tpu.vector_store %arg12[%c80_563, %c0_564], %891 {strides = array<i32>} : memref<128x32xf32, #tpu.memory_space<vmem>>, vector<8x32xf32>,
    %c88_565 = arith.constant 88 : index
    %c0_566 = arith.constant 0 : index
    %893 = vector.load %arg13[%c88_565, %c0_566] : memref<128x32xf32, #tpu.memory_space<vmem>>, vector<8x32xf32>
    %c32_567 = arith.constant 32 : index
    %c0_568 = arith.constant 0 : index
    %894 = vector.load %arg13[%c32_567, %c0_568] : memref<128x32xf32, #tpu.memory_space<vmem>>, vector<8x32xf32>
    %895 = arith.select %21, %893, %894 : vector<8x32xi1>, vector<8x32xf32>
    %c88_569 = arith.constant 88 : index
    %c0_570 = arith.constant 0 : index
    %896 = vector.load %arg12[%c88_569, %c0_570] : memref<128x32xf32, #tpu.memory_space<vmem>>, vector<8x32xf32>
    tpu.vector_store %arg12[%c88_569, %c0_570], %895 {strides = array<i32>} : memref<128x32xf32, #tpu.memory_space<vmem>>, vector<8x32xf32>,
    %c96_571 = arith.constant 96 : index
    %c0_572 = arith.constant 0 : index
    %897 = vector.load %arg13[%c96_571, %c0_572] : memref<128x32xf32, #tpu.memory_space<vmem>>, vector<8x32xf32>
    %c24_573 = arith.constant 24 : index
    %c0_574 = arith.constant 0 : index
    %898 = vector.load %arg13[%c24_573, %c0_574] : memref<128x32xf32, #tpu.memory_space<vmem>>, vector<8x32xf32>
    %899 = arith.select %21, %897, %898 : vector<8x32xi1>, vector<8x32xf32>
    %c96_575 = arith.constant 96 : index
    %c0_576 = arith.constant 0 : index
    %900 = vector.load %arg12[%c96_575, %c0_576] : memref<128x32xf32, #tpu.memory_space<vmem>>, vector<8x32xf32>
    tpu.vector_store %arg12[%c96_575, %c0_576], %899 {strides = array<i32>} : memref<128x32xf32, #tpu.memory_space<vmem>>, vector<8x32xf32>,
    %c104_577 = arith.constant 104 : index
    %c0_578 = arith.constant 0 : index
    %901 = vector.load %arg13[%c104_577, %c0_578] : memref<128x32xf32, #tpu.memory_space<vmem>>, vector<8x32xf32>
    %c16_579 = arith.constant 16 : index
    %c0_580 = arith.constant 0 : index
    %902 = vector.load %arg13[%c16_579, %c0_580] : memref<128x32xf32, #tpu.memory_space<vmem>>, vector<8x32xf32>
    %903 = arith.select %21, %901, %902 : vector<8x32xi1>, vector<8x32xf32>
    %c104_581 = arith.constant 104 : index
    %c0_582 = arith.constant 0 : index
    %904 = vector.load %arg12[%c104_581, %c0_582] : memref<128x32xf32, #tpu.memory_space<vmem>>, vector<8x32xf32>
    tpu.vector_store %arg12[%c104_581, %c0_582], %903 {strides = array<i32>} : memref<128x32xf32, #tpu.memory_space<vmem>>, vector<8x32xf32>,
    %c112_583 = arith.constant 112 : index
    %c0_584 = arith.constant 0 : index
    %905 = vector.load %arg13[%c112_583, %c0_584] : memref<128x32xf32, #tpu.memory_space<vmem>>, vector<8x32xf32>
    %c8_585 = arith.constant 8 : index
    %c0_586 = arith.constant 0 : index
    %906 = vector.load %arg13[%c8_585, %c0_586] : memref<128x32xf32, #tpu.memory_space<vmem>>, vector<8x32xf32>
    %907 = arith.select %21, %905, %906 : vector<8x32xi1>, vector<8x32xf32>
    %c112_587 = arith.constant 112 : index
    %c0_588 = arith.constant 0 : index
    %908 = vector.load %arg12[%c112_587, %c0_588] : memref<128x32xf32, #tpu.memory_space<vmem>>, vector<8x32xf32>
    tpu.vector_store %arg12[%c112_587, %c0_588], %907 {strides = array<i32>} : memref<128x32xf32, #tpu.memory_space<vmem>>, vector<8x32xf32>,
    %c120_589 = arith.constant 120 : index
    %c0_590 = arith.constant 0 : index
    %909 = vector.load %arg13[%c120_589, %c0_590] : memref<128x32xf32, #tpu.memory_space<vmem>>, vector<8x32xf32>
    %c0_591 = arith.constant 0 : index
    %c0_592 = arith.constant 0 : index
    %910 = vector.load %arg13[%c0_591, %c0_592] : memref<128x32xf32, #tpu.memory_space<vmem>>, vector<8x32xf32>
    %911 = arith.select %21, %909, %910 : vector<8x32xi1>, vector<8x32xf32>
    %c120_593 = arith.constant 120 : index
    %c0_594 = arith.constant 0 : index
    %912 = vector.load %arg12[%c120_593, %c0_594] : memref<128x32xf32, #tpu.memory_space<vmem>>, vector<8x32xf32>
    tpu.vector_store %arg12[%c120_593, %c0_594], %911 {strides = array<i32>} : memref<128x32xf32, #tpu.memory_space<vmem>>, vector<8x32xf32>,
    %c0_595 = arith.constant 0 : index
    %c0_596 = arith.constant 0 : index
    %913 = vector.load %arg12[%c0_595, %c0_596] : memref<128x32xf32, #tpu.memory_space<vmem>>, vector<128x32xf32>
    %c2 = arith.constant 2 : index
    %c0_597 = arith.constant 0 : index
    %c0_598 = arith.constant 0 : index
    %914 = vector.load %arg2[%c2, %c0_597, %c0_598] : memref<4x32x128xf32, #tpu.memory_space<vmem>>, vector<1x32x128xf32>
    %915 = vector.shape_cast %914 : vector<1x32x128xf32> to vector<32x128xf32>
    %cst_599 = arith.constant dense<0.000000e+00> : vector<128x128xf32>
    %916 = tpu.matmul %913, %915, %cst_599 {dimension_numbers = #tpu.dot_dimension_numbers<[1], [0], [0], [1], [0, 0, 1, 1], [], []>} : vector<128x32xf32>, vector<32x128xf32>, vector<128x128xf32> -> vector<128x128xf32>
    %c2_600 = arith.constant 2 : index
    %c0_601 = arith.constant 0 : index
    %c0_602 = arith.constant 0 : index
    %917 = vector.load %arg4[%c2_600, %c0_601, %c0_602] : memref<4x1x128xf32, #tpu.memory_space<vmem>>, vector<1x1x128xf32>
    %918 = vector.shape_cast %917 : vector<1x1x128xf32> to vector<1x128xf32>
    %919 = vector.broadcast %918 : vector<1x128xf32> to vector<128x128xf32>
    %920 = arith.addf %916, %919 : vector<128x128xf32>
    %c0_603 = arith.constant 0 : index
    %c0_604 = arith.constant 0 : index
    %921 = vector.load %arg10[%c0_603, %c0_604] : memref<128x128xf32, #tpu.memory_space<vmem>>, vector<128x128xf32>
    tpu.vector_store %arg10[%c0_603, %c0_604], %920 {strides = array<i32>} : memref<128x128xf32, #tpu.memory_space<vmem>>, vector<128x128xf32>,
    %c0_605 = arith.constant 0 : index
    %c0_606 = arith.constant 0 : index
    %922 = vector.load %arg10[%c0_605, %c0_606] : memref<128x128xf32, #tpu.memory_space<vmem>>, vector<8x128xf32>
    %c120_607 = arith.constant 120 : index
    %c0_608 = arith.constant 0 : index
    %923 = vector.load %arg10[%c120_607, %c0_608] : memref<128x128xf32, #tpu.memory_space<vmem>>, vector<8x128xf32>
    %924 = arith.select %18, %922, %923 : vector<8x128xi1>, vector<8x128xf32>
    %c0_609 = arith.constant 0 : index
    %c0_610 = arith.constant 0 : index
    %925 = vector.load %arg11[%c0_609, %c0_610] : memref<128x128xf32, #tpu.memory_space<vmem>>, vector<8x128xf32>
    tpu.vector_store %arg11[%c0_609, %c0_610], %924 {strides = array<i32>} : memref<128x128xf32, #tpu.memory_space<vmem>>, vector<8x128xf32>,
    %c8_611 = arith.constant 8 : index
    %c0_612 = arith.constant 0 : index
    %926 = vector.load %arg10[%c8_611, %c0_612] : memref<128x128xf32, #tpu.memory_space<vmem>>, vector<8x128xf32>
    %c112_613 = arith.constant 112 : index
    %c0_614 = arith.constant 0 : index
    %927 = vector.load %arg10[%c112_613, %c0_614] : memref<128x128xf32, #tpu.memory_space<vmem>>, vector<8x128xf32>
    %928 = arith.select %18, %926, %927 : vector<8x128xi1>, vector<8x128xf32>
    %c8_615 = arith.constant 8 : index
    %c0_616 = arith.constant 0 : index
    %929 = vector.load %arg11[%c8_615, %c0_616] : memref<128x128xf32, #tpu.memory_space<vmem>>, vector<8x128xf32>
    tpu.vector_store %arg11[%c8_615, %c0_616], %928 {strides = array<i32>} : memref<128x128xf32, #tpu.memory_space<vmem>>, vector<8x128xf32>,
    %c16_617 = arith.constant 16 : index
    %c0_618 = arith.constant 0 : index
    %930 = vector.load %arg10[%c16_617, %c0_618] : memref<128x128xf32, #tpu.memory_space<vmem>>, vector<8x128xf32>
    %c104_619 = arith.constant 104 : index
    %c0_620 = arith.constant 0 : index
    %931 = vector.load %arg10[%c104_619, %c0_620] : memref<128x128xf32, #tpu.memory_space<vmem>>, vector<8x128xf32>
    %932 = arith.select %18, %930, %931 : vector<8x128xi1>, vector<8x128xf32>
    %c16_621 = arith.constant 16 : index
    %c0_622 = arith.constant 0 : index
    %933 = vector.load %arg11[%c16_621, %c0_622] : memref<128x128xf32, #tpu.memory_space<vmem>>, vector<8x128xf32>
    tpu.vector_store %arg11[%c16_621, %c0_622], %932 {strides = array<i32>} : memref<128x128xf32, #tpu.memory_space<vmem>>, vector<8x128xf32>,
    %c24_623 = arith.constant 24 : index
    %c0_624 = arith.constant 0 : index
    %934 = vector.load %arg10[%c24_623, %c0_624] : memref<128x128xf32, #tpu.memory_space<vmem>>, vector<8x128xf32>
    %c96_625 = arith.constant 96 : index
    %c0_626 = arith.constant 0 : index
    %935 = vector.load %arg10[%c96_625, %c0_626] : memref<128x128xf32, #tpu.memory_space<vmem>>, vector<8x128xf32>
    %936 = arith.select %18, %934, %935 : vector<8x128xi1>, vector<8x128xf32>
    %c24_627 = arith.constant 24 : index
    %c0_628 = arith.constant 0 : index
    %937 = vector.load %arg11[%c24_627, %c0_628] : memref<128x128xf32, #tpu.memory_space<vmem>>, vector<8x128xf32>
    tpu.vector_store %arg11[%c24_627, %c0_628], %936 {strides = array<i32>} : memref<128x128xf32, #tpu.memory_space<vmem>>, vector<8x128xf32>,
    %c32_629 = arith.constant 32 : index
    %c0_630 = arith.constant 0 : index
    %938 = vector.load %arg10[%c32_629, %c0_630] : memref<128x128xf32, #tpu.memory_space<vmem>>, vector<8x128xf32>
    %c88_631 = arith.constant 88 : index
    %c0_632 = arith.constant 0 : index
    %939 = vector.load %arg10[%c88_631, %c0_632] : memref<128x128xf32, #tpu.memory_space<vmem>>, vector<8x128xf32>
    %940 = arith.select %18, %938, %939 : vector<8x128xi1>, vector<8x128xf32>
    %c32_633 = arith.constant 32 : index
    %c0_634 = arith.constant 0 : index
    %941 = vector.load %arg11[%c32_633, %c0_634] : memref<128x128xf32, #tpu.memory_space<vmem>>, vector<8x128xf32>
    tpu.vector_store %arg11[%c32_633, %c0_634], %940 {strides = array<i32>} : memref<128x128xf32, #tpu.memory_space<vmem>>, vector<8x128xf32>,
    %c40_635 = arith.constant 40 : index
    %c0_636 = arith.constant 0 : index
    %942 = vector.load %arg10[%c40_635, %c0_636] : memref<128x128xf32, #tpu.memory_space<vmem>>, vector<8x128xf32>
    %c80_637 = arith.constant 80 : index
    %c0_638 = arith.constant 0 : index
    %943 = vector.load %arg10[%c80_637, %c0_638] : memref<128x128xf32, #tpu.memory_space<vmem>>, vector<8x128xf32>
    %944 = arith.select %18, %942, %943 : vector<8x128xi1>, vector<8x128xf32>
    %c40_639 = arith.constant 40 : index
    %c0_640 = arith.constant 0 : index
    %945 = vector.load %arg11[%c40_639, %c0_640] : memref<128x128xf32, #tpu.memory_space<vmem>>, vector<8x128xf32>
    tpu.vector_store %arg11[%c40_639, %c0_640], %944 {strides = array<i32>} : memref<128x128xf32, #tpu.memory_space<vmem>>, vector<8x128xf32>,
    %c48_641 = arith.constant 48 : index
    %c0_642 = arith.constant 0 : index
    %946 = vector.load %arg10[%c48_641, %c0_642] : memref<128x128xf32, #tpu.memory_space<vmem>>, vector<8x128xf32>
    %c72_643 = arith.constant 72 : index
    %c0_644 = arith.constant 0 : index
    %947 = vector.load %arg10[%c72_643, %c0_644] : memref<128x128xf32, #tpu.memory_space<vmem>>, vector<8x128xf32>
    %948 = arith.select %18, %946, %947 : vector<8x128xi1>, vector<8x128xf32>
    %c48_645 = arith.constant 48 : index
    %c0_646 = arith.constant 0 : index
    %949 = vector.load %arg11[%c48_645, %c0_646] : memref<128x128xf32, #tpu.memory_space<vmem>>, vector<8x128xf32>
    tpu.vector_store %arg11[%c48_645, %c0_646], %948 {strides = array<i32>} : memref<128x128xf32, #tpu.memory_space<vmem>>, vector<8x128xf32>,
    %c56_647 = arith.constant 56 : index
    %c0_648 = arith.constant 0 : index
    %950 = vector.load %arg10[%c56_647, %c0_648] : memref<128x128xf32, #tpu.memory_space<vmem>>, vector<8x128xf32>
    %c64_649 = arith.constant 64 : index
    %c0_650 = arith.constant 0 : index
    %951 = vector.load %arg10[%c64_649, %c0_650] : memref<128x128xf32, #tpu.memory_space<vmem>>, vector<8x128xf32>
    %952 = arith.select %18, %950, %951 : vector<8x128xi1>, vector<8x128xf32>
    %c56_651 = arith.constant 56 : index
    %c0_652 = arith.constant 0 : index
    %953 = vector.load %arg11[%c56_651, %c0_652] : memref<128x128xf32, #tpu.memory_space<vmem>>, vector<8x128xf32>
    tpu.vector_store %arg11[%c56_651, %c0_652], %952 {strides = array<i32>} : memref<128x128xf32, #tpu.memory_space<vmem>>, vector<8x128xf32>,
    %c64_653 = arith.constant 64 : index
    %c0_654 = arith.constant 0 : index
    %954 = vector.load %arg10[%c64_653, %c0_654] : memref<128x128xf32, #tpu.memory_space<vmem>>, vector<8x128xf32>
    %c56_655 = arith.constant 56 : index
    %c0_656 = arith.constant 0 : index
    %955 = vector.load %arg10[%c56_655, %c0_656] : memref<128x128xf32, #tpu.memory_space<vmem>>, vector<8x128xf32>
    %956 = arith.select %18, %954, %955 : vector<8x128xi1>, vector<8x128xf32>
    %c64_657 = arith.constant 64 : index
    %c0_658 = arith.constant 0 : index
    %957 = vector.load %arg11[%c64_657, %c0_658] : memref<128x128xf32, #tpu.memory_space<vmem>>, vector<8x128xf32>
    tpu.vector_store %arg11[%c64_657, %c0_658], %956 {strides = array<i32>} : memref<128x128xf32, #tpu.memory_space<vmem>>, vector<8x128xf32>,
    %c72_659 = arith.constant 72 : index
    %c0_660 = arith.constant 0 : index
    %958 = vector.load %arg10[%c72_659, %c0_660] : memref<128x128xf32, #tpu.memory_space<vmem>>, vector<8x128xf32>
    %c48_661 = arith.constant 48 : index
    %c0_662 = arith.constant 0 : index
    %959 = vector.load %arg10[%c48_661, %c0_662] : memref<128x128xf32, #tpu.memory_space<vmem>>, vector<8x128xf32>
    %960 = arith.select %18, %958, %959 : vector<8x128xi1>, vector<8x128xf32>
    %c72_663 = arith.constant 72 : index
    %c0_664 = arith.constant 0 : index
    %961 = vector.load %arg11[%c72_663, %c0_664] : memref<128x128xf32, #tpu.memory_space<vmem>>, vector<8x128xf32>
    tpu.vector_store %arg11[%c72_663, %c0_664], %960 {strides = array<i32>} : memref<128x128xf32, #tpu.memory_space<vmem>>, vector<8x128xf32>,
    %c80_665 = arith.constant 80 : index
    %c0_666 = arith.constant 0 : index
    %962 = vector.load %arg10[%c80_665, %c0_666] : memref<128x128xf32, #tpu.memory_space<vmem>>, vector<8x128xf32>
    %c40_667 = arith.constant 40 : index
    %c0_668 = arith.constant 0 : index
    %963 = vector.load %arg10[%c40_667, %c0_668] : memref<128x128xf32, #tpu.memory_space<vmem>>, vector<8x128xf32>
    %964 = arith.select %18, %962, %963 : vector<8x128xi1>, vector<8x128xf32>
    %c80_669 = arith.constant 80 : index
    %c0_670 = arith.constant 0 : index
    %965 = vector.load %arg11[%c80_669, %c0_670] : memref<128x128xf32, #tpu.memory_space<vmem>>, vector<8x128xf32>
    tpu.vector_store %arg11[%c80_669, %c0_670], %964 {strides = array<i32>} : memref<128x128xf32, #tpu.memory_space<vmem>>, vector<8x128xf32>,
    %c88_671 = arith.constant 88 : index
    %c0_672 = arith.constant 0 : index
    %966 = vector.load %arg10[%c88_671, %c0_672] : memref<128x128xf32, #tpu.memory_space<vmem>>, vector<8x128xf32>
    %c32_673 = arith.constant 32 : index
    %c0_674 = arith.constant 0 : index
    %967 = vector.load %arg10[%c32_673, %c0_674] : memref<128x128xf32, #tpu.memory_space<vmem>>, vector<8x128xf32>
    %968 = arith.select %18, %966, %967 : vector<8x128xi1>, vector<8x128xf32>
    %c88_675 = arith.constant 88 : index
    %c0_676 = arith.constant 0 : index
    %969 = vector.load %arg11[%c88_675, %c0_676] : memref<128x128xf32, #tpu.memory_space<vmem>>, vector<8x128xf32>
    tpu.vector_store %arg11[%c88_675, %c0_676], %968 {strides = array<i32>} : memref<128x128xf32, #tpu.memory_space<vmem>>, vector<8x128xf32>,
    %c96_677 = arith.constant 96 : index
    %c0_678 = arith.constant 0 : index
    %970 = vector.load %arg10[%c96_677, %c0_678] : memref<128x128xf32, #tpu.memory_space<vmem>>, vector<8x128xf32>
    %c24_679 = arith.constant 24 : index
    %c0_680 = arith.constant 0 : index
    %971 = vector.load %arg10[%c24_679, %c0_680] : memref<128x128xf32, #tpu.memory_space<vmem>>, vector<8x128xf32>
    %972 = arith.select %18, %970, %971 : vector<8x128xi1>, vector<8x128xf32>
    %c96_681 = arith.constant 96 : index
    %c0_682 = arith.constant 0 : index
    %973 = vector.load %arg11[%c96_681, %c0_682] : memref<128x128xf32, #tpu.memory_space<vmem>>, vector<8x128xf32>
    tpu.vector_store %arg11[%c96_681, %c0_682], %972 {strides = array<i32>} : memref<128x128xf32, #tpu.memory_space<vmem>>, vector<8x128xf32>,
    %c104_683 = arith.constant 104 : index
    %c0_684 = arith.constant 0 : index
    %974 = vector.load %arg10[%c104_683, %c0_684] : memref<128x128xf32, #tpu.memory_space<vmem>>, vector<8x128xf32>
    %c16_685 = arith.constant 16 : index
    %c0_686 = arith.constant 0 : index
    %975 = vector.load %arg10[%c16_685, %c0_686] : memref<128x128xf32, #tpu.memory_space<vmem>>, vector<8x128xf32>
    %976 = arith.select %18, %974, %975 : vector<8x128xi1>, vector<8x128xf32>
    %c104_687 = arith.constant 104 : index
    %c0_688 = arith.constant 0 : index
    %977 = vector.load %arg11[%c104_687, %c0_688] : memref<128x128xf32, #tpu.memory_space<vmem>>, vector<8x128xf32>
    tpu.vector_store %arg11[%c104_687, %c0_688], %976 {strides = array<i32>} : memref<128x128xf32, #tpu.memory_space<vmem>>, vector<8x128xf32>,
    %c112_689 = arith.constant 112 : index
    %c0_690 = arith.constant 0 : index
    %978 = vector.load %arg10[%c112_689, %c0_690] : memref<128x128xf32, #tpu.memory_space<vmem>>, vector<8x128xf32>
    %c8_691 = arith.constant 8 : index
    %c0_692 = arith.constant 0 : index
    %979 = vector.load %arg10[%c8_691, %c0_692] : memref<128x128xf32, #tpu.memory_space<vmem>>, vector<8x128xf32>
    %980 = arith.select %18, %978, %979 : vector<8x128xi1>, vector<8x128xf32>
    %c112_693 = arith.constant 112 : index
    %c0_694 = arith.constant 0 : index
    %981 = vector.load %arg11[%c112_693, %c0_694] : memref<128x128xf32, #tpu.memory_space<vmem>>, vector<8x128xf32>
    tpu.vector_store %arg11[%c112_693, %c0_694], %980 {strides = array<i32>} : memref<128x128xf32, #tpu.memory_space<vmem>>, vector<8x128xf32>,
    %c120_695 = arith.constant 120 : index
    %c0_696 = arith.constant 0 : index
    %982 = vector.load %arg10[%c120_695, %c0_696] : memref<128x128xf32, #tpu.memory_space<vmem>>, vector<8x128xf32>
    %c0_697 = arith.constant 0 : index
    %c0_698 = arith.constant 0 : index
    %983 = vector.load %arg10[%c0_697, %c0_698] : memref<128x128xf32, #tpu.memory_space<vmem>>, vector<8x128xf32>
    %984 = arith.select %18, %982, %983 : vector<8x128xi1>, vector<8x128xf32>
    %c120_699 = arith.constant 120 : index
    %c0_700 = arith.constant 0 : index
    %985 = vector.load %arg11[%c120_699, %c0_700] : memref<128x128xf32, #tpu.memory_space<vmem>>, vector<8x128xf32>
    tpu.vector_store %arg11[%c120_699, %c0_700], %984 {strides = array<i32>} : memref<128x128xf32, #tpu.memory_space<vmem>>, vector<8x128xf32>,
    %c2_701 = arith.constant 2 : index
    %c0_702 = arith.constant 0 : index
    %c0_703 = arith.constant 0 : index
    %986 = vector.load %arg3[%c2_701, %c0_702, %c0_703] : memref<4x32x128xf32, #tpu.memory_space<vmem>>, vector<1x32x128xf32>
    %987 = vector.shape_cast %986 : vector<1x32x128xf32> to vector<32x128xf32>
    %cst_704 = arith.constant 0.000000e+00 : f32
    %988 = vector.broadcast %cst_704 : f32 to vector<8x32xf32>
    %cst_705 = arith.constant 0.000000e+00 : f32
    %989 = vector.broadcast %cst_705 : f32 to vector<8x32xf32>
    %c0_706 = arith.constant 0 : index
    %c0_707 = arith.constant 0 : index
    %990 = vector.load %arg11[%c0_706, %c0_707] : memref<128x128xf32, #tpu.memory_space<vmem>>, vector<8x128xf32>
    %cst_708 = arith.constant dense<0.000000e+00> : vector<8x128xf32>
    %991 = tpu.matmul %988, %987, %cst_708 {dimension_numbers = #tpu.dot_dimension_numbers<[1], [0], [0], [1], [0, 0, 1, 1], [], []>} : vector<8x32xf32>, vector<32x128xf32>, vector<8x128xf32> -> vector<8x128xf32>
    %992 = arith.addf %990, %991 : vector<8x128xf32>
    %993 = arith.negf %992 : vector<8x128xf32>
    %994 = math.exp %993 : vector<8x128xf32>
    %cst_709 = arith.constant 1.000000e+00 : f32
    %995 = vector.broadcast %cst_709 : f32 to vector<8x128xf32>
    %996 = arith.addf %995, %994 : vector<8x128xf32>
    %997 = arith.divf %995, %996 : vector<8x128xf32>
    %998 = math.tanh %992 : vector<8x128xf32>
    %999 = vector.extract_strided_slice %997 {offsets = [0, 32], sizes = [8, 32], strides = [1, 1]} : vector<8x128xf32> to vector<8x32xf32>
    %1000 = arith.mulf %999, %989 : vector<8x32xf32>
    %1001 = vector.extract_strided_slice %997 {offsets = [0, 0], sizes = [8, 32], strides = [1, 1]} : vector<8x128xf32> to vector<8x32xf32>
    %1002 = vector.extract_strided_slice %998 {offsets = [0, 64], sizes = [8, 32], strides = [1, 1]} : vector<8x128xf32> to vector<8x32xf32>
    %1003 = arith.mulf %1001, %1002 : vector<8x32xf32>
    %1004 = arith.addf %1000, %1003 : vector<8x32xf32>
    %1005 = vector.extract_strided_slice %997 {offsets = [0, 96], sizes = [8, 32], strides = [1, 1]} : vector<8x128xf32> to vector<8x32xf32>
    %1006 = math.tanh %1004 : vector<8x32xf32>
    %1007 = arith.mulf %1005, %1006 : vector<8x32xf32>
    %c0_710 = arith.constant 0 : index
    %c0_711 = arith.constant 0 : index
    %1008 = vector.load %arg13[%c0_710, %c0_711] : memref<128x32xf32, #tpu.memory_space<vmem>>, vector<8x32xf32>
    tpu.vector_store %arg13[%c0_710, %c0_711], %1007 {strides = array<i32>} : memref<128x32xf32, #tpu.memory_space<vmem>>, vector<8x32xf32>,
    %c8_712 = arith.constant 8 : index
    %c0_713 = arith.constant 0 : index
    %1009 = vector.load %arg11[%c8_712, %c0_713] : memref<128x128xf32, #tpu.memory_space<vmem>>, vector<8x128xf32>
    %cst_714 = arith.constant dense<0.000000e+00> : vector<8x128xf32>
    %1010 = tpu.matmul %1007, %987, %cst_714 {dimension_numbers = #tpu.dot_dimension_numbers<[1], [0], [0], [1], [0, 0, 1, 1], [], []>} : vector<8x32xf32>, vector<32x128xf32>, vector<8x128xf32> -> vector<8x128xf32>
    %1011 = arith.addf %1009, %1010 : vector<8x128xf32>
    %1012 = arith.negf %1011 : vector<8x128xf32>
    %1013 = math.exp %1012 : vector<8x128xf32>
    %cst_715 = arith.constant 1.000000e+00 : f32
    %1014 = vector.broadcast %cst_715 : f32 to vector<8x128xf32>
    %1015 = arith.addf %1014, %1013 : vector<8x128xf32>
    %1016 = arith.divf %1014, %1015 : vector<8x128xf32>
    %1017 = math.tanh %1011 : vector<8x128xf32>
    %1018 = vector.extract_strided_slice %1016 {offsets = [0, 32], sizes = [8, 32], strides = [1, 1]} : vector<8x128xf32> to vector<8x32xf32>
    %1019 = arith.mulf %1018, %1004 : vector<8x32xf32>
    %1020 = vector.extract_strided_slice %1016 {offsets = [0, 0], sizes = [8, 32], strides = [1, 1]} : vector<8x128xf32> to vector<8x32xf32>
    %1021 = vector.extract_strided_slice %1017 {offsets = [0, 64], sizes = [8, 32], strides = [1, 1]} : vector<8x128xf32> to vector<8x32xf32>
    %1022 = arith.mulf %1020, %1021 : vector<8x32xf32>
    %1023 = arith.addf %1019, %1022 : vector<8x32xf32>
    %1024 = vector.extract_strided_slice %1016 {offsets = [0, 96], sizes = [8, 32], strides = [1, 1]} : vector<8x128xf32> to vector<8x32xf32>
    %1025 = math.tanh %1023 : vector<8x32xf32>
    %1026 = arith.mulf %1024, %1025 : vector<8x32xf32>
    %c8_716 = arith.constant 8 : index
    %c0_717 = arith.constant 0 : index
    %1027 = vector.load %arg13[%c8_716, %c0_717] : memref<128x32xf32, #tpu.memory_space<vmem>>, vector<8x32xf32>
    tpu.vector_store %arg13[%c8_716, %c0_717], %1026 {strides = array<i32>} : memref<128x32xf32, #tpu.memory_space<vmem>>, vector<8x32xf32>,
    %c16_718 = arith.constant 16 : index
    %c0_719 = arith.constant 0 : index
    %1028 = vector.load %arg11[%c16_718, %c0_719] : memref<128x128xf32, #tpu.memory_space<vmem>>, vector<8x128xf32>
    %cst_720 = arith.constant dense<0.000000e+00> : vector<8x128xf32>
    %1029 = tpu.matmul %1026, %987, %cst_720 {dimension_numbers = #tpu.dot_dimension_numbers<[1], [0], [0], [1], [0, 0, 1, 1], [], []>} : vector<8x32xf32>, vector<32x128xf32>, vector<8x128xf32> -> vector<8x128xf32>
    %1030 = arith.addf %1028, %1029 : vector<8x128xf32>
    %1031 = arith.negf %1030 : vector<8x128xf32>
    %1032 = math.exp %1031 : vector<8x128xf32>
    %cst_721 = arith.constant 1.000000e+00 : f32
    %1033 = vector.broadcast %cst_721 : f32 to vector<8x128xf32>
    %1034 = arith.addf %1033, %1032 : vector<8x128xf32>
    %1035 = arith.divf %1033, %1034 : vector<8x128xf32>
    %1036 = math.tanh %1030 : vector<8x128xf32>
    %1037 = vector.extract_strided_slice %1035 {offsets = [0, 32], sizes = [8, 32], strides = [1, 1]} : vector<8x128xf32> to vector<8x32xf32>
    %1038 = arith.mulf %1037, %1023 : vector<8x32xf32>
    %1039 = vector.extract_strided_slice %1035 {offsets = [0, 0], sizes = [8, 32], strides = [1, 1]} : vector<8x128xf32> to vector<8x32xf32>
    %1040 = vector.extract_strided_slice %1036 {offsets = [0, 64], sizes = [8, 32], strides = [1, 1]} : vector<8x128xf32> to vector<8x32xf32>
    %1041 = arith.mulf %1039, %1040 : vector<8x32xf32>
    %1042 = arith.addf %1038, %1041 : vector<8x32xf32>
    %1043 = vector.extract_strided_slice %1035 {offsets = [0, 96], sizes = [8, 32], strides = [1, 1]} : vector<8x128xf32> to vector<8x32xf32>
    %1044 = math.tanh %1042 : vector<8x32xf32>
    %1045 = arith.mulf %1043, %1044 : vector<8x32xf32>
    %c16_722 = arith.constant 16 : index
    %c0_723 = arith.constant 0 : index
    %1046 = vector.load %arg13[%c16_722, %c0_723] : memref<128x32xf32, #tpu.memory_space<vmem>>, vector<8x32xf32>
    tpu.vector_store %arg13[%c16_722, %c0_723], %1045 {strides = array<i32>} : memref<128x32xf32, #tpu.memory_space<vmem>>, vector<8x32xf32>,
    %c24_724 = arith.constant 24 : index
    %c0_725 = arith.constant 0 : index
    %1047 = vector.load %arg11[%c24_724, %c0_725] : memref<128x128xf32, #tpu.memory_space<vmem>>, vector<8x128xf32>
    %cst_726 = arith.constant dense<0.000000e+00> : vector<8x128xf32>
    %1048 = tpu.matmul %1045, %987, %cst_726 {dimension_numbers = #tpu.dot_dimension_numbers<[1], [0], [0], [1], [0, 0, 1, 1], [], []>} : vector<8x32xf32>, vector<32x128xf32>, vector<8x128xf32> -> vector<8x128xf32>
    %1049 = arith.addf %1047, %1048 : vector<8x128xf32>
    %1050 = arith.negf %1049 : vector<8x128xf32>
    %1051 = math.exp %1050 : vector<8x128xf32>
    %cst_727 = arith.constant 1.000000e+00 : f32
    %1052 = vector.broadcast %cst_727 : f32 to vector<8x128xf32>
    %1053 = arith.addf %1052, %1051 : vector<8x128xf32>
    %1054 = arith.divf %1052, %1053 : vector<8x128xf32>
    %1055 = math.tanh %1049 : vector<8x128xf32>
    %1056 = vector.extract_strided_slice %1054 {offsets = [0, 32], sizes = [8, 32], strides = [1, 1]} : vector<8x128xf32> to vector<8x32xf32>
    %1057 = arith.mulf %1056, %1042 : vector<8x32xf32>
    %1058 = vector.extract_strided_slice %1054 {offsets = [0, 0], sizes = [8, 32], strides = [1, 1]} : vector<8x128xf32> to vector<8x32xf32>
    %1059 = vector.extract_strided_slice %1055 {offsets = [0, 64], sizes = [8, 32], strides = [1, 1]} : vector<8x128xf32> to vector<8x32xf32>
    %1060 = arith.mulf %1058, %1059 : vector<8x32xf32>
    %1061 = arith.addf %1057, %1060 : vector<8x32xf32>
    %1062 = vector.extract_strided_slice %1054 {offsets = [0, 96], sizes = [8, 32], strides = [1, 1]} : vector<8x128xf32> to vector<8x32xf32>
    %1063 = math.tanh %1061 : vector<8x32xf32>
    %1064 = arith.mulf %1062, %1063 : vector<8x32xf32>
    %c24_728 = arith.constant 24 : index
    %c0_729 = arith.constant 0 : index
    %1065 = vector.load %arg13[%c24_728, %c0_729] : memref<128x32xf32, #tpu.memory_space<vmem>>, vector<8x32xf32>
    tpu.vector_store %arg13[%c24_728, %c0_729], %1064 {strides = array<i32>} : memref<128x32xf32, #tpu.memory_space<vmem>>, vector<8x32xf32>,
    %c32_730 = arith.constant 32 : index
    %c0_731 = arith.constant 0 : index
    %1066 = vector.load %arg11[%c32_730, %c0_731] : memref<128x128xf32, #tpu.memory_space<vmem>>, vector<8x128xf32>
    %cst_732 = arith.constant dense<0.000000e+00> : vector<8x128xf32>
    %1067 = tpu.matmul %1064, %987, %cst_732 {dimension_numbers = #tpu.dot_dimension_numbers<[1], [0], [0], [1], [0, 0, 1, 1], [], []>} : vector<8x32xf32>, vector<32x128xf32>, vector<8x128xf32> -> vector<8x128xf32>
    %1068 = arith.addf %1066, %1067 : vector<8x128xf32>
    %1069 = arith.negf %1068 : vector<8x128xf32>
    %1070 = math.exp %1069 : vector<8x128xf32>
    %cst_733 = arith.constant 1.000000e+00 : f32
    %1071 = vector.broadcast %cst_733 : f32 to vector<8x128xf32>
    %1072 = arith.addf %1071, %1070 : vector<8x128xf32>
    %1073 = arith.divf %1071, %1072 : vector<8x128xf32>
    %1074 = math.tanh %1068 : vector<8x128xf32>
    %1075 = vector.extract_strided_slice %1073 {offsets = [0, 32], sizes = [8, 32], strides = [1, 1]} : vector<8x128xf32> to vector<8x32xf32>
    %1076 = arith.mulf %1075, %1061 : vector<8x32xf32>
    %1077 = vector.extract_strided_slice %1073 {offsets = [0, 0], sizes = [8, 32], strides = [1, 1]} : vector<8x128xf32> to vector<8x32xf32>
    %1078 = vector.extract_strided_slice %1074 {offsets = [0, 64], sizes = [8, 32], strides = [1, 1]} : vector<8x128xf32> to vector<8x32xf32>
    %1079 = arith.mulf %1077, %1078 : vector<8x32xf32>
    %1080 = arith.addf %1076, %1079 : vector<8x32xf32>
    %1081 = vector.extract_strided_slice %1073 {offsets = [0, 96], sizes = [8, 32], strides = [1, 1]} : vector<8x128xf32> to vector<8x32xf32>
    %1082 = math.tanh %1080 : vector<8x32xf32>
    %1083 = arith.mulf %1081, %1082 : vector<8x32xf32>
    %c32_734 = arith.constant 32 : index
    %c0_735 = arith.constant 0 : index
    %1084 = vector.load %arg13[%c32_734, %c0_735] : memref<128x32xf32, #tpu.memory_space<vmem>>, vector<8x32xf32>
    tpu.vector_store %arg13[%c32_734, %c0_735], %1083 {strides = array<i32>} : memref<128x32xf32, #tpu.memory_space<vmem>>, vector<8x32xf32>,
    %c40_736 = arith.constant 40 : index
    %c0_737 = arith.constant 0 : index
    %1085 = vector.load %arg11[%c40_736, %c0_737] : memref<128x128xf32, #tpu.memory_space<vmem>>, vector<8x128xf32>
    %cst_738 = arith.constant dense<0.000000e+00> : vector<8x128xf32>
    %1086 = tpu.matmul %1083, %987, %cst_738 {dimension_numbers = #tpu.dot_dimension_numbers<[1], [0], [0], [1], [0, 0, 1, 1], [], []>} : vector<8x32xf32>, vector<32x128xf32>, vector<8x128xf32> -> vector<8x128xf32>
    %1087 = arith.addf %1085, %1086 : vector<8x128xf32>
    %1088 = arith.negf %1087 : vector<8x128xf32>
    %1089 = math.exp %1088 : vector<8x128xf32>
    %cst_739 = arith.constant 1.000000e+00 : f32
    %1090 = vector.broadcast %cst_739 : f32 to vector<8x128xf32>
    %1091 = arith.addf %1090, %1089 : vector<8x128xf32>
    %1092 = arith.divf %1090, %1091 : vector<8x128xf32>
    %1093 = math.tanh %1087 : vector<8x128xf32>
    %1094 = vector.extract_strided_slice %1092 {offsets = [0, 32], sizes = [8, 32], strides = [1, 1]} : vector<8x128xf32> to vector<8x32xf32>
    %1095 = arith.mulf %1094, %1080 : vector<8x32xf32>
    %1096 = vector.extract_strided_slice %1092 {offsets = [0, 0], sizes = [8, 32], strides = [1, 1]} : vector<8x128xf32> to vector<8x32xf32>
    %1097 = vector.extract_strided_slice %1093 {offsets = [0, 64], sizes = [8, 32], strides = [1, 1]} : vector<8x128xf32> to vector<8x32xf32>
    %1098 = arith.mulf %1096, %1097 : vector<8x32xf32>
    %1099 = arith.addf %1095, %1098 : vector<8x32xf32>
    %1100 = vector.extract_strided_slice %1092 {offsets = [0, 96], sizes = [8, 32], strides = [1, 1]} : vector<8x128xf32> to vector<8x32xf32>
    %1101 = math.tanh %1099 : vector<8x32xf32>
    %1102 = arith.mulf %1100, %1101 : vector<8x32xf32>
    %c40_740 = arith.constant 40 : index
    %c0_741 = arith.constant 0 : index
    %1103 = vector.load %arg13[%c40_740, %c0_741] : memref<128x32xf32, #tpu.memory_space<vmem>>, vector<8x32xf32>
    tpu.vector_store %arg13[%c40_740, %c0_741], %1102 {strides = array<i32>} : memref<128x32xf32, #tpu.memory_space<vmem>>, vector<8x32xf32>,
    %c48_742 = arith.constant 48 : index
    %c0_743 = arith.constant 0 : index
    %1104 = vector.load %arg11[%c48_742, %c0_743] : memref<128x128xf32, #tpu.memory_space<vmem>>, vector<8x128xf32>
    %cst_744 = arith.constant dense<0.000000e+00> : vector<8x128xf32>
    %1105 = tpu.matmul %1102, %987, %cst_744 {dimension_numbers = #tpu.dot_dimension_numbers<[1], [0], [0], [1], [0, 0, 1, 1], [], []>} : vector<8x32xf32>, vector<32x128xf32>, vector<8x128xf32> -> vector<8x128xf32>
    %1106 = arith.addf %1104, %1105 : vector<8x128xf32>
    %1107 = arith.negf %1106 : vector<8x128xf32>
    %1108 = math.exp %1107 : vector<8x128xf32>
    %cst_745 = arith.constant 1.000000e+00 : f32
    %1109 = vector.broadcast %cst_745 : f32 to vector<8x128xf32>
    %1110 = arith.addf %1109, %1108 : vector<8x128xf32>
    %1111 = arith.divf %1109, %1110 : vector<8x128xf32>
    %1112 = math.tanh %1106 : vector<8x128xf32>
    %1113 = vector.extract_strided_slice %1111 {offsets = [0, 32], sizes = [8, 32], strides = [1, 1]} : vector<8x128xf32> to vector<8x32xf32>
    %1114 = arith.mulf %1113, %1099 : vector<8x32xf32>
    %1115 = vector.extract_strided_slice %1111 {offsets = [0, 0], sizes = [8, 32], strides = [1, 1]} : vector<8x128xf32> to vector<8x32xf32>
    %1116 = vector.extract_strided_slice %1112 {offsets = [0, 64], sizes = [8, 32], strides = [1, 1]} : vector<8x128xf32> to vector<8x32xf32>
    %1117 = arith.mulf %1115, %1116 : vector<8x32xf32>
    %1118 = arith.addf %1114, %1117 : vector<8x32xf32>
    %1119 = vector.extract_strided_slice %1111 {offsets = [0, 96], sizes = [8, 32], strides = [1, 1]} : vector<8x128xf32> to vector<8x32xf32>
    %1120 = math.tanh %1118 : vector<8x32xf32>
    %1121 = arith.mulf %1119, %1120 : vector<8x32xf32>
    %c48_746 = arith.constant 48 : index
    %c0_747 = arith.constant 0 : index
    %1122 = vector.load %arg13[%c48_746, %c0_747] : memref<128x32xf32, #tpu.memory_space<vmem>>, vector<8x32xf32>
    tpu.vector_store %arg13[%c48_746, %c0_747], %1121 {strides = array<i32>} : memref<128x32xf32, #tpu.memory_space<vmem>>, vector<8x32xf32>,
    %c56_748 = arith.constant 56 : index
    %c0_749 = arith.constant 0 : index
    %1123 = vector.load %arg11[%c56_748, %c0_749] : memref<128x128xf32, #tpu.memory_space<vmem>>, vector<8x128xf32>
    %cst_750 = arith.constant dense<0.000000e+00> : vector<8x128xf32>
    %1124 = tpu.matmul %1121, %987, %cst_750 {dimension_numbers = #tpu.dot_dimension_numbers<[1], [0], [0], [1], [0, 0, 1, 1], [], []>} : vector<8x32xf32>, vector<32x128xf32>, vector<8x128xf32> -> vector<8x128xf32>
    %1125 = arith.addf %1123, %1124 : vector<8x128xf32>
    %1126 = arith.negf %1125 : vector<8x128xf32>
    %1127 = math.exp %1126 : vector<8x128xf32>
    %cst_751 = arith.constant 1.000000e+00 : f32
    %1128 = vector.broadcast %cst_751 : f32 to vector<8x128xf32>
    %1129 = arith.addf %1128, %1127 : vector<8x128xf32>
    %1130 = arith.divf %1128, %1129 : vector<8x128xf32>
    %1131 = math.tanh %1125 : vector<8x128xf32>
    %1132 = vector.extract_strided_slice %1130 {offsets = [0, 32], sizes = [8, 32], strides = [1, 1]} : vector<8x128xf32> to vector<8x32xf32>
    %1133 = arith.mulf %1132, %1118 : vector<8x32xf32>
    %1134 = vector.extract_strided_slice %1130 {offsets = [0, 0], sizes = [8, 32], strides = [1, 1]} : vector<8x128xf32> to vector<8x32xf32>
    %1135 = vector.extract_strided_slice %1131 {offsets = [0, 64], sizes = [8, 32], strides = [1, 1]} : vector<8x128xf32> to vector<8x32xf32>
    %1136 = arith.mulf %1134, %1135 : vector<8x32xf32>
    %1137 = arith.addf %1133, %1136 : vector<8x32xf32>
    %1138 = vector.extract_strided_slice %1130 {offsets = [0, 96], sizes = [8, 32], strides = [1, 1]} : vector<8x128xf32> to vector<8x32xf32>
    %1139 = math.tanh %1137 : vector<8x32xf32>
    %1140 = arith.mulf %1138, %1139 : vector<8x32xf32>
    %c56_752 = arith.constant 56 : index
    %c0_753 = arith.constant 0 : index
    %1141 = vector.load %arg13[%c56_752, %c0_753] : memref<128x32xf32, #tpu.memory_space<vmem>>, vector<8x32xf32>
    tpu.vector_store %arg13[%c56_752, %c0_753], %1140 {strides = array<i32>} : memref<128x32xf32, #tpu.memory_space<vmem>>, vector<8x32xf32>,
    %c64_754 = arith.constant 64 : index
    %c0_755 = arith.constant 0 : index
    %1142 = vector.load %arg11[%c64_754, %c0_755] : memref<128x128xf32, #tpu.memory_space<vmem>>, vector<8x128xf32>
    %cst_756 = arith.constant dense<0.000000e+00> : vector<8x128xf32>
    %1143 = tpu.matmul %1140, %987, %cst_756 {dimension_numbers = #tpu.dot_dimension_numbers<[1], [0], [0], [1], [0, 0, 1, 1], [], []>} : vector<8x32xf32>, vector<32x128xf32>, vector<8x128xf32> -> vector<8x128xf32>
    %1144 = arith.addf %1142, %1143 : vector<8x128xf32>
    %1145 = arith.negf %1144 : vector<8x128xf32>
    %1146 = math.exp %1145 : vector<8x128xf32>
    %cst_757 = arith.constant 1.000000e+00 : f32
    %1147 = vector.broadcast %cst_757 : f32 to vector<8x128xf32>
    %1148 = arith.addf %1147, %1146 : vector<8x128xf32>
    %1149 = arith.divf %1147, %1148 : vector<8x128xf32>
    %1150 = math.tanh %1144 : vector<8x128xf32>
    %1151 = vector.extract_strided_slice %1149 {offsets = [0, 32], sizes = [8, 32], strides = [1, 1]} : vector<8x128xf32> to vector<8x32xf32>
    %1152 = arith.mulf %1151, %1137 : vector<8x32xf32>
    %1153 = vector.extract_strided_slice %1149 {offsets = [0, 0], sizes = [8, 32], strides = [1, 1]} : vector<8x128xf32> to vector<8x32xf32>
    %1154 = vector.extract_strided_slice %1150 {offsets = [0, 64], sizes = [8, 32], strides = [1, 1]} : vector<8x128xf32> to vector<8x32xf32>
    %1155 = arith.mulf %1153, %1154 : vector<8x32xf32>
    %1156 = arith.addf %1152, %1155 : vector<8x32xf32>
    %1157 = vector.extract_strided_slice %1149 {offsets = [0, 96], sizes = [8, 32], strides = [1, 1]} : vector<8x128xf32> to vector<8x32xf32>
    %1158 = math.tanh %1156 : vector<8x32xf32>
    %1159 = arith.mulf %1157, %1158 : vector<8x32xf32>
    %c64_758 = arith.constant 64 : index
    %c0_759 = arith.constant 0 : index
    %1160 = vector.load %arg13[%c64_758, %c0_759] : memref<128x32xf32, #tpu.memory_space<vmem>>, vector<8x32xf32>
    tpu.vector_store %arg13[%c64_758, %c0_759], %1159 {strides = array<i32>} : memref<128x32xf32, #tpu.memory_space<vmem>>, vector<8x32xf32>,
    %c72_760 = arith.constant 72 : index
    %c0_761 = arith.constant 0 : index
    %1161 = vector.load %arg11[%c72_760, %c0_761] : memref<128x128xf32, #tpu.memory_space<vmem>>, vector<8x128xf32>
    %cst_762 = arith.constant dense<0.000000e+00> : vector<8x128xf32>
    %1162 = tpu.matmul %1159, %987, %cst_762 {dimension_numbers = #tpu.dot_dimension_numbers<[1], [0], [0], [1], [0, 0, 1, 1], [], []>} : vector<8x32xf32>, vector<32x128xf32>, vector<8x128xf32> -> vector<8x128xf32>
    %1163 = arith.addf %1161, %1162 : vector<8x128xf32>
    %1164 = arith.negf %1163 : vector<8x128xf32>
    %1165 = math.exp %1164 : vector<8x128xf32>
    %cst_763 = arith.constant 1.000000e+00 : f32
    %1166 = vector.broadcast %cst_763 : f32 to vector<8x128xf32>
    %1167 = arith.addf %1166, %1165 : vector<8x128xf32>
    %1168 = arith.divf %1166, %1167 : vector<8x128xf32>
    %1169 = math.tanh %1163 : vector<8x128xf32>
    %1170 = vector.extract_strided_slice %1168 {offsets = [0, 32], sizes = [8, 32], strides = [1, 1]} : vector<8x128xf32> to vector<8x32xf32>
    %1171 = arith.mulf %1170, %1156 : vector<8x32xf32>
    %1172 = vector.extract_strided_slice %1168 {offsets = [0, 0], sizes = [8, 32], strides = [1, 1]} : vector<8x128xf32> to vector<8x32xf32>
    %1173 = vector.extract_strided_slice %1169 {offsets = [0, 64], sizes = [8, 32], strides = [1, 1]} : vector<8x128xf32> to vector<8x32xf32>
    %1174 = arith.mulf %1172, %1173 : vector<8x32xf32>
    %1175 = arith.addf %1171, %1174 : vector<8x32xf32>
    %1176 = vector.extract_strided_slice %1168 {offsets = [0, 96], sizes = [8, 32], strides = [1, 1]} : vector<8x128xf32> to vector<8x32xf32>
    %1177 = math.tanh %1175 : vector<8x32xf32>
    %1178 = arith.mulf %1176, %1177 : vector<8x32xf32>
    %c72_764 = arith.constant 72 : index
    %c0_765 = arith.constant 0 : index
    %1179 = vector.load %arg13[%c72_764, %c0_765] : memref<128x32xf32, #tpu.memory_space<vmem>>, vector<8x32xf32>
    tpu.vector_store %arg13[%c72_764, %c0_765], %1178 {strides = array<i32>} : memref<128x32xf32, #tpu.memory_space<vmem>>, vector<8x32xf32>,
    %c80_766 = arith.constant 80 : index
    %c0_767 = arith.constant 0 : index
    %1180 = vector.load %arg11[%c80_766, %c0_767] : memref<128x128xf32, #tpu.memory_space<vmem>>, vector<8x128xf32>
    %cst_768 = arith.constant dense<0.000000e+00> : vector<8x128xf32>
    %1181 = tpu.matmul %1178, %987, %cst_768 {dimension_numbers = #tpu.dot_dimension_numbers<[1], [0], [0], [1], [0, 0, 1, 1], [], []>} : vector<8x32xf32>, vector<32x128xf32>, vector<8x128xf32> -> vector<8x128xf32>
    %1182 = arith.addf %1180, %1181 : vector<8x128xf32>
    %1183 = arith.negf %1182 : vector<8x128xf32>
    %1184 = math.exp %1183 : vector<8x128xf32>
    %cst_769 = arith.constant 1.000000e+00 : f32
    %1185 = vector.broadcast %cst_769 : f32 to vector<8x128xf32>
    %1186 = arith.addf %1185, %1184 : vector<8x128xf32>
    %1187 = arith.divf %1185, %1186 : vector<8x128xf32>
    %1188 = math.tanh %1182 : vector<8x128xf32>
    %1189 = vector.extract_strided_slice %1187 {offsets = [0, 32], sizes = [8, 32], strides = [1, 1]} : vector<8x128xf32> to vector<8x32xf32>
    %1190 = arith.mulf %1189, %1175 : vector<8x32xf32>
    %1191 = vector.extract_strided_slice %1187 {offsets = [0, 0], sizes = [8, 32], strides = [1, 1]} : vector<8x128xf32> to vector<8x32xf32>
    %1192 = vector.extract_strided_slice %1188 {offsets = [0, 64], sizes = [8, 32], strides = [1, 1]} : vector<8x128xf32> to vector<8x32xf32>
    %1193 = arith.mulf %1191, %1192 : vector<8x32xf32>
    %1194 = arith.addf %1190, %1193 : vector<8x32xf32>
    %1195 = vector.extract_strided_slice %1187 {offsets = [0, 96], sizes = [8, 32], strides = [1, 1]} : vector<8x128xf32> to vector<8x32xf32>
    %1196 = math.tanh %1194 : vector<8x32xf32>
    %1197 = arith.mulf %1195, %1196 : vector<8x32xf32>
    %c80_770 = arith.constant 80 : index
    %c0_771 = arith.constant 0 : index
    %1198 = vector.load %arg13[%c80_770, %c0_771] : memref<128x32xf32, #tpu.memory_space<vmem>>, vector<8x32xf32>
    tpu.vector_store %arg13[%c80_770, %c0_771], %1197 {strides = array<i32>} : memref<128x32xf32, #tpu.memory_space<vmem>>, vector<8x32xf32>,
    %c88_772 = arith.constant 88 : index
    %c0_773 = arith.constant 0 : index
    %1199 = vector.load %arg11[%c88_772, %c0_773] : memref<128x128xf32, #tpu.memory_space<vmem>>, vector<8x128xf32>
    %cst_774 = arith.constant dense<0.000000e+00> : vector<8x128xf32>
    %1200 = tpu.matmul %1197, %987, %cst_774 {dimension_numbers = #tpu.dot_dimension_numbers<[1], [0], [0], [1], [0, 0, 1, 1], [], []>} : vector<8x32xf32>, vector<32x128xf32>, vector<8x128xf32> -> vector<8x128xf32>
    %1201 = arith.addf %1199, %1200 : vector<8x128xf32>
    %1202 = arith.negf %1201 : vector<8x128xf32>
    %1203 = math.exp %1202 : vector<8x128xf32>
    %cst_775 = arith.constant 1.000000e+00 : f32
    %1204 = vector.broadcast %cst_775 : f32 to vector<8x128xf32>
    %1205 = arith.addf %1204, %1203 : vector<8x128xf32>
    %1206 = arith.divf %1204, %1205 : vector<8x128xf32>
    %1207 = math.tanh %1201 : vector<8x128xf32>
    %1208 = vector.extract_strided_slice %1206 {offsets = [0, 32], sizes = [8, 32], strides = [1, 1]} : vector<8x128xf32> to vector<8x32xf32>
    %1209 = arith.mulf %1208, %1194 : vector<8x32xf32>
    %1210 = vector.extract_strided_slice %1206 {offsets = [0, 0], sizes = [8, 32], strides = [1, 1]} : vector<8x128xf32> to vector<8x32xf32>
    %1211 = vector.extract_strided_slice %1207 {offsets = [0, 64], sizes = [8, 32], strides = [1, 1]} : vector<8x128xf32> to vector<8x32xf32>
    %1212 = arith.mulf %1210, %1211 : vector<8x32xf32>
    %1213 = arith.addf %1209, %1212 : vector<8x32xf32>
    %1214 = vector.extract_strided_slice %1206 {offsets = [0, 96], sizes = [8, 32], strides = [1, 1]} : vector<8x128xf32> to vector<8x32xf32>
    %1215 = math.tanh %1213 : vector<8x32xf32>
    %1216 = arith.mulf %1214, %1215 : vector<8x32xf32>
    %c88_776 = arith.constant 88 : index
    %c0_777 = arith.constant 0 : index
    %1217 = vector.load %arg13[%c88_776, %c0_777] : memref<128x32xf32, #tpu.memory_space<vmem>>, vector<8x32xf32>
    tpu.vector_store %arg13[%c88_776, %c0_777], %1216 {strides = array<i32>} : memref<128x32xf32, #tpu.memory_space<vmem>>, vector<8x32xf32>,
    %c96_778 = arith.constant 96 : index
    %c0_779 = arith.constant 0 : index
    %1218 = vector.load %arg11[%c96_778, %c0_779] : memref<128x128xf32, #tpu.memory_space<vmem>>, vector<8x128xf32>
    %cst_780 = arith.constant dense<0.000000e+00> : vector<8x128xf32>
    %1219 = tpu.matmul %1216, %987, %cst_780 {dimension_numbers = #tpu.dot_dimension_numbers<[1], [0], [0], [1], [0, 0, 1, 1], [], []>} : vector<8x32xf32>, vector<32x128xf32>, vector<8x128xf32> -> vector<8x128xf32>
    %1220 = arith.addf %1218, %1219 : vector<8x128xf32>
    %1221 = arith.negf %1220 : vector<8x128xf32>
    %1222 = math.exp %1221 : vector<8x128xf32>
    %cst_781 = arith.constant 1.000000e+00 : f32
    %1223 = vector.broadcast %cst_781 : f32 to vector<8x128xf32>
    %1224 = arith.addf %1223, %1222 : vector<8x128xf32>
    %1225 = arith.divf %1223, %1224 : vector<8x128xf32>
    %1226 = math.tanh %1220 : vector<8x128xf32>
    %1227 = vector.extract_strided_slice %1225 {offsets = [0, 32], sizes = [8, 32], strides = [1, 1]} : vector<8x128xf32> to vector<8x32xf32>
    %1228 = arith.mulf %1227, %1213 : vector<8x32xf32>
    %1229 = vector.extract_strided_slice %1225 {offsets = [0, 0], sizes = [8, 32], strides = [1, 1]} : vector<8x128xf32> to vector<8x32xf32>
    %1230 = vector.extract_strided_slice %1226 {offsets = [0, 64], sizes = [8, 32], strides = [1, 1]} : vector<8x128xf32> to vector<8x32xf32>
    %1231 = arith.mulf %1229, %1230 : vector<8x32xf32>
    %1232 = arith.addf %1228, %1231 : vector<8x32xf32>
    %1233 = vector.extract_strided_slice %1225 {offsets = [0, 96], sizes = [8, 32], strides = [1, 1]} : vector<8x128xf32> to vector<8x32xf32>
    %1234 = math.tanh %1232 : vector<8x32xf32>
    %1235 = arith.mulf %1233, %1234 : vector<8x32xf32>
    %c96_782 = arith.constant 96 : index
    %c0_783 = arith.constant 0 : index
    %1236 = vector.load %arg13[%c96_782, %c0_783] : memref<128x32xf32, #tpu.memory_space<vmem>>, vector<8x32xf32>
    tpu.vector_store %arg13[%c96_782, %c0_783], %1235 {strides = array<i32>} : memref<128x32xf32, #tpu.memory_space<vmem>>, vector<8x32xf32>,
    %c104_784 = arith.constant 104 : index
    %c0_785 = arith.constant 0 : index
    %1237 = vector.load %arg11[%c104_784, %c0_785] : memref<128x128xf32, #tpu.memory_space<vmem>>, vector<8x128xf32>
    %cst_786 = arith.constant dense<0.000000e+00> : vector<8x128xf32>
    %1238 = tpu.matmul %1235, %987, %cst_786 {dimension_numbers = #tpu.dot_dimension_numbers<[1], [0], [0], [1], [0, 0, 1, 1], [], []>} : vector<8x32xf32>, vector<32x128xf32>, vector<8x128xf32> -> vector<8x128xf32>
    %1239 = arith.addf %1237, %1238 : vector<8x128xf32>
    %1240 = arith.negf %1239 : vector<8x128xf32>
    %1241 = math.exp %1240 : vector<8x128xf32>
    %cst_787 = arith.constant 1.000000e+00 : f32
    %1242 = vector.broadcast %cst_787 : f32 to vector<8x128xf32>
    %1243 = arith.addf %1242, %1241 : vector<8x128xf32>
    %1244 = arith.divf %1242, %1243 : vector<8x128xf32>
    %1245 = math.tanh %1239 : vector<8x128xf32>
    %1246 = vector.extract_strided_slice %1244 {offsets = [0, 32], sizes = [8, 32], strides = [1, 1]} : vector<8x128xf32> to vector<8x32xf32>
    %1247 = arith.mulf %1246, %1232 : vector<8x32xf32>
    %1248 = vector.extract_strided_slice %1244 {offsets = [0, 0], sizes = [8, 32], strides = [1, 1]} : vector<8x128xf32> to vector<8x32xf32>
    %1249 = vector.extract_strided_slice %1245 {offsets = [0, 64], sizes = [8, 32], strides = [1, 1]} : vector<8x128xf32> to vector<8x32xf32>
    %1250 = arith.mulf %1248, %1249 : vector<8x32xf32>
    %1251 = arith.addf %1247, %1250 : vector<8x32xf32>
    %1252 = vector.extract_strided_slice %1244 {offsets = [0, 96], sizes = [8, 32], strides = [1, 1]} : vector<8x128xf32> to vector<8x32xf32>
    %1253 = math.tanh %1251 : vector<8x32xf32>
    %1254 = arith.mulf %1252, %1253 : vector<8x32xf32>
    %c104_788 = arith.constant 104 : index
    %c0_789 = arith.constant 0 : index
    %1255 = vector.load %arg13[%c104_788, %c0_789] : memref<128x32xf32, #tpu.memory_space<vmem>>, vector<8x32xf32>
    tpu.vector_store %arg13[%c104_788, %c0_789], %1254 {strides = array<i32>} : memref<128x32xf32, #tpu.memory_space<vmem>>, vector<8x32xf32>,
    %c112_790 = arith.constant 112 : index
    %c0_791 = arith.constant 0 : index
    %1256 = vector.load %arg11[%c112_790, %c0_791] : memref<128x128xf32, #tpu.memory_space<vmem>>, vector<8x128xf32>
    %cst_792 = arith.constant dense<0.000000e+00> : vector<8x128xf32>
    %1257 = tpu.matmul %1254, %987, %cst_792 {dimension_numbers = #tpu.dot_dimension_numbers<[1], [0], [0], [1], [0, 0, 1, 1], [], []>} : vector<8x32xf32>, vector<32x128xf32>, vector<8x128xf32> -> vector<8x128xf32>
    %1258 = arith.addf %1256, %1257 : vector<8x128xf32>
    %1259 = arith.negf %1258 : vector<8x128xf32>
    %1260 = math.exp %1259 : vector<8x128xf32>
    %cst_793 = arith.constant 1.000000e+00 : f32
    %1261 = vector.broadcast %cst_793 : f32 to vector<8x128xf32>
    %1262 = arith.addf %1261, %1260 : vector<8x128xf32>
    %1263 = arith.divf %1261, %1262 : vector<8x128xf32>
    %1264 = math.tanh %1258 : vector<8x128xf32>
    %1265 = vector.extract_strided_slice %1263 {offsets = [0, 32], sizes = [8, 32], strides = [1, 1]} : vector<8x128xf32> to vector<8x32xf32>
    %1266 = arith.mulf %1265, %1251 : vector<8x32xf32>
    %1267 = vector.extract_strided_slice %1263 {offsets = [0, 0], sizes = [8, 32], strides = [1, 1]} : vector<8x128xf32> to vector<8x32xf32>
    %1268 = vector.extract_strided_slice %1264 {offsets = [0, 64], sizes = [8, 32], strides = [1, 1]} : vector<8x128xf32> to vector<8x32xf32>
    %1269 = arith.mulf %1267, %1268 : vector<8x32xf32>
    %1270 = arith.addf %1266, %1269 : vector<8x32xf32>
    %1271 = vector.extract_strided_slice %1263 {offsets = [0, 96], sizes = [8, 32], strides = [1, 1]} : vector<8x128xf32> to vector<8x32xf32>
    %1272 = math.tanh %1270 : vector<8x32xf32>
    %1273 = arith.mulf %1271, %1272 : vector<8x32xf32>
    %c112_794 = arith.constant 112 : index
    %c0_795 = arith.constant 0 : index
    %1274 = vector.load %arg13[%c112_794, %c0_795] : memref<128x32xf32, #tpu.memory_space<vmem>>, vector<8x32xf32>
    tpu.vector_store %arg13[%c112_794, %c0_795], %1273 {strides = array<i32>} : memref<128x32xf32, #tpu.memory_space<vmem>>, vector<8x32xf32>,
    %c120_796 = arith.constant 120 : index
    %c0_797 = arith.constant 0 : index
    %1275 = vector.load %arg11[%c120_796, %c0_797] : memref<128x128xf32, #tpu.memory_space<vmem>>, vector<8x128xf32>
    %cst_798 = arith.constant dense<0.000000e+00> : vector<8x128xf32>
    %1276 = tpu.matmul %1273, %987, %cst_798 {dimension_numbers = #tpu.dot_dimension_numbers<[1], [0], [0], [1], [0, 0, 1, 1], [], []>} : vector<8x32xf32>, vector<32x128xf32>, vector<8x128xf32> -> vector<8x128xf32>
    %1277 = arith.addf %1275, %1276 : vector<8x128xf32>
    %1278 = arith.negf %1277 : vector<8x128xf32>
    %1279 = math.exp %1278 : vector<8x128xf32>
    %cst_799 = arith.constant 1.000000e+00 : f32
    %1280 = vector.broadcast %cst_799 : f32 to vector<8x128xf32>
    %1281 = arith.addf %1280, %1279 : vector<8x128xf32>
    %1282 = arith.divf %1280, %1281 : vector<8x128xf32>
    %1283 = math.tanh %1277 : vector<8x128xf32>
    %1284 = vector.extract_strided_slice %1282 {offsets = [0, 32], sizes = [8, 32], strides = [1, 1]} : vector<8x128xf32> to vector<8x32xf32>
    %1285 = arith.mulf %1284, %1270 : vector<8x32xf32>
    %1286 = vector.extract_strided_slice %1282 {offsets = [0, 0], sizes = [8, 32], strides = [1, 1]} : vector<8x128xf32> to vector<8x32xf32>
    %1287 = vector.extract_strided_slice %1283 {offsets = [0, 64], sizes = [8, 32], strides = [1, 1]} : vector<8x128xf32> to vector<8x32xf32>
    %1288 = arith.mulf %1286, %1287 : vector<8x32xf32>
    %1289 = arith.addf %1285, %1288 : vector<8x32xf32>
    %1290 = vector.extract_strided_slice %1282 {offsets = [0, 96], sizes = [8, 32], strides = [1, 1]} : vector<8x128xf32> to vector<8x32xf32>
    %1291 = math.tanh %1289 : vector<8x32xf32>
    %1292 = arith.mulf %1290, %1291 : vector<8x32xf32>
    %c120_800 = arith.constant 120 : index
    %c0_801 = arith.constant 0 : index
    %1293 = vector.load %arg13[%c120_800, %c0_801] : memref<128x32xf32, #tpu.memory_space<vmem>>, vector<8x32xf32>
    tpu.vector_store %arg13[%c120_800, %c0_801], %1292 {strides = array<i32>} : memref<128x32xf32, #tpu.memory_space<vmem>>, vector<8x32xf32>,
    %c0_802 = arith.constant 0 : index
    %c0_803 = arith.constant 0 : index
    %1294 = vector.load %arg13[%c0_802, %c0_803] : memref<128x32xf32, #tpu.memory_space<vmem>>, vector<8x32xf32>
    %c120_804 = arith.constant 120 : index
    %c0_805 = arith.constant 0 : index
    %1295 = vector.load %arg13[%c120_804, %c0_805] : memref<128x32xf32, #tpu.memory_space<vmem>>, vector<8x32xf32>
    %1296 = arith.select %21, %1294, %1295 : vector<8x32xi1>, vector<8x32xf32>
    %c0_806 = arith.constant 0 : index
    %c0_807 = arith.constant 0 : index
    %1297 = vector.load %arg12[%c0_806, %c0_807] : memref<128x32xf32, #tpu.memory_space<vmem>>, vector<8x32xf32>
    tpu.vector_store %arg12[%c0_806, %c0_807], %1296 {strides = array<i32>} : memref<128x32xf32, #tpu.memory_space<vmem>>, vector<8x32xf32>,
    %c8_808 = arith.constant 8 : index
    %c0_809 = arith.constant 0 : index
    %1298 = vector.load %arg13[%c8_808, %c0_809] : memref<128x32xf32, #tpu.memory_space<vmem>>, vector<8x32xf32>
    %c112_810 = arith.constant 112 : index
    %c0_811 = arith.constant 0 : index
    %1299 = vector.load %arg13[%c112_810, %c0_811] : memref<128x32xf32, #tpu.memory_space<vmem>>, vector<8x32xf32>
    %1300 = arith.select %21, %1298, %1299 : vector<8x32xi1>, vector<8x32xf32>
    %c8_812 = arith.constant 8 : index
    %c0_813 = arith.constant 0 : index
    %1301 = vector.load %arg12[%c8_812, %c0_813] : memref<128x32xf32, #tpu.memory_space<vmem>>, vector<8x32xf32>
    tpu.vector_store %arg12[%c8_812, %c0_813], %1300 {strides = array<i32>} : memref<128x32xf32, #tpu.memory_space<vmem>>, vector<8x32xf32>,
    %c16_814 = arith.constant 16 : index
    %c0_815 = arith.constant 0 : index
    %1302 = vector.load %arg13[%c16_814, %c0_815] : memref<128x32xf32, #tpu.memory_space<vmem>>, vector<8x32xf32>
    %c104_816 = arith.constant 104 : index
    %c0_817 = arith.constant 0 : index
    %1303 = vector.load %arg13[%c104_816, %c0_817] : memref<128x32xf32, #tpu.memory_space<vmem>>, vector<8x32xf32>
    %1304 = arith.select %21, %1302, %1303 : vector<8x32xi1>, vector<8x32xf32>
    %c16_818 = arith.constant 16 : index
    %c0_819 = arith.constant 0 : index
    %1305 = vector.load %arg12[%c16_818, %c0_819] : memref<128x32xf32, #tpu.memory_space<vmem>>, vector<8x32xf32>
    tpu.vector_store %arg12[%c16_818, %c0_819], %1304 {strides = array<i32>} : memref<128x32xf32, #tpu.memory_space<vmem>>, vector<8x32xf32>,
    %c24_820 = arith.constant 24 : index
    %c0_821 = arith.constant 0 : index
    %1306 = vector.load %arg13[%c24_820, %c0_821] : memref<128x32xf32, #tpu.memory_space<vmem>>, vector<8x32xf32>
    %c96_822 = arith.constant 96 : index
    %c0_823 = arith.constant 0 : index
    %1307 = vector.load %arg13[%c96_822, %c0_823] : memref<128x32xf32, #tpu.memory_space<vmem>>, vector<8x32xf32>
    %1308 = arith.select %21, %1306, %1307 : vector<8x32xi1>, vector<8x32xf32>
    %c24_824 = arith.constant 24 : index
    %c0_825 = arith.constant 0 : index
    %1309 = vector.load %arg12[%c24_824, %c0_825] : memref<128x32xf32, #tpu.memory_space<vmem>>, vector<8x32xf32>
    tpu.vector_store %arg12[%c24_824, %c0_825], %1308 {strides = array<i32>} : memref<128x32xf32, #tpu.memory_space<vmem>>, vector<8x32xf32>,
    %c32_826 = arith.constant 32 : index
    %c0_827 = arith.constant 0 : index
    %1310 = vector.load %arg13[%c32_826, %c0_827] : memref<128x32xf32, #tpu.memory_space<vmem>>, vector<8x32xf32>
    %c88_828 = arith.constant 88 : index
    %c0_829 = arith.constant 0 : index
    %1311 = vector.load %arg13[%c88_828, %c0_829] : memref<128x32xf32, #tpu.memory_space<vmem>>, vector<8x32xf32>
    %1312 = arith.select %21, %1310, %1311 : vector<8x32xi1>, vector<8x32xf32>
    %c32_830 = arith.constant 32 : index
    %c0_831 = arith.constant 0 : index
    %1313 = vector.load %arg12[%c32_830, %c0_831] : memref<128x32xf32, #tpu.memory_space<vmem>>, vector<8x32xf32>
    tpu.vector_store %arg12[%c32_830, %c0_831], %1312 {strides = array<i32>} : memref<128x32xf32, #tpu.memory_space<vmem>>, vector<8x32xf32>,
    %c40_832 = arith.constant 40 : index
    %c0_833 = arith.constant 0 : index
    %1314 = vector.load %arg13[%c40_832, %c0_833] : memref<128x32xf32, #tpu.memory_space<vmem>>, vector<8x32xf32>
    %c80_834 = arith.constant 80 : index
    %c0_835 = arith.constant 0 : index
    %1315 = vector.load %arg13[%c80_834, %c0_835] : memref<128x32xf32, #tpu.memory_space<vmem>>, vector<8x32xf32>
    %1316 = arith.select %21, %1314, %1315 : vector<8x32xi1>, vector<8x32xf32>
    %c40_836 = arith.constant 40 : index
    %c0_837 = arith.constant 0 : index
    %1317 = vector.load %arg12[%c40_836, %c0_837] : memref<128x32xf32, #tpu.memory_space<vmem>>, vector<8x32xf32>
    tpu.vector_store %arg12[%c40_836, %c0_837], %1316 {strides = array<i32>} : memref<128x32xf32, #tpu.memory_space<vmem>>, vector<8x32xf32>,
    %c48_838 = arith.constant 48 : index
    %c0_839 = arith.constant 0 : index
    %1318 = vector.load %arg13[%c48_838, %c0_839] : memref<128x32xf32, #tpu.memory_space<vmem>>, vector<8x32xf32>
    %c72_840 = arith.constant 72 : index
    %c0_841 = arith.constant 0 : index
    %1319 = vector.load %arg13[%c72_840, %c0_841] : memref<128x32xf32, #tpu.memory_space<vmem>>, vector<8x32xf32>
    %1320 = arith.select %21, %1318, %1319 : vector<8x32xi1>, vector<8x32xf32>
    %c48_842 = arith.constant 48 : index
    %c0_843 = arith.constant 0 : index
    %1321 = vector.load %arg12[%c48_842, %c0_843] : memref<128x32xf32, #tpu.memory_space<vmem>>, vector<8x32xf32>
    tpu.vector_store %arg12[%c48_842, %c0_843], %1320 {strides = array<i32>} : memref<128x32xf32, #tpu.memory_space<vmem>>, vector<8x32xf32>,
    %c56_844 = arith.constant 56 : index
    %c0_845 = arith.constant 0 : index
    %1322 = vector.load %arg13[%c56_844, %c0_845] : memref<128x32xf32, #tpu.memory_space<vmem>>, vector<8x32xf32>
    %c64_846 = arith.constant 64 : index
    %c0_847 = arith.constant 0 : index
    %1323 = vector.load %arg13[%c64_846, %c0_847] : memref<128x32xf32, #tpu.memory_space<vmem>>, vector<8x32xf32>
    %1324 = arith.select %21, %1322, %1323 : vector<8x32xi1>, vector<8x32xf32>
    %c56_848 = arith.constant 56 : index
    %c0_849 = arith.constant 0 : index
    %1325 = vector.load %arg12[%c56_848, %c0_849] : memref<128x32xf32, #tpu.memory_space<vmem>>, vector<8x32xf32>
    tpu.vector_store %arg12[%c56_848, %c0_849], %1324 {strides = array<i32>} : memref<128x32xf32, #tpu.memory_space<vmem>>, vector<8x32xf32>,
    %c64_850 = arith.constant 64 : index
    %c0_851 = arith.constant 0 : index
    %1326 = vector.load %arg13[%c64_850, %c0_851] : memref<128x32xf32, #tpu.memory_space<vmem>>, vector<8x32xf32>
    %c56_852 = arith.constant 56 : index
    %c0_853 = arith.constant 0 : index
    %1327 = vector.load %arg13[%c56_852, %c0_853] : memref<128x32xf32, #tpu.memory_space<vmem>>, vector<8x32xf32>
    %1328 = arith.select %21, %1326, %1327 : vector<8x32xi1>, vector<8x32xf32>
    %c64_854 = arith.constant 64 : index
    %c0_855 = arith.constant 0 : index
    %1329 = vector.load %arg12[%c64_854, %c0_855] : memref<128x32xf32, #tpu.memory_space<vmem>>, vector<8x32xf32>
    tpu.vector_store %arg12[%c64_854, %c0_855], %1328 {strides = array<i32>} : memref<128x32xf32, #tpu.memory_space<vmem>>, vector<8x32xf32>,
    %c72_856 = arith.constant 72 : index
    %c0_857 = arith.constant 0 : index
    %1330 = vector.load %arg13[%c72_856, %c0_857] : memref<128x32xf32, #tpu.memory_space<vmem>>, vector<8x32xf32>
    %c48_858 = arith.constant 48 : index
    %c0_859 = arith.constant 0 : index
    %1331 = vector.load %arg13[%c48_858, %c0_859] : memref<128x32xf32, #tpu.memory_space<vmem>>, vector<8x32xf32>
    %1332 = arith.select %21, %1330, %1331 : vector<8x32xi1>, vector<8x32xf32>
    %c72_860 = arith.constant 72 : index
    %c0_861 = arith.constant 0 : index
    %1333 = vector.load %arg12[%c72_860, %c0_861] : memref<128x32xf32, #tpu.memory_space<vmem>>, vector<8x32xf32>
    tpu.vector_store %arg12[%c72_860, %c0_861], %1332 {strides = array<i32>} : memref<128x32xf32, #tpu.memory_space<vmem>>, vector<8x32xf32>,
    %c80_862 = arith.constant 80 : index
    %c0_863 = arith.constant 0 : index
    %1334 = vector.load %arg13[%c80_862, %c0_863] : memref<128x32xf32, #tpu.memory_space<vmem>>, vector<8x32xf32>
    %c40_864 = arith.constant 40 : index
    %c0_865 = arith.constant 0 : index
    %1335 = vector.load %arg13[%c40_864, %c0_865] : memref<128x32xf32, #tpu.memory_space<vmem>>, vector<8x32xf32>
    %1336 = arith.select %21, %1334, %1335 : vector<8x32xi1>, vector<8x32xf32>
    %c80_866 = arith.constant 80 : index
    %c0_867 = arith.constant 0 : index
    %1337 = vector.load %arg12[%c80_866, %c0_867] : memref<128x32xf32, #tpu.memory_space<vmem>>, vector<8x32xf32>
    tpu.vector_store %arg12[%c80_866, %c0_867], %1336 {strides = array<i32>} : memref<128x32xf32, #tpu.memory_space<vmem>>, vector<8x32xf32>,
    %c88_868 = arith.constant 88 : index
    %c0_869 = arith.constant 0 : index
    %1338 = vector.load %arg13[%c88_868, %c0_869] : memref<128x32xf32, #tpu.memory_space<vmem>>, vector<8x32xf32>
    %c32_870 = arith.constant 32 : index
    %c0_871 = arith.constant 0 : index
    %1339 = vector.load %arg13[%c32_870, %c0_871] : memref<128x32xf32, #tpu.memory_space<vmem>>, vector<8x32xf32>
    %1340 = arith.select %21, %1338, %1339 : vector<8x32xi1>, vector<8x32xf32>
    %c88_872 = arith.constant 88 : index
    %c0_873 = arith.constant 0 : index
    %1341 = vector.load %arg12[%c88_872, %c0_873] : memref<128x32xf32, #tpu.memory_space<vmem>>, vector<8x32xf32>
    tpu.vector_store %arg12[%c88_872, %c0_873], %1340 {strides = array<i32>} : memref<128x32xf32, #tpu.memory_space<vmem>>, vector<8x32xf32>,
    %c96_874 = arith.constant 96 : index
    %c0_875 = arith.constant 0 : index
    %1342 = vector.load %arg13[%c96_874, %c0_875] : memref<128x32xf32, #tpu.memory_space<vmem>>, vector<8x32xf32>
    %c24_876 = arith.constant 24 : index
    %c0_877 = arith.constant 0 : index
    %1343 = vector.load %arg13[%c24_876, %c0_877] : memref<128x32xf32, #tpu.memory_space<vmem>>, vector<8x32xf32>
    %1344 = arith.select %21, %1342, %1343 : vector<8x32xi1>, vector<8x32xf32>
    %c96_878 = arith.constant 96 : index
    %c0_879 = arith.constant 0 : index
    %1345 = vector.load %arg12[%c96_878, %c0_879] : memref<128x32xf32, #tpu.memory_space<vmem>>, vector<8x32xf32>
    tpu.vector_store %arg12[%c96_878, %c0_879], %1344 {strides = array<i32>} : memref<128x32xf32, #tpu.memory_space<vmem>>, vector<8x32xf32>,
    %c104_880 = arith.constant 104 : index
    %c0_881 = arith.constant 0 : index
    %1346 = vector.load %arg13[%c104_880, %c0_881] : memref<128x32xf32, #tpu.memory_space<vmem>>, vector<8x32xf32>
    %c16_882 = arith.constant 16 : index
    %c0_883 = arith.constant 0 : index
    %1347 = vector.load %arg13[%c16_882, %c0_883] : memref<128x32xf32, #tpu.memory_space<vmem>>, vector<8x32xf32>
    %1348 = arith.select %21, %1346, %1347 : vector<8x32xi1>, vector<8x32xf32>
    %c104_884 = arith.constant 104 : index
    %c0_885 = arith.constant 0 : index
    %1349 = vector.load %arg12[%c104_884, %c0_885] : memref<128x32xf32, #tpu.memory_space<vmem>>, vector<8x32xf32>
    tpu.vector_store %arg12[%c104_884, %c0_885], %1348 {strides = array<i32>} : memref<128x32xf32, #tpu.memory_space<vmem>>, vector<8x32xf32>,
    %c112_886 = arith.constant 112 : index
    %c0_887 = arith.constant 0 : index
    %1350 = vector.load %arg13[%c112_886, %c0_887] : memref<128x32xf32, #tpu.memory_space<vmem>>, vector<8x32xf32>
    %c8_888 = arith.constant 8 : index
    %c0_889 = arith.constant 0 : index
    %1351 = vector.load %arg13[%c8_888, %c0_889] : memref<128x32xf32, #tpu.memory_space<vmem>>, vector<8x32xf32>
    %1352 = arith.select %21, %1350, %1351 : vector<8x32xi1>, vector<8x32xf32>
    %c112_890 = arith.constant 112 : index
    %c0_891 = arith.constant 0 : index
    %1353 = vector.load %arg12[%c112_890, %c0_891] : memref<128x32xf32, #tpu.memory_space<vmem>>, vector<8x32xf32>
    tpu.vector_store %arg12[%c112_890, %c0_891], %1352 {strides = array<i32>} : memref<128x32xf32, #tpu.memory_space<vmem>>, vector<8x32xf32>,
    %c120_892 = arith.constant 120 : index
    %c0_893 = arith.constant 0 : index
    %1354 = vector.load %arg13[%c120_892, %c0_893] : memref<128x32xf32, #tpu.memory_space<vmem>>, vector<8x32xf32>
    %c0_894 = arith.constant 0 : index
    %c0_895 = arith.constant 0 : index
    %1355 = vector.load %arg13[%c0_894, %c0_895] : memref<128x32xf32, #tpu.memory_space<vmem>>, vector<8x32xf32>
    %1356 = arith.select %21, %1354, %1355 : vector<8x32xi1>, vector<8x32xf32>
    %c120_896 = arith.constant 120 : index
    %c0_897 = arith.constant 0 : index
    %1357 = vector.load %arg12[%c120_896, %c0_897] : memref<128x32xf32, #tpu.memory_space<vmem>>, vector<8x32xf32>
    tpu.vector_store %arg12[%c120_896, %c0_897], %1356 {strides = array<i32>} : memref<128x32xf32, #tpu.memory_space<vmem>>, vector<8x32xf32>,
    %c0_898 = arith.constant 0 : index
    %c0_899 = arith.constant 0 : index
    %1358 = vector.load %arg12[%c0_898, %c0_899] : memref<128x32xf32, #tpu.memory_space<vmem>>, vector<128x32xf32>
    %c3 = arith.constant 3 : index
    %c0_900 = arith.constant 0 : index
    %c0_901 = arith.constant 0 : index
    %1359 = vector.load %arg2[%c3, %c0_900, %c0_901] : memref<4x32x128xf32, #tpu.memory_space<vmem>>, vector<1x32x128xf32>
    %1360 = vector.shape_cast %1359 : vector<1x32x128xf32> to vector<32x128xf32>
    %cst_902 = arith.constant dense<0.000000e+00> : vector<128x128xf32>
    %1361 = tpu.matmul %1358, %1360, %cst_902 {dimension_numbers = #tpu.dot_dimension_numbers<[1], [0], [0], [1], [0, 0, 1, 1], [], []>} : vector<128x32xf32>, vector<32x128xf32>, vector<128x128xf32> -> vector<128x128xf32>
    %c3_903 = arith.constant 3 : index
    %c0_904 = arith.constant 0 : index
    %c0_905 = arith.constant 0 : index
    %1362 = vector.load %arg4[%c3_903, %c0_904, %c0_905] : memref<4x1x128xf32, #tpu.memory_space<vmem>>, vector<1x1x128xf32>
    %1363 = vector.shape_cast %1362 : vector<1x1x128xf32> to vector<1x128xf32>
    %1364 = vector.broadcast %1363 : vector<1x128xf32> to vector<128x128xf32>
    %1365 = arith.addf %1361, %1364 : vector<128x128xf32>
    %c0_906 = arith.constant 0 : index
    %c0_907 = arith.constant 0 : index
    %1366 = vector.load %arg10[%c0_906, %c0_907] : memref<128x128xf32, #tpu.memory_space<vmem>>, vector<128x128xf32>
    tpu.vector_store %arg10[%c0_906, %c0_907], %1365 {strides = array<i32>} : memref<128x128xf32, #tpu.memory_space<vmem>>, vector<128x128xf32>,
    %c0_908 = arith.constant 0 : index
    %c0_909 = arith.constant 0 : index
    %1367 = vector.load %arg10[%c0_908, %c0_909] : memref<128x128xf32, #tpu.memory_space<vmem>>, vector<8x128xf32>
    %c120_910 = arith.constant 120 : index
    %c0_911 = arith.constant 0 : index
    %1368 = vector.load %arg10[%c120_910, %c0_911] : memref<128x128xf32, #tpu.memory_space<vmem>>, vector<8x128xf32>
    %1369 = arith.select %18, %1367, %1368 : vector<8x128xi1>, vector<8x128xf32>
    %c0_912 = arith.constant 0 : index
    %c0_913 = arith.constant 0 : index
    %1370 = vector.load %arg11[%c0_912, %c0_913] : memref<128x128xf32, #tpu.memory_space<vmem>>, vector<8x128xf32>
    tpu.vector_store %arg11[%c0_912, %c0_913], %1369 {strides = array<i32>} : memref<128x128xf32, #tpu.memory_space<vmem>>, vector<8x128xf32>,
    %c8_914 = arith.constant 8 : index
    %c0_915 = arith.constant 0 : index
    %1371 = vector.load %arg10[%c8_914, %c0_915] : memref<128x128xf32, #tpu.memory_space<vmem>>, vector<8x128xf32>
    %c112_916 = arith.constant 112 : index
    %c0_917 = arith.constant 0 : index
    %1372 = vector.load %arg10[%c112_916, %c0_917] : memref<128x128xf32, #tpu.memory_space<vmem>>, vector<8x128xf32>
    %1373 = arith.select %18, %1371, %1372 : vector<8x128xi1>, vector<8x128xf32>
    %c8_918 = arith.constant 8 : index
    %c0_919 = arith.constant 0 : index
    %1374 = vector.load %arg11[%c8_918, %c0_919] : memref<128x128xf32, #tpu.memory_space<vmem>>, vector<8x128xf32>
    tpu.vector_store %arg11[%c8_918, %c0_919], %1373 {strides = array<i32>} : memref<128x128xf32, #tpu.memory_space<vmem>>, vector<8x128xf32>,
    %c16_920 = arith.constant 16 : index
    %c0_921 = arith.constant 0 : index
    %1375 = vector.load %arg10[%c16_920, %c0_921] : memref<128x128xf32, #tpu.memory_space<vmem>>, vector<8x128xf32>
    %c104_922 = arith.constant 104 : index
    %c0_923 = arith.constant 0 : index
    %1376 = vector.load %arg10[%c104_922, %c0_923] : memref<128x128xf32, #tpu.memory_space<vmem>>, vector<8x128xf32>
    %1377 = arith.select %18, %1375, %1376 : vector<8x128xi1>, vector<8x128xf32>
    %c16_924 = arith.constant 16 : index
    %c0_925 = arith.constant 0 : index
    %1378 = vector.load %arg11[%c16_924, %c0_925] : memref<128x128xf32, #tpu.memory_space<vmem>>, vector<8x128xf32>
    tpu.vector_store %arg11[%c16_924, %c0_925], %1377 {strides = array<i32>} : memref<128x128xf32, #tpu.memory_space<vmem>>, vector<8x128xf32>,
    %c24_926 = arith.constant 24 : index
    %c0_927 = arith.constant 0 : index
    %1379 = vector.load %arg10[%c24_926, %c0_927] : memref<128x128xf32, #tpu.memory_space<vmem>>, vector<8x128xf32>
    %c96_928 = arith.constant 96 : index
    %c0_929 = arith.constant 0 : index
    %1380 = vector.load %arg10[%c96_928, %c0_929] : memref<128x128xf32, #tpu.memory_space<vmem>>, vector<8x128xf32>
    %1381 = arith.select %18, %1379, %1380 : vector<8x128xi1>, vector<8x128xf32>
    %c24_930 = arith.constant 24 : index
    %c0_931 = arith.constant 0 : index
    %1382 = vector.load %arg11[%c24_930, %c0_931] : memref<128x128xf32, #tpu.memory_space<vmem>>, vector<8x128xf32>
    tpu.vector_store %arg11[%c24_930, %c0_931], %1381 {strides = array<i32>} : memref<128x128xf32, #tpu.memory_space<vmem>>, vector<8x128xf32>,
    %c32_932 = arith.constant 32 : index
    %c0_933 = arith.constant 0 : index
    %1383 = vector.load %arg10[%c32_932, %c0_933] : memref<128x128xf32, #tpu.memory_space<vmem>>, vector<8x128xf32>
    %c88_934 = arith.constant 88 : index
    %c0_935 = arith.constant 0 : index
    %1384 = vector.load %arg10[%c88_934, %c0_935] : memref<128x128xf32, #tpu.memory_space<vmem>>, vector<8x128xf32>
    %1385 = arith.select %18, %1383, %1384 : vector<8x128xi1>, vector<8x128xf32>
    %c32_936 = arith.constant 32 : index
    %c0_937 = arith.constant 0 : index
    %1386 = vector.load %arg11[%c32_936, %c0_937] : memref<128x128xf32, #tpu.memory_space<vmem>>, vector<8x128xf32>
    tpu.vector_store %arg11[%c32_936, %c0_937], %1385 {strides = array<i32>} : memref<128x128xf32, #tpu.memory_space<vmem>>, vector<8x128xf32>,
    %c40_938 = arith.constant 40 : index
    %c0_939 = arith.constant 0 : index
    %1387 = vector.load %arg10[%c40_938, %c0_939] : memref<128x128xf32, #tpu.memory_space<vmem>>, vector<8x128xf32>
    %c80_940 = arith.constant 80 : index
    %c0_941 = arith.constant 0 : index
    %1388 = vector.load %arg10[%c80_940, %c0_941] : memref<128x128xf32, #tpu.memory_space<vmem>>, vector<8x128xf32>
    %1389 = arith.select %18, %1387, %1388 : vector<8x128xi1>, vector<8x128xf32>
    %c40_942 = arith.constant 40 : index
    %c0_943 = arith.constant 0 : index
    %1390 = vector.load %arg11[%c40_942, %c0_943] : memref<128x128xf32, #tpu.memory_space<vmem>>, vector<8x128xf32>
    tpu.vector_store %arg11[%c40_942, %c0_943], %1389 {strides = array<i32>} : memref<128x128xf32, #tpu.memory_space<vmem>>, vector<8x128xf32>,
    %c48_944 = arith.constant 48 : index
    %c0_945 = arith.constant 0 : index
    %1391 = vector.load %arg10[%c48_944, %c0_945] : memref<128x128xf32, #tpu.memory_space<vmem>>, vector<8x128xf32>
    %c72_946 = arith.constant 72 : index
    %c0_947 = arith.constant 0 : index
    %1392 = vector.load %arg10[%c72_946, %c0_947] : memref<128x128xf32, #tpu.memory_space<vmem>>, vector<8x128xf32>
    %1393 = arith.select %18, %1391, %1392 : vector<8x128xi1>, vector<8x128xf32>
    %c48_948 = arith.constant 48 : index
    %c0_949 = arith.constant 0 : index
    %1394 = vector.load %arg11[%c48_948, %c0_949] : memref<128x128xf32, #tpu.memory_space<vmem>>, vector<8x128xf32>
    tpu.vector_store %arg11[%c48_948, %c0_949], %1393 {strides = array<i32>} : memref<128x128xf32, #tpu.memory_space<vmem>>, vector<8x128xf32>,
    %c56_950 = arith.constant 56 : index
    %c0_951 = arith.constant 0 : index
    %1395 = vector.load %arg10[%c56_950, %c0_951] : memref<128x128xf32, #tpu.memory_space<vmem>>, vector<8x128xf32>
    %c64_952 = arith.constant 64 : index
    %c0_953 = arith.constant 0 : index
    %1396 = vector.load %arg10[%c64_952, %c0_953] : memref<128x128xf32, #tpu.memory_space<vmem>>, vector<8x128xf32>
    %1397 = arith.select %18, %1395, %1396 : vector<8x128xi1>, vector<8x128xf32>
    %c56_954 = arith.constant 56 : index
    %c0_955 = arith.constant 0 : index
    %1398 = vector.load %arg11[%c56_954, %c0_955] : memref<128x128xf32, #tpu.memory_space<vmem>>, vector<8x128xf32>
    tpu.vector_store %arg11[%c56_954, %c0_955], %1397 {strides = array<i32>} : memref<128x128xf32, #tpu.memory_space<vmem>>, vector<8x128xf32>,
    %c64_956 = arith.constant 64 : index
    %c0_957 = arith.constant 0 : index
    %1399 = vector.load %arg10[%c64_956, %c0_957] : memref<128x128xf32, #tpu.memory_space<vmem>>, vector<8x128xf32>
    %c56_958 = arith.constant 56 : index
    %c0_959 = arith.constant 0 : index
    %1400 = vector.load %arg10[%c56_958, %c0_959] : memref<128x128xf32, #tpu.memory_space<vmem>>, vector<8x128xf32>
    %1401 = arith.select %18, %1399, %1400 : vector<8x128xi1>, vector<8x128xf32>
    %c64_960 = arith.constant 64 : index
    %c0_961 = arith.constant 0 : index
    %1402 = vector.load %arg11[%c64_960, %c0_961] : memref<128x128xf32, #tpu.memory_space<vmem>>, vector<8x128xf32>
    tpu.vector_store %arg11[%c64_960, %c0_961], %1401 {strides = array<i32>} : memref<128x128xf32, #tpu.memory_space<vmem>>, vector<8x128xf32>,
    %c72_962 = arith.constant 72 : index
    %c0_963 = arith.constant 0 : index
    %1403 = vector.load %arg10[%c72_962, %c0_963] : memref<128x128xf32, #tpu.memory_space<vmem>>, vector<8x128xf32>
    %c48_964 = arith.constant 48 : index
    %c0_965 = arith.constant 0 : index
    %1404 = vector.load %arg10[%c48_964, %c0_965] : memref<128x128xf32, #tpu.memory_space<vmem>>, vector<8x128xf32>
    %1405 = arith.select %18, %1403, %1404 : vector<8x128xi1>, vector<8x128xf32>
    %c72_966 = arith.constant 72 : index
    %c0_967 = arith.constant 0 : index
    %1406 = vector.load %arg11[%c72_966, %c0_967] : memref<128x128xf32, #tpu.memory_space<vmem>>, vector<8x128xf32>
    tpu.vector_store %arg11[%c72_966, %c0_967], %1405 {strides = array<i32>} : memref<128x128xf32, #tpu.memory_space<vmem>>, vector<8x128xf32>,
    %c80_968 = arith.constant 80 : index
    %c0_969 = arith.constant 0 : index
    %1407 = vector.load %arg10[%c80_968, %c0_969] : memref<128x128xf32, #tpu.memory_space<vmem>>, vector<8x128xf32>
    %c40_970 = arith.constant 40 : index
    %c0_971 = arith.constant 0 : index
    %1408 = vector.load %arg10[%c40_970, %c0_971] : memref<128x128xf32, #tpu.memory_space<vmem>>, vector<8x128xf32>
    %1409 = arith.select %18, %1407, %1408 : vector<8x128xi1>, vector<8x128xf32>
    %c80_972 = arith.constant 80 : index
    %c0_973 = arith.constant 0 : index
    %1410 = vector.load %arg11[%c80_972, %c0_973] : memref<128x128xf32, #tpu.memory_space<vmem>>, vector<8x128xf32>
    tpu.vector_store %arg11[%c80_972, %c0_973], %1409 {strides = array<i32>} : memref<128x128xf32, #tpu.memory_space<vmem>>, vector<8x128xf32>,
    %c88_974 = arith.constant 88 : index
    %c0_975 = arith.constant 0 : index
    %1411 = vector.load %arg10[%c88_974, %c0_975] : memref<128x128xf32, #tpu.memory_space<vmem>>, vector<8x128xf32>
    %c32_976 = arith.constant 32 : index
    %c0_977 = arith.constant 0 : index
    %1412 = vector.load %arg10[%c32_976, %c0_977] : memref<128x128xf32, #tpu.memory_space<vmem>>, vector<8x128xf32>
    %1413 = arith.select %18, %1411, %1412 : vector<8x128xi1>, vector<8x128xf32>
    %c88_978 = arith.constant 88 : index
    %c0_979 = arith.constant 0 : index
    %1414 = vector.load %arg11[%c88_978, %c0_979] : memref<128x128xf32, #tpu.memory_space<vmem>>, vector<8x128xf32>
    tpu.vector_store %arg11[%c88_978, %c0_979], %1413 {strides = array<i32>} : memref<128x128xf32, #tpu.memory_space<vmem>>, vector<8x128xf32>,
    %c96_980 = arith.constant 96 : index
    %c0_981 = arith.constant 0 : index
    %1415 = vector.load %arg10[%c96_980, %c0_981] : memref<128x128xf32, #tpu.memory_space<vmem>>, vector<8x128xf32>
    %c24_982 = arith.constant 24 : index
    %c0_983 = arith.constant 0 : index
    %1416 = vector.load %arg10[%c24_982, %c0_983] : memref<128x128xf32, #tpu.memory_space<vmem>>, vector<8x128xf32>
    %1417 = arith.select %18, %1415, %1416 : vector<8x128xi1>, vector<8x128xf32>
    %c96_984 = arith.constant 96 : index
    %c0_985 = arith.constant 0 : index
    %1418 = vector.load %arg11[%c96_984, %c0_985] : memref<128x128xf32, #tpu.memory_space<vmem>>, vector<8x128xf32>
    tpu.vector_store %arg11[%c96_984, %c0_985], %1417 {strides = array<i32>} : memref<128x128xf32, #tpu.memory_space<vmem>>, vector<8x128xf32>,
    %c104_986 = arith.constant 104 : index
    %c0_987 = arith.constant 0 : index
    %1419 = vector.load %arg10[%c104_986, %c0_987] : memref<128x128xf32, #tpu.memory_space<vmem>>, vector<8x128xf32>
    %c16_988 = arith.constant 16 : index
    %c0_989 = arith.constant 0 : index
    %1420 = vector.load %arg10[%c16_988, %c0_989] : memref<128x128xf32, #tpu.memory_space<vmem>>, vector<8x128xf32>
    %1421 = arith.select %18, %1419, %1420 : vector<8x128xi1>, vector<8x128xf32>
    %c104_990 = arith.constant 104 : index
    %c0_991 = arith.constant 0 : index
    %1422 = vector.load %arg11[%c104_990, %c0_991] : memref<128x128xf32, #tpu.memory_space<vmem>>, vector<8x128xf32>
    tpu.vector_store %arg11[%c104_990, %c0_991], %1421 {strides = array<i32>} : memref<128x128xf32, #tpu.memory_space<vmem>>, vector<8x128xf32>,
    %c112_992 = arith.constant 112 : index
    %c0_993 = arith.constant 0 : index
    %1423 = vector.load %arg10[%c112_992, %c0_993] : memref<128x128xf32, #tpu.memory_space<vmem>>, vector<8x128xf32>
    %c8_994 = arith.constant 8 : index
    %c0_995 = arith.constant 0 : index
    %1424 = vector.load %arg10[%c8_994, %c0_995] : memref<128x128xf32, #tpu.memory_space<vmem>>, vector<8x128xf32>
    %1425 = arith.select %18, %1423, %1424 : vector<8x128xi1>, vector<8x128xf32>
    %c112_996 = arith.constant 112 : index
    %c0_997 = arith.constant 0 : index
    %1426 = vector.load %arg11[%c112_996, %c0_997] : memref<128x128xf32, #tpu.memory_space<vmem>>, vector<8x128xf32>
    tpu.vector_store %arg11[%c112_996, %c0_997], %1425 {strides = array<i32>} : memref<128x128xf32, #tpu.memory_space<vmem>>, vector<8x128xf32>,
    %c120_998 = arith.constant 120 : index
    %c0_999 = arith.constant 0 : index
    %1427 = vector.load %arg10[%c120_998, %c0_999] : memref<128x128xf32, #tpu.memory_space<vmem>>, vector<8x128xf32>
    %c0_1000 = arith.constant 0 : index
    %c0_1001 = arith.constant 0 : index
    %1428 = vector.load %arg10[%c0_1000, %c0_1001] : memref<128x128xf32, #tpu.memory_space<vmem>>, vector<8x128xf32>
    %1429 = arith.select %18, %1427, %1428 : vector<8x128xi1>, vector<8x128xf32>
    %c120_1002 = arith.constant 120 : index
    %c0_1003 = arith.constant 0 : index
    %1430 = vector.load %arg11[%c120_1002, %c0_1003] : memref<128x128xf32, #tpu.memory_space<vmem>>, vector<8x128xf32>
    tpu.vector_store %arg11[%c120_1002, %c0_1003], %1429 {strides = array<i32>} : memref<128x128xf32, #tpu.memory_space<vmem>>, vector<8x128xf32>,
    %c3_1004 = arith.constant 3 : index
    %c0_1005 = arith.constant 0 : index
    %c0_1006 = arith.constant 0 : index
    %1431 = vector.load %arg3[%c3_1004, %c0_1005, %c0_1006] : memref<4x32x128xf32, #tpu.memory_space<vmem>>, vector<1x32x128xf32>
    %1432 = vector.shape_cast %1431 : vector<1x32x128xf32> to vector<32x128xf32>
    %cst_1007 = arith.constant 0.000000e+00 : f32
    %1433 = vector.broadcast %cst_1007 : f32 to vector<8x32xf32>
    %cst_1008 = arith.constant 0.000000e+00 : f32
    %1434 = vector.broadcast %cst_1008 : f32 to vector<8x32xf32>
    %c0_1009 = arith.constant 0 : index
    %c0_1010 = arith.constant 0 : index
    %1435 = vector.load %arg11[%c0_1009, %c0_1010] : memref<128x128xf32, #tpu.memory_space<vmem>>, vector<8x128xf32>
    %cst_1011 = arith.constant dense<0.000000e+00> : vector<8x128xf32>
    %1436 = tpu.matmul %1433, %1432, %cst_1011 {dimension_numbers = #tpu.dot_dimension_numbers<[1], [0], [0], [1], [0, 0, 1, 1], [], []>} : vector<8x32xf32>, vector<32x128xf32>, vector<8x128xf32> -> vector<8x128xf32>
    %1437 = arith.addf %1435, %1436 : vector<8x128xf32>
    %1438 = arith.negf %1437 : vector<8x128xf32>
    %1439 = math.exp %1438 : vector<8x128xf32>
    %cst_1012 = arith.constant 1.000000e+00 : f32
    %1440 = vector.broadcast %cst_1012 : f32 to vector<8x128xf32>
    %1441 = arith.addf %1440, %1439 : vector<8x128xf32>
    %1442 = arith.divf %1440, %1441 : vector<8x128xf32>
    %1443 = math.tanh %1437 : vector<8x128xf32>
    %1444 = vector.extract_strided_slice %1442 {offsets = [0, 32], sizes = [8, 32], strides = [1, 1]} : vector<8x128xf32> to vector<8x32xf32>
    %1445 = arith.mulf %1444, %1434 : vector<8x32xf32>
    %1446 = vector.extract_strided_slice %1442 {offsets = [0, 0], sizes = [8, 32], strides = [1, 1]} : vector<8x128xf32> to vector<8x32xf32>
    %1447 = vector.extract_strided_slice %1443 {offsets = [0, 64], sizes = [8, 32], strides = [1, 1]} : vector<8x128xf32> to vector<8x32xf32>
    %1448 = arith.mulf %1446, %1447 : vector<8x32xf32>
    %1449 = arith.addf %1445, %1448 : vector<8x32xf32>
    %1450 = vector.extract_strided_slice %1442 {offsets = [0, 96], sizes = [8, 32], strides = [1, 1]} : vector<8x128xf32> to vector<8x32xf32>
    %1451 = math.tanh %1449 : vector<8x32xf32>
    %1452 = arith.mulf %1450, %1451 : vector<8x32xf32>
    %c0_1013 = arith.constant 0 : index
    %c0_1014 = arith.constant 0 : index
    %1453 = vector.load %arg13[%c0_1013, %c0_1014] : memref<128x32xf32, #tpu.memory_space<vmem>>, vector<8x32xf32>
    tpu.vector_store %arg13[%c0_1013, %c0_1014], %1452 {strides = array<i32>} : memref<128x32xf32, #tpu.memory_space<vmem>>, vector<8x32xf32>,
    %c8_1015 = arith.constant 8 : index
    %c0_1016 = arith.constant 0 : index
    %1454 = vector.load %arg11[%c8_1015, %c0_1016] : memref<128x128xf32, #tpu.memory_space<vmem>>, vector<8x128xf32>
    %cst_1017 = arith.constant dense<0.000000e+00> : vector<8x128xf32>
    %1455 = tpu.matmul %1452, %1432, %cst_1017 {dimension_numbers = #tpu.dot_dimension_numbers<[1], [0], [0], [1], [0, 0, 1, 1], [], []>} : vector<8x32xf32>, vector<32x128xf32>, vector<8x128xf32> -> vector<8x128xf32>
    %1456 = arith.addf %1454, %1455 : vector<8x128xf32>
    %1457 = arith.negf %1456 : vector<8x128xf32>
    %1458 = math.exp %1457 : vector<8x128xf32>
    %cst_1018 = arith.constant 1.000000e+00 : f32
    %1459 = vector.broadcast %cst_1018 : f32 to vector<8x128xf32>
    %1460 = arith.addf %1459, %1458 : vector<8x128xf32>
    %1461 = arith.divf %1459, %1460 : vector<8x128xf32>
    %1462 = math.tanh %1456 : vector<8x128xf32>
    %1463 = vector.extract_strided_slice %1461 {offsets = [0, 32], sizes = [8, 32], strides = [1, 1]} : vector<8x128xf32> to vector<8x32xf32>
    %1464 = arith.mulf %1463, %1449 : vector<8x32xf32>
    %1465 = vector.extract_strided_slice %1461 {offsets = [0, 0], sizes = [8, 32], strides = [1, 1]} : vector<8x128xf32> to vector<8x32xf32>
    %1466 = vector.extract_strided_slice %1462 {offsets = [0, 64], sizes = [8, 32], strides = [1, 1]} : vector<8x128xf32> to vector<8x32xf32>
    %1467 = arith.mulf %1465, %1466 : vector<8x32xf32>
    %1468 = arith.addf %1464, %1467 : vector<8x32xf32>
    %1469 = vector.extract_strided_slice %1461 {offsets = [0, 96], sizes = [8, 32], strides = [1, 1]} : vector<8x128xf32> to vector<8x32xf32>
    %1470 = math.tanh %1468 : vector<8x32xf32>
    %1471 = arith.mulf %1469, %1470 : vector<8x32xf32>
    %c8_1019 = arith.constant 8 : index
    %c0_1020 = arith.constant 0 : index
    %1472 = vector.load %arg13[%c8_1019, %c0_1020] : memref<128x32xf32, #tpu.memory_space<vmem>>, vector<8x32xf32>
    tpu.vector_store %arg13[%c8_1019, %c0_1020], %1471 {strides = array<i32>} : memref<128x32xf32, #tpu.memory_space<vmem>>, vector<8x32xf32>,
    %c16_1021 = arith.constant 16 : index
    %c0_1022 = arith.constant 0 : index
    %1473 = vector.load %arg11[%c16_1021, %c0_1022] : memref<128x128xf32, #tpu.memory_space<vmem>>, vector<8x128xf32>
    %cst_1023 = arith.constant dense<0.000000e+00> : vector<8x128xf32>
    %1474 = tpu.matmul %1471, %1432, %cst_1023 {dimension_numbers = #tpu.dot_dimension_numbers<[1], [0], [0], [1], [0, 0, 1, 1], [], []>} : vector<8x32xf32>, vector<32x128xf32>, vector<8x128xf32> -> vector<8x128xf32>
    %1475 = arith.addf %1473, %1474 : vector<8x128xf32>
    %1476 = arith.negf %1475 : vector<8x128xf32>
    %1477 = math.exp %1476 : vector<8x128xf32>
    %cst_1024 = arith.constant 1.000000e+00 : f32
    %1478 = vector.broadcast %cst_1024 : f32 to vector<8x128xf32>
    %1479 = arith.addf %1478, %1477 : vector<8x128xf32>
    %1480 = arith.divf %1478, %1479 : vector<8x128xf32>
    %1481 = math.tanh %1475 : vector<8x128xf32>
    %1482 = vector.extract_strided_slice %1480 {offsets = [0, 32], sizes = [8, 32], strides = [1, 1]} : vector<8x128xf32> to vector<8x32xf32>
    %1483 = arith.mulf %1482, %1468 : vector<8x32xf32>
    %1484 = vector.extract_strided_slice %1480 {offsets = [0, 0], sizes = [8, 32], strides = [1, 1]} : vector<8x128xf32> to vector<8x32xf32>
    %1485 = vector.extract_strided_slice %1481 {offsets = [0, 64], sizes = [8, 32], strides = [1, 1]} : vector<8x128xf32> to vector<8x32xf32>
    %1486 = arith.mulf %1484, %1485 : vector<8x32xf32>
    %1487 = arith.addf %1483, %1486 : vector<8x32xf32>
    %1488 = vector.extract_strided_slice %1480 {offsets = [0, 96], sizes = [8, 32], strides = [1, 1]} : vector<8x128xf32> to vector<8x32xf32>
    %1489 = math.tanh %1487 : vector<8x32xf32>
    %1490 = arith.mulf %1488, %1489 : vector<8x32xf32>
    %c16_1025 = arith.constant 16 : index
    %c0_1026 = arith.constant 0 : index
    %1491 = vector.load %arg13[%c16_1025, %c0_1026] : memref<128x32xf32, #tpu.memory_space<vmem>>, vector<8x32xf32>
    tpu.vector_store %arg13[%c16_1025, %c0_1026], %1490 {strides = array<i32>} : memref<128x32xf32, #tpu.memory_space<vmem>>, vector<8x32xf32>,
    %c24_1027 = arith.constant 24 : index
    %c0_1028 = arith.constant 0 : index
    %1492 = vector.load %arg11[%c24_1027, %c0_1028] : memref<128x128xf32, #tpu.memory_space<vmem>>, vector<8x128xf32>
    %cst_1029 = arith.constant dense<0.000000e+00> : vector<8x128xf32>
    %1493 = tpu.matmul %1490, %1432, %cst_1029 {dimension_numbers = #tpu.dot_dimension_numbers<[1], [0], [0], [1], [0, 0, 1, 1], [], []>} : vector<8x32xf32>, vector<32x128xf32>, vector<8x128xf32> -> vector<8x128xf32>
    %1494 = arith.addf %1492, %1493 : vector<8x128xf32>
    %1495 = arith.negf %1494 : vector<8x128xf32>
    %1496 = math.exp %1495 : vector<8x128xf32>
    %cst_1030 = arith.constant 1.000000e+00 : f32
    %1497 = vector.broadcast %cst_1030 : f32 to vector<8x128xf32>
    %1498 = arith.addf %1497, %1496 : vector<8x128xf32>
    %1499 = arith.divf %1497, %1498 : vector<8x128xf32>
    %1500 = math.tanh %1494 : vector<8x128xf32>
    %1501 = vector.extract_strided_slice %1499 {offsets = [0, 32], sizes = [8, 32], strides = [1, 1]} : vector<8x128xf32> to vector<8x32xf32>
    %1502 = arith.mulf %1501, %1487 : vector<8x32xf32>
    %1503 = vector.extract_strided_slice %1499 {offsets = [0, 0], sizes = [8, 32], strides = [1, 1]} : vector<8x128xf32> to vector<8x32xf32>
    %1504 = vector.extract_strided_slice %1500 {offsets = [0, 64], sizes = [8, 32], strides = [1, 1]} : vector<8x128xf32> to vector<8x32xf32>
    %1505 = arith.mulf %1503, %1504 : vector<8x32xf32>
    %1506 = arith.addf %1502, %1505 : vector<8x32xf32>
    %1507 = vector.extract_strided_slice %1499 {offsets = [0, 96], sizes = [8, 32], strides = [1, 1]} : vector<8x128xf32> to vector<8x32xf32>
    %1508 = math.tanh %1506 : vector<8x32xf32>
    %1509 = arith.mulf %1507, %1508 : vector<8x32xf32>
    %c24_1031 = arith.constant 24 : index
    %c0_1032 = arith.constant 0 : index
    %1510 = vector.load %arg13[%c24_1031, %c0_1032] : memref<128x32xf32, #tpu.memory_space<vmem>>, vector<8x32xf32>
    tpu.vector_store %arg13[%c24_1031, %c0_1032], %1509 {strides = array<i32>} : memref<128x32xf32, #tpu.memory_space<vmem>>, vector<8x32xf32>,
    %c32_1033 = arith.constant 32 : index
    %c0_1034 = arith.constant 0 : index
    %1511 = vector.load %arg11[%c32_1033, %c0_1034] : memref<128x128xf32, #tpu.memory_space<vmem>>, vector<8x128xf32>
    %cst_1035 = arith.constant dense<0.000000e+00> : vector<8x128xf32>
    %1512 = tpu.matmul %1509, %1432, %cst_1035 {dimension_numbers = #tpu.dot_dimension_numbers<[1], [0], [0], [1], [0, 0, 1, 1], [], []>} : vector<8x32xf32>, vector<32x128xf32>, vector<8x128xf32> -> vector<8x128xf32>
    %1513 = arith.addf %1511, %1512 : vector<8x128xf32>
    %1514 = arith.negf %1513 : vector<8x128xf32>
    %1515 = math.exp %1514 : vector<8x128xf32>
    %cst_1036 = arith.constant 1.000000e+00 : f32
    %1516 = vector.broadcast %cst_1036 : f32 to vector<8x128xf32>
    %1517 = arith.addf %1516, %1515 : vector<8x128xf32>
    %1518 = arith.divf %1516, %1517 : vector<8x128xf32>
    %1519 = math.tanh %1513 : vector<8x128xf32>
    %1520 = vector.extract_strided_slice %1518 {offsets = [0, 32], sizes = [8, 32], strides = [1, 1]} : vector<8x128xf32> to vector<8x32xf32>
    %1521 = arith.mulf %1520, %1506 : vector<8x32xf32>
    %1522 = vector.extract_strided_slice %1518 {offsets = [0, 0], sizes = [8, 32], strides = [1, 1]} : vector<8x128xf32> to vector<8x32xf32>
    %1523 = vector.extract_strided_slice %1519 {offsets = [0, 64], sizes = [8, 32], strides = [1, 1]} : vector<8x128xf32> to vector<8x32xf32>
    %1524 = arith.mulf %1522, %1523 : vector<8x32xf32>
    %1525 = arith.addf %1521, %1524 : vector<8x32xf32>
    %1526 = vector.extract_strided_slice %1518 {offsets = [0, 96], sizes = [8, 32], strides = [1, 1]} : vector<8x128xf32> to vector<8x32xf32>
    %1527 = math.tanh %1525 : vector<8x32xf32>
    %1528 = arith.mulf %1526, %1527 : vector<8x32xf32>
    %c32_1037 = arith.constant 32 : index
    %c0_1038 = arith.constant 0 : index
    %1529 = vector.load %arg13[%c32_1037, %c0_1038] : memref<128x32xf32, #tpu.memory_space<vmem>>, vector<8x32xf32>
    tpu.vector_store %arg13[%c32_1037, %c0_1038], %1528 {strides = array<i32>} : memref<128x32xf32, #tpu.memory_space<vmem>>, vector<8x32xf32>,
    %c40_1039 = arith.constant 40 : index
    %c0_1040 = arith.constant 0 : index
    %1530 = vector.load %arg11[%c40_1039, %c0_1040] : memref<128x128xf32, #tpu.memory_space<vmem>>, vector<8x128xf32>
    %cst_1041 = arith.constant dense<0.000000e+00> : vector<8x128xf32>
    %1531 = tpu.matmul %1528, %1432, %cst_1041 {dimension_numbers = #tpu.dot_dimension_numbers<[1], [0], [0], [1], [0, 0, 1, 1], [], []>} : vector<8x32xf32>, vector<32x128xf32>, vector<8x128xf32> -> vector<8x128xf32>
    %1532 = arith.addf %1530, %1531 : vector<8x128xf32>
    %1533 = arith.negf %1532 : vector<8x128xf32>
    %1534 = math.exp %1533 : vector<8x128xf32>
    %cst_1042 = arith.constant 1.000000e+00 : f32
    %1535 = vector.broadcast %cst_1042 : f32 to vector<8x128xf32>
    %1536 = arith.addf %1535, %1534 : vector<8x128xf32>
    %1537 = arith.divf %1535, %1536 : vector<8x128xf32>
    %1538 = math.tanh %1532 : vector<8x128xf32>
    %1539 = vector.extract_strided_slice %1537 {offsets = [0, 32], sizes = [8, 32], strides = [1, 1]} : vector<8x128xf32> to vector<8x32xf32>
    %1540 = arith.mulf %1539, %1525 : vector<8x32xf32>
    %1541 = vector.extract_strided_slice %1537 {offsets = [0, 0], sizes = [8, 32], strides = [1, 1]} : vector<8x128xf32> to vector<8x32xf32>
    %1542 = vector.extract_strided_slice %1538 {offsets = [0, 64], sizes = [8, 32], strides = [1, 1]} : vector<8x128xf32> to vector<8x32xf32>
    %1543 = arith.mulf %1541, %1542 : vector<8x32xf32>
    %1544 = arith.addf %1540, %1543 : vector<8x32xf32>
    %1545 = vector.extract_strided_slice %1537 {offsets = [0, 96], sizes = [8, 32], strides = [1, 1]} : vector<8x128xf32> to vector<8x32xf32>
    %1546 = math.tanh %1544 : vector<8x32xf32>
    %1547 = arith.mulf %1545, %1546 : vector<8x32xf32>
    %c40_1043 = arith.constant 40 : index
    %c0_1044 = arith.constant 0 : index
    %1548 = vector.load %arg13[%c40_1043, %c0_1044] : memref<128x32xf32, #tpu.memory_space<vmem>>, vector<8x32xf32>
    tpu.vector_store %arg13[%c40_1043, %c0_1044], %1547 {strides = array<i32>} : memref<128x32xf32, #tpu.memory_space<vmem>>, vector<8x32xf32>,
    %c48_1045 = arith.constant 48 : index
    %c0_1046 = arith.constant 0 : index
    %1549 = vector.load %arg11[%c48_1045, %c0_1046] : memref<128x128xf32, #tpu.memory_space<vmem>>, vector<8x128xf32>
    %cst_1047 = arith.constant dense<0.000000e+00> : vector<8x128xf32>
    %1550 = tpu.matmul %1547, %1432, %cst_1047 {dimension_numbers = #tpu.dot_dimension_numbers<[1], [0], [0], [1], [0, 0, 1, 1], [], []>} : vector<8x32xf32>, vector<32x128xf32>, vector<8x128xf32> -> vector<8x128xf32>
    %1551 = arith.addf %1549, %1550 : vector<8x128xf32>
    %1552 = arith.negf %1551 : vector<8x128xf32>
    %1553 = math.exp %1552 : vector<8x128xf32>
    %cst_1048 = arith.constant 1.000000e+00 : f32
    %1554 = vector.broadcast %cst_1048 : f32 to vector<8x128xf32>
    %1555 = arith.addf %1554, %1553 : vector<8x128xf32>
    %1556 = arith.divf %1554, %1555 : vector<8x128xf32>
    %1557 = math.tanh %1551 : vector<8x128xf32>
    %1558 = vector.extract_strided_slice %1556 {offsets = [0, 32], sizes = [8, 32], strides = [1, 1]} : vector<8x128xf32> to vector<8x32xf32>
    %1559 = arith.mulf %1558, %1544 : vector<8x32xf32>
    %1560 = vector.extract_strided_slice %1556 {offsets = [0, 0], sizes = [8, 32], strides = [1, 1]} : vector<8x128xf32> to vector<8x32xf32>
    %1561 = vector.extract_strided_slice %1557 {offsets = [0, 64], sizes = [8, 32], strides = [1, 1]} : vector<8x128xf32> to vector<8x32xf32>
    %1562 = arith.mulf %1560, %1561 : vector<8x32xf32>
    %1563 = arith.addf %1559, %1562 : vector<8x32xf32>
    %1564 = vector.extract_strided_slice %1556 {offsets = [0, 96], sizes = [8, 32], strides = [1, 1]} : vector<8x128xf32> to vector<8x32xf32>
    %1565 = math.tanh %1563 : vector<8x32xf32>
    %1566 = arith.mulf %1564, %1565 : vector<8x32xf32>
    %c48_1049 = arith.constant 48 : index
    %c0_1050 = arith.constant 0 : index
    %1567 = vector.load %arg13[%c48_1049, %c0_1050] : memref<128x32xf32, #tpu.memory_space<vmem>>, vector<8x32xf32>
    tpu.vector_store %arg13[%c48_1049, %c0_1050], %1566 {strides = array<i32>} : memref<128x32xf32, #tpu.memory_space<vmem>>, vector<8x32xf32>,
    %c56_1051 = arith.constant 56 : index
    %c0_1052 = arith.constant 0 : index
    %1568 = vector.load %arg11[%c56_1051, %c0_1052] : memref<128x128xf32, #tpu.memory_space<vmem>>, vector<8x128xf32>
    %cst_1053 = arith.constant dense<0.000000e+00> : vector<8x128xf32>
    %1569 = tpu.matmul %1566, %1432, %cst_1053 {dimension_numbers = #tpu.dot_dimension_numbers<[1], [0], [0], [1], [0, 0, 1, 1], [], []>} : vector<8x32xf32>, vector<32x128xf32>, vector<8x128xf32> -> vector<8x128xf32>
    %1570 = arith.addf %1568, %1569 : vector<8x128xf32>
    %1571 = arith.negf %1570 : vector<8x128xf32>
    %1572 = math.exp %1571 : vector<8x128xf32>
    %cst_1054 = arith.constant 1.000000e+00 : f32
    %1573 = vector.broadcast %cst_1054 : f32 to vector<8x128xf32>
    %1574 = arith.addf %1573, %1572 : vector<8x128xf32>
    %1575 = arith.divf %1573, %1574 : vector<8x128xf32>
    %1576 = math.tanh %1570 : vector<8x128xf32>
    %1577 = vector.extract_strided_slice %1575 {offsets = [0, 32], sizes = [8, 32], strides = [1, 1]} : vector<8x128xf32> to vector<8x32xf32>
    %1578 = arith.mulf %1577, %1563 : vector<8x32xf32>
    %1579 = vector.extract_strided_slice %1575 {offsets = [0, 0], sizes = [8, 32], strides = [1, 1]} : vector<8x128xf32> to vector<8x32xf32>
    %1580 = vector.extract_strided_slice %1576 {offsets = [0, 64], sizes = [8, 32], strides = [1, 1]} : vector<8x128xf32> to vector<8x32xf32>
    %1581 = arith.mulf %1579, %1580 : vector<8x32xf32>
    %1582 = arith.addf %1578, %1581 : vector<8x32xf32>
    %1583 = vector.extract_strided_slice %1575 {offsets = [0, 96], sizes = [8, 32], strides = [1, 1]} : vector<8x128xf32> to vector<8x32xf32>
    %1584 = math.tanh %1582 : vector<8x32xf32>
    %1585 = arith.mulf %1583, %1584 : vector<8x32xf32>
    %c56_1055 = arith.constant 56 : index
    %c0_1056 = arith.constant 0 : index
    %1586 = vector.load %arg13[%c56_1055, %c0_1056] : memref<128x32xf32, #tpu.memory_space<vmem>>, vector<8x32xf32>
    tpu.vector_store %arg13[%c56_1055, %c0_1056], %1585 {strides = array<i32>} : memref<128x32xf32, #tpu.memory_space<vmem>>, vector<8x32xf32>,
    %c64_1057 = arith.constant 64 : index
    %c0_1058 = arith.constant 0 : index
    %1587 = vector.load %arg11[%c64_1057, %c0_1058] : memref<128x128xf32, #tpu.memory_space<vmem>>, vector<8x128xf32>
    %cst_1059 = arith.constant dense<0.000000e+00> : vector<8x128xf32>
    %1588 = tpu.matmul %1585, %1432, %cst_1059 {dimension_numbers = #tpu.dot_dimension_numbers<[1], [0], [0], [1], [0, 0, 1, 1], [], []>} : vector<8x32xf32>, vector<32x128xf32>, vector<8x128xf32> -> vector<8x128xf32>
    %1589 = arith.addf %1587, %1588 : vector<8x128xf32>
    %1590 = arith.negf %1589 : vector<8x128xf32>
    %1591 = math.exp %1590 : vector<8x128xf32>
    %cst_1060 = arith.constant 1.000000e+00 : f32
    %1592 = vector.broadcast %cst_1060 : f32 to vector<8x128xf32>
    %1593 = arith.addf %1592, %1591 : vector<8x128xf32>
    %1594 = arith.divf %1592, %1593 : vector<8x128xf32>
    %1595 = math.tanh %1589 : vector<8x128xf32>
    %1596 = vector.extract_strided_slice %1594 {offsets = [0, 32], sizes = [8, 32], strides = [1, 1]} : vector<8x128xf32> to vector<8x32xf32>
    %1597 = arith.mulf %1596, %1582 : vector<8x32xf32>
    %1598 = vector.extract_strided_slice %1594 {offsets = [0, 0], sizes = [8, 32], strides = [1, 1]} : vector<8x128xf32> to vector<8x32xf32>
    %1599 = vector.extract_strided_slice %1595 {offsets = [0, 64], sizes = [8, 32], strides = [1, 1]} : vector<8x128xf32> to vector<8x32xf32>
    %1600 = arith.mulf %1598, %1599 : vector<8x32xf32>
    %1601 = arith.addf %1597, %1600 : vector<8x32xf32>
    %1602 = vector.extract_strided_slice %1594 {offsets = [0, 96], sizes = [8, 32], strides = [1, 1]} : vector<8x128xf32> to vector<8x32xf32>
    %1603 = math.tanh %1601 : vector<8x32xf32>
    %1604 = arith.mulf %1602, %1603 : vector<8x32xf32>
    %c64_1061 = arith.constant 64 : index
    %c0_1062 = arith.constant 0 : index
    %1605 = vector.load %arg13[%c64_1061, %c0_1062] : memref<128x32xf32, #tpu.memory_space<vmem>>, vector<8x32xf32>
    tpu.vector_store %arg13[%c64_1061, %c0_1062], %1604 {strides = array<i32>} : memref<128x32xf32, #tpu.memory_space<vmem>>, vector<8x32xf32>,
    %c72_1063 = arith.constant 72 : index
    %c0_1064 = arith.constant 0 : index
    %1606 = vector.load %arg11[%c72_1063, %c0_1064] : memref<128x128xf32, #tpu.memory_space<vmem>>, vector<8x128xf32>
    %cst_1065 = arith.constant dense<0.000000e+00> : vector<8x128xf32>
    %1607 = tpu.matmul %1604, %1432, %cst_1065 {dimension_numbers = #tpu.dot_dimension_numbers<[1], [0], [0], [1], [0, 0, 1, 1], [], []>} : vector<8x32xf32>, vector<32x128xf32>, vector<8x128xf32> -> vector<8x128xf32>
    %1608 = arith.addf %1606, %1607 : vector<8x128xf32>
    %1609 = arith.negf %1608 : vector<8x128xf32>
    %1610 = math.exp %1609 : vector<8x128xf32>
    %cst_1066 = arith.constant 1.000000e+00 : f32
    %1611 = vector.broadcast %cst_1066 : f32 to vector<8x128xf32>
    %1612 = arith.addf %1611, %1610 : vector<8x128xf32>
    %1613 = arith.divf %1611, %1612 : vector<8x128xf32>
    %1614 = math.tanh %1608 : vector<8x128xf32>
    %1615 = vector.extract_strided_slice %1613 {offsets = [0, 32], sizes = [8, 32], strides = [1, 1]} : vector<8x128xf32> to vector<8x32xf32>
    %1616 = arith.mulf %1615, %1601 : vector<8x32xf32>
    %1617 = vector.extract_strided_slice %1613 {offsets = [0, 0], sizes = [8, 32], strides = [1, 1]} : vector<8x128xf32> to vector<8x32xf32>
    %1618 = vector.extract_strided_slice %1614 {offsets = [0, 64], sizes = [8, 32], strides = [1, 1]} : vector<8x128xf32> to vector<8x32xf32>
    %1619 = arith.mulf %1617, %1618 : vector<8x32xf32>
    %1620 = arith.addf %1616, %1619 : vector<8x32xf32>
    %1621 = vector.extract_strided_slice %1613 {offsets = [0, 96], sizes = [8, 32], strides = [1, 1]} : vector<8x128xf32> to vector<8x32xf32>
    %1622 = math.tanh %1620 : vector<8x32xf32>
    %1623 = arith.mulf %1621, %1622 : vector<8x32xf32>
    %c72_1067 = arith.constant 72 : index
    %c0_1068 = arith.constant 0 : index
    %1624 = vector.load %arg13[%c72_1067, %c0_1068] : memref<128x32xf32, #tpu.memory_space<vmem>>, vector<8x32xf32>
    tpu.vector_store %arg13[%c72_1067, %c0_1068], %1623 {strides = array<i32>} : memref<128x32xf32, #tpu.memory_space<vmem>>, vector<8x32xf32>,
    %c80_1069 = arith.constant 80 : index
    %c0_1070 = arith.constant 0 : index
    %1625 = vector.load %arg11[%c80_1069, %c0_1070] : memref<128x128xf32, #tpu.memory_space<vmem>>, vector<8x128xf32>
    %cst_1071 = arith.constant dense<0.000000e+00> : vector<8x128xf32>
    %1626 = tpu.matmul %1623, %1432, %cst_1071 {dimension_numbers = #tpu.dot_dimension_numbers<[1], [0], [0], [1], [0, 0, 1, 1], [], []>} : vector<8x32xf32>, vector<32x128xf32>, vector<8x128xf32> -> vector<8x128xf32>
    %1627 = arith.addf %1625, %1626 : vector<8x128xf32>
    %1628 = arith.negf %1627 : vector<8x128xf32>
    %1629 = math.exp %1628 : vector<8x128xf32>
    %cst_1072 = arith.constant 1.000000e+00 : f32
    %1630 = vector.broadcast %cst_1072 : f32 to vector<8x128xf32>
    %1631 = arith.addf %1630, %1629 : vector<8x128xf32>
    %1632 = arith.divf %1630, %1631 : vector<8x128xf32>
    %1633 = math.tanh %1627 : vector<8x128xf32>
    %1634 = vector.extract_strided_slice %1632 {offsets = [0, 32], sizes = [8, 32], strides = [1, 1]} : vector<8x128xf32> to vector<8x32xf32>
    %1635 = arith.mulf %1634, %1620 : vector<8x32xf32>
    %1636 = vector.extract_strided_slice %1632 {offsets = [0, 0], sizes = [8, 32], strides = [1, 1]} : vector<8x128xf32> to vector<8x32xf32>
    %1637 = vector.extract_strided_slice %1633 {offsets = [0, 64], sizes = [8, 32], strides = [1, 1]} : vector<8x128xf32> to vector<8x32xf32>
    %1638 = arith.mulf %1636, %1637 : vector<8x32xf32>
    %1639 = arith.addf %1635, %1638 : vector<8x32xf32>
    %1640 = vector.extract_strided_slice %1632 {offsets = [0, 96], sizes = [8, 32], strides = [1, 1]} : vector<8x128xf32> to vector<8x32xf32>
    %1641 = math.tanh %1639 : vector<8x32xf32>
    %1642 = arith.mulf %1640, %1641 : vector<8x32xf32>
    %c80_1073 = arith.constant 80 : index
    %c0_1074 = arith.constant 0 : index
    %1643 = vector.load %arg13[%c80_1073, %c0_1074] : memref<128x32xf32, #tpu.memory_space<vmem>>, vector<8x32xf32>
    tpu.vector_store %arg13[%c80_1073, %c0_1074], %1642 {strides = array<i32>} : memref<128x32xf32, #tpu.memory_space<vmem>>, vector<8x32xf32>,
    %c88_1075 = arith.constant 88 : index
    %c0_1076 = arith.constant 0 : index
    %1644 = vector.load %arg11[%c88_1075, %c0_1076] : memref<128x128xf32, #tpu.memory_space<vmem>>, vector<8x128xf32>
    %cst_1077 = arith.constant dense<0.000000e+00> : vector<8x128xf32>
    %1645 = tpu.matmul %1642, %1432, %cst_1077 {dimension_numbers = #tpu.dot_dimension_numbers<[1], [0], [0], [1], [0, 0, 1, 1], [], []>} : vector<8x32xf32>, vector<32x128xf32>, vector<8x128xf32> -> vector<8x128xf32>
    %1646 = arith.addf %1644, %1645 : vector<8x128xf32>
    %1647 = arith.negf %1646 : vector<8x128xf32>
    %1648 = math.exp %1647 : vector<8x128xf32>
    %cst_1078 = arith.constant 1.000000e+00 : f32
    %1649 = vector.broadcast %cst_1078 : f32 to vector<8x128xf32>
    %1650 = arith.addf %1649, %1648 : vector<8x128xf32>
    %1651 = arith.divf %1649, %1650 : vector<8x128xf32>
    %1652 = math.tanh %1646 : vector<8x128xf32>
    %1653 = vector.extract_strided_slice %1651 {offsets = [0, 32], sizes = [8, 32], strides = [1, 1]} : vector<8x128xf32> to vector<8x32xf32>
    %1654 = arith.mulf %1653, %1639 : vector<8x32xf32>
    %1655 = vector.extract_strided_slice %1651 {offsets = [0, 0], sizes = [8, 32], strides = [1, 1]} : vector<8x128xf32> to vector<8x32xf32>
    %1656 = vector.extract_strided_slice %1652 {offsets = [0, 64], sizes = [8, 32], strides = [1, 1]} : vector<8x128xf32> to vector<8x32xf32>
    %1657 = arith.mulf %1655, %1656 : vector<8x32xf32>
    %1658 = arith.addf %1654, %1657 : vector<8x32xf32>
    %1659 = vector.extract_strided_slice %1651 {offsets = [0, 96], sizes = [8, 32], strides = [1, 1]} : vector<8x128xf32> to vector<8x32xf32>
    %1660 = math.tanh %1658 : vector<8x32xf32>
    %1661 = arith.mulf %1659, %1660 : vector<8x32xf32>
    %c88_1079 = arith.constant 88 : index
    %c0_1080 = arith.constant 0 : index
    %1662 = vector.load %arg13[%c88_1079, %c0_1080] : memref<128x32xf32, #tpu.memory_space<vmem>>, vector<8x32xf32>
    tpu.vector_store %arg13[%c88_1079, %c0_1080], %1661 {strides = array<i32>} : memref<128x32xf32, #tpu.memory_space<vmem>>, vector<8x32xf32>,
    %c96_1081 = arith.constant 96 : index
    %c0_1082 = arith.constant 0 : index
    %1663 = vector.load %arg11[%c96_1081, %c0_1082] : memref<128x128xf32, #tpu.memory_space<vmem>>, vector<8x128xf32>
    %cst_1083 = arith.constant dense<0.000000e+00> : vector<8x128xf32>
    %1664 = tpu.matmul %1661, %1432, %cst_1083 {dimension_numbers = #tpu.dot_dimension_numbers<[1], [0], [0], [1], [0, 0, 1, 1], [], []>} : vector<8x32xf32>, vector<32x128xf32>, vector<8x128xf32> -> vector<8x128xf32>
    %1665 = arith.addf %1663, %1664 : vector<8x128xf32>
    %1666 = arith.negf %1665 : vector<8x128xf32>
    %1667 = math.exp %1666 : vector<8x128xf32>
    %cst_1084 = arith.constant 1.000000e+00 : f32
    %1668 = vector.broadcast %cst_1084 : f32 to vector<8x128xf32>
    %1669 = arith.addf %1668, %1667 : vector<8x128xf32>
    %1670 = arith.divf %1668, %1669 : vector<8x128xf32>
    %1671 = math.tanh %1665 : vector<8x128xf32>
    %1672 = vector.extract_strided_slice %1670 {offsets = [0, 32], sizes = [8, 32], strides = [1, 1]} : vector<8x128xf32> to vector<8x32xf32>
    %1673 = arith.mulf %1672, %1658 : vector<8x32xf32>
    %1674 = vector.extract_strided_slice %1670 {offsets = [0, 0], sizes = [8, 32], strides = [1, 1]} : vector<8x128xf32> to vector<8x32xf32>
    %1675 = vector.extract_strided_slice %1671 {offsets = [0, 64], sizes = [8, 32], strides = [1, 1]} : vector<8x128xf32> to vector<8x32xf32>
    %1676 = arith.mulf %1674, %1675 : vector<8x32xf32>
    %1677 = arith.addf %1673, %1676 : vector<8x32xf32>
    %1678 = vector.extract_strided_slice %1670 {offsets = [0, 96], sizes = [8, 32], strides = [1, 1]} : vector<8x128xf32> to vector<8x32xf32>
    %1679 = math.tanh %1677 : vector<8x32xf32>
    %1680 = arith.mulf %1678, %1679 : vector<8x32xf32>
    %c96_1085 = arith.constant 96 : index
    %c0_1086 = arith.constant 0 : index
    %1681 = vector.load %arg13[%c96_1085, %c0_1086] : memref<128x32xf32, #tpu.memory_space<vmem>>, vector<8x32xf32>
    tpu.vector_store %arg13[%c96_1085, %c0_1086], %1680 {strides = array<i32>} : memref<128x32xf32, #tpu.memory_space<vmem>>, vector<8x32xf32>,
    %c104_1087 = arith.constant 104 : index
    %c0_1088 = arith.constant 0 : index
    %1682 = vector.load %arg11[%c104_1087, %c0_1088] : memref<128x128xf32, #tpu.memory_space<vmem>>, vector<8x128xf32>
    %cst_1089 = arith.constant dense<0.000000e+00> : vector<8x128xf32>
    %1683 = tpu.matmul %1680, %1432, %cst_1089 {dimension_numbers = #tpu.dot_dimension_numbers<[1], [0], [0], [1], [0, 0, 1, 1], [], []>} : vector<8x32xf32>, vector<32x128xf32>, vector<8x128xf32> -> vector<8x128xf32>
    %1684 = arith.addf %1682, %1683 : vector<8x128xf32>
    %1685 = arith.negf %1684 : vector<8x128xf32>
    %1686 = math.exp %1685 : vector<8x128xf32>
    %cst_1090 = arith.constant 1.000000e+00 : f32
    %1687 = vector.broadcast %cst_1090 : f32 to vector<8x128xf32>
    %1688 = arith.addf %1687, %1686 : vector<8x128xf32>
    %1689 = arith.divf %1687, %1688 : vector<8x128xf32>
    %1690 = math.tanh %1684 : vector<8x128xf32>
    %1691 = vector.extract_strided_slice %1689 {offsets = [0, 32], sizes = [8, 32], strides = [1, 1]} : vector<8x128xf32> to vector<8x32xf32>
    %1692 = arith.mulf %1691, %1677 : vector<8x32xf32>
    %1693 = vector.extract_strided_slice %1689 {offsets = [0, 0], sizes = [8, 32], strides = [1, 1]} : vector<8x128xf32> to vector<8x32xf32>
    %1694 = vector.extract_strided_slice %1690 {offsets = [0, 64], sizes = [8, 32], strides = [1, 1]} : vector<8x128xf32> to vector<8x32xf32>
    %1695 = arith.mulf %1693, %1694 : vector<8x32xf32>
    %1696 = arith.addf %1692, %1695 : vector<8x32xf32>
    %1697 = vector.extract_strided_slice %1689 {offsets = [0, 96], sizes = [8, 32], strides = [1, 1]} : vector<8x128xf32> to vector<8x32xf32>
    %1698 = math.tanh %1696 : vector<8x32xf32>
    %1699 = arith.mulf %1697, %1698 : vector<8x32xf32>
    %c104_1091 = arith.constant 104 : index
    %c0_1092 = arith.constant 0 : index
    %1700 = vector.load %arg13[%c104_1091, %c0_1092] : memref<128x32xf32, #tpu.memory_space<vmem>>, vector<8x32xf32>
    tpu.vector_store %arg13[%c104_1091, %c0_1092], %1699 {strides = array<i32>} : memref<128x32xf32, #tpu.memory_space<vmem>>, vector<8x32xf32>,
    %c112_1093 = arith.constant 112 : index
    %c0_1094 = arith.constant 0 : index
    %1701 = vector.load %arg11[%c112_1093, %c0_1094] : memref<128x128xf32, #tpu.memory_space<vmem>>, vector<8x128xf32>
    %cst_1095 = arith.constant dense<0.000000e+00> : vector<8x128xf32>
    %1702 = tpu.matmul %1699, %1432, %cst_1095 {dimension_numbers = #tpu.dot_dimension_numbers<[1], [0], [0], [1], [0, 0, 1, 1], [], []>} : vector<8x32xf32>, vector<32x128xf32>, vector<8x128xf32> -> vector<8x128xf32>
    %1703 = arith.addf %1701, %1702 : vector<8x128xf32>
    %1704 = arith.negf %1703 : vector<8x128xf32>
    %1705 = math.exp %1704 : vector<8x128xf32>
    %cst_1096 = arith.constant 1.000000e+00 : f32
    %1706 = vector.broadcast %cst_1096 : f32 to vector<8x128xf32>
    %1707 = arith.addf %1706, %1705 : vector<8x128xf32>
    %1708 = arith.divf %1706, %1707 : vector<8x128xf32>
    %1709 = math.tanh %1703 : vector<8x128xf32>
    %1710 = vector.extract_strided_slice %1708 {offsets = [0, 32], sizes = [8, 32], strides = [1, 1]} : vector<8x128xf32> to vector<8x32xf32>
    %1711 = arith.mulf %1710, %1696 : vector<8x32xf32>
    %1712 = vector.extract_strided_slice %1708 {offsets = [0, 0], sizes = [8, 32], strides = [1, 1]} : vector<8x128xf32> to vector<8x32xf32>
    %1713 = vector.extract_strided_slice %1709 {offsets = [0, 64], sizes = [8, 32], strides = [1, 1]} : vector<8x128xf32> to vector<8x32xf32>
    %1714 = arith.mulf %1712, %1713 : vector<8x32xf32>
    %1715 = arith.addf %1711, %1714 : vector<8x32xf32>
    %1716 = vector.extract_strided_slice %1708 {offsets = [0, 96], sizes = [8, 32], strides = [1, 1]} : vector<8x128xf32> to vector<8x32xf32>
    %1717 = math.tanh %1715 : vector<8x32xf32>
    %1718 = arith.mulf %1716, %1717 : vector<8x32xf32>
    %c112_1097 = arith.constant 112 : index
    %c0_1098 = arith.constant 0 : index
    %1719 = vector.load %arg13[%c112_1097, %c0_1098] : memref<128x32xf32, #tpu.memory_space<vmem>>, vector<8x32xf32>
    tpu.vector_store %arg13[%c112_1097, %c0_1098], %1718 {strides = array<i32>} : memref<128x32xf32, #tpu.memory_space<vmem>>, vector<8x32xf32>,
    %c120_1099 = arith.constant 120 : index
    %c0_1100 = arith.constant 0 : index
    %1720 = vector.load %arg11[%c120_1099, %c0_1100] : memref<128x128xf32, #tpu.memory_space<vmem>>, vector<8x128xf32>
    %cst_1101 = arith.constant dense<0.000000e+00> : vector<8x128xf32>
    %1721 = tpu.matmul %1718, %1432, %cst_1101 {dimension_numbers = #tpu.dot_dimension_numbers<[1], [0], [0], [1], [0, 0, 1, 1], [], []>} : vector<8x32xf32>, vector<32x128xf32>, vector<8x128xf32> -> vector<8x128xf32>
    %1722 = arith.addf %1720, %1721 : vector<8x128xf32>
    %1723 = arith.negf %1722 : vector<8x128xf32>
    %1724 = math.exp %1723 : vector<8x128xf32>
    %cst_1102 = arith.constant 1.000000e+00 : f32
    %1725 = vector.broadcast %cst_1102 : f32 to vector<8x128xf32>
    %1726 = arith.addf %1725, %1724 : vector<8x128xf32>
    %1727 = arith.divf %1725, %1726 : vector<8x128xf32>
    %1728 = math.tanh %1722 : vector<8x128xf32>
    %1729 = vector.extract_strided_slice %1727 {offsets = [0, 32], sizes = [8, 32], strides = [1, 1]} : vector<8x128xf32> to vector<8x32xf32>
    %1730 = arith.mulf %1729, %1715 : vector<8x32xf32>
    %1731 = vector.extract_strided_slice %1727 {offsets = [0, 0], sizes = [8, 32], strides = [1, 1]} : vector<8x128xf32> to vector<8x32xf32>
    %1732 = vector.extract_strided_slice %1728 {offsets = [0, 64], sizes = [8, 32], strides = [1, 1]} : vector<8x128xf32> to vector<8x32xf32>
    %1733 = arith.mulf %1731, %1732 : vector<8x32xf32>
    %1734 = arith.addf %1730, %1733 : vector<8x32xf32>
    %1735 = vector.extract_strided_slice %1727 {offsets = [0, 96], sizes = [8, 32], strides = [1, 1]} : vector<8x128xf32> to vector<8x32xf32>
    %1736 = math.tanh %1734 : vector<8x32xf32>
    %1737 = arith.mulf %1735, %1736 : vector<8x32xf32>
    %c120_1103 = arith.constant 120 : index
    %c0_1104 = arith.constant 0 : index
    %1738 = vector.load %arg13[%c120_1103, %c0_1104] : memref<128x32xf32, #tpu.memory_space<vmem>>, vector<8x32xf32>
    tpu.vector_store %arg13[%c120_1103, %c0_1104], %1737 {strides = array<i32>} : memref<128x32xf32, #tpu.memory_space<vmem>>, vector<8x32xf32>,
    %c56_1105 = arith.constant 56 : index
    %c0_1106 = arith.constant 0 : index
    %1739 = vector.load %arg13[%c56_1105, %c0_1106] : memref<128x32xf32, #tpu.memory_space<vmem>>, vector<8x32xf32>
    %c64_1107 = arith.constant 64 : index
    %c0_1108 = arith.constant 0 : index
    %1740 = vector.load %arg13[%c64_1107, %c0_1108] : memref<128x32xf32, #tpu.memory_space<vmem>>, vector<8x32xf32>
    %1741 = arith.select %21, %1739, %1740 : vector<8x32xi1>, vector<8x32xf32>
    %c120_1109 = arith.constant 120 : index
    %c0_1110 = arith.constant 0 : index
    %1742 = vector.load %arg13[%c120_1109, %c0_1110] : memref<128x32xf32, #tpu.memory_space<vmem>>, vector<8x32xf32>
    %c0_1111 = arith.constant 0 : index
    %c0_1112 = arith.constant 0 : index
    %1743 = vector.load %arg13[%c0_1111, %c0_1112] : memref<128x32xf32, #tpu.memory_space<vmem>>, vector<8x32xf32>
    %1744 = arith.select %21, %1742, %1743 : vector<8x32xi1>, vector<8x32xf32>
    %c0_1113 = arith.constant 0 : index
    %c0_1114 = arith.constant 0 : index
    %1745 = vector.load %arg5[%c0_1113, %c0_1114] : memref<32x4xf32, #tpu.memory_space<vmem>>, vector<32x4xf32>
    %c0_1115 = arith.constant 0 : index
    %c0_1116 = arith.constant 0 : index
    %c0_1117 = arith.constant 0 : index
    %1746 = vector.load %arg7[%c0_1115, %c0_1116, %c0_1117] : memref<4x1x4xf32, #tpu.memory_space<vmem>>, vector<1x1x4xf32>
    %1747 = vector.shape_cast %1746 : vector<1x1x4xf32> to vector<1x4xf32>
    %c0_1118 = arith.constant 0 : index
    %c0_1119 = arith.constant 0 : index
    %c0_1120 = arith.constant 0 : index
    %1748 = vector.load %arg8[%c0_1118, %c0_1119, %c0_1120] : memref<4x1x4xf32, #tpu.memory_space<vmem>>, vector<1x1x4xf32>
    %1749 = vector.shape_cast %1748 : vector<1x1x4xf32> to vector<1x4xf32>
    %cst_1121 = arith.constant 0.000000e+00 : f32
    %1750 = vector.broadcast %cst_1121 : f32 to vector<8x1xf32>
    %cst_1122 = arith.constant 0.000000e+00 : f32
    %1751 = vector.broadcast %cst_1122 : f32 to vector<8x1xf32>
    %cst_1123 = arith.constant dense<0.000000e+00> : vector<8x4xf32>
    %1752 = tpu.matmul %1741, %1745, %cst_1123 {dimension_numbers = #tpu.dot_dimension_numbers<[1], [0], [0], [1], [0, 0, 1, 1], [], []>} : vector<8x32xf32>, vector<32x4xf32>, vector<8x4xf32> -> vector<8x4xf32>
    %1753 = vector.broadcast %1750 : vector<8x1xf32> to vector<8x4xf32>
    %1754 = vector.broadcast %1747 : vector<1x4xf32> to vector<8x4xf32>
    %1755 = arith.mulf %1753, %1754 : vector<8x4xf32>
    %1756 = arith.addf %1752, %1755 : vector<8x4xf32>
    %1757 = vector.broadcast %1749 : vector<1x4xf32> to vector<8x4xf32>
    %1758 = arith.addf %1756, %1757 : vector<8x4xf32>
    %1759 = arith.negf %1758 : vector<8x4xf32>
    %1760 = math.exp %1759 : vector<8x4xf32>
    %cst_1124 = arith.constant 1.000000e+00 : f32
    %1761 = vector.broadcast %cst_1124 : f32 to vector<8x4xf32>
    %1762 = arith.addf %1761, %1760 : vector<8x4xf32>
    %1763 = arith.divf %1761, %1762 : vector<8x4xf32>
    %1764 = math.tanh %1758 : vector<8x4xf32>
    %1765 = vector.extract_strided_slice %1763 {offsets = [0, 1], sizes = [8, 1], strides = [1, 1]} : vector<8x4xf32> to vector<8x1xf32>
    %1766 = arith.mulf %1765, %1751 : vector<8x1xf32>
    %1767 = vector.extract_strided_slice %1763 {offsets = [0, 0], sizes = [8, 1], strides = [1, 1]} : vector<8x4xf32> to vector<8x1xf32>
    %1768 = vector.extract_strided_slice %1764 {offsets = [0, 2], sizes = [8, 1], strides = [1, 1]} : vector<8x4xf32> to vector<8x1xf32>
    %1769 = arith.mulf %1767, %1768 : vector<8x1xf32>
    %1770 = arith.addf %1766, %1769 : vector<8x1xf32>
    %1771 = vector.extract_strided_slice %1763 {offsets = [0, 3], sizes = [8, 1], strides = [1, 1]} : vector<8x4xf32> to vector<8x1xf32>
    %1772 = math.tanh %1770 : vector<8x1xf32>
    %1773 = arith.mulf %1771, %1772 : vector<8x1xf32>
    %cst_1125 = arith.constant dense<0.000000e+00> : vector<8x4xf32>
    %1774 = tpu.matmul %1744, %1745, %cst_1125 {dimension_numbers = #tpu.dot_dimension_numbers<[1], [0], [0], [1], [0, 0, 1, 1], [], []>} : vector<8x32xf32>, vector<32x4xf32>, vector<8x4xf32> -> vector<8x4xf32>
    %1775 = vector.broadcast %1773 : vector<8x1xf32> to vector<8x4xf32>
    %1776 = vector.broadcast %1747 : vector<1x4xf32> to vector<8x4xf32>
    %1777 = arith.mulf %1775, %1776 : vector<8x4xf32>
    %1778 = arith.addf %1774, %1777 : vector<8x4xf32>
    %1779 = vector.broadcast %1749 : vector<1x4xf32> to vector<8x4xf32>
    %1780 = arith.addf %1778, %1779 : vector<8x4xf32>
    %1781 = arith.negf %1780 : vector<8x4xf32>
    %1782 = math.exp %1781 : vector<8x4xf32>
    %cst_1126 = arith.constant 1.000000e+00 : f32
    %1783 = vector.broadcast %cst_1126 : f32 to vector<8x4xf32>
    %1784 = arith.addf %1783, %1782 : vector<8x4xf32>
    %1785 = arith.divf %1783, %1784 : vector<8x4xf32>
    %1786 = math.tanh %1780 : vector<8x4xf32>
    %1787 = vector.extract_strided_slice %1785 {offsets = [0, 1], sizes = [8, 1], strides = [1, 1]} : vector<8x4xf32> to vector<8x1xf32>
    %1788 = arith.mulf %1787, %1770 : vector<8x1xf32>
    %1789 = vector.extract_strided_slice %1785 {offsets = [0, 0], sizes = [8, 1], strides = [1, 1]} : vector<8x4xf32> to vector<8x1xf32>
    %1790 = vector.extract_strided_slice %1786 {offsets = [0, 2], sizes = [8, 1], strides = [1, 1]} : vector<8x4xf32> to vector<8x1xf32>
    %1791 = arith.mulf %1789, %1790 : vector<8x1xf32>
    %1792 = arith.addf %1788, %1791 : vector<8x1xf32>
    %1793 = vector.extract_strided_slice %1785 {offsets = [0, 3], sizes = [8, 1], strides = [1, 1]} : vector<8x4xf32> to vector<8x1xf32>
    %1794 = math.tanh %1792 : vector<8x1xf32>
    %1795 = arith.mulf %1793, %1794 : vector<8x1xf32>
    %c1_1127 = arith.constant 1 : index
    %c0_1128 = arith.constant 0 : index
    %c0_1129 = arith.constant 0 : index
    %1796 = vector.load %arg7[%c1_1127, %c0_1128, %c0_1129] : memref<4x1x4xf32, #tpu.memory_space<vmem>>, vector<1x1x4xf32>
    %1797 = vector.shape_cast %1796 : vector<1x1x4xf32> to vector<1x4xf32>
    %c1_1130 = arith.constant 1 : index
    %c0_1131 = arith.constant 0 : index
    %c0_1132 = arith.constant 0 : index
    %1798 = vector.load %arg8[%c1_1130, %c0_1131, %c0_1132] : memref<4x1x4xf32, #tpu.memory_space<vmem>>, vector<1x1x4xf32>
    %1799 = vector.shape_cast %1798 : vector<1x1x4xf32> to vector<1x4xf32>
    %cst_1133 = arith.constant 0.000000e+00 : f32
    %1800 = vector.broadcast %cst_1133 : f32 to vector<8x1xf32>
    %cst_1134 = arith.constant 0.000000e+00 : f32
    %1801 = vector.broadcast %cst_1134 : f32 to vector<8x1xf32>
    %c0_1135 = arith.constant 0 : index
    %c0_1136 = arith.constant 0 : index
    %c0_1137 = arith.constant 0 : index
    %1802 = vector.load %arg6[%c0_1135, %c0_1136, %c0_1137] : memref<3x1x4xf32, #tpu.memory_space<vmem>>, vector<1x1x4xf32>
    %1803 = vector.shape_cast %1802 : vector<1x1x4xf32> to vector<1x4xf32>
    %1804 = vector.broadcast %1773 : vector<8x1xf32> to vector<8x4xf32>
    %1805 = vector.broadcast %1803 : vector<1x4xf32> to vector<8x4xf32>
    %1806 = arith.mulf %1804, %1805 : vector<8x4xf32>
    %1807 = vector.broadcast %1800 : vector<8x1xf32> to vector<8x4xf32>
    %1808 = vector.broadcast %1797 : vector<1x4xf32> to vector<8x4xf32>
    %1809 = arith.mulf %1807, %1808 : vector<8x4xf32>
    %1810 = arith.addf %1806, %1809 : vector<8x4xf32>
    %1811 = vector.broadcast %1799 : vector<1x4xf32> to vector<8x4xf32>
    %1812 = arith.addf %1810, %1811 : vector<8x4xf32>
    %1813 = arith.negf %1812 : vector<8x4xf32>
    %1814 = math.exp %1813 : vector<8x4xf32>
    %cst_1138 = arith.constant 1.000000e+00 : f32
    %1815 = vector.broadcast %cst_1138 : f32 to vector<8x4xf32>
    %1816 = arith.addf %1815, %1814 : vector<8x4xf32>
    %1817 = arith.divf %1815, %1816 : vector<8x4xf32>
    %1818 = math.tanh %1812 : vector<8x4xf32>
    %1819 = vector.extract_strided_slice %1817 {offsets = [0, 1], sizes = [8, 1], strides = [1, 1]} : vector<8x4xf32> to vector<8x1xf32>
    %1820 = arith.mulf %1819, %1801 : vector<8x1xf32>
    %1821 = vector.extract_strided_slice %1817 {offsets = [0, 0], sizes = [8, 1], strides = [1, 1]} : vector<8x4xf32> to vector<8x1xf32>
    %1822 = vector.extract_strided_slice %1818 {offsets = [0, 2], sizes = [8, 1], strides = [1, 1]} : vector<8x4xf32> to vector<8x1xf32>
    %1823 = arith.mulf %1821, %1822 : vector<8x1xf32>
    %1824 = arith.addf %1820, %1823 : vector<8x1xf32>
    %1825 = vector.extract_strided_slice %1817 {offsets = [0, 3], sizes = [8, 1], strides = [1, 1]} : vector<8x4xf32> to vector<8x1xf32>
    %1826 = math.tanh %1824 : vector<8x1xf32>
    %1827 = arith.mulf %1825, %1826 : vector<8x1xf32>
    %c0_1139 = arith.constant 0 : index
    %c0_1140 = arith.constant 0 : index
    %c0_1141 = arith.constant 0 : index
    %1828 = vector.load %arg6[%c0_1139, %c0_1140, %c0_1141] : memref<3x1x4xf32, #tpu.memory_space<vmem>>, vector<1x1x4xf32>
    %1829 = vector.shape_cast %1828 : vector<1x1x4xf32> to vector<1x4xf32>
    %1830 = vector.broadcast %1795 : vector<8x1xf32> to vector<8x4xf32>
    %1831 = vector.broadcast %1829 : vector<1x4xf32> to vector<8x4xf32>
    %1832 = arith.mulf %1830, %1831 : vector<8x4xf32>
    %1833 = vector.broadcast %1827 : vector<8x1xf32> to vector<8x4xf32>
    %1834 = vector.broadcast %1797 : vector<1x4xf32> to vector<8x4xf32>
    %1835 = arith.mulf %1833, %1834 : vector<8x4xf32>
    %1836 = arith.addf %1832, %1835 : vector<8x4xf32>
    %1837 = vector.broadcast %1799 : vector<1x4xf32> to vector<8x4xf32>
    %1838 = arith.addf %1836, %1837 : vector<8x4xf32>
    %1839 = arith.negf %1838 : vector<8x4xf32>
    %1840 = math.exp %1839 : vector<8x4xf32>
    %cst_1142 = arith.constant 1.000000e+00 : f32
    %1841 = vector.broadcast %cst_1142 : f32 to vector<8x4xf32>
    %1842 = arith.addf %1841, %1840 : vector<8x4xf32>
    %1843 = arith.divf %1841, %1842 : vector<8x4xf32>
    %1844 = math.tanh %1838 : vector<8x4xf32>
    %1845 = vector.extract_strided_slice %1843 {offsets = [0, 1], sizes = [8, 1], strides = [1, 1]} : vector<8x4xf32> to vector<8x1xf32>
    %1846 = arith.mulf %1845, %1824 : vector<8x1xf32>
    %1847 = vector.extract_strided_slice %1843 {offsets = [0, 0], sizes = [8, 1], strides = [1, 1]} : vector<8x4xf32> to vector<8x1xf32>
    %1848 = vector.extract_strided_slice %1844 {offsets = [0, 2], sizes = [8, 1], strides = [1, 1]} : vector<8x4xf32> to vector<8x1xf32>
    %1849 = arith.mulf %1847, %1848 : vector<8x1xf32>
    %1850 = arith.addf %1846, %1849 : vector<8x1xf32>
    %1851 = vector.extract_strided_slice %1843 {offsets = [0, 3], sizes = [8, 1], strides = [1, 1]} : vector<8x4xf32> to vector<8x1xf32>
    %1852 = math.tanh %1850 : vector<8x1xf32>
    %1853 = arith.mulf %1851, %1852 : vector<8x1xf32>
    %c2_1143 = arith.constant 2 : index
    %c0_1144 = arith.constant 0 : index
    %c0_1145 = arith.constant 0 : index
    %1854 = vector.load %arg7[%c2_1143, %c0_1144, %c0_1145] : memref<4x1x4xf32, #tpu.memory_space<vmem>>, vector<1x1x4xf32>
    %1855 = vector.shape_cast %1854 : vector<1x1x4xf32> to vector<1x4xf32>
    %c2_1146 = arith.constant 2 : index
    %c0_1147 = arith.constant 0 : index
    %c0_1148 = arith.constant 0 : index
    %1856 = vector.load %arg8[%c2_1146, %c0_1147, %c0_1148] : memref<4x1x4xf32, #tpu.memory_space<vmem>>, vector<1x1x4xf32>
    %1857 = vector.shape_cast %1856 : vector<1x1x4xf32> to vector<1x4xf32>
    %cst_1149 = arith.constant 0.000000e+00 : f32
    %1858 = vector.broadcast %cst_1149 : f32 to vector<8x1xf32>
    %cst_1150 = arith.constant 0.000000e+00 : f32
    %1859 = vector.broadcast %cst_1150 : f32 to vector<8x1xf32>
    %c1_1151 = arith.constant 1 : index
    %c0_1152 = arith.constant 0 : index
    %c0_1153 = arith.constant 0 : index
    %1860 = vector.load %arg6[%c1_1151, %c0_1152, %c0_1153] : memref<3x1x4xf32, #tpu.memory_space<vmem>>, vector<1x1x4xf32>
    %1861 = vector.shape_cast %1860 : vector<1x1x4xf32> to vector<1x4xf32>
    %1862 = vector.broadcast %1827 : vector<8x1xf32> to vector<8x4xf32>
    %1863 = vector.broadcast %1861 : vector<1x4xf32> to vector<8x4xf32>
    %1864 = arith.mulf %1862, %1863 : vector<8x4xf32>
    %1865 = vector.broadcast %1858 : vector<8x1xf32> to vector<8x4xf32>
    %1866 = vector.broadcast %1855 : vector<1x4xf32> to vector<8x4xf32>
    %1867 = arith.mulf %1865, %1866 : vector<8x4xf32>
    %1868 = arith.addf %1864, %1867 : vector<8x4xf32>
    %1869 = vector.broadcast %1857 : vector<1x4xf32> to vector<8x4xf32>
    %1870 = arith.addf %1868, %1869 : vector<8x4xf32>
    %1871 = arith.negf %1870 : vector<8x4xf32>
    %1872 = math.exp %1871 : vector<8x4xf32>
    %cst_1154 = arith.constant 1.000000e+00 : f32
    %1873 = vector.broadcast %cst_1154 : f32 to vector<8x4xf32>
    %1874 = arith.addf %1873, %1872 : vector<8x4xf32>
    %1875 = arith.divf %1873, %1874 : vector<8x4xf32>
    %1876 = math.tanh %1870 : vector<8x4xf32>
    %1877 = vector.extract_strided_slice %1875 {offsets = [0, 1], sizes = [8, 1], strides = [1, 1]} : vector<8x4xf32> to vector<8x1xf32>
    %1878 = arith.mulf %1877, %1859 : vector<8x1xf32>
    %1879 = vector.extract_strided_slice %1875 {offsets = [0, 0], sizes = [8, 1], strides = [1, 1]} : vector<8x4xf32> to vector<8x1xf32>
    %1880 = vector.extract_strided_slice %1876 {offsets = [0, 2], sizes = [8, 1], strides = [1, 1]} : vector<8x4xf32> to vector<8x1xf32>
    %1881 = arith.mulf %1879, %1880 : vector<8x1xf32>
    %1882 = arith.addf %1878, %1881 : vector<8x1xf32>
    %1883 = vector.extract_strided_slice %1875 {offsets = [0, 3], sizes = [8, 1], strides = [1, 1]} : vector<8x4xf32> to vector<8x1xf32>
    %1884 = math.tanh %1882 : vector<8x1xf32>
    %1885 = arith.mulf %1883, %1884 : vector<8x1xf32>
    %c1_1155 = arith.constant 1 : index
    %c0_1156 = arith.constant 0 : index
    %c0_1157 = arith.constant 0 : index
    %1886 = vector.load %arg6[%c1_1155, %c0_1156, %c0_1157] : memref<3x1x4xf32, #tpu.memory_space<vmem>>, vector<1x1x4xf32>
    %1887 = vector.shape_cast %1886 : vector<1x1x4xf32> to vector<1x4xf32>
    %1888 = vector.broadcast %1853 : vector<8x1xf32> to vector<8x4xf32>
    %1889 = vector.broadcast %1887 : vector<1x4xf32> to vector<8x4xf32>
    %1890 = arith.mulf %1888, %1889 : vector<8x4xf32>
    %1891 = vector.broadcast %1885 : vector<8x1xf32> to vector<8x4xf32>
    %1892 = vector.broadcast %1855 : vector<1x4xf32> to vector<8x4xf32>
    %1893 = arith.mulf %1891, %1892 : vector<8x4xf32>
    %1894 = arith.addf %1890, %1893 : vector<8x4xf32>
    %1895 = vector.broadcast %1857 : vector<1x4xf32> to vector<8x4xf32>
    %1896 = arith.addf %1894, %1895 : vector<8x4xf32>
    %1897 = arith.negf %1896 : vector<8x4xf32>
    %1898 = math.exp %1897 : vector<8x4xf32>
    %cst_1158 = arith.constant 1.000000e+00 : f32
    %1899 = vector.broadcast %cst_1158 : f32 to vector<8x4xf32>
    %1900 = arith.addf %1899, %1898 : vector<8x4xf32>
    %1901 = arith.divf %1899, %1900 : vector<8x4xf32>
    %1902 = math.tanh %1896 : vector<8x4xf32>
    %1903 = vector.extract_strided_slice %1901 {offsets = [0, 1], sizes = [8, 1], strides = [1, 1]} : vector<8x4xf32> to vector<8x1xf32>
    %1904 = arith.mulf %1903, %1882 : vector<8x1xf32>
    %1905 = vector.extract_strided_slice %1901 {offsets = [0, 0], sizes = [8, 1], strides = [1, 1]} : vector<8x4xf32> to vector<8x1xf32>
    %1906 = vector.extract_strided_slice %1902 {offsets = [0, 2], sizes = [8, 1], strides = [1, 1]} : vector<8x4xf32> to vector<8x1xf32>
    %1907 = arith.mulf %1905, %1906 : vector<8x1xf32>
    %1908 = arith.addf %1904, %1907 : vector<8x1xf32>
    %1909 = vector.extract_strided_slice %1901 {offsets = [0, 3], sizes = [8, 1], strides = [1, 1]} : vector<8x4xf32> to vector<8x1xf32>
    %1910 = math.tanh %1908 : vector<8x1xf32>
    %1911 = arith.mulf %1909, %1910 : vector<8x1xf32>
    %c3_1159 = arith.constant 3 : index
    %c0_1160 = arith.constant 0 : index
    %c0_1161 = arith.constant 0 : index
    %1912 = vector.load %arg7[%c3_1159, %c0_1160, %c0_1161] : memref<4x1x4xf32, #tpu.memory_space<vmem>>, vector<1x1x4xf32>
    %1913 = vector.shape_cast %1912 : vector<1x1x4xf32> to vector<1x4xf32>
    %c3_1162 = arith.constant 3 : index
    %c0_1163 = arith.constant 0 : index
    %c0_1164 = arith.constant 0 : index
    %1914 = vector.load %arg8[%c3_1162, %c0_1163, %c0_1164] : memref<4x1x4xf32, #tpu.memory_space<vmem>>, vector<1x1x4xf32>
    %1915 = vector.shape_cast %1914 : vector<1x1x4xf32> to vector<1x4xf32>
    %cst_1165 = arith.constant 0.000000e+00 : f32
    %1916 = vector.broadcast %cst_1165 : f32 to vector<8x1xf32>
    %cst_1166 = arith.constant 0.000000e+00 : f32
    %1917 = vector.broadcast %cst_1166 : f32 to vector<8x1xf32>
    %c2_1167 = arith.constant 2 : index
    %c0_1168 = arith.constant 0 : index
    %c0_1169 = arith.constant 0 : index
    %1918 = vector.load %arg6[%c2_1167, %c0_1168, %c0_1169] : memref<3x1x4xf32, #tpu.memory_space<vmem>>, vector<1x1x4xf32>
    %1919 = vector.shape_cast %1918 : vector<1x1x4xf32> to vector<1x4xf32>
    %1920 = vector.broadcast %1885 : vector<8x1xf32> to vector<8x4xf32>
    %1921 = vector.broadcast %1919 : vector<1x4xf32> to vector<8x4xf32>
    %1922 = arith.mulf %1920, %1921 : vector<8x4xf32>
    %1923 = vector.broadcast %1916 : vector<8x1xf32> to vector<8x4xf32>
    %1924 = vector.broadcast %1913 : vector<1x4xf32> to vector<8x4xf32>
    %1925 = arith.mulf %1923, %1924 : vector<8x4xf32>
    %1926 = arith.addf %1922, %1925 : vector<8x4xf32>
    %1927 = vector.broadcast %1915 : vector<1x4xf32> to vector<8x4xf32>
    %1928 = arith.addf %1926, %1927 : vector<8x4xf32>
    %1929 = arith.negf %1928 : vector<8x4xf32>
    %1930 = math.exp %1929 : vector<8x4xf32>
    %cst_1170 = arith.constant 1.000000e+00 : f32
    %1931 = vector.broadcast %cst_1170 : f32 to vector<8x4xf32>
    %1932 = arith.addf %1931, %1930 : vector<8x4xf32>
    %1933 = arith.divf %1931, %1932 : vector<8x4xf32>
    %1934 = math.tanh %1928 : vector<8x4xf32>
    %1935 = vector.extract_strided_slice %1933 {offsets = [0, 1], sizes = [8, 1], strides = [1, 1]} : vector<8x4xf32> to vector<8x1xf32>
    %1936 = arith.mulf %1935, %1917 : vector<8x1xf32>
    %1937 = vector.extract_strided_slice %1933 {offsets = [0, 0], sizes = [8, 1], strides = [1, 1]} : vector<8x4xf32> to vector<8x1xf32>
    %1938 = vector.extract_strided_slice %1934 {offsets = [0, 2], sizes = [8, 1], strides = [1, 1]} : vector<8x4xf32> to vector<8x1xf32>
    %1939 = arith.mulf %1937, %1938 : vector<8x1xf32>
    %1940 = arith.addf %1936, %1939 : vector<8x1xf32>
    %1941 = vector.extract_strided_slice %1933 {offsets = [0, 3], sizes = [8, 1], strides = [1, 1]} : vector<8x4xf32> to vector<8x1xf32>
    %1942 = math.tanh %1940 : vector<8x1xf32>
    %1943 = arith.mulf %1941, %1942 : vector<8x1xf32>
    %c2_1171 = arith.constant 2 : index
    %c0_1172 = arith.constant 0 : index
    %c0_1173 = arith.constant 0 : index
    %1944 = vector.load %arg6[%c2_1171, %c0_1172, %c0_1173] : memref<3x1x4xf32, #tpu.memory_space<vmem>>, vector<1x1x4xf32>
    %1945 = vector.shape_cast %1944 : vector<1x1x4xf32> to vector<1x4xf32>
    %1946 = vector.broadcast %1911 : vector<8x1xf32> to vector<8x4xf32>
    %1947 = vector.broadcast %1945 : vector<1x4xf32> to vector<8x4xf32>
    %1948 = arith.mulf %1946, %1947 : vector<8x4xf32>
    %1949 = vector.broadcast %1943 : vector<8x1xf32> to vector<8x4xf32>
    %1950 = vector.broadcast %1913 : vector<1x4xf32> to vector<8x4xf32>
    %1951 = arith.mulf %1949, %1950 : vector<8x4xf32>
    %1952 = arith.addf %1948, %1951 : vector<8x4xf32>
    %1953 = vector.broadcast %1915 : vector<1x4xf32> to vector<8x4xf32>
    %1954 = arith.addf %1952, %1953 : vector<8x4xf32>
    %1955 = arith.negf %1954 : vector<8x4xf32>
    %1956 = math.exp %1955 : vector<8x4xf32>
    %cst_1174 = arith.constant 1.000000e+00 : f32
    %1957 = vector.broadcast %cst_1174 : f32 to vector<8x4xf32>
    %1958 = arith.addf %1957, %1956 : vector<8x4xf32>
    %1959 = arith.divf %1957, %1958 : vector<8x4xf32>
    %1960 = math.tanh %1954 : vector<8x4xf32>
    %1961 = vector.extract_strided_slice %1959 {offsets = [0, 1], sizes = [8, 1], strides = [1, 1]} : vector<8x4xf32> to vector<8x1xf32>
    %1962 = arith.mulf %1961, %1940 : vector<8x1xf32>
    %1963 = vector.extract_strided_slice %1959 {offsets = [0, 0], sizes = [8, 1], strides = [1, 1]} : vector<8x4xf32> to vector<8x1xf32>
    %1964 = vector.extract_strided_slice %1960 {offsets = [0, 2], sizes = [8, 1], strides = [1, 1]} : vector<8x4xf32> to vector<8x1xf32>
    %1965 = arith.mulf %1963, %1964 : vector<8x1xf32>
    %1966 = arith.addf %1962, %1965 : vector<8x1xf32>
    %1967 = vector.extract_strided_slice %1959 {offsets = [0, 3], sizes = [8, 1], strides = [1, 1]} : vector<8x4xf32> to vector<8x1xf32>
    %1968 = math.tanh %1966 : vector<8x1xf32>
    %1969 = arith.mulf %1967, %1968 : vector<8x1xf32>
    %1970 = tpu.iota {dimensions = array<i32: 1>} : vector<8x2xi32>
    %cst_1175 = arith.constant 0.000000e+00 : f32
    %1971 = vector.broadcast %cst_1175 : f32 to vector<8x2xf32>
    %c0_i32_1176 = arith.constant 0 : i32
    %1972 = vector.broadcast %c0_i32_1176 : i32 to vector<8x2xi32>
    %1973 = arith.cmpi eq, %1970, %1972 : vector<8x2xi32>
    %1974 = vector.shape_cast %1943 : vector<8x1xf32> to vector<8x1xf32>
    %1975 = vector.broadcast %1974 : vector<8x1xf32> to vector<8x2xf32>
    %1976 = arith.select %1973, %1975, %1971 : vector<8x2xi1>, vector<8x2xf32>
    %c1_i32_1177 = arith.constant 1 : i32
    %1977 = vector.broadcast %c1_i32_1177 : i32 to vector<8x2xi32>
    %1978 = arith.cmpi eq, %1970, %1977 : vector<8x2xi32>
    %1979 = vector.shape_cast %1969 : vector<8x1xf32> to vector<8x1xf32>
    %1980 = vector.broadcast %1979 : vector<8x1xf32> to vector<8x2xf32>
    %1981 = arith.select %1978, %1980, %1976 : vector<8x2xi1>, vector<8x2xf32>
    %c0_1178 = arith.constant 0 : index
    %c0_1179 = arith.constant 0 : index
    %c0_1180 = arith.constant 0 : index
    %1982 = vector.load %arg9[%c0_1178, %c0_1179, %c0_1180] : memref<1x8x2xf32, #tpu.memory_space<vmem>>, vector<1x8x2xf32>
    %1983 = vector.shape_cast %1982 : vector<1x8x2xf32> to vector<8x2xf32>
    %1984 = vector.shape_cast %1981 : vector<8x2xf32> to vector<1x8x2xf32>
    tpu.vector_store %arg9[%c0_1178, %c0_1179, %c0_1180], %1984 {strides = array<i32>} : memref<1x8x2xf32, #tpu.memory_space<vmem>>, vector<1x8x2xf32>,
    return
  }
  func.func @transform_0(%arg0: i32) -> (i32, i32, i32) {
    %c0_i32 = arith.constant 0 : i32
    %c0_i32_0 = arith.constant 0 : i32
    %c0_i32_1 = arith.constant 0 : i32
    return %arg0, %c0_i32, %c0_i32_0 : i32, i32, i32
  }
  func.func @transform_1(%arg0: i32) -> (i32, i32, i32) {
    %c0_i32 = arith.constant 0 : i32
    %c0_i32_0 = arith.constant 0 : i32
    %c0_i32_1 = arith.constant 0 : i32
    %c0_i32_2 = arith.constant 0 : i32
    return %c0_i32, %c0_i32_0, %c0_i32_1 : i32, i32, i32
  }
  func.func @transform_2(%arg0: i32) -> (i32, i32, i32) {
    %c0_i32 = arith.constant 0 : i32
    %c0_i32_0 = arith.constant 0 : i32
    %c0_i32_1 = arith.constant 0 : i32
    %c0_i32_2 = arith.constant 0 : i32
    return %c0_i32, %c0_i32_0, %c0_i32_1 : i32, i32, i32
  }
  func.func @transform_3(%arg0: i32) -> (i32, i32, i32) {
    %c0_i32 = arith.constant 0 : i32
    %c0_i32_0 = arith.constant 0 : i32
    %c0_i32_1 = arith.constant 0 : i32
    %c0_i32_2 = arith.constant 0 : i32
    return %c0_i32, %c0_i32_0, %c0_i32_1 : i32, i32, i32
  }
  func.func @transform_4(%arg0: i32) -> (i32, i32) {
    %c0_i32 = arith.constant 0 : i32
    %c0_i32_0 = arith.constant 0 : i32
    %c0_i32_1 = arith.constant 0 : i32
    return %c0_i32, %c0_i32_0 : i32, i32
  }
  func.func @transform_5(%arg0: i32) -> (i32, i32, i32) {
    %c0_i32 = arith.constant 0 : i32
    %c0_i32_0 = arith.constant 0 : i32
    %c0_i32_1 = arith.constant 0 : i32
    %c0_i32_2 = arith.constant 0 : i32
    return %c0_i32, %c0_i32_0, %c0_i32_1 : i32, i32, i32
  }
  func.func @transform_6(%arg0: i32) -> (i32, i32, i32) {
    %c0_i32 = arith.constant 0 : i32
    %c0_i32_0 = arith.constant 0 : i32
    %c0_i32_1 = arith.constant 0 : i32
    %c0_i32_2 = arith.constant 0 : i32
    return %c0_i32, %c0_i32_0, %c0_i32_1 : i32, i32, i32
  }
  func.func @transform_7(%arg0: i32) -> (i32, i32, i32) {
    %c0_i32 = arith.constant 0 : i32
    %c0_i32_0 = arith.constant 0 : i32
    %c0_i32_1 = arith.constant 0 : i32
    %c0_i32_2 = arith.constant 0 : i32
    return %c0_i32, %c0_i32_0, %c0_i32_1 : i32, i32, i32
  }
  func.func @transform_8(%arg0: i32) -> (i32, i32, i32) {
    %c0_i32 = arith.constant 0 : i32
    %c0_i32_0 = arith.constant 0 : i32
    %c0_i32_1 = arith.constant 0 : i32
    return %arg0, %c0_i32, %c0_i32_0 : i32, i32, i32
  }
}

</mosaic_0001>

<bundles_post_ra>
// kernel: pitch_predictor_without_content.1
= control target key start
LH: loop header
LB: loop body
LE: loop exit
PB: predicated region body
PF: predicated region fallthrough
CT: control target
= control target key end

     0   :  { %vm72_vm0 = vcmask 261120   ;;  %v11088_v3 = vmov 0.0|0.0   ;;  %vm11089_vm1 = vmmov 0   ;;  %v11090_v4 = vmov 0.0   ;;  %s11092_s11 = smov 32   ;;  %s11093_s10 = smov 126   ;;  %s13050_s1 = inlined_call_operand.vmem [shape: f32[4,32,128], index: 1, kind: input, shape index: {}]   ;;  %s13051_s0 = inlined_call_operand.vmem [shape: f32[1,128,32], index: 0, kind: input, shape index: {}]   ;;  %s13052_s2 = inlined_call_operand.vmem [shape: f32[4,32,128], index: 2, kind: input, shape index: {}]   ;;  %s13053_s3 = inlined_call_operand.vmem [shape: f32[4,1,128], index: 3, kind: input, shape index: {}]   ;;  %s13054_s4 = inlined_call_operand.vmem [shape: f32[32,4], index: 4, kind: input, shape index: {}]   ;;  %s13055_s6 = inlined_call_operand.vmem [shape: f32[4,1,4], index: 6, kind: input, shape index: {}]   ;;  %s13056_s7 = inlined_call_operand.vmem [shape: f32[4,1,4], index: 7, kind: input, shape index: {}]   ;;  %s13057_s5 = inlined_call_operand.vmem [shape: f32[3,1,4], index: 5, kind: input, shape index: {}]   ;;  %s13058_s8 = inlined_call_operand.vmem [shape: f32[1,8,2], index: 8, kind: output, shape index: {}]  }
   0x1   :  { %v61_v0 = vld [vmem:[%s13050_s1] sm:$0xff]  ;;  %v62_v1 = vld [vmem:[%s13050_s1 + $0x8] sm:$0xff]  ;;  %v63_v2 = vld [vmem:[%s13050_s1 + $0x10] sm:$0xff]  ;;  %10081 = vmatprep.subr.bf16.mxu1 %v11088_v3  ;;  %9259 = vmatprep.mubr.msk.f32.mxu1 %vm11089_vm1, %v11090_v4  ;;  %v29_v35 = vlaneseq  ;;  %s11094_s12 = smov 1   ;;  %vm8555_vm6 = vcmask 15360  }
   0x2   :  { %v10073_v5 = vpack.c.bf16 %v62_v1, %v61_v0  ;;  %v64_v6 = vld [vmem:[%s13050_s1 + $0x18] sm:$0xff]  ;;  %v45_v7 = vld [vmem:[%s13051_s0] sm:$0xff]  ;;  %v347_v10 = vld [vmem:[%s13052_s2 + $0x8] sm:$0xff] }
   0x3   :  { %v10077_v8 = vpack.c.bf16 %v64_v6, %v63_v2  ;;  %9227 = vmatprep.mubr.msk.f32.mxu0 %vm72_vm0, %v45_v7  ;;  %v346_v9 = vld [vmem:[%s13052_s2] sm:$0xff]  ;;  %v348_v12 = vld [vmem:[%s13052_s2 + $0x10] sm:$0xff]  ;;  %v349_v13 = vld [vmem:[%s13052_s2 + $0x18] sm:$0xff]  ;;  %v11264_v42 = vand.u32 127, %v29_v35 }
   0x4   :  { %10074 = vmatprep.subr.bf16.mxu0 %v10073_v5  ;;  %v11167_v11 = vpack.c.bf16 %v347_v10, %v346_v9  ;;  %v46_v14 = vld [vmem:[%s13051_s0 + $0x8] sm:$0xff]  ;;  %v47_v15 = vld [vmem:[%s13051_s0 + $0x10] sm:$0xff]  ;;  %v11182_v16 = vpack.c.bf16 %v349_v13, %v348_v12  ;;  %v48_v17 = vld [vmem:[%s13051_s0 + $0x18] sm:$0xff] }
   0x5   :  { %10076 = vmatpush3.bf16.msra.mxu0 %v10073_v5  ;;  %v49_v18 = vld [vmem:[%s13051_s0 + $0x20] sm:$0xff]  ;;  %v50_v19 = vld [vmem:[%s13051_s0 + $0x28] sm:$0xff]  ;;  %v51_v20 = vld [vmem:[%s13051_s0 + $0x30] sm:$0xff]  ;;  %v35_v47 = vand.u32 31, %v11264_v42  ;;  %vm44_vm3 = vcmp.lt.s32.totalorder %v11264_v42, 16  ;;  %vm8546_vm4 = vcmp.eq.s32.totalorder %v11264_v42, 0 }
   0x6   :  { %10078 = vmatprep.subr.bf16.mxu0 %v10077_v8  ;;  %10083 = vmatpush3.bf16.msra.mxu1 %v11167_v11  ;;  %v52_v21 = vld [vmem:[%s13051_s0 + $0x38] sm:$0xff]  ;;  %v53_v22 = vld [vmem:[%s13051_s0 + $0x40] sm:$0xff]  ;;  %v54_v23 = vld [vmem:[%s13051_s0 + $0x48] sm:$0xff]  ;;  %vm8548_vm5 = vcmp.eq.s32.totalorder %v11264_v42, 1 }
   0x7   :  { %10084 = vmatprep.subr.bf16.mxu1 %v11088_v3  ;;  %v55_v24 = vld [vmem:[%s13051_s0 + $0x50] sm:$0xff]  ;;  %v56_v25 = vld [vmem:[%s13051_s0 + $0x58] sm:$0xff]  ;;  %v57_v26 = vld [vmem:[%s13051_s0 + $0x60] sm:$0xff]  ;;  %vm11275_vm2 = vcmp.lt.s32.totalorder %v35_v47, 16 }
   0x8   :  { %v58_v27 = vld [vmem:[%s13051_s0 + $0x68] sm:$0xff]  ;;  %v59_v28 = vld [vmem:[%s13051_s0 + $0x70] sm:$0xff]  ;;  %v60_v29 = vld [vmem:[%s13051_s0 + $0x78] sm:$0xff]  ;;  %s11091_s0 = smov 64  }
   0x9   :  { %10080 = vmatpush3.bf16.msra.mxu0 %v10077_v8  ;;  %v8561_v30 = vld [vmem:[%s13053_s3] ss:$0 sm:$0xff] }
   0xa   :  { %10105 = vmatprep.subr.bf16.mxu0 %v11088_v3  ;;  %10086 = vmatpush3.bf16.msra.mxu1 %v11182_v16  ;;  %v8780_v52 = vld [vmem:[%s13055_s6] ss:$0 sm:$0xff] }
   0xb   :  { %10087 = vmatprep.subr.bf16.mxu1 %v11088_v3 }
   0xc   :  { %9228 = vmatmul.mubr.msk.f32.vlgmr.msra.gmra.mrb[0].mxu0 %vm72_vm0, %v46_v14 }
   0xd   :  { %9230 = vmatprep.mubr.msk.f32.mxu0 %vm72_vm0, %v47_v15  ;;  %10107 = vmatpush3.bf16.msra.mxu0 %v11167_v11 }
   0xe   :  { %10108 = vmatprep.subr.bf16.mxu0 %v11088_v3  ;;  %9260 = vmatmul.mubr.f32.vlgmr.msra.gmra.mrb[0].mxu1 %v11090_v4 }
   0xf   :  { %10089 = vmatpush3.bf16.msra.mxu1 %v11167_v11  ;;  %9270 = vmatprep.mubr.msk.f32.mxu1 %vm11089_vm1, %v11090_v4 }
  0x10   :  { %9231 = vmatmul.mubr.msk.f32.gmra.mrb[2].mxu0 %vm72_vm0, %v48_v17  ;;  %10090 = vmatprep.subr.bf16.mxu1 %v11088_v3 }
  0x11   :  { %9233 = vmatprep.mubr.msk.f32.mxu0 %vm72_vm0, %v49_v18  ;;  %10110 = vmatpush3.bf16.msra.mxu0 %v11182_v16 }
  0x12   :  { %10117 = vmatprep.subr.bf16.mxu0 %v11088_v3 }
  0x13   :  { %10092 = vmatpush3.bf16.msra.mxu1 %v11182_v16 }
  0x14   :  { %9234 = vmatmul.mubr.msk.f32.gmra.mrb[4].mxu0 %vm72_vm0, %v50_v19  ;;  %10093 = vmatprep.subr.bf16.mxu1 %v11088_v3 }
  0x15   :  { %9236 = vmatprep.mubr.msk.f32.mxu0 %vm72_vm0, %v51_v20 }
  0x18   :  { %9237 = vmatmul.mubr.msk.f32.gmra.mrb[6].mxu0 %vm72_vm0, %v52_v21 }
  0x19   :  { %9239 = vmatprep.mubr.msk.f32.mxu0 %vm72_vm0, %v53_v22 }
  0x1c   :  { %9240 = vmatmul.mubr.msk.f32.gmra.mrb[8].mxu0 %vm72_vm0, %v54_v23 }
  0x1d   :  { %9242 = vmatprep.mubr.msk.f32.mxu0 %vm72_vm0, %v55_v24 }
  0x20   :  { %9243 = vmatmul.mubr.msk.f32.gmra.mrb[10].mxu0 %vm72_vm0, %v56_v25 }
  0x21   :  { %9245 = vmatprep.mubr.msk.f32.mxu0 %vm72_vm0, %v57_v26 }
  0x24   :  { %9246 = vmatmul.mubr.msk.f32.gmra.mrb[12].mxu0 %vm72_vm0, %v58_v27 }
  0x25   :  { %9248 = vmatprep.mubr.msk.f32.mxu0 %vm72_vm0, %v59_v28 }
  0x28   :  { %9249 = vmatmul.mubr.msk.f32.gmra.mrb[14].mxu0 %vm72_vm0, %v60_v29 }
  0x29   :  { %9303 = vmatprep.mubr.msk.f32.mxu0 %vm11089_vm1, %v11090_v4 }
  0xdf   :  { %v9229_v31 = vpop.f32.mrb[0].mxu0 }
  0xe0   :  { %v11258_v32 = vadd.f32 %v9229_v31, %v8561_v30  ;;  %v187_v33 = vpop.f32.mrb[1].mxu0 }
  0xe1   :  { %v420_v38 = vpop.f32.mrb[0].mxu1  ;;  %v11339_v17 = vadd.f32 %v8561_v30, %v187_v33 }
  0xe2   :  { %v9261_v40 = vpop.f32.mrb[1].mxu1 }
  0xe3   :  { %v9232_v34 = vpop.f32.mrb[2].mxu0 }
  0xe4   :  { %v11260_v36 = vadd.f32 %v9232_v34, %v8561_v30  ;;  %v197_v37 = vpop.f32.mrb[3].mxu0 }
  0xe5   :  { %v11262_v39 = vadd.f32 %v8561_v30, %v197_v37 }
  0xe7   :  { %v9235_v41 = vpop.f32.mrb[4].mxu0 }
  0xe8   :  { %v11266_v43 = vadd.f32 %v9235_v41, %v8561_v30  ;;  %v207_v44 = vpop.f32.mrb[5].mxu0 }
  0xe9   :  { %v11268_v45 = vadd.f32 %v8561_v30, %v207_v44 }
  0xeb   :  { %v9238_v46 = vpop.f32.mrb[6].mxu0 }
  0xec   :  { %v11271_v48 = vadd.f32 %v9238_v46, %v8561_v30  ;;  %v217_v49 = vpop.f32.mrb[7].mxu0 }
  0xed   :  { %v11273_v50 = vadd.f32 %v8561_v30, %v217_v49 }
  0xef   :  { %v9241_v51 = vpop.f32.mrb[8].mxu0 }
  0xf0   :  { %v11279_v53 = vadd.f32 %v9241_v51, %v8561_v30  ;;  %v227_v54 = vpop.f32.mrb[9].mxu0 }
  0xf1   :  { %v11281_v55 = vadd.f32 %v8561_v30, %v227_v54 }
  0xf2   :  { %v308_v56 = vsel %vm11275_vm2, %v11273_v50, %v11279_v53  ;;  %v320_v57 = vsel %vm11275_vm2, %v11279_v53, %v11273_v50 }
  0xf3   :  { %v9244_v58 = vpop.f32.mrb[10].mxu0  ;;  %v312_v59 = vsel %vm11275_vm2, %v11271_v48, %v11281_v55  ;;  %v316_v60 = vsel %vm11275_vm2, %v11281_v55, %v11271_v48 }
  0xf4   :  { %v11299_v61 = vadd.f32 %v9244_v58, %v8561_v30  ;;  %v237_v62 = vpop.f32.mrb[11].mxu0 }
  0xf5   :  { %v11301_v63 = vadd.f32 %v8561_v30, %v237_v62 }
  0xf6   :  { %v300_v0 = vsel %vm11275_vm2, %v11268_v45, %v11299_v61  ;;  %v328_v1 = vsel %vm11275_vm2, %v11299_v61, %v11268_v45 }
  0xf7   :  { %v9247_v2 = vpop.f32.mrb[12].mxu0  ;;  %v304_v5 = vsel %vm11275_vm2, %v11266_v43, %v11301_v63  ;;  %v324_v6 = vsel %vm11275_vm2, %v11301_v63, %v11266_v43 }
  0xf8   :  { %v11319_v7 = vadd.f32 %v9247_v2, %v8561_v30  ;;  %v247_v8 = vpop.f32.mrb[13].mxu0 }
  0xf9   :  { %v11321_v9 = vadd.f32 %v8561_v30, %v247_v8 }
  0xfa   :  { %v292_v10 = vsel %vm11275_vm2, %v11262_v39, %v11319_v7  ;;  %v336_v12 = vsel %vm11275_vm2, %v11319_v7, %v11262_v39 }
  0xfb   :  { %v9250_v13 = vpop.f32.mrb[14].mxu0  ;;  %v296_v14 = vsel %vm11275_vm2, %v11260_v36, %v11321_v9  ;;  %v332_v15 = vsel %vm11275_vm2, %v11321_v9, %v11260_v36 }
  0xfc   :  { %v11341_v18 = vadd.f32 %v9250_v13, %v8561_v30  ;;  %v257_v19 = vpop.f32.mrb[15].mxu0 }
  0xfd   :  { %v11343_v20 = vadd.f32 %v8561_v30, %v257_v19 }
  0xfe   :  { %v284_v21 = vsel %vm11275_vm2, %v11339_v17, %v11341_v18  ;;  %v344_v22 = vsel %vm11275_vm2, %v11341_v18, %v11339_v17  ;;  %v8609_v18 = vld [vmem:[%s13050_s1 + $0x20] sm:$0xff] }
  0xff   :  { %v424_v23 = vadd.f32 %v420_v38, %v284_v21  ;;  %v288_v24 = vsel %vm11275_vm2, %v11258_v32, %v11343_v20  ;;  %v340_v25 = vsel %vm11275_vm2, %v11343_v20, %v11258_v32 }
 0x101   :  { %10512 = vtanh.f32 %v424_v23  ;;  %v8578_v27 = vmul.f32 -1.442695, %v424_v23 }
 0x103   :  { %10514 = vpow2.f32 %v8578_v27 }
 0x10b   :  { %v10513_v26 = vpop.eup %10512 }
 0x10c   :  { %434 = vrot.lane.b32.xlu0 %v10513_v26, %s11091_s0 }
 0x10d   :  { %v10515_v28 = vpop.eup %10514 }
 0x10e   :  { %v428_v29 = vadd.f32 1.0, %v10515_v28 }
 0x110   :  { %10516 = vrcp.f32 %v428_v29 }
 0x11a   :  { %v10517_v30 = vpop.eup %10516 }
 0x11b   :  { %v432_v34 = vmul.f32 0.0, %v10517_v30 }
 0x17e   :  { %v435_v31 = vpop.permute.xlu0 %434 }
 0x17f   :  { %v437_v33 = vmul.f32 %v10517_v30, %v435_v31 }
 0x181   :  { %439 = vrot.lane.b32.xlu0 %v437_v33, %s11092_s11 }
 0x1f3   :  { %v440_v35 = vpop.permute.xlu0 %439 }
 0x1f4   :  { %v442_v37 = vadd.f32 %v440_v35, %v432_v34 }
 0x1f6   :  { %10518 = vtanh.f32 %v442_v37 }
 0x200   :  { %v10519_v38 = vpop.eup %10518 }
 0x201   :  { %445 = vrot.lane.b32.xlu1 %v10519_v38, %s11091_s0 }
 0x273   :  { %v446_v40 = vpop.permute.xlu1 %445 }
 0x274   :  { %v448_v41 = vmul.f32 %v10517_v30, %v446_v40 }
 0x276   :  { %450 = vrot.lane.b32.xlu1 %v448_v41, %s11092_s11 }
 0x2e8   :  { %v451_v44 = vpop.permute.xlu1 %450 }
 0x2e9   :  { %453 = vst.msk [vmem:[#allocation5] sm:$0xff] %vm72_vm0, %v451_v44  ;;  %9271 = vmatmul.mubr.msk.f32.vlgmr.msra.gmra.mrb[2].mxu1 %vm72_vm0, %v451_v44 }
 0x2ea   :  { %10095 = vmatpush3.bf16.msra.mxu1 %v11167_v11  ;;  %9281 = vmatprep.mubr.msk.f32.mxu1 %vm11089_vm1, %v11090_v4 }
 0x2eb   :  { %10096 = vmatprep.subr.bf16.mxu1 %v11088_v3 }
 0x2ee   :  { %10098 = vmatpush3.bf16.msra.mxu1 %v11182_v16 }
 0x2ef   :  { %10099 = vmatprep.subr.bf16.mxu1 %v11088_v3 }
 0x3bc   :  { %v523_v46 = vpop.f32.mrb[2].mxu1 }
 0x3bd   :  { %v527_v47 = vadd.f32 %v523_v46, %v288_v24  ;;  %v9272_v49 = vpop.f32.mrb[3].mxu1 }
 0x3bf   :  { %10520 = vtanh.f32 %v527_v47  ;;  %v8580_v54 = vmul.f32 -1.442695, %v527_v47 }
 0x3c1   :  { %10522 = vpow2.f32 %v8580_v54 }
 0x3c9   :  { %v10521_v51 = vpop.eup %10520 }
 0x3ca   :  { %537 = vrot.lane.b32.xlu0 %v10521_v51, %s11091_s0 }
 0x3cb   :  { %v10523_v58 = vpop.eup %10522 }
 0x3cc   :  { %v531_v62 = vadd.f32 1.0, %v10523_v58 }
 0x3ce   :  { %10524 = vrcp.f32 %v531_v62 }
 0x3d8   :  { %v10525_v2 = vpop.eup %10524 }
 0x3d9   :  { %v535_v19 = vmul.f32 %v10525_v2, %v442_v37 }
 0x43c   :  { %v538_v8 = vpop.permute.xlu0 %537 }
 0x43d   :  { %v540_v13 = vmul.f32 %v10525_v2, %v538_v8 }
 0x43f   :  { %542 = vrot.lane.b32.xlu1 %v540_v13, %s11092_s11 }
 0x4b1   :  { %v543_v21 = vpop.permute.xlu1 %542 }
 0x4b2   :  { %v545_v23 = vadd.f32 %v543_v21, %v535_v19 }
 0x4b4   :  { %10526 = vtanh.f32 %v545_v23 }
 0x4be   :  { %v10527_v24 = vpop.eup %10526 }
 0x4bf   :  { %548 = vrot.lane.b32.xlu0 %v10527_v24, %s11091_s0 }
 0x531   :  { %v549_v26 = vpop.permute.xlu0 %548 }
 0x532   :  { %v551_v27 = vmul.f32 %v10525_v2, %v549_v26 }
 0x534   :  { %553 = vrot.lane.b32.xlu1 %v551_v27, %s11092_s11 }
 0x5a6   :  { %v554_v28 = vpop.permute.xlu1 %553 }
 0x5a7   :  { %556 = vst.msk [vmem:[#allocation5 + $0x8] sm:$0xff] %vm72_vm0, %v554_v28  ;;  %9282 = vmatmul.mubr.msk.f32.vlgmr.msra.gmra.mrb[4].mxu1 %vm72_vm0, %v554_v28 }
 0x5a8   :  { %10101 = vmatpush3.bf16.msra.mxu1 %v11167_v11  ;;  %9292 = vmatprep.mubr.msk.f32.mxu1 %vm11089_vm1, %v11090_v4 }
 0x5a9   :  { %10102 = vmatprep.subr.bf16.mxu1 %v11088_v3 }
 0x5ac   :  { %10104 = vmatpush3.bf16.msra.mxu1 %v11182_v16 }
 0x5ad   :  { %10111 = vmatprep.subr.bf16.mxu1 %v11088_v3 }
 0x67a   :  { %v626_v29 = vpop.f32.mrb[4].mxu1 }
 0x67b   :  { %v630_v30 = vadd.f32 %v626_v29, %v292_v10  ;;  %v9283_v31 = vpop.f32.mrb[5].mxu1 }
 0x67d   :  { %10528 = vtanh.f32 %v630_v30  ;;  %v8582_v34 = vmul.f32 -1.442695, %v630_v30 }
 0x67f   :  { %10530 = vpow2.f32 %v8582_v34 }
 0x687   :  { %v10529_v33 = vpop.eup %10528 }
 0x688   :  { %640 = vrot.lane.b32.xlu0 %v10529_v33, %s11091_s0 }
 0x689   :  { %v10531_v35 = vpop.eup %10530 }
 0x68a   :  { %v634_v37 = vadd.f32 1.0, %v10531_v35 }
 0x68c   :  { %10532 = vrcp.f32 %v634_v37 }
 0x696   :  { %v10533_v38 = vpop.eup %10532 }
 0x697   :  { %v638_v44 = vmul.f32 %v10533_v38, %v545_v23 }
 0x6fa   :  { %v641_v40 = vpop.permute.xlu0 %640 }
 0x6fb   :  { %v643_v41 = vmul.f32 %v10533_v38, %v641_v40 }
 0x6fd   :  { %645 = vrot.lane.b32.xlu1 %v643_v41, %s11092_s11 }
 0x76f   :  { %v646_v46 = vpop.permute.xlu1 %645 }
 0x770   :  { %v648_v47 = vadd.f32 %v646_v46, %v638_v44 }
 0x772   :  { %10534 = vtanh.f32 %v648_v47 }
 0x77c   :  { %v10535_v10 = vpop.eup %10534 }
 0x77d   :  { %651 = vrot.lane.b32.xlu0 %v10535_v10, %s11091_s0 }
 0x7ef   :  { %v652_v49 = vpop.permute.xlu0 %651 }
 0x7f0   :  { %v654_v51 = vmul.f32 %v10533_v38, %v652_v49 }
 0x7f2   :  { %656 = vrot.lane.b32.xlu1 %v654_v51, %s11092_s11 }
 0x864   :  { %v657_v54 = vpop.permute.xlu1 %656 }
 0x865   :  { %659 = vst.msk [vmem:[#allocation5 + $0x10] sm:$0xff] %vm72_vm0, %v657_v54  ;;  %9293 = vmatmul.mubr.msk.f32.vlgmr.msra.gmra.mrb[6].mxu1 %vm72_vm0, %v657_v54 }
 0x866   :  { %10113 = vmatpush3.bf16.msra.mxu1 %v11167_v11  ;;  %9314 = vmatprep.mubr.msk.f32.mxu1 %vm11089_vm1, %v11090_v4 }
 0x867   :  { %10114 = vmatprep.subr.bf16.mxu1 %v11088_v3 }
 0x86a   :  { %10116 = vmatpush3.bf16.msra.mxu1 %v11182_v16 }
 0x86b   :  { %10123 = vmatprep.subr.bf16.mxu1 %v11088_v3 }
 0x938   :  { %v729_v58 = vpop.f32.mrb[6].mxu1 }
 0x939   :  { %v733_v62 = vadd.f32 %v729_v58, %v296_v14  ;;  %v9294_v2 = vpop.f32.mrb[7].mxu1 }
 0x93b   :  { %10536 = vtanh.f32 %v733_v62  ;;  %v8584_v13 = vmul.f32 -1.442695, %v733_v62 }
 0x93d   :  { %10538 = vpow2.f32 %v8584_v13 }
 0x945   :  { %v10537_v8 = vpop.eup %10536 }
 0x946   :  { %743 = vrot.lane.b32.xlu0 %v10537_v8, %s11091_s0 }
 0x947   :  { %v10539_v19 = vpop.eup %10538 }
 0x948   :  { %v737_v21 = vadd.f32 1.0, %v10539_v19 }
 0x94a   :  { %10540 = vrcp.f32 %v737_v21 }
 0x954   :  { %v10541_v23 = vpop.eup %10540 }
 0x955   :  { %v741_v27 = vmul.f32 %v10541_v23, %v648_v47 }
 0x9b8   :  { %v744_v24 = vpop.permute.xlu0 %743 }
 0x9b9   :  { %v746_v26 = vmul.f32 %v10541_v23, %v744_v24 }
 0x9bb   :  { %748 = vrot.lane.b32.xlu1 %v746_v26, %s11092_s11 }
 0xa2d   :  { %v749_v28 = vpop.permute.xlu1 %748 }
 0xa2e   :  { %v751_v29 = vadd.f32 %v749_v28, %v741_v27 }
 0xa30   :  { %10542 = vtanh.f32 %v751_v29 }
 0xa3a   :  { %v10543_v14 = vpop.eup %10542 }
 0xa3b   :  { %754 = vrot.lane.b32.xlu0 %v10543_v14, %s11091_s0 }
 0xaad   :  { %v755_v30 = vpop.permute.xlu0 %754 }
 0xaae   :  { %v757_v31 = vmul.f32 %v10541_v23, %v755_v30 }
 0xab0   :  { %759 = vrot.lane.b32.xlu1 %v757_v31, %s11092_s11 }
 0xb22   :  { %v760_v33 = vpop.permute.xlu1 %759 }
 0xb23   :  { %762 = vst.msk [vmem:[#allocation5 + $0x18] sm:$0xff] %vm72_vm0, %v760_v33  ;;  %9304 = vmatmul.mubr.msk.f32.vlgmr.msra.gmra.mrb[16].mxu0 %vm72_vm0, %v760_v33 }
 0xb24   :  { %10119 = vmatpush3.bf16.msra.mxu0 %v11167_v11  ;;  %9325 = vmatprep.mubr.msk.f32.mxu0 %vm11089_vm1, %v11090_v4 }
 0xb25   :  { %10120 = vmatprep.subr.bf16.mxu0 %v11088_v3 }
 0xb28   :  { %10122 = vmatpush3.bf16.msra.mxu0 %v11182_v16 }
 0xb29   :  { %10129 = vmatprep.subr.bf16.mxu0 %v11088_v3 }
 0xbf6   :  { %v832_v34 = vpop.f32.mrb[16].mxu0 }
 0xbf7   :  { %v836_v35 = vadd.f32 %v832_v34, %v300_v0  ;;  %v9305_v37 = vpop.f32.mrb[17].mxu0 }
 0xbf9   :  { %10544 = vtanh.f32 %v836_v35  ;;  %v8586_v40 = vmul.f32 -1.442695, %v836_v35 }
 0xbfb   :  { %10546 = vpow2.f32 %v8586_v40 }
 0xc03   :  { %v10545_v38 = vpop.eup %10544 }
 0xc04   :  { %846 = vrot.lane.b32.xlu0 %v10545_v38, %s11091_s0 }
 0xc05   :  { %v10547_v41 = vpop.eup %10546 }
 0xc06   :  { %v840_v44 = vadd.f32 1.0, %v10547_v41 }
 0xc08   :  { %10548 = vrcp.f32 %v840_v44 }
 0xc12   :  { %v10549_v46 = vpop.eup %10548 }
 0xc13   :  { %v844_v49 = vmul.f32 %v10549_v46, %v751_v29 }
 0xc76   :  { %v847_v47 = vpop.permute.xlu0 %846 }
 0xc77   :  { %v849_v10 = vmul.f32 %v10549_v46, %v847_v47 }
 0xc79   :  { %851 = vrot.lane.b32.xlu1 %v849_v10, %s11092_s11 }
 0xceb   :  { %v852_v51 = vpop.permute.xlu1 %851 }
 0xcec   :  { %v854_v54 = vadd.f32 %v852_v51, %v844_v49 }
 0xcee   :  { %10550 = vtanh.f32 %v854_v54 }
 0xcf8   :  { %v10551_v0 = vpop.eup %10550 }
 0xcf9   :  { %857 = vrot.lane.b32.xlu0 %v10551_v0, %s11091_s0 }
 0xd6b   :  { %v858_v58 = vpop.permute.xlu0 %857 }
 0xd6c   :  { %v860_v62 = vmul.f32 %v10549_v46, %v858_v58 }
 0xd6e   :  { %862 = vrot.lane.b32.xlu1 %v860_v62, %s11092_s11 }
 0xde0   :  { %v863_v2 = vpop.permute.xlu1 %862 }
 0xde1   :  { %865 = vst.msk [vmem:[#allocation5 + $0x20] sm:$0xff] %vm72_vm0, %v863_v2  ;;  %9315 = vmatmul.mubr.msk.f32.vlgmr.msra.gmra.mrb[8].mxu1 %vm72_vm0, %v863_v2 }
 0xde2   :  { %10125 = vmatpush3.bf16.msra.mxu1 %v11167_v11  ;;  %9336 = vmatprep.mubr.msk.f32.mxu1 %vm11089_vm1, %v11090_v4 }
 0xde3   :  { %10126 = vmatprep.subr.bf16.mxu1 %v11088_v3 }
 0xde6   :  { %10128 = vmatpush3.bf16.msra.mxu1 %v11182_v16 }
 0xde7   :  { %10135 = vmatprep.subr.bf16.mxu1 %v11088_v3 }
 0xeb4   :  { %v935_v8 = vpop.f32.mrb[8].mxu1 }
 0xeb5   :  { %v939_v13 = vadd.f32 %v935_v8, %v304_v5  ;;  %v9316_v19 = vpop.f32.mrb[9].mxu1 }
 0xeb7   :  { %10552 = vtanh.f32 %v939_v13  ;;  %v8588_v23 = vmul.f32 -1.442695, %v939_v13 }
 0xeb9   :  { %10554 = vpow2.f32 %v8588_v23 }
 0xec1   :  { %v10553_v21 = vpop.eup %10552 }
 0xec2   :  { %949 = vrot.lane.b32.xlu0 %v10553_v21, %s11091_s0 }
 0xec3   :  { %v10555_v24 = vpop.eup %10554 }
 0xec4   :  { %v943_v26 = vadd.f32 1.0, %v10555_v24 }
 0xec6   :  { %10556 = vrcp.f32 %v943_v26 }
 0xed0   :  { %v10557_v27 = vpop.eup %10556 }
 0xed1   :  { %v947_v14 = vmul.f32 %v10557_v27, %v854_v54 }
 0xf34   :  { %v950_v28 = vpop.permute.xlu0 %949 }
 0xf35   :  { %v952_v29 = vmul.f32 %v10557_v27, %v950_v28 }
 0xf37   :  { %954 = vrot.lane.b32.xlu1 %v952_v29, %s11092_s11 }
 0xfa9   :  { %v955_v30 = vpop.permute.xlu1 %954 }
 0xfaa   :  { %v957_v31 = vadd.f32 %v955_v30, %v947_v14 }
 0xfac   :  { %10558 = vtanh.f32 %v957_v31 }
 0xfb6   :  { %v10559_v5 = vpop.eup %10558 }
 0xfb7   :  { %960 = vrot.lane.b32.xlu0 %v10559_v5, %s11091_s0 }
0x1029   :  { %v961_v33 = vpop.permute.xlu0 %960 }
0x102a   :  { %v963_v34 = vmul.f32 %v10557_v27, %v961_v33 }
0x102c   :  { %965 = vrot.lane.b32.xlu1 %v963_v34, %s11092_s11 }
0x109e   :  { %v966_v35 = vpop.permute.xlu1 %965 }
0x109f   :  { %968 = vst.msk [vmem:[#allocation5 + $0x28] sm:$0xff] %vm72_vm0, %v966_v35  ;;  %9326 = vmatmul.mubr.msk.f32.vlgmr.msra.gmra.mrb[18].mxu0 %vm72_vm0, %v966_v35 }
0x10a0   :  { %10131 = vmatpush3.bf16.msra.mxu0 %v11167_v11  ;;  %9347 = vmatprep.mubr.msk.f32.mxu0 %vm11089_vm1, %v11090_v4 }
0x10a1   :  { %10132 = vmatprep.subr.bf16.mxu0 %v11088_v3 }
0x10a4   :  { %10134 = vmatpush3.bf16.msra.mxu0 %v11182_v16 }
0x10a5   :  { %10141 = vmatprep.subr.bf16.mxu0 %v11088_v3 }
0x1172   :  { %v1038_v37 = vpop.f32.mrb[18].mxu0 }
0x1173   :  { %v1042_v38 = vadd.f32 %v1038_v37, %v308_v56  ;;  %v9327_v40 = vpop.f32.mrb[19].mxu0 }
0x1175   :  { %10560 = vtanh.f32 %v1042_v38  ;;  %v8590_v44 = vmul.f32 -1.442695, %v1042_v38 }
0x1177   :  { %10562 = vpow2.f32 %v8590_v44 }
0x117f   :  { %v10561_v41 = vpop.eup %10560 }
0x1180   :  { %1052 = vrot.lane.b32.xlu0 %v10561_v41, %s11091_s0 }
0x1181   :  { %v10563_v46 = vpop.eup %10562 }
0x1182   :  { %v1046_v47 = vadd.f32 1.0, %v10563_v46 }
0x1184   :  { %10564 = vrcp.f32 %v1046_v47 }
0x118e   :  { %v10565_v10 = vpop.eup %10564 }
0x118f   :  { %v1050_v54 = vmul.f32 %v10565_v10, %v957_v31 }
0x11f2   :  { %v1053_v49 = vpop.permute.xlu0 %1052 }
0x11f3   :  { %v1055_v51 = vmul.f32 %v10565_v10, %v1053_v49 }
0x11f5   :  { %1057 = vrot.lane.b32.xlu1 %v1055_v51, %s11092_s11 }
0x1267   :  { %v1058_v0 = vpop.permute.xlu1 %1057 }
0x1268   :  { %v1060_v58 = vadd.f32 %v1058_v0, %v1050_v54 }
0x126a   :  { %10566 = vtanh.f32 %v1060_v58 }
0x1274   :  { %v10567_v56 = vpop.eup %10566 }
0x1275   :  { %1063 = vrot.lane.b32.xlu0 %v10567_v56, %s11091_s0 }
0x12e7   :  { %v1064_v62 = vpop.permute.xlu0 %1063 }
0x12e8   :  { %v1066_v2 = vmul.f32 %v10565_v10, %v1064_v62 }
0x12ea   :  { %1068 = vrot.lane.b32.xlu1 %v1066_v2, %s11092_s11 }
0x135c   :  { %v1069_v8 = vpop.permute.xlu1 %1068 }
0x135d   :  { %1071 = vst.msk [vmem:[#allocation5 + $0x30] sm:$0xff] %vm72_vm0, %v1069_v8  ;;  %9337 = vmatmul.mubr.msk.f32.vlgmr.msra.gmra.mrb[10].mxu1 %vm72_vm0, %v1069_v8 }
0x135e   :  { %10137 = vmatpush3.bf16.msra.mxu1 %v11167_v11  ;;  %9358 = vmatprep.mubr.msk.f32.mxu1 %vm11089_vm1, %v11090_v4 }
0x135f   :  { %10138 = vmatprep.subr.bf16.mxu1 %v11088_v3 }
0x1362   :  { %10140 = vmatpush3.bf16.msra.mxu1 %v11182_v16 }
0x1363   :  { %10147 = vmatprep.subr.bf16.mxu1 %v11088_v3 }
0x1430   :  { %v1141_v13 = vpop.f32.mrb[10].mxu1 }
0x1431   :  { %v1145_v19 = vadd.f32 %v1141_v13, %v312_v59  ;;  %v9338_v21 = vpop.f32.mrb[11].mxu1 }
0x1433   :  { %10568 = vtanh.f32 %v1145_v19  ;;  %v8592_v24 = vmul.f32 -1.442695, %v1145_v19 }
0x1435   :  { %10570 = vpow2.f32 %v8592_v24 }
0x143d   :  { %v10569_v23 = vpop.eup %10568 }
0x143e   :  { %1155 = vrot.lane.b32.xlu0 %v10569_v23, %s11091_s0 }
0x143f   :  { %v10571_v26 = vpop.eup %10570 }
0x1440   :  { %v1149_v27 = vadd.f32 1.0, %v10571_v26 }
0x1442   :  { %10572 = vrcp.f32 %v1149_v27 }
0x144c   :  { %v10573_v28 = vpop.eup %10572 }
0x144d   :  { %v1153_v30 = vmul.f32 %v10573_v28, %v1060_v58 }
0x14b0   :  { %v1156_v29 = vpop.permute.xlu0 %1155 }
0x14b1   :  { %v1158_v14 = vmul.f32 %v10573_v28, %v1156_v29 }
0x14b3   :  { %1160 = vrot.lane.b32.xlu1 %v1158_v14, %s11092_s11 }
0x1525   :  { %v1161_v31 = vpop.permute.xlu1 %1160 }
0x1526   :  { %v1163_v5 = vadd.f32 %v1161_v31, %v1153_v30 }
0x1528   :  { %10574 = vtanh.f32 %v1163_v5 }
0x1532   :  { %v10575_v59 = vpop.eup %10574 }
0x1533   :  { %1166 = vrot.lane.b32.xlu0 %v10575_v59, %s11091_s0 }
0x15a5   :  { %v1167_v33 = vpop.permute.xlu0 %1166 }
0x15a6   :  { %v1169_v34 = vmul.f32 %v10573_v28, %v1167_v33 }
0x15a8   :  { %1171 = vrot.lane.b32.xlu1 %v1169_v34, %s11092_s11  ;;  %v2023_v34 = vld [vmem:[#allocation5 + $0x30] sm:$0xff] }
0x161a   :  { %v1172_v35 = vpop.permute.xlu1 %1171 }
0x161b   :  { %1174 = vst.msk [vmem:[#allocation5 + $0x38] sm:$0xff] %vm72_vm0, %v1172_v35  ;;  %9348 = vmatmul.mubr.msk.f32.vlgmr.msra.gmra.mrb[20].mxu0 %vm72_vm0, %v1172_v35 }
0x161c   :  { %10143 = vmatpush3.bf16.msra.mxu0 %v11167_v11  ;;  %9369 = vmatprep.mubr.msk.f32.mxu0 %vm11089_vm1, %v11090_v4 }
0x161d   :  { %10144 = vmatprep.subr.bf16.mxu0 %v11088_v3 }
0x1620   :  { %10146 = vmatpush3.bf16.msra.mxu0 %v11182_v16 }
0x1621   :  { %10153 = vmatprep.subr.bf16.mxu0 %v11088_v3 }
0x1622   :  { %v2027_v62 = vld [vmem:[#allocation5 + $0x38] sm:$0xff] }
0x16ee   :  { %v1244_v37 = vpop.f32.mrb[20].mxu0 }
0x16ef   :  { %v1248_v38 = vadd.f32 %v1244_v37, %v316_v60  ;;  %v9349_v40 = vpop.f32.mrb[21].mxu0 }
0x16f1   :  { %10576 = vtanh.f32 %v1248_v38  ;;  %v8594_v44 = vmul.f32 -1.442695, %v1248_v38 }
0x16f3   :  { %10578 = vpow2.f32 %v8594_v44 }
0x16fb   :  { %v10577_v41 = vpop.eup %10576 }
0x16fc   :  { %1258 = vrot.lane.b32.xlu0 %v10577_v41, %s11091_s0 }
0x16fd   :  { %v10579_v46 = vpop.eup %10578 }
0x16fe   :  { %v1252_v47 = vadd.f32 1.0, %v10579_v46 }
0x1700   :  { %10580 = vrcp.f32 %v1252_v47 }
0x170a   :  { %v10581_v10 = vpop.eup %10580 }
0x170b   :  { %v1256_v54 = vmul.f32 %v10581_v10, %v1163_v5 }
0x176e   :  { %v1259_v49 = vpop.permute.xlu0 %1258 }
0x176f   :  { %v1261_v51 = vmul.f32 %v10581_v10, %v1259_v49 }
0x1771   :  { %1263 = vrot.lane.b32.xlu1 %v1261_v51, %s11092_s11 }
0x17e3   :  { %v1264_v0 = vpop.permute.xlu1 %1263 }
0x17e4   :  { %v1266_v58 = vadd.f32 %v1264_v0, %v1256_v54 }
0x17e6   :  { %10582 = vtanh.f32 %v1266_v58 }
0x17f0   :  { %v10583_v48 = vpop.eup %10582 }
0x17f1   :  { %1269 = vrot.lane.b32.xlu0 %v10583_v48, %s11091_s0 }
0x1863   :  { %v1270_v55 = vpop.permute.xlu0 %1269 }
0x1864   :  { %v1272_v60 = vmul.f32 %v10581_v10, %v1270_v55 }
0x1866   :  { %1274 = vrot.lane.b32.xlu1 %v1272_v60, %s11092_s11 }
0x18d8   :  { %v1275_v56 = vpop.permute.xlu1 %1274 }
0x18d9   :  { %1277 = vst.msk [vmem:[#allocation5 + $0x40] sm:$0xff] %vm72_vm0, %v1275_v56  ;;  %9359 = vmatmul.mubr.msk.f32.vlgmr.msra.gmra.mrb[12].mxu1 %vm72_vm0, %v1275_v56  ;;  %v2019_v56 = vld [vmem:[#allocation5 + $0x28] sm:$0xff] }
0x18da   :  { %10149 = vmatpush3.bf16.msra.mxu1 %v11167_v11  ;;  %9380 = vmatprep.mubr.msk.f32.mxu1 %vm11089_vm1, %v11090_v4 }
0x18db   :  { %10150 = vmatprep.subr.bf16.mxu1 %v11088_v3 }
0x18de   :  { %10152 = vmatpush3.bf16.msra.mxu1 %v11182_v16 }
0x18df   :  { %10159 = vmatprep.subr.bf16.mxu1 %v11088_v3 }
0x18e0   :  { %v2028_v2 = vld [vmem:[#allocation5 + $0x40] sm:$0xff] }
0x18e1   :  { %v2029_v8 = vsel %vm44_vm3, %v2027_v62, %v2028_v2  ;;  %v2033_v13 = vsel %vm44_vm3, %v2028_v2, %v2027_v62 }
0x18e2   :  { %2030 = vst.msk [vmem:[#allocation4 + $0x38] sm:$0xff] %vm72_vm0, %v2029_v8  ;;  %2034 = vst.msk [vmem:[#allocation4 + $0x40] sm:$0xff] %vm72_vm0, %v2033_v13 }
0x19ac   :  { %v1347_v19 = vpop.f32.mrb[12].mxu1 }
0x19ad   :  { %v1351_v21 = vadd.f32 %v1347_v19, %v320_v57  ;;  %v9360_v23 = vpop.f32.mrb[13].mxu1 }
0x19af   :  { %10584 = vtanh.f32 %v1351_v21  ;;  %v8596_v26 = vmul.f32 -1.442695, %v1351_v21 }
0x19b1   :  { %10586 = vpow2.f32 %v8596_v26 }
0x19b9   :  { %v10585_v24 = vpop.eup %10584 }
0x19ba   :  { %1361 = vrot.lane.b32.xlu0 %v10585_v24, %s11091_s0 }
0x19bb   :  { %v10587_v27 = vpop.eup %10586 }
0x19bc   :  { %v1355_v28 = vadd.f32 1.0, %v10587_v27 }
0x19be   :  { %10588 = vrcp.f32 %v1355_v28 }
0x19c8   :  { %v10589_v29 = vpop.eup %10588 }
0x19c9   :  { %v1359_v31 = vmul.f32 %v10589_v29, %v1266_v58 }
0x1a2c   :  { %v1362_v14 = vpop.permute.xlu0 %1361 }
0x1a2d   :  { %v1364_v30 = vmul.f32 %v10589_v29, %v1362_v14 }
0x1a2f   :  { %1366 = vrot.lane.b32.xlu1 %v1364_v30, %s11092_s11 }
0x1aa1   :  { %v1367_v5 = vpop.permute.xlu1 %1366 }
0x1aa2   :  { %v1369_v59 = vadd.f32 %v1367_v5, %v1359_v31 }
0x1aa4   :  { %10590 = vtanh.f32 %v1369_v59 }
0x1aae   :  { %v10591_v50 = vpop.eup %10590 }
0x1aaf   :  { %1372 = vrot.lane.b32.xlu0 %v10591_v50, %s11091_s0  ;;  %v2015_v50 = vld [vmem:[#allocation5 + $0x20] sm:$0xff] }
0x1b21   :  { %v1373_v53 = vpop.permute.xlu0 %1372 }
0x1b22   :  { %v1375_v57 = vmul.f32 %v10589_v29, %v1373_v53 }
0x1b24   :  { %1377 = vrot.lane.b32.xlu1 %v1375_v57, %s11092_s11 }
0x1b96   :  { %v1378_v33 = vpop.permute.xlu1 %1377 }
0x1b97   :  { %1380 = vst.msk [vmem:[#allocation5 + $0x48] sm:$0xff] %vm72_vm0, %v1378_v33  ;;  %9370 = vmatmul.mubr.msk.f32.vlgmr.msra.gmra.mrb[22].mxu0 %vm72_vm0, %v1378_v33 }
0x1b98   :  { %10155 = vmatpush3.bf16.msra.mxu0 %v11167_v11  ;;  %9391 = vmatprep.mubr.msk.f32.mxu0 %vm11089_vm1, %v11090_v4 }
0x1b99   :  { %10156 = vmatprep.subr.bf16.mxu0 %v11088_v3 }
0x1b9c   :  { %10158 = vmatpush3.bf16.msra.mxu0 %v11182_v16 }
0x1b9d   :  { %10165 = vmatprep.subr.bf16.mxu0 %v11088_v3 }
0x1b9e   :  { %v2024_v35 = vld [vmem:[#allocation5 + $0x48] sm:$0xff] }
0x1b9f   :  { %v2025_v37 = vsel %vm44_vm3, %v2023_v34, %v2024_v35  ;;  %v2037_v38 = vsel %vm44_vm3, %v2024_v35, %v2023_v34 }
0x1ba0   :  { %2026 = vst.msk [vmem:[#allocation4 + $0x30] sm:$0xff] %vm72_vm0, %v2025_v37  ;;  %2038 = vst.msk [vmem:[#allocation4 + $0x48] sm:$0xff] %vm72_vm0, %v2037_v38 }
0x1c6a   :  { %v1450_v40 = vpop.f32.mrb[22].mxu0 }
0x1c6b   :  { %v1454_v41 = vadd.f32 %v1450_v40, %v324_v6  ;;  %v9371_v44 = vpop.f32.mrb[23].mxu0 }
0x1c6d   :  { %10592 = vtanh.f32 %v1454_v41  ;;  %v8598_v47 = vmul.f32 -1.442695, %v1454_v41 }
0x1c6f   :  { %10594 = vpow2.f32 %v8598_v47 }
0x1c77   :  { %v10593_v46 = vpop.eup %10592 }
0x1c78   :  { %1464 = vrot.lane.b32.xlu0 %v10593_v46, %s11091_s0 }
0x1c79   :  { %v10595_v10 = vpop.eup %10594 }
0x1c7a   :  { %v1458_v49 = vadd.f32 1.0, %v10595_v10 }
0x1c7c   :  { %10596 = vrcp.f32 %v1458_v49 }
0x1c86   :  { %v10597_v51 = vpop.eup %10596 }
0x1c87   :  { %v1462_v58 = vmul.f32 %v10597_v51, %v1369_v59 }
0x1cea   :  { %v1465_v54 = vpop.permute.xlu0 %1464 }
0x1ceb   :  { %v1467_v0 = vmul.f32 %v10597_v51, %v1465_v54 }
0x1ced   :  { %1469 = vrot.lane.b32.xlu1 %v1467_v0, %s11092_s11 }
0x1d5f   :  { %v1470_v48 = vpop.permute.xlu1 %1469 }
0x1d60   :  { %v1472_v55 = vadd.f32 %v1470_v48, %v1462_v58  ;;  %v2011_v58 = vld [vmem:[#allocation5 + $0x18] sm:$0xff] }
0x1d62   :  { %10598 = vtanh.f32 %v1472_v55 }
0x1d6c   :  { %v10599_v43 = vpop.eup %10598 }
0x1d6d   :  { %1475 = vrot.lane.b32.xlu0 %v10599_v43, %s11091_s0 }
0x1ddf   :  { %v1476_v63 = vpop.permute.xlu0 %1475 }
0x1de0   :  { %v1478_v6 = vmul.f32 %v10597_v51, %v1476_v63 }
0x1de2   :  { %1480 = vrot.lane.b32.xlu1 %v1478_v6, %s11092_s11 }
0x1e54   :  { %v1481_v60 = vpop.permute.xlu1 %1480 }
0x1e55   :  { %1483 = vst.msk [vmem:[#allocation5 + $0x50] sm:$0xff] %vm72_vm0, %v1481_v60  ;;  %9381 = vmatmul.mubr.msk.f32.vlgmr.msra.gmra.mrb[14].mxu1 %vm72_vm0, %v1481_v60 }
0x1e56   :  { %10161 = vmatpush3.bf16.msra.mxu1 %v11167_v11  ;;  %9402 = vmatprep.mubr.msk.f32.mxu1 %vm11089_vm1, %v11090_v4 }
0x1e57   :  { %10162 = vmatprep.subr.bf16.mxu1 %v11088_v3 }
0x1e5a   :  { %10164 = vmatpush3.bf16.msra.mxu1 %v11182_v16 }
0x1e5b   :  { %10171 = vmatprep.subr.bf16.mxu1 %v11088_v3 }
0x1e5c   :  { %v2020_v62 = vld [vmem:[#allocation5 + $0x50] sm:$0xff] }
0x1e5d   :  { %v2021_v2 = vsel %vm44_vm3, %v2019_v56, %v2020_v62  ;;  %v2041_v8 = vsel %vm44_vm3, %v2020_v62, %v2019_v56 }
0x1e5e   :  { %2022 = vst.msk [vmem:[#allocation4 + $0x28] sm:$0xff] %vm72_vm0, %v2021_v2  ;;  %2042 = vst.msk [vmem:[#allocation4 + $0x50] sm:$0xff] %vm72_vm0, %v2041_v8 }
0x1f28   :  { %v1553_v13 = vpop.f32.mrb[14].mxu1 }
0x1f29   :  { %v1557_v19 = vadd.f32 %v1553_v13, %v328_v1  ;;  %v9382_v21 = vpop.f32.mrb[15].mxu1 }
0x1f2b   :  { %10600 = vtanh.f32 %v1557_v19  ;;  %v8600_v24 = vmul.f32 -1.442695, %v1557_v19 }
0x1f2d   :  { %10602 = vpow2.f32 %v8600_v24 }
0x1f35   :  { %v10601_v23 = vpop.eup %10600 }
0x1f36   :  { %1567 = vrot.lane.b32.xlu0 %v10601_v23, %s11091_s0 }
0x1f37   :  { %v10603_v26 = vpop.eup %10602 }
0x1f38   :  { %v1561_v27 = vadd.f32 1.0, %v10603_v26  ;;  %v2007_v26 = vld [vmem:[#allocation5 + $0x10] sm:$0xff] }
0x1f3a   :  { %10604 = vrcp.f32 %v1561_v27 }
0x1f44   :  { %v10605_v28 = vpop.eup %10604 }
0x1f45   :  { %v1565_v30 = vmul.f32 %v10605_v28, %v1472_v55 }
0x1fa8   :  { %v1568_v29 = vpop.permute.xlu0 %1567 }
0x1fa9   :  { %v1570_v14 = vmul.f32 %v10605_v28, %v1568_v29 }
0x1fab   :  { %1572 = vrot.lane.b32.xlu1 %v1570_v14, %s11092_s11 }
0x201d   :  { %v1573_v31 = vpop.permute.xlu1 %1572 }
0x201e   :  { %v1575_v5 = vadd.f32 %v1573_v31, %v1565_v30 }
0x2020   :  { %10606 = vtanh.f32 %v1575_v5 }
0x202a   :  { %v10607_v45 = vpop.eup %10606 }
0x202b   :  { %1578 = vrot.lane.b32.xlu0 %v10607_v45, %s11091_s0 }
0x209d   :  { %v1579_v61 = vpop.permute.xlu0 %1578 }
0x209e   :  { %v1581_v1 = vmul.f32 %v10605_v28, %v1579_v61 }
0x20a0   :  { %1583 = vrot.lane.b32.xlu1 %v1581_v1, %s11092_s11 }
0x2112   :  { %v1584_v59 = vpop.permute.xlu1 %1583 }
0x2113   :  { %1586 = vst.msk [vmem:[#allocation5 + $0x58] sm:$0xff] %vm72_vm0, %v1584_v59  ;;  %9392 = vmatmul.mubr.msk.f32.vlgmr.msra.gmra.mrb[24].mxu0 %vm72_vm0, %v1584_v59 }
0x2114   :  { %10167 = vmatpush3.bf16.msra.mxu0 %v11167_v11  ;;  %9413 = vmatprep.mubr.msk.f32.mxu0 %vm11089_vm1, %v11090_v4 }
0x2115   :  { %10168 = vmatprep.subr.bf16.mxu0 %v11088_v3 }
0x2118   :  { %10170 = vmatpush3.bf16.msra.mxu0 %v11182_v16 }
0x211a   :  { %v2016_v53 = vld [vmem:[#allocation5 + $0x58] sm:$0xff] }
0x211b   :  { %v2017_v57 = vsel %vm44_vm3, %v2015_v50, %v2016_v53  ;;  %v2045_v33 = vsel %vm44_vm3, %v2016_v53, %v2015_v50 }
0x211c   :  { %2018 = vst.msk [vmem:[#allocation4 + $0x20] sm:$0xff] %vm72_vm0, %v2017_v57  ;;  %2046 = vst.msk [vmem:[#allocation4 + $0x58] sm:$0xff] %vm72_vm0, %v2045_v33 }
0x21e6   :  { %v1656_v34 = vpop.f32.mrb[24].mxu0 }
0x21e7   :  { %v1660_v35 = vadd.f32 %v1656_v34, %v332_v15  ;;  %v9393_v37 = vpop.f32.mrb[25].mxu0 }
0x21e8   :  { %v2003_v37 = vld [vmem:[#allocation5 + $0x8] sm:$0xff] }
0x21e9   :  { %10608 = vtanh.f32 %v1660_v35  ;;  %v8602_v40 = vmul.f32 -1.442695, %v1660_v35 }
0x21eb   :  { %10610 = vpow2.f32 %v8602_v40 }
0x21f3   :  { %v10609_v38 = vpop.eup %10608 }
0x21f4   :  { %1670 = vrot.lane.b32.xlu0 %v10609_v38, %s11091_s0 }
0x21f5   :  { %v10611_v41 = vpop.eup %10610 }
0x21f6   :  { %v1664_v44 = vadd.f32 1.0, %v10611_v41 }
0x21f8   :  { %10612 = vrcp.f32 %v1664_v44 }
0x2202   :  { %v10613_v46 = vpop.eup %10612 }
0x2203   :  { %v1668_v49 = vmul.f32 %v10613_v46, %v1575_v5 }
0x2266   :  { %v1671_v47 = vpop.permute.xlu0 %1670 }
0x2267   :  { %v1673_v10 = vmul.f32 %v10613_v46, %v1671_v47 }
0x2269   :  { %1675 = vrot.lane.b32.xlu1 %v1673_v10, %s11092_s11 }
0x22db   :  { %v1676_v51 = vpop.permute.xlu1 %1675 }
0x22dc   :  { %v1678_v54 = vadd.f32 %v1676_v51, %v1668_v49 }
0x22de   :  { %10614 = vtanh.f32 %v1678_v54 }
0x22e8   :  { %v10615_v36 = vpop.eup %10614 }
0x22e9   :  { %1681 = vrot.lane.b32.xlu0 %v10615_v36, %s11091_s0 }
0x235b   :  { %v1682_v9 = vpop.permute.xlu0 %1681 }
0x235c   :  { %v1684_v15 = vmul.f32 %v10613_v46, %v1682_v9 }
0x235e   :  { %1686 = vrot.lane.b32.xlu1 %v1684_v15, %s11092_s11 }
0x23d0   :  { %v1687_v0 = vpop.permute.xlu1 %1686 }
0x23d1   :  { %1689 = vst.msk [vmem:[#allocation5 + $0x60] sm:$0xff] %vm72_vm0, %v1687_v0  ;;  %9403 = vmatmul.mubr.msk.f32.vlgmr.msra.gmra.mrb[16].mxu1 %vm72_vm0, %v1687_v0 }
0x23d2   :  { %10173 = vmatpush3.bf16.msra.mxu1 %v11167_v11  ;;  %9424 = vmatprep.mubr.msk.f32.mxu1 %vm11089_vm1, %v11090_v4 }
0x23d3   :  { %10174 = vmatprep.subr.bf16.mxu1 %v11088_v3 }
0x23d6   :  { %10176 = vmatpush3.bf16.msra.mxu1 %v11182_v16 }
0x23d7   :  { %10185 = vmatprep.subr.bf16.mxu1 %v11088_v3 }
0x23d8   :  { %v2012_v48 = vld [vmem:[#allocation5 + $0x60] sm:$0xff] }
0x23d9   :  { %v2013_v55 = vsel %vm44_vm3, %v2011_v58, %v2012_v48  ;;  %v2049_v43 = vsel %vm44_vm3, %v2012_v48, %v2011_v58 }
0x23da   :  { %2014 = vst.msk [vmem:[#allocation4 + $0x18] sm:$0xff] %vm72_vm0, %v2013_v55  ;;  %2050 = vst.msk [vmem:[#allocation4 + $0x60] sm:$0xff] %vm72_vm0, %v2049_v43  ;;  %v8611_v43 = vld [vmem:[%s13050_s1 + $0x30] sm:$0xff] }
0x24a4   :  { %v1759_v11 = vpop.f32.mrb[16].mxu1 }
0x24a5   :  { %v1763_v16 = vadd.f32 %v1759_v11, %v336_v12  ;;  %v9404_v63 = vpop.f32.mrb[17].mxu1  ;;  %v8612_v11 = vld [vmem:[%s13050_s1 + $0x38] sm:$0xff] }
0x24a6   :  { %v10181_v63 = vpack.c.bf16 %v8612_v11, %v8611_v43 }
0x24a7   :  { %10616 = vtanh.f32 %v1763_v16  ;;  %v8604_v60 = vmul.f32 -1.442695, %v1763_v16 }
0x24a9   :  { %10618 = vpow2.f32 %v8604_v60  ;;  %v8631_v60 = vld [vmem:[%s13052_s2 + $0x20] sm:$0xff] }
0x24b1   :  { %v10617_v6 = vpop.eup %10616 }
0x24b2   :  { %1773 = vrot.lane.b32.xlu0 %v10617_v6, %s11091_s0 }
0x24b3   :  { %v10619_v56 = vpop.eup %10618 }
0x24b4   :  { %v1767_v62 = vadd.f32 1.0, %v10619_v56  ;;  %v8632_v56 = vld [vmem:[%s13052_s2 + $0x28] sm:$0xff] }
0x24b6   :  { %10620 = vrcp.f32 %v1767_v62  ;;  %v11666_v62 = vpack.c.bf16 %v8632_v56, %v8631_v60 }
0x24c0   :  { %v10621_v2 = vpop.eup %10620 }
0x24c1   :  { %v1771_v19 = vmul.f32 %v10621_v2, %v1678_v54 }
0x2524   :  { %v1774_v8 = vpop.permute.xlu0 %1773 }
0x2525   :  { %v1776_v13 = vmul.f32 %v10621_v2, %v1774_v8  ;;  %v8634_v8 = vld [vmem:[%s13052_s2 + $0x38] sm:$0xff] }
0x2527   :  { %1778 = vrot.lane.b32.xlu1 %v1776_v13, %s11092_s11 }
0x2599   :  { %v1779_v21 = vpop.permute.xlu1 %1778 }
0x259a   :  { %v1781_v23 = vadd.f32 %v1779_v21, %v1771_v19  ;;  %v1999_v21 = vld [vmem:[#allocation5] sm:$0xff] }
0x259c   :  { %10622 = vtanh.f32 %v1781_v23 }
0x25a6   :  { %v10623_v39 = vpop.eup %10622 }
0x25a7   :  { %1784 = vrot.lane.b32.xlu0 %v10623_v39, %s11091_s0 }
0x2619   :  { %v1785_v7 = vpop.permute.xlu0 %1784 }
0x261a   :  { %v1787_v12 = vmul.f32 %v10621_v2, %v1785_v7  ;;  %v8633_v2 = vld [vmem:[%s13052_s2 + $0x30] sm:$0xff] }
0x261b   :  { %v11676_v13 = vpack.c.bf16 %v8634_v8, %v8633_v2 }
0x261c   :  { %1789 = vrot.lane.b32.xlu1 %v1787_v12, %s11092_s11 }
0x268e   :  { %v1790_v24 = vpop.permute.xlu1 %1789 }
0x268f   :  { %1792 = vst.msk [vmem:[#allocation5 + $0x68] sm:$0xff] %vm72_vm0, %v1790_v24  ;;  %9414 = vmatmul.mubr.msk.f32.vlgmr.msra.gmra.mrb[26].mxu0 %vm72_vm0, %v1790_v24 }
0x2696   :  { %v2008_v27 = vld [vmem:[#allocation5 + $0x68] sm:$0xff] }
0x2697   :  { %v2009_v28 = vsel %vm44_vm3, %v2007_v26, %v2008_v27  ;;  %v2053_v29 = vsel %vm44_vm3, %v2008_v27, %v2007_v26  ;;  %v2066_v27 = vld [vmem:[#allocation4 + $0x18] sm:$0xff] }
0x2698   :  { %2010 = vst.msk [vmem:[#allocation4 + $0x10] sm:$0xff] %vm72_vm0, %v2009_v28  ;;  %2054 = vst.msk [vmem:[#allocation4 + $0x68] sm:$0xff] %vm72_vm0, %v2053_v29  ;;  %v2067_v28 = vld [vmem:[#allocation4 + $0x20] sm:$0xff]  ;;  %v2068_v29 = vld [vmem:[#allocation4 + $0x28] sm:$0xff] }
0x269f   :  { %v2065_v26 = vld [vmem:[#allocation4 + $0x10] sm:$0xff] }
0x2762   :  { %v1862_v14 = vpop.f32.mrb[26].mxu0 }
0x2763   :  { %v1866_v30 = vadd.f32 %v1862_v14, %v340_v25  ;;  %v9415_v31 = vpop.f32.mrb[27].mxu0  ;;  %v2069_v14 = vld [vmem:[#allocation4 + $0x30] sm:$0xff] }
0x2764   :  { %v2071_v31 = vld [vmem:[#allocation4 + $0x40] sm:$0xff] }
0x2765   :  { %10624 = vtanh.f32 %v1866_v30  ;;  %v8606_v45 = vmul.f32 -1.442695, %v1866_v30  ;;  %v2070_v30 = vld [vmem:[#allocation4 + $0x38] sm:$0xff] }
0x2767   :  { %10626 = vpow2.f32 %v8606_v45  ;;  %v2073_v45 = vld [vmem:[#allocation4 + $0x50] sm:$0xff] }
0x276f   :  { %v10625_v5 = vpop.eup %10624 }
0x2770   :  { %1876 = vrot.lane.b32.xlu0 %v10625_v5, %s11091_s0  ;;  %v2072_v5 = vld [vmem:[#allocation4 + $0x48] sm:$0xff] }
0x2771   :  { %v10627_v61 = vpop.eup %10626 }
0x2772   :  { %v1870_v1 = vadd.f32 1.0, %v10627_v61  ;;  %v2074_v61 = vld [vmem:[#allocation4 + $0x58] sm:$0xff] }
0x2774   :  { %10628 = vrcp.f32 %v1870_v1  ;;  %v2075_v1 = vld [vmem:[#allocation4 + $0x60] sm:$0xff] }
0x277e   :  { %v10629_v59 = vpop.eup %10628 }
0x277f   :  { %v1874_v57 = vmul.f32 %v10629_v59, %v1781_v23 }
0x27e2   :  { %v1877_v50 = vpop.permute.xlu0 %1876 }
0x27e3   :  { %v1879_v53 = vmul.f32 %v10629_v59, %v1877_v50 }
0x27e5   :  { %1881 = vrot.lane.b32.xlu1 %v1879_v53, %s11092_s11 }
0x2857   :  { %v1882_v33 = vpop.permute.xlu1 %1881 }
0x2858   :  { %v1884_v34 = vadd.f32 %v1882_v33, %v1874_v57 }
0x285a   :  { %10630 = vtanh.f32 %v1884_v34 }
0x2864   :  { %v10631_v32 = vpop.eup %10630 }
0x2865   :  { %1887 = vrot.lane.b32.xlu0 %v10631_v32, %s11091_s0 }
0x28d7   :  { %v1888_v20 = vpop.permute.xlu0 %1887 }
0x28d8   :  { %v1890_v25 = vmul.f32 %v10629_v59, %v1888_v20  ;;  %v2076_v59 = vld [vmem:[#allocation4 + $0x68] sm:$0xff] }
0x28da   :  { %1892 = vrot.lane.b32.xlu1 %v1890_v25, %s11092_s11 }
0x294c   :  { %v1893_v35 = vpop.permute.xlu1 %1892 }
0x294d   :  { %1895 = vst.msk [vmem:[#allocation5 + $0x70] sm:$0xff] %vm72_vm0, %v1893_v35  ;;  %9425 = vmatmul.mubr.msk.f32.vlgmr.msra.gmra.mrb[18].mxu1 %vm72_vm0, %v1893_v35 }
0x294e   :  { %9467 = vmatprep.mubr.msk.f32.mxu1 %vm11089_vm1, %v11090_v4  ;;  %10187 = vmatpush3.bf16.msra.mxu1 %v11666_v62 }
0x294f   :  { %10188 = vmatprep.subr.bf16.mxu1 %v11088_v3 }
0x2952   :  { %10190 = vmatpush3.bf16.msra.mxu1 %v11676_v13 }
0x2953   :  { %10191 = vmatprep.subr.bf16.mxu1 %v11088_v3 }
0x2954   :  { %v2004_v38 = vld [vmem:[#allocation5 + $0x70] sm:$0xff] }
0x2955   :  { %v2005_v40 = vsel %vm44_vm3, %v2003_v37, %v2004_v38  ;;  %v2057_v41 = vsel %vm44_vm3, %v2004_v38, %v2003_v37  ;;  %9468 = vmatmul.mubr.f32.vlgmr.msra.gmra.mrb[20].mxu1 %v11090_v4 }
0x2956   :  { %2006 = vst.msk [vmem:[#allocation4 + $0x8] sm:$0xff] %vm72_vm0, %v2005_v40  ;;  %2058 = vst.msk [vmem:[#allocation4 + $0x70] sm:$0xff] %vm72_vm0, %v2057_v41  ;;  %10193 = vmatpush3.bf16.msra.mxu1 %v11666_v62  ;;  %9478 = vmatprep.mubr.msk.f32.mxu1 %vm11089_vm1, %v11090_v4 }
0x2957   :  { %10194 = vmatprep.subr.bf16.mxu1 %v11088_v3 }
0x295a   :  { %10196 = vmatpush3.bf16.msra.mxu1 %v11676_v13 }
0x295b   :  { %10197 = vmatprep.subr.bf16.mxu1 %v11088_v3 }
0x295d   :  { %v2064_v24 = vld [vmem:[#allocation4 + $0x8] sm:$0xff]  ;;  %v2077_v50 = vld [vmem:[#allocation4 + $0x70] sm:$0xff] }
0x2a20   :  { %v1965_v44 = vpop.f32.mrb[18].mxu1 }
0x2a21   :  { %v1969_v46 = vadd.f32 %v1965_v44, %v344_v22  ;;  %v9426_v47 = vpop.f32.mrb[19].mxu1  ;;  %v8610_v22 = vld [vmem:[%s13050_s1 + $0x28] sm:$0xff] }
0x2a22   :  { %v10177_v55 = vpack.c.bf16 %v8610_v22, %v8609_v18 }
0x2a23   :  { %10632 = vtanh.f32 %v1969_v46  ;;  %v8608_v49 = vmul.f32 -1.442695, %v1969_v46 }
0x2a24   :  { %10178 = vmatprep.subr.bf16.mxu0 %v10177_v55 }
0x2a25   :  { %10634 = vpow2.f32 %v8608_v49  ;;  %10180 = vmatpush3.bf16.msra.mxu0 %v10177_v55 }
0x2a26   :  { %10182 = vmatprep.subr.bf16.mxu0 %v10181_v63 }
0x2a28   :  { %v2437_v57 = vpop.f32.mrb[20].mxu1 }
0x2a29   :  { %10184 = vmatpush3.bf16.msra.mxu0 %v10181_v63  ;;  %v9469_v33 = vpop.f32.mrb[21].mxu1 }
0x2a2a   :  { %10209 = vmatprep.subr.bf16.mxu0 %v11088_v3 }
0x2a2d   :  { %v10633_v10 = vpop.eup %10632 }
0x2a2e   :  { %1979 = vrot.lane.b32.xlu0 %v10633_v10, %s11091_s0 }
0x2a2f   :  { %v10635_v51 = vpop.eup %10634 }
0x2a30   :  { %v1973_v54 = vadd.f32 1.0, %v10635_v51 }
0x2a32   :  { %10636 = vrcp.f32 %v1973_v54 }
0x2a3c   :  { %v10637_v36 = vpop.eup %10636 }
0x2a3d   :  { %v1977_v0 = vmul.f32 %v10637_v36, %v1884_v34  ;;  %v8614_v34 = vld [vmem:[%s13053_s3 + $0x1] ss:$0 sm:$0xff] }
0x2aa0   :  { %v1980_v9 = vpop.permute.xlu0 %1979 }
0x2aa1   :  { %v1982_v15 = vmul.f32 %v10637_v36, %v1980_v9 }
0x2aa3   :  { %1984 = vrot.lane.b32.xlu1 %v1982_v15, %s11092_s11 }
0x2b15   :  { %v1985_v58 = vpop.permute.xlu1 %1984 }
0x2b16   :  { %v1987_v48 = vadd.f32 %v1985_v58, %v1977_v0 }
0x2b18   :  { %10638 = vtanh.f32 %v1987_v48 }
0x2b22   :  { %v10639_v17 = vpop.eup %10638 }
0x2b23   :  { %1990 = vrot.lane.b32.xlu0 %v10639_v17, %s11091_s0 }
0x2b95   :  { %v1991_v16 = vpop.permute.xlu0 %1990 }
0x2b96   :  { %v1993_v6 = vmul.f32 %v10637_v36, %v1991_v16 }
0x2b98   :  { %1995 = vrot.lane.b32.xlu1 %v1993_v6, %s11092_s11 }
0x2c0a   :  { %v1996_v19 = vpop.permute.xlu1 %1995 }
0x2c0b   :  { %1998 = vst.msk [vmem:[#allocation5 + $0x78] sm:$0xff] %vm72_vm0, %v1996_v19 }
0x2c12   :  { %v2000_v23 = vld [vmem:[#allocation5 + $0x78] sm:$0xff] }
0x2c13   :  { %v2001_v39 = vsel %vm44_vm3, %v1999_v21, %v2000_v23  ;;  %v2061_v7 = vsel %vm44_vm3, %v2000_v23, %v1999_v21 }
0x2c14   :  { %2002 = vst.msk [vmem:[#allocation4] sm:$0xff] %vm72_vm0, %v2001_v39  ;;  %2062 = vst.msk [vmem:[#allocation4 + $0x78] sm:$0xff] %vm72_vm0, %v2061_v7 }
0x2c1b   :  { %v2063_v12 = vld [vmem:[#allocation4] sm:$0xff]  ;;  %v2078_v53 = vld [vmem:[#allocation4 + $0x78] sm:$0xff] }
0x2c1c   :  { %9435 = vmatprep.mubr.msk.f32.mxu0 %vm72_vm0, %v2063_v12 }
0x2c1d   :  { %9436 = vmatmul.mubr.msk.f32.vlgmr.msra.gmra.mrb[28].mxu0 %vm72_vm0, %v2064_v24 }
0x2c1e   :  { %9438 = vmatprep.mubr.msk.f32.mxu0 %vm72_vm0, %v2065_v26  ;;  %10211 = vmatpush3.bf16.msra.mxu0 %v11666_v62 }
0x2c1f   :  { %10212 = vmatprep.subr.bf16.mxu0 %v11088_v3 }
0x2c21   :  { %9439 = vmatmul.mubr.msk.f32.gmra.mrb[30].mxu0 %vm72_vm0, %v2066_v27 }
0x2c22   :  { %9441 = vmatprep.mubr.msk.f32.mxu0 %vm72_vm0, %v2067_v28  ;;  %10214 = vmatpush3.bf16.msra.mxu0 %v11676_v13 }
0x2c23   :  { %10221 = vmatprep.subr.bf16.mxu0 %v11088_v3 }
0x2c25   :  { %9442 = vmatmul.mubr.msk.f32.gmra.mrb[32].mxu0 %vm72_vm0, %v2068_v29 }
0x2c26   :  { %9444 = vmatprep.mubr.msk.f32.mxu0 %vm72_vm0, %v2069_v14 }
0x2c29   :  { %9445 = vmatmul.mubr.msk.f32.gmra.mrb[34].mxu0 %vm72_vm0, %v2070_v30 }
0x2c2a   :  { %9447 = vmatprep.mubr.msk.f32.mxu0 %vm72_vm0, %v2071_v31 }
0x2c2d   :  { %9448 = vmatmul.mubr.msk.f32.gmra.mrb[36].mxu0 %vm72_vm0, %v2072_v5 }
0x2c2e   :  { %9450 = vmatprep.mubr.msk.f32.mxu0 %vm72_vm0, %v2073_v45 }
0x2c31   :  { %9451 = vmatmul.mubr.msk.f32.gmra.mrb[38].mxu0 %vm72_vm0, %v2074_v61 }
0x2c32   :  { %9453 = vmatprep.mubr.msk.f32.mxu0 %vm72_vm0, %v2075_v1 }
0x2c35   :  { %9454 = vmatmul.mubr.msk.f32.gmra.mrb[40].mxu0 %vm72_vm0, %v2076_v59 }
0x2c36   :  { %9456 = vmatprep.mubr.msk.f32.mxu0 %vm72_vm0, %v2077_v50 }
0x2c39   :  { %9457 = vmatmul.mubr.msk.f32.gmra.mrb[42].mxu0 %vm72_vm0, %v2078_v53 }
0x2c3a   :  { %9511 = vmatprep.mubr.msk.f32.mxu0 %vm11089_vm1, %v11090_v4 }
0x2cf0   :  { %v9437_v32 = vpop.f32.mrb[28].mxu0 }
0x2cf1   :  { %v11719_v20 = vadd.f32 %v9437_v32, %v8614_v34  ;;  %v2206_v25 = vpop.f32.mrb[29].mxu0 }
0x2cf2   :  { %v11793_v24 = vadd.f32 %v8614_v34, %v2206_v25 }
0x2cf4   :  { %v9440_v35 = vpop.f32.mrb[30].mxu0 }
0x2cf5   :  { %v11721_v37 = vadd.f32 %v9440_v35, %v8614_v34  ;;  %v2216_v38 = vpop.f32.mrb[31].mxu0 }
0x2cf6   :  { %v11723_v40 = vadd.f32 %v8614_v34, %v2216_v38 }
0x2cf8   :  { %v9443_v41 = vpop.f32.mrb[32].mxu0 }
0x2cf9   :  { %v11725_v44 = vadd.f32 %v9443_v41, %v8614_v34  ;;  %v2226_v46 = vpop.f32.mrb[33].mxu0 }
0x2cfa   :  { %v11727_v47 = vadd.f32 %v8614_v34, %v2226_v46 }
0x2cfc   :  { %v9446_v10 = vpop.f32.mrb[34].mxu0 }
0x2cfd   :  { %v11729_v49 = vadd.f32 %v9446_v10, %v8614_v34  ;;  %v2236_v51 = vpop.f32.mrb[35].mxu0 }
0x2cfe   :  { %v11731_v54 = vadd.f32 %v8614_v34, %v2236_v51 }
0x2d00   :  { %v9449_v36 = vpop.f32.mrb[36].mxu0 }
0x2d01   :  { %v11733_v9 = vadd.f32 %v9449_v36, %v8614_v34  ;;  %v2246_v15 = vpop.f32.mrb[37].mxu0 }
0x2d02   :  { %v11735_v0 = vadd.f32 %v8614_v34, %v2246_v15 }
0x2d03   :  { %v2327_v58 = vsel %vm11275_vm2, %v11731_v54, %v11733_v9  ;;  %v2339_v48 = vsel %vm11275_vm2, %v11733_v9, %v11731_v54 }
0x2d04   :  { %v9452_v17 = vpop.f32.mrb[38].mxu0  ;;  %v2331_v18 = vsel %vm11275_vm2, %v11729_v49, %v11735_v0  ;;  %v2335_v22 = vsel %vm11275_vm2, %v11735_v0, %v11729_v49 }
0x2d05   :  { %v11753_v55 = vadd.f32 %v9452_v17, %v8614_v34  ;;  %v2256_v43 = vpop.f32.mrb[39].mxu0 }
0x2d06   :  { %v11755_v11 = vadd.f32 %v8614_v34, %v2256_v43 }
0x2d07   :  { %v2319_v16 = vsel %vm11275_vm2, %v11727_v47, %v11753_v55  ;;  %v2347_v63 = vsel %vm11275_vm2, %v11753_v55, %v11727_v47 }
0x2d08   :  { %v9455_v6 = vpop.f32.mrb[40].mxu0  ;;  %v2323_v60 = vsel %vm11275_vm2, %v11725_v44, %v11755_v11  ;;  %v2343_v56 = vsel %vm11275_vm2, %v11755_v11, %v11725_v44 }
0x2d09   :  { %v11773_v2 = vadd.f32 %v9455_v6, %v8614_v34  ;;  %v2266_v8 = vpop.f32.mrb[41].mxu0 }
0x2d0a   :  { %v11775_v19 = vadd.f32 %v8614_v34, %v2266_v8 }
0x2d0b   :  { %v2311_v21 = vsel %vm11275_vm2, %v11723_v40, %v11773_v2  ;;  %v2355_v23 = vsel %vm11275_vm2, %v11773_v2, %v11723_v40 }
0x2d0c   :  { %v9458_v39 = vpop.f32.mrb[42].mxu0  ;;  %v2315_v7 = vsel %vm11275_vm2, %v11721_v37, %v11775_v19  ;;  %v2351_v12 = vsel %vm11275_vm2, %v11775_v19, %v11721_v37 }
0x2d0d   :  { %v11795_v26 = vadd.f32 %v9458_v39, %v8614_v34  ;;  %v2276_v27 = vpop.f32.mrb[43].mxu0 }
0x2d0e   :  { %v11797_v28 = vadd.f32 %v8614_v34, %v2276_v27 }
0x2d0f   :  { %v2303_v29 = vsel %vm11275_vm2, %v11793_v24, %v11795_v26  ;;  %v2363_v14 = vsel %vm11275_vm2, %v11795_v26, %v11793_v24  ;;  %v8666_v26 = vld [vmem:[%s13050_s1 + $0x40] sm:$0xff] }
0x2d10   :  { %v2441_v30 = vadd.f32 %v2437_v57, %v2303_v29  ;;  %v2307_v31 = vsel %vm11275_vm2, %v11719_v20, %v11797_v28  ;;  %v2359_v5 = vsel %vm11275_vm2, %v11797_v28, %v11719_v20 }
0x2d12   :  { %10640 = vtanh.f32 %v2441_v30  ;;  %v8635_v61 = vmul.f32 -1.442695, %v2441_v30 }
0x2d14   :  { %10642 = vpow2.f32 %v8635_v61 }
0x2d1c   :  { %v10641_v45 = vpop.eup %10640 }
0x2d1d   :  { %2451 = vrot.lane.b32.xlu0 %v10641_v45, %s11091_s0 }
0x2d1e   :  { %v10643_v1 = vpop.eup %10642 }
0x2d1f   :  { %v2445_v59 = vadd.f32 1.0, %v10643_v1 }
0x2d21   :  { %10644 = vrcp.f32 %v2445_v59 }
0x2d2b   :  { %v10645_v50 = vpop.eup %10644 }
0x2d2c   :  { %v2449_v33 = vmul.f32 0.0, %v10645_v50 }
0x2d8f   :  { %v2452_v53 = vpop.permute.xlu0 %2451 }
0x2d90   :  { %v2454_v57 = vmul.f32 %v10645_v50, %v2452_v53 }
0x2d92   :  { %2456 = vrot.lane.b32.xlu1 %v2454_v57, %s11092_s11 }
0x2e04   :  { %v2457_v34 = vpop.permute.xlu1 %2456 }
0x2e05   :  { %v2459_v32 = vadd.f32 %v2457_v34, %v2449_v33 }
0x2e07   :  { %10646 = vtanh.f32 %v2459_v32 }
0x2e11   :  { %v10647_v25 = vpop.eup %10646 }
0x2e12   :  { %2462 = vrot.lane.b32.xlu0 %v10647_v25, %s11091_s0 }
0x2e84   :  { %v2463_v35 = vpop.permute.xlu0 %2462 }
0x2e85   :  { %v2465_v38 = vmul.f32 %v10645_v50, %v2463_v35 }
0x2e87   :  { %2467 = vrot.lane.b32.xlu1 %v2465_v38, %s11092_s11 }
0x2ef9   :  { %v2468_v41 = vpop.permute.xlu1 %2467 }
0x2efa   :  { %2470 = vst.msk [vmem:[#allocation5] sm:$0xff] %vm72_vm0, %v2468_v41  ;;  %9479 = vmatmul.mubr.msk.f32.vlgmr.msra.gmra.mrb[22].mxu1 %vm72_vm0, %v2468_v41 }
0x2efb   :  { %10199 = vmatpush3.bf16.msra.mxu1 %v11666_v62  ;;  %9489 = vmatprep.mubr.msk.f32.mxu1 %vm11089_vm1, %v11090_v4 }
0x2efc   :  { %10200 = vmatprep.subr.bf16.mxu1 %v11088_v3 }
0x2eff   :  { %10202 = vmatpush3.bf16.msra.mxu1 %v11676_v13 }
0x2f00   :  { %10203 = vmatprep.subr.bf16.mxu1 %v11088_v3 }
0x2fcd   :  { %v2540_v46 = vpop.f32.mrb[22].mxu1 }
0x2fce   :  { %v2544_v10 = vadd.f32 %v2540_v46, %v2307_v31  ;;  %v9480_v51 = vpop.f32.mrb[23].mxu1 }
0x2fd0   :  { %10648 = vtanh.f32 %v2544_v10  ;;  %v8637_v15 = vmul.f32 -1.442695, %v2544_v10 }
0x2fd2   :  { %10650 = vpow2.f32 %v8637_v15 }
0x2fda   :  { %v10649_v36 = vpop.eup %10648 }
0x2fdb   :  { %2554 = vrot.lane.b32.xlu0 %v10649_v36, %s11091_s0 }
0x2fdc   :  { %v10651_v17 = vpop.eup %10650 }
0x2fdd   :  { %v2548_v43 = vadd.f32 1.0, %v10651_v17 }
0x2fdf   :  { %10652 = vrcp.f32 %v2548_v43 }
0x2fe9   :  { %v10653_v6 = vpop.eup %10652 }
0x2fea   :  { %v2552_v27 = vmul.f32 %v10653_v6, %v2459_v32 }
0x304d   :  { %v2555_v8 = vpop.permute.xlu0 %2554 }
0x304e   :  { %v2557_v39 = vmul.f32 %v10653_v6, %v2555_v8 }
0x3050   :  { %2559 = vrot.lane.b32.xlu1 %v2557_v39, %s11092_s11 }
0x30c2   :  { %v2560_v29 = vpop.permute.xlu1 %2559 }
0x30c3   :  { %v2562_v30 = vadd.f32 %v2560_v29, %v2552_v27 }
0x30c5   :  { %10654 = vtanh.f32 %v2562_v30 }
0x30cf   :  { %v10655_v31 = vpop.eup %10654 }
0x30d0   :  { %2565 = vrot.lane.b32.xlu0 %v10655_v31, %s11091_s0 }
0x3142   :  { %v2566_v45 = vpop.permute.xlu0 %2565 }
0x3143   :  { %v2568_v61 = vmul.f32 %v10653_v6, %v2566_v45 }
0x3145   :  { %2570 = vrot.lane.b32.xlu1 %v2568_v61, %s11092_s11 }
0x31b7   :  { %v2571_v1 = vpop.permute.xlu1 %2570 }
0x31b8   :  { %2573 = vst.msk [vmem:[#allocation5 + $0x8] sm:$0xff] %vm72_vm0, %v2571_v1  ;;  %9490 = vmatmul.mubr.msk.f32.vlgmr.msra.gmra.mrb[24].mxu1 %vm72_vm0, %v2571_v1 }
0x31b9   :  { %10205 = vmatpush3.bf16.msra.mxu1 %v11666_v62  ;;  %9500 = vmatprep.mubr.msk.f32.mxu1 %vm11089_vm1, %v11090_v4 }
0x31ba   :  { %10206 = vmatprep.subr.bf16.mxu1 %v11088_v3 }
0x31bd   :  { %10208 = vmatpush3.bf16.msra.mxu1 %v11676_v13 }
0x31be   :  { %10215 = vmatprep.subr.bf16.mxu1 %v11088_v3 }
0x328b   :  { %v2643_v59 = vpop.f32.mrb[24].mxu1 }
0x328c   :  { %v2647_v50 = vadd.f32 %v2643_v59, %v2311_v21  ;;  %v9491_v53 = vpop.f32.mrb[25].mxu1 }
0x328e   :  { %10656 = vtanh.f32 %v2647_v50  ;;  %v8639_v33 = vmul.f32 -1.442695, %v2647_v50 }
0x3290   :  { %10658 = vpow2.f32 %v8639_v33 }
0x3298   :  { %v10657_v57 = vpop.eup %10656 }
0x3299   :  { %2657 = vrot.lane.b32.xlu0 %v10657_v57, %s11091_s0 }
0x329a   :  { %v10659_v34 = vpop.eup %10658 }
0x329b   :  { %v2651_v32 = vadd.f32 1.0, %v10659_v34 }
0x329d   :  { %10660 = vrcp.f32 %v2651_v32 }
0x32a7   :  { %v10661_v25 = vpop.eup %10660 }
0x32a8   :  { %v2655_v41 = vmul.f32 %v10661_v25, %v2562_v30 }
0x330b   :  { %v2658_v35 = vpop.permute.xlu0 %2657 }
0x330c   :  { %v2660_v38 = vmul.f32 %v10661_v25, %v2658_v35 }
0x330e   :  { %2662 = vrot.lane.b32.xlu1 %v2660_v38, %s11092_s11 }
0x3380   :  { %v2663_v46 = vpop.permute.xlu1 %2662 }
0x3381   :  { %v2665_v10 = vadd.f32 %v2663_v46, %v2655_v41 }
0x3383   :  { %10662 = vtanh.f32 %v2665_v10 }
0x338d   :  { %v10663_v21 = vpop.eup %10662 }
0x338e   :  { %2668 = vrot.lane.b32.xlu0 %v10663_v21, %s11091_s0 }
0x3400   :  { %v2669_v51 = vpop.permute.xlu0 %2668 }
0x3401   :  { %v2671_v36 = vmul.f32 %v10661_v25, %v2669_v51 }
0x3403   :  { %2673 = vrot.lane.b32.xlu1 %v2671_v36, %s11092_s11 }
0x3475   :  { %v2674_v15 = vpop.permute.xlu1 %2673 }
0x3476   :  { %2676 = vst.msk [vmem:[#allocation5 + $0x10] sm:$0xff] %vm72_vm0, %v2674_v15  ;;  %9501 = vmatmul.mubr.msk.f32.vlgmr.msra.gmra.mrb[26].mxu1 %vm72_vm0, %v2674_v15 }
0x3477   :  { %10217 = vmatpush3.bf16.msra.mxu1 %v11666_v62  ;;  %9522 = vmatprep.mubr.msk.f32.mxu1 %vm11089_vm1, %v11090_v4 }
0x3478   :  { %10218 = vmatprep.subr.bf16.mxu1 %v11088_v3 }
0x347b   :  { %10220 = vmatpush3.bf16.msra.mxu1 %v11676_v13 }
0x347c   :  { %10227 = vmatprep.subr.bf16.mxu1 %v11088_v3 }
0x3549   :  { %v2746_v17 = vpop.f32.mrb[26].mxu1 }
0x354a   :  { %v2750_v43 = vadd.f32 %v2746_v17, %v2315_v7  ;;  %v9502_v6 = vpop.f32.mrb[27].mxu1 }
0x354c   :  { %10664 = vtanh.f32 %v2750_v43  ;;  %v8641_v39 = vmul.f32 -1.442695, %v2750_v43 }
0x354e   :  { %10666 = vpow2.f32 %v8641_v39 }
0x3556   :  { %v10665_v8 = vpop.eup %10664 }
0x3557   :  { %2760 = vrot.lane.b32.xlu0 %v10665_v8, %s11091_s0 }
0x3558   :  { %v10667_v27 = vpop.eup %10666 }
0x3559   :  { %v2754_v29 = vadd.f32 1.0, %v10667_v27 }
0x355b   :  { %10668 = vrcp.f32 %v2754_v29 }
0x3565   :  { %v10669_v30 = vpop.eup %10668 }
0x3566   :  { %v2758_v61 = vmul.f32 %v10669_v30, %v2665_v10 }
0x35c9   :  { %v2761_v31 = vpop.permute.xlu0 %2760 }
0x35ca   :  { %v2763_v45 = vmul.f32 %v10669_v30, %v2761_v31 }
0x35cc   :  { %2765 = vrot.lane.b32.xlu1 %v2763_v45, %s11092_s11 }
0x363e   :  { %v2766_v1 = vpop.permute.xlu1 %2765 }
0x363f   :  { %v2768_v59 = vadd.f32 %v2766_v1, %v2758_v61 }
0x3641   :  { %10670 = vtanh.f32 %v2768_v59 }
0x364b   :  { %v10671_v7 = vpop.eup %10670 }
0x364c   :  { %2771 = vrot.lane.b32.xlu0 %v10671_v7, %s11091_s0 }
0x36be   :  { %v2772_v50 = vpop.permute.xlu0 %2771 }
0x36bf   :  { %v2774_v53 = vmul.f32 %v10669_v30, %v2772_v50 }
0x36c1   :  { %2776 = vrot.lane.b32.xlu1 %v2774_v53, %s11092_s11 }
0x3733   :  { %v2777_v57 = vpop.permute.xlu1 %2776 }
0x3734   :  { %2779 = vst.msk [vmem:[#allocation5 + $0x18] sm:$0xff] %vm72_vm0, %v2777_v57  ;;  %9512 = vmatmul.mubr.msk.f32.vlgmr.msra.gmra.mrb[44].mxu0 %vm72_vm0, %v2777_v57 }
0x3735   :  { %10223 = vmatpush3.bf16.msra.mxu0 %v11666_v62  ;;  %9533 = vmatprep.mubr.msk.f32.mxu0 %vm11089_vm1, %v11090_v4 }
0x3736   :  { %10224 = vmatprep.subr.bf16.mxu0 %v11088_v3 }
0x3739   :  { %10226 = vmatpush3.bf16.msra.mxu0 %v11676_v13 }
0x373a   :  { %10233 = vmatprep.subr.bf16.mxu0 %v11088_v3 }
0x3807   :  { %v2849_v33 = vpop.f32.mrb[44].mxu0 }
0x3808   :  { %v2853_v34 = vadd.f32 %v2849_v33, %v2319_v16  ;;  %v9513_v32 = vpop.f32.mrb[45].mxu0 }
0x380a   :  { %10672 = vtanh.f32 %v2853_v34  ;;  %v8643_v35 = vmul.f32 -1.442695, %v2853_v34 }
0x380c   :  { %10674 = vpow2.f32 %v8643_v35 }
0x3814   :  { %v10673_v25 = vpop.eup %10672 }
0x3815   :  { %2863 = vrot.lane.b32.xlu0 %v10673_v25, %s11091_s0 }
0x3816   :  { %v10675_v38 = vpop.eup %10674 }
0x3817   :  { %v2857_v41 = vadd.f32 1.0, %v10675_v38 }
0x3819   :  { %10676 = vrcp.f32 %v2857_v41 }
0x3823   :  { %v10677_v46 = vpop.eup %10676 }
0x3824   :  { %v2861_v51 = vmul.f32 %v10677_v46, %v2768_v59 }
0x3887   :  { %v2864_v10 = vpop.permute.xlu0 %2863 }
0x3888   :  { %v2866_v21 = vmul.f32 %v10677_v46, %v2864_v10 }
0x388a   :  { %2868 = vrot.lane.b32.xlu1 %v2866_v21, %s11092_s11 }
0x38fc   :  { %v2869_v36 = vpop.permute.xlu1 %2868 }
0x38fd   :  { %v2871_v15 = vadd.f32 %v2869_v36, %v2861_v51 }
0x38ff   :  { %10678 = vtanh.f32 %v2871_v15 }
0x3909   :  { %v10679_v16 = vpop.eup %10678 }
0x390a   :  { %2874 = vrot.lane.b32.xlu0 %v10679_v16, %s11091_s0 }
0x397c   :  { %v2875_v17 = vpop.permute.xlu0 %2874 }
0x397d   :  { %v2877_v43 = vmul.f32 %v10677_v46, %v2875_v17 }
0x397f   :  { %2879 = vrot.lane.b32.xlu1 %v2877_v43, %s11092_s11 }
0x39f1   :  { %v2880_v6 = vpop.permute.xlu1 %2879 }
0x39f2   :  { %2882 = vst.msk [vmem:[#allocation5 + $0x20] sm:$0xff] %vm72_vm0, %v2880_v6  ;;  %9523 = vmatmul.mubr.msk.f32.vlgmr.msra.gmra.mrb[28].mxu1 %vm72_vm0, %v2880_v6 }
0x39f3   :  { %10229 = vmatpush3.bf16.msra.mxu1 %v11666_v62  ;;  %9544 = vmatprep.mubr.msk.f32.mxu1 %vm11089_vm1, %v11090_v4 }
0x39f4   :  { %10230 = vmatprep.subr.bf16.mxu1 %v11088_v3 }
0x39f7   :  { %10232 = vmatpush3.bf16.msra.mxu1 %v11676_v13 }
0x39f8   :  { %10239 = vmatprep.subr.bf16.mxu1 %v11088_v3 }
0x3ac5   :  { %v2952_v8 = vpop.f32.mrb[28].mxu1 }
0x3ac6   :  { %v2956_v39 = vadd.f32 %v2952_v8, %v2323_v60  ;;  %v9524_v27 = vpop.f32.mrb[29].mxu1 }
0x3ac8   :  { %10680 = vtanh.f32 %v2956_v39  ;;  %v8645_v30 = vmul.f32 -1.442695, %v2956_v39 }
0x3aca   :  { %10682 = vpow2.f32 %v8645_v30 }
0x3ad2   :  { %v10681_v29 = vpop.eup %10680 }
0x3ad3   :  { %2966 = vrot.lane.b32.xlu0 %v10681_v29, %s11091_s0 }
0x3ad4   :  { %v10683_v31 = vpop.eup %10682 }
0x3ad5   :  { %v2960_v45 = vadd.f32 1.0, %v10683_v31 }
0x3ad7   :  { %10684 = vrcp.f32 %v2960_v45 }
0x3ae1   :  { %v10685_v61 = vpop.eup %10684 }
0x3ae2   :  { %v2964_v7 = vmul.f32 %v10685_v61, %v2871_v15 }
0x3b45   :  { %v2967_v1 = vpop.permute.xlu0 %2966 }
0x3b46   :  { %v2969_v59 = vmul.f32 %v10685_v61, %v2967_v1 }
0x3b48   :  { %2971 = vrot.lane.b32.xlu1 %v2969_v59, %s11092_s11 }
0x3bba   :  { %v2972_v50 = vpop.permute.xlu1 %2971 }
0x3bbb   :  { %v2974_v53 = vadd.f32 %v2972_v50, %v2964_v7 }
0x3bbd   :  { %10686 = vtanh.f32 %v2974_v53 }
0x3bc7   :  { %v10687_v60 = vpop.eup %10686 }
0x3bc8   :  { %2977 = vrot.lane.b32.xlu0 %v10687_v60, %s11091_s0 }
0x3c3a   :  { %v2978_v57 = vpop.permute.xlu0 %2977 }
0x3c3b   :  { %v2980_v33 = vmul.f32 %v10685_v61, %v2978_v57 }
0x3c3d   :  { %2982 = vrot.lane.b32.xlu1 %v2980_v33, %s11092_s11 }
0x3caf   :  { %v2983_v34 = vpop.permute.xlu1 %2982 }
0x3cb0   :  { %2985 = vst.msk [vmem:[#allocation5 + $0x28] sm:$0xff] %vm72_vm0, %v2983_v34  ;;  %9534 = vmatmul.mubr.msk.f32.vlgmr.msra.gmra.mrb[46].mxu0 %vm72_vm0, %v2983_v34 }
0x3cb1   :  { %10235 = vmatpush3.bf16.msra.mxu0 %v11666_v62  ;;  %9555 = vmatprep.mubr.msk.f32.mxu0 %vm11089_vm1, %v11090_v4 }
0x3cb2   :  { %10236 = vmatprep.subr.bf16.mxu0 %v11088_v3 }
0x3cb5   :  { %10238 = vmatpush3.bf16.msra.mxu0 %v11676_v13 }
0x3cb6   :  { %10245 = vmatprep.subr.bf16.mxu0 %v11088_v3 }
0x3d83   :  { %v3055_v32 = vpop.f32.mrb[46].mxu0 }
0x3d84   :  { %v3059_v25 = vadd.f32 %v3055_v32, %v2327_v58  ;;  %v9535_v35 = vpop.f32.mrb[47].mxu0 }
0x3d86   :  { %10688 = vtanh.f32 %v3059_v25  ;;  %v8647_v41 = vmul.f32 -1.442695, %v3059_v25 }
0x3d88   :  { %10690 = vpow2.f32 %v8647_v41 }
0x3d90   :  { %v10689_v38 = vpop.eup %10688 }
0x3d91   :  { %3069 = vrot.lane.b32.xlu0 %v10689_v38, %s11091_s0 }
0x3d92   :  { %v10691_v46 = vpop.eup %10690 }
0x3d93   :  { %v3063_v10 = vadd.f32 1.0, %v10691_v46 }
0x3d95   :  { %10692 = vrcp.f32 %v3063_v10 }
0x3d9f   :  { %v10693_v21 = vpop.eup %10692 }
0x3da0   :  { %v3067_v15 = vmul.f32 %v10693_v21, %v2974_v53 }
0x3e03   :  { %v3070_v51 = vpop.permute.xlu0 %3069 }
0x3e04   :  { %v3072_v36 = vmul.f32 %v10693_v21, %v3070_v51 }
0x3e06   :  { %3074 = vrot.lane.b32.xlu1 %v3072_v36, %s11092_s11 }
0x3e78   :  { %v3075_v16 = vpop.permute.xlu1 %3074 }
0x3e79   :  { %v3077_v17 = vadd.f32 %v3075_v16, %v3067_v15 }
0x3e7b   :  { %10694 = vtanh.f32 %v3077_v17 }
0x3e85   :  { %v10695_v58 = vpop.eup %10694 }
0x3e86   :  { %3080 = vrot.lane.b32.xlu0 %v10695_v58, %s11091_s0 }
0x3ef8   :  { %v3081_v43 = vpop.permute.xlu0 %3080 }
0x3ef9   :  { %v3083_v6 = vmul.f32 %v10693_v21, %v3081_v43 }
0x3efb   :  { %3085 = vrot.lane.b32.xlu1 %v3083_v6, %s11092_s11 }
0x3f6d   :  { %v3086_v8 = vpop.permute.xlu1 %3085 }
0x3f6e   :  { %3088 = vst.msk [vmem:[#allocation5 + $0x30] sm:$0xff] %vm72_vm0, %v3086_v8  ;;  %9545 = vmatmul.mubr.msk.f32.vlgmr.msra.gmra.mrb[30].mxu1 %vm72_vm0, %v3086_v8 }
0x3f6f   :  { %10241 = vmatpush3.bf16.msra.mxu1 %v11666_v62  ;;  %9566 = vmatprep.mubr.msk.f32.mxu1 %vm11089_vm1, %v11090_v4 }
0x3f70   :  { %10242 = vmatprep.subr.bf16.mxu1 %v11088_v3 }
0x3f73   :  { %10244 = vmatpush3.bf16.msra.mxu1 %v11676_v13 }
0x3f74   :  { %10251 = vmatprep.subr.bf16.mxu1 %v11088_v3 }
0x4041   :  { %v3158_v39 = vpop.f32.mrb[30].mxu1 }
0x4042   :  { %v3162_v27 = vadd.f32 %v3158_v39, %v2331_v18  ;;  %v9546_v29 = vpop.f32.mrb[31].mxu1 }
0x4044   :  { %10696 = vtanh.f32 %v3162_v27  ;;  %v8649_v31 = vmul.f32 -1.442695, %v3162_v27 }
0x4046   :  { %10698 = vpow2.f32 %v8649_v31 }
0x404e   :  { %v10697_v30 = vpop.eup %10696 }
0x404f   :  { %3172 = vrot.lane.b32.xlu0 %v10697_v30, %s11091_s0 }
0x4050   :  { %v10699_v45 = vpop.eup %10698 }
0x4051   :  { %v3166_v61 = vadd.f32 1.0, %v10699_v45 }
0x4053   :  { %10700 = vrcp.f32 %v3166_v61 }
0x405d   :  { %v10701_v1 = vpop.eup %10700 }
0x405e   :  { %v3170_v50 = vmul.f32 %v10701_v1, %v3077_v17 }
0x40c1   :  { %v3173_v59 = vpop.permute.xlu0 %3172 }
0x40c2   :  { %v3175_v7 = vmul.f32 %v10701_v1, %v3173_v59 }
0x40c4   :  { %3177 = vrot.lane.b32.xlu1 %v3175_v7, %s11092_s11 }
0x4136   :  { %v3178_v53 = vpop.permute.xlu1 %3177 }
0x4137   :  { %v3180_v60 = vadd.f32 %v3178_v53, %v3170_v50 }
0x4139   :  { %10702 = vtanh.f32 %v3180_v60 }
0x4143   :  { %v10703_v18 = vpop.eup %10702 }
0x4144   :  { %3183 = vrot.lane.b32.xlu0 %v10703_v18, %s11091_s0 }
0x41b6   :  { %v3184_v57 = vpop.permute.xlu0 %3183 }
0x41b7   :  { %v3186_v33 = vmul.f32 %v10701_v1, %v3184_v57 }
0x41b9   :  { %3188 = vrot.lane.b32.xlu1 %v3186_v33, %s11092_s11  ;;  %v4040_v33 = vld [vmem:[#allocation5 + $0x30] sm:$0xff] }
0x422b   :  { %v3189_v34 = vpop.permute.xlu1 %3188 }
0x422c   :  { %3191 = vst.msk [vmem:[#allocation5 + $0x38] sm:$0xff] %vm72_vm0, %v3189_v34  ;;  %9556 = vmatmul.mubr.msk.f32.vlgmr.msra.gmra.mrb[48].mxu0 %vm72_vm0, %v3189_v34 }
0x422d   :  { %10247 = vmatpush3.bf16.msra.mxu0 %v11666_v62  ;;  %9577 = vmatprep.mubr.msk.f32.mxu0 %vm11089_vm1, %v11090_v4 }
0x422e   :  { %10248 = vmatprep.subr.bf16.mxu0 %v11088_v3 }
0x4231   :  { %10250 = vmatpush3.bf16.msra.mxu0 %v11676_v13 }
0x4232   :  { %10257 = vmatprep.subr.bf16.mxu0 %v11088_v3 }
0x4233   :  { %v4044_v43 = vld [vmem:[#allocation5 + $0x38] sm:$0xff] }
0x42ff   :  { %v3261_v32 = vpop.f32.mrb[48].mxu0 }
0x4300   :  { %v3265_v25 = vadd.f32 %v3261_v32, %v2335_v22  ;;  %v9557_v35 = vpop.f32.mrb[49].mxu0 }
0x4302   :  { %10704 = vtanh.f32 %v3265_v25  ;;  %v8651_v41 = vmul.f32 -1.442695, %v3265_v25 }
0x4304   :  { %10706 = vpow2.f32 %v8651_v41 }
0x430c   :  { %v10705_v38 = vpop.eup %10704 }
0x430d   :  { %3275 = vrot.lane.b32.xlu0 %v10705_v38, %s11091_s0 }
0x430e   :  { %v10707_v46 = vpop.eup %10706 }
0x430f   :  { %v3269_v10 = vadd.f32 1.0, %v10707_v46 }
0x4311   :  { %10708 = vrcp.f32 %v3269_v10 }
0x431b   :  { %v10709_v21 = vpop.eup %10708 }
0x431c   :  { %v3273_v15 = vmul.f32 %v10709_v21, %v3180_v60 }
0x437f   :  { %v3276_v51 = vpop.permute.xlu0 %3275 }
0x4380   :  { %v3278_v36 = vmul.f32 %v10709_v21, %v3276_v51 }
0x4382   :  { %3280 = vrot.lane.b32.xlu1 %v3278_v36, %s11092_s11 }
0x43f4   :  { %v3281_v16 = vpop.permute.xlu1 %3280 }
0x43f5   :  { %v3283_v17 = vadd.f32 %v3281_v16, %v3273_v15 }
0x43f7   :  { %10710 = vtanh.f32 %v3283_v17 }
0x4401   :  { %v10711_v49 = vpop.eup %10710 }
0x4402   :  { %3286 = vrot.lane.b32.xlu0 %v10711_v49, %s11091_s0 }
0x4474   :  { %v3287_v0 = vpop.permute.xlu0 %3286 }
0x4475   :  { %v3289_v22 = vmul.f32 %v10709_v21, %v3287_v0 }
0x4477   :  { %3291 = vrot.lane.b32.xlu1 %v3289_v22, %s11092_s11 }
0x44e9   :  { %v3292_v58 = vpop.permute.xlu1 %3291 }
0x44ea   :  { %3294 = vst.msk [vmem:[#allocation5 + $0x40] sm:$0xff] %vm72_vm0, %v3292_v58  ;;  %9567 = vmatmul.mubr.msk.f32.vlgmr.msra.gmra.mrb[32].mxu1 %vm72_vm0, %v3292_v58  ;;  %v4036_v58 = vld [vmem:[#allocation5 + $0x28] sm:$0xff] }
0x44eb   :  { %10253 = vmatpush3.bf16.msra.mxu1 %v11666_v62  ;;  %9588 = vmatprep.mubr.msk.f32.mxu1 %vm11089_vm1, %v11090_v4 }
0x44ec   :  { %10254 = vmatprep.subr.bf16.mxu1 %v11088_v3 }
0x44ef   :  { %10256 = vmatpush3.bf16.msra.mxu1 %v11676_v13 }
0x44f0   :  { %10263 = vmatprep.subr.bf16.mxu1 %v11088_v3 }
0x44f1   :  { %v4045_v6 = vld [vmem:[#allocation5 + $0x40] sm:$0xff] }
0x44f2   :  { %v4046_v8 = vsel %vm44_vm3, %v4044_v43, %v4045_v6  ;;  %v4050_v39 = vsel %vm44_vm3, %v4045_v6, %v4044_v43 }
0x44f3   :  { %4047 = vst.msk [vmem:[#allocation4 + $0x38] sm:$0xff] %vm72_vm0, %v4046_v8  ;;  %4051 = vst.msk [vmem:[#allocation4 + $0x40] sm:$0xff] %vm72_vm0, %v4050_v39 }
0x45bd   :  { %v3364_v27 = vpop.f32.mrb[32].mxu1 }
0x45be   :  { %v3368_v29 = vadd.f32 %v3364_v27, %v2339_v48  ;;  %v9568_v30 = vpop.f32.mrb[33].mxu1 }
0x45c0   :  { %10712 = vtanh.f32 %v3368_v29  ;;  %v8653_v45 = vmul.f32 -1.442695, %v3368_v29 }
0x45c2   :  { %10714 = vpow2.f32 %v8653_v45 }
0x45ca   :  { %v10713_v31 = vpop.eup %10712 }
0x45cb   :  { %3378 = vrot.lane.b32.xlu0 %v10713_v31, %s11091_s0 }
0x45cc   :  { %v10715_v61 = vpop.eup %10714 }
0x45cd   :  { %v3372_v1 = vadd.f32 1.0, %v10715_v61 }
0x45cf   :  { %10716 = vrcp.f32 %v3372_v1 }
0x45d9   :  { %v10717_v59 = vpop.eup %10716 }
0x45da   :  { %v3376_v53 = vmul.f32 %v10717_v59, %v3283_v17 }
0x463d   :  { %v3379_v7 = vpop.permute.xlu0 %3378 }
0x463e   :  { %v3381_v50 = vmul.f32 %v10717_v59, %v3379_v7 }
0x4640   :  { %3383 = vrot.lane.b32.xlu1 %v3381_v50, %s11092_s11 }
0x46b2   :  { %v3384_v60 = vpop.permute.xlu1 %3383 }
0x46b3   :  { %v3386_v18 = vadd.f32 %v3384_v60, %v3376_v53 }
0x46b5   :  { %10718 = vtanh.f32 %v3386_v18 }
0x46bf   :  { %v10719_v54 = vpop.eup %10718 }
0x46c0   :  { %3389 = vrot.lane.b32.xlu0 %v10719_v54, %s11091_s0  ;;  %v4032_v54 = vld [vmem:[#allocation5 + $0x20] sm:$0xff] }
0x4732   :  { %v3390_v9 = vpop.permute.xlu0 %3389 }
0x4733   :  { %v3392_v48 = vmul.f32 %v10717_v59, %v3390_v9 }
0x4735   :  { %3394 = vrot.lane.b32.xlu1 %v3392_v48, %s11092_s11 }
0x47a7   :  { %v3395_v57 = vpop.permute.xlu1 %3394 }
0x47a8   :  { %3397 = vst.msk [vmem:[#allocation5 + $0x48] sm:$0xff] %vm72_vm0, %v3395_v57  ;;  %9578 = vmatmul.mubr.msk.f32.vlgmr.msra.gmra.mrb[50].mxu0 %vm72_vm0, %v3395_v57 }
0x47a9   :  { %10259 = vmatpush3.bf16.msra.mxu0 %v11666_v62  ;;  %9599 = vmatprep.mubr.msk.f32.mxu0 %vm11089_vm1, %v11090_v4 }
0x47aa   :  { %10260 = vmatprep.subr.bf16.mxu0 %v11088_v3 }
0x47ad   :  { %10262 = vmatpush3.bf16.msra.mxu0 %v11676_v13 }
0x47ae   :  { %10269 = vmatprep.subr.bf16.mxu0 %v11088_v3 }
0x47af   :  { %v4041_v34 = vld [vmem:[#allocation5 + $0x48] sm:$0xff] }
0x47b0   :  { %v4042_v32 = vsel %vm44_vm3, %v4040_v33, %v4041_v34  ;;  %v4054_v25 = vsel %vm44_vm3, %v4041_v34, %v4040_v33 }
0x47b1   :  { %4043 = vst.msk [vmem:[#allocation4 + $0x30] sm:$0xff] %vm72_vm0, %v4042_v32  ;;  %4055 = vst.msk [vmem:[#allocation4 + $0x48] sm:$0xff] %vm72_vm0, %v4054_v25 }
0x487b   :  { %v3467_v35 = vpop.f32.mrb[50].mxu0 }
0x487c   :  { %v3471_v38 = vadd.f32 %v3467_v35, %v2343_v56  ;;  %v9579_v41 = vpop.f32.mrb[51].mxu0 }
0x487e   :  { %10720 = vtanh.f32 %v3471_v38  ;;  %v8655_v10 = vmul.f32 -1.442695, %v3471_v38 }
0x4880   :  { %10722 = vpow2.f32 %v8655_v10 }
0x4888   :  { %v10721_v46 = vpop.eup %10720 }
0x4889   :  { %3481 = vrot.lane.b32.xlu0 %v10721_v46, %s11091_s0 }
0x488a   :  { %v10723_v21 = vpop.eup %10722 }
0x488b   :  { %v3475_v51 = vadd.f32 1.0, %v10723_v21 }
0x488d   :  { %10724 = vrcp.f32 %v3475_v51 }
0x4897   :  { %v10725_v36 = vpop.eup %10724 }
0x4898   :  { %v3479_v17 = vmul.f32 %v10725_v36, %v3386_v18 }
0x48fb   :  { %v3482_v15 = vpop.permute.xlu0 %3481 }
0x48fc   :  { %v3484_v16 = vmul.f32 %v10725_v36, %v3482_v15 }
0x48fe   :  { %3486 = vrot.lane.b32.xlu1 %v3484_v16, %s11092_s11 }
0x4970   :  { %v3487_v49 = vpop.permute.xlu1 %3486 }
0x4971   :  { %v3489_v0 = vadd.f32 %v3487_v49, %v3479_v17  ;;  %v4028_v17 = vld [vmem:[#allocation5 + $0x18] sm:$0xff] }
0x4973   :  { %10726 = vtanh.f32 %v3489_v0 }
0x497d   :  { %v10727_v44 = vpop.eup %10726 }
0x497e   :  { %3492 = vrot.lane.b32.xlu0 %v10727_v44, %s11091_s0 }
0x49f0   :  { %v3493_v11 = vpop.permute.xlu0 %3492 }
0x49f1   :  { %v3495_v56 = vmul.f32 %v10725_v36, %v3493_v11 }
0x49f3   :  { %3497 = vrot.lane.b32.xlu1 %v3495_v56, %s11092_s11 }
0x4a65   :  { %v3498_v22 = vpop.permute.xlu1 %3497 }
0x4a66   :  { %3500 = vst.msk [vmem:[#allocation5 + $0x50] sm:$0xff] %vm72_vm0, %v3498_v22  ;;  %9589 = vmatmul.mubr.msk.f32.vlgmr.msra.gmra.mrb[34].mxu1 %vm72_vm0, %v3498_v22 }
0x4a67   :  { %10265 = vmatpush3.bf16.msra.mxu1 %v11666_v62  ;;  %9610 = vmatprep.mubr.msk.f32.mxu1 %vm11089_vm1, %v11090_v4 }
0x4a68   :  { %10266 = vmatprep.subr.bf16.mxu1 %v11088_v3 }
0x4a6b   :  { %10268 = vmatpush3.bf16.msra.mxu1 %v11676_v13 }
0x4a6c   :  { %10275 = vmatprep.subr.bf16.mxu1 %v11088_v3 }
0x4a6d   :  { %v4037_v43 = vld [vmem:[#allocation5 + $0x50] sm:$0xff] }
0x4a6e   :  { %v4038_v6 = vsel %vm44_vm3, %v4036_v58, %v4037_v43  ;;  %v4058_v8 = vsel %vm44_vm3, %v4037_v43, %v4036_v58 }
0x4a6f   :  { %4039 = vst.msk [vmem:[#allocation4 + $0x28] sm:$0xff] %vm72_vm0, %v4038_v6  ;;  %4059 = vst.msk [vmem:[#allocation4 + $0x50] sm:$0xff] %vm72_vm0, %v4058_v8 }
0x4b39   :  { %v3570_v39 = vpop.f32.mrb[34].mxu1 }
0x4b3a   :  { %v3574_v27 = vadd.f32 %v3570_v39, %v2347_v63  ;;  %v9590_v29 = vpop.f32.mrb[35].mxu1 }
0x4b3c   :  { %10728 = vtanh.f32 %v3574_v27  ;;  %v8657_v31 = vmul.f32 -1.442695, %v3574_v27 }
0x4b3e   :  { %10730 = vpow2.f32 %v8657_v31 }
0x4b46   :  { %v10729_v30 = vpop.eup %10728 }
0x4b47   :  { %3584 = vrot.lane.b32.xlu0 %v10729_v30, %s11091_s0 }
0x4b48   :  { %v10731_v45 = vpop.eup %10730 }
0x4b49   :  { %v3578_v61 = vadd.f32 1.0, %v10731_v45  ;;  %v4024_v45 = vld [vmem:[#allocation5 + $0x10] sm:$0xff] }
0x4b4b   :  { %10732 = vrcp.f32 %v3578_v61 }
0x4b55   :  { %v10733_v1 = vpop.eup %10732 }
0x4b56   :  { %v3582_v50 = vmul.f32 %v10733_v1, %v3489_v0 }
0x4bb9   :  { %v3585_v59 = vpop.permute.xlu0 %3584 }
0x4bba   :  { %v3587_v7 = vmul.f32 %v10733_v1, %v3585_v59 }
0x4bbc   :  { %3589 = vrot.lane.b32.xlu1 %v3587_v7, %s11092_s11 }
0x4c2e   :  { %v3590_v53 = vpop.permute.xlu1 %3589 }
0x4c2f   :  { %v3592_v60 = vadd.f32 %v3590_v53, %v3582_v50 }
0x4c31   :  { %10734 = vtanh.f32 %v3592_v60 }
0x4c3b   :  { %v10735_v47 = vpop.eup %10734 }
0x4c3c   :  { %3595 = vrot.lane.b32.xlu0 %v10735_v47, %s11091_s0 }
0x4cae   :  { %v3596_v55 = vpop.permute.xlu0 %3595 }
0x4caf   :  { %v3598_v63 = vmul.f32 %v10733_v1, %v3596_v55 }
0x4cb1   :  { %3600 = vrot.lane.b32.xlu1 %v3598_v63, %s11092_s11 }
0x4d23   :  { %v3601_v18 = vpop.permute.xlu1 %3600 }
0x4d24   :  { %3603 = vst.msk [vmem:[#allocation5 + $0x58] sm:$0xff] %vm72_vm0, %v3601_v18  ;;  %9600 = vmatmul.mubr.msk.f32.vlgmr.msra.gmra.mrb[52].mxu0 %vm72_vm0, %v3601_v18 }
0x4d25   :  { %10271 = vmatpush3.bf16.msra.mxu0 %v11666_v62  ;;  %9621 = vmatprep.mubr.msk.f32.mxu0 %vm11089_vm1, %v11090_v4 }
0x4d26   :  { %10272 = vmatprep.subr.bf16.mxu0 %v11088_v3 }
0x4d29   :  { %10274 = vmatpush3.bf16.msra.mxu0 %v11676_v13 }
0x4d2b   :  { %v4033_v9 = vld [vmem:[#allocation5 + $0x58] sm:$0xff] }
0x4d2c   :  { %v4034_v48 = vsel %vm44_vm3, %v4032_v54, %v4033_v9  ;;  %v4062_v57 = vsel %vm44_vm3, %v4033_v9, %v4032_v54 }
0x4d2d   :  { %4035 = vst.msk [vmem:[#allocation4 + $0x20] sm:$0xff] %vm72_vm0, %v4034_v48  ;;  %4063 = vst.msk [vmem:[#allocation4 + $0x58] sm:$0xff] %vm72_vm0, %v4062_v57 }
0x4df7   :  { %v3673_v33 = vpop.f32.mrb[52].mxu0 }
0x4df8   :  { %v3677_v34 = vadd.f32 %v3673_v33, %v2351_v12  ;;  %v9601_v32 = vpop.f32.mrb[53].mxu0 }
0x4df9   :  { %v4020_v32 = vld [vmem:[#allocation5 + $0x8] sm:$0xff] }
0x4dfa   :  { %10736 = vtanh.f32 %v3677_v34  ;;  %v8659_v35 = vmul.f32 -1.442695, %v3677_v34 }
0x4dfc   :  { %10738 = vpow2.f32 %v8659_v35 }
0x4e04   :  { %v10737_v25 = vpop.eup %10736 }
0x4e05   :  { %3687 = vrot.lane.b32.xlu0 %v10737_v25, %s11091_s0 }
0x4e06   :  { %v10739_v38 = vpop.eup %10738 }
0x4e07   :  { %v3681_v41 = vadd.f32 1.0, %v10739_v38 }
0x4e09   :  { %10740 = vrcp.f32 %v3681_v41 }
0x4e13   :  { %v10741_v46 = vpop.eup %10740 }
0x4e14   :  { %v3685_v51 = vmul.f32 %v10741_v46, %v3592_v60 }
0x4e77   :  { %v3688_v10 = vpop.permute.xlu0 %3687 }
0x4e78   :  { %v3690_v21 = vmul.f32 %v10741_v46, %v3688_v10 }
0x4e7a   :  { %3692 = vrot.lane.b32.xlu1 %v3690_v21, %s11092_s11 }
0x4eec   :  { %v3693_v36 = vpop.permute.xlu1 %3692 }
0x4eed   :  { %v3695_v15 = vadd.f32 %v3693_v36, %v3685_v51 }
0x4eef   :  { %10742 = vtanh.f32 %v3695_v15 }
0x4ef9   :  { %v10743_v37 = vpop.eup %10742 }
0x4efa   :  { %3698 = vrot.lane.b32.xlu0 %v10743_v37, %s11091_s0 }
0x4f6c   :  { %v3699_v19 = vpop.permute.xlu0 %3698 }
0x4f6d   :  { %v3701_v12 = vmul.f32 %v10741_v46, %v3699_v19 }
0x4f6f   :  { %3703 = vrot.lane.b32.xlu1 %v3701_v12, %s11092_s11 }
0x4fe1   :  { %v3704_v16 = vpop.permute.xlu1 %3703 }
0x4fe2   :  { %3706 = vst.msk [vmem:[#allocation5 + $0x60] sm:$0xff] %vm72_vm0, %v3704_v16  ;;  %9611 = vmatmul.mubr.msk.f32.vlgmr.msra.gmra.mrb[36].mxu1 %vm72_vm0, %v3704_v16 }
0x4fe3   :  { %10277 = vmatpush3.bf16.msra.mxu1 %v11666_v62  ;;  %9632 = vmatprep.mubr.msk.f32.mxu1 %vm11089_vm1, %v11090_v4 }
0x4fe4   :  { %10278 = vmatprep.subr.bf16.mxu1 %v11088_v3 }
0x4fe7   :  { %10280 = vmatpush3.bf16.msra.mxu1 %v11676_v13 }
0x4fe8   :  { %10289 = vmatprep.subr.bf16.mxu1 %v11088_v3 }
0x4fe9   :  { %v4029_v49 = vld [vmem:[#allocation5 + $0x60] sm:$0xff] }
0x4fea   :  { %v4030_v0 = vsel %vm44_vm3, %v4028_v17, %v4029_v49  ;;  %v4066_v44 = vsel %vm44_vm3, %v4029_v49, %v4028_v17 }
0x4feb   :  { %4031 = vst.msk [vmem:[#allocation4 + $0x18] sm:$0xff] %vm72_vm0, %v4030_v0  ;;  %4067 = vst.msk [vmem:[#allocation4 + $0x60] sm:$0xff] %vm72_vm0, %v4066_v44  ;;  %v8668_v0 = vld [vmem:[%s13050_s1 + $0x50] sm:$0xff] }
0x50b5   :  { %v3776_v62 = vpop.f32.mrb[36].mxu1 }
0x50b6   :  { %v3780_v13 = vadd.f32 %v3776_v62, %v2355_v23  ;;  %v9612_v11 = vpop.f32.mrb[37].mxu1  ;;  %v8669_v62 = vld [vmem:[%s13050_s1 + $0x58] sm:$0xff] }
0x50b8   :  { %10744 = vtanh.f32 %v3780_v13  ;;  %v8661_v22 = vmul.f32 -1.442695, %v3780_v13  ;;  %v10285_v13 = vpack.c.bf16 %v8669_v62, %v8668_v0 }
0x50ba   :  { %10746 = vpow2.f32 %v8661_v22  ;;  %v8688_v22 = vld [vmem:[%s13052_s2 + $0x40] sm:$0xff] }
0x50c2   :  { %v10745_v56 = vpop.eup %10744 }
0x50c3   :  { %3790 = vrot.lane.b32.xlu0 %v10745_v56, %s11091_s0 }
0x50c4   :  { %v10747_v58 = vpop.eup %10746 }
0x50c5   :  { %v3784_v43 = vadd.f32 1.0, %v10747_v58  ;;  %v8689_v58 = vld [vmem:[%s13052_s2 + $0x48] sm:$0xff] }
0x50c7   :  { %10748 = vrcp.f32 %v3784_v43  ;;  %v12119_v43 = vpack.c.bf16 %v8689_v58, %v8688_v22 }
0x50d1   :  { %v10749_v6 = vpop.eup %10748 }
0x50d2   :  { %v3788_v27 = vmul.f32 %v10749_v6, %v3695_v15 }
0x5135   :  { %v3791_v8 = vpop.permute.xlu0 %3790 }
0x5136   :  { %v3793_v39 = vmul.f32 %v10749_v6, %v3791_v8  ;;  %v8691_v8 = vld [vmem:[%s13052_s2 + $0x58] sm:$0xff] }
0x5138   :  { %3795 = vrot.lane.b32.xlu1 %v3793_v39, %s11092_s11 }
0x51aa   :  { %v3796_v29 = vpop.permute.xlu1 %3795 }
0x51ab   :  { %v3798_v30 = vadd.f32 %v3796_v29, %v3788_v27  ;;  %v4016_v29 = vld [vmem:[#allocation5] sm:$0xff] }
0x51ad   :  { %10750 = vtanh.f32 %v3798_v30 }
0x51b7   :  { %v10751_v40 = vpop.eup %10750 }
0x51b8   :  { %3801 = vrot.lane.b32.xlu0 %v10751_v40, %s11091_s0 }
0x522a   :  { %v3802_v2 = vpop.permute.xlu0 %3801 }
0x522b   :  { %v3804_v23 = vmul.f32 %v10749_v6, %v3802_v2  ;;  %v8690_v6 = vld [vmem:[%s13052_s2 + $0x50] sm:$0xff] }
0x522c   :  { %v12129_v39 = vpack.c.bf16 %v8691_v8, %v8690_v6 }
0x522d   :  { %3806 = vrot.lane.b32.xlu1 %v3804_v23, %s11092_s11 }
0x529f   :  { %v3807_v31 = vpop.permute.xlu1 %3806 }
0x52a0   :  { %3809 = vst.msk [vmem:[#allocation5 + $0x68] sm:$0xff] %vm72_vm0, %v3807_v31  ;;  %9622 = vmatmul.mubr.msk.f32.vlgmr.msra.gmra.mrb[54].mxu0 %vm72_vm0, %v3807_v31 }
0x52a7   :  { %v4025_v61 = vld [vmem:[#allocation5 + $0x68] sm:$0xff] }
0x52a8   :  { %v4026_v1 = vsel %vm44_vm3, %v4024_v45, %v4025_v61  ;;  %v4070_v59 = vsel %vm44_vm3, %v4025_v61, %v4024_v45  ;;  %v4083_v61 = vld [vmem:[#allocation4 + $0x18] sm:$0xff] }
0x52a9   :  { %4027 = vst.msk [vmem:[#allocation4 + $0x10] sm:$0xff] %vm72_vm0, %v4026_v1  ;;  %4071 = vst.msk [vmem:[#allocation4 + $0x68] sm:$0xff] %vm72_vm0, %v4070_v59  ;;  %v4084_v1 = vld [vmem:[#allocation4 + $0x20] sm:$0xff]  ;;  %v4085_v59 = vld [vmem:[#allocation4 + $0x28] sm:$0xff] }
0x52b0   :  { %v4082_v45 = vld [vmem:[#allocation4 + $0x10] sm:$0xff] }
0x5373   :  { %v3879_v7 = vpop.f32.mrb[54].mxu0 }
0x5374   :  { %v3883_v50 = vadd.f32 %v3879_v7, %v2359_v5  ;;  %v9623_v53 = vpop.f32.mrb[55].mxu0  ;;  %v4086_v7 = vld [vmem:[#allocation4 + $0x30] sm:$0xff] }
0x5375   :  { %v4088_v53 = vld [vmem:[#allocation4 + $0x40] sm:$0xff] }
0x5376   :  { %10752 = vtanh.f32 %v3883_v50  ;;  %v8663_v47 = vmul.f32 -1.442695, %v3883_v50  ;;  %v4087_v50 = vld [vmem:[#allocation4 + $0x38] sm:$0xff] }
0x5378   :  { %10754 = vpow2.f32 %v8663_v47  ;;  %v4090_v47 = vld [vmem:[#allocation4 + $0x50] sm:$0xff] }
0x5380   :  { %v10753_v60 = vpop.eup %10752 }
0x5381   :  { %3893 = vrot.lane.b32.xlu0 %v10753_v60, %s11091_s0  ;;  %v4089_v60 = vld [vmem:[#allocation4 + $0x48] sm:$0xff] }
0x5382   :  { %v10755_v55 = vpop.eup %10754 }
0x5383   :  { %v3887_v63 = vadd.f32 1.0, %v10755_v55  ;;  %v4091_v55 = vld [vmem:[#allocation4 + $0x58] sm:$0xff] }
0x5385   :  { %10756 = vrcp.f32 %v3887_v63  ;;  %v4092_v63 = vld [vmem:[#allocation4 + $0x60] sm:$0xff] }
0x538f   :  { %v10757_v18 = vpop.eup %10756 }
0x5390   :  { %v3891_v48 = vmul.f32 %v10757_v18, %v3798_v30 }
0x53f3   :  { %v3894_v54 = vpop.permute.xlu0 %3893 }
0x53f4   :  { %v3896_v9 = vmul.f32 %v10757_v18, %v3894_v54 }
0x53f6   :  { %3898 = vrot.lane.b32.xlu1 %v3896_v9, %s11092_s11 }
0x5468   :  { %v3899_v57 = vpop.permute.xlu1 %3898 }
0x5469   :  { %v3901_v33 = vadd.f32 %v3899_v57, %v3891_v48 }
0x546b   :  { %10758 = vtanh.f32 %v3901_v33 }
0x5475   :  { %v10759_v20 = vpop.eup %10758 }
0x5476   :  { %3904 = vrot.lane.b32.xlu0 %v10759_v20, %s11091_s0 }
0x54e8   :  { %v3905_v28 = vpop.permute.xlu0 %3904 }
0x54e9   :  { %v3907_v5 = vmul.f32 %v10757_v18, %v3905_v28  ;;  %v4093_v18 = vld [vmem:[#allocation4 + $0x68] sm:$0xff] }
0x54eb   :  { %3909 = vrot.lane.b32.xlu1 %v3907_v5, %s11092_s11 }
0x555d   :  { %v3910_v34 = vpop.permute.xlu1 %3909 }
0x555e   :  { %3912 = vst.msk [vmem:[#allocation5 + $0x70] sm:$0xff] %vm72_vm0, %v3910_v34  ;;  %9633 = vmatmul.mubr.msk.f32.vlgmr.msra.gmra.mrb[38].mxu1 %vm72_vm0, %v3910_v34 }
0x555f   :  { %9675 = vmatprep.mubr.msk.f32.mxu1 %vm11089_vm1, %v11090_v4  ;;  %10291 = vmatpush3.bf16.msra.mxu1 %v12119_v43 }
0x5560   :  { %10292 = vmatprep.subr.bf16.mxu1 %v11088_v3 }
0x5563   :  { %10294 = vmatpush3.bf16.msra.mxu1 %v12129_v39 }
0x5564   :  { %10295 = vmatprep.subr.bf16.mxu1 %v11088_v3 }
0x5565   :  { %v4021_v25 = vld [vmem:[#allocation5 + $0x70] sm:$0xff] }
0x5566   :  { %v4022_v35 = vsel %vm44_vm3, %v4020_v32, %v4021_v25  ;;  %v4074_v38 = vsel %vm44_vm3, %v4021_v25, %v4020_v32  ;;  %9676 = vmatmul.mubr.f32.vlgmr.msra.gmra.mrb[40].mxu1 %v11090_v4 }
0x5567   :  { %4023 = vst.msk [vmem:[#allocation4 + $0x8] sm:$0xff] %vm72_vm0, %v4022_v35  ;;  %4075 = vst.msk [vmem:[#allocation4 + $0x70] sm:$0xff] %vm72_vm0, %v4074_v38  ;;  %10297 = vmatpush3.bf16.msra.mxu1 %v12119_v43  ;;  %9686 = vmatprep.mubr.msk.f32.mxu1 %vm11089_vm1, %v11090_v4 }
0x5568   :  { %10298 = vmatprep.subr.bf16.mxu1 %v11088_v3 }
0x556b   :  { %10300 = vmatpush3.bf16.msra.mxu1 %v12129_v39 }
0x556c   :  { %10301 = vmatprep.subr.bf16.mxu1 %v11088_v3 }
0x556e   :  { %v4081_v31 = vld [vmem:[#allocation4 + $0x8] sm:$0xff]  ;;  %v4094_v54 = vld [vmem:[#allocation4 + $0x70] sm:$0xff] }
0x5631   :  { %v3982_v41 = vpop.f32.mrb[38].mxu1 }
0x5632   :  { %v3986_v46 = vadd.f32 %v3982_v41, %v2363_v14  ;;  %v9634_v10 = vpop.f32.mrb[39].mxu1  ;;  %v8667_v14 = vld [vmem:[%s13050_s1 + $0x48] sm:$0xff] }
0x5633   :  { %v10281_v44 = vpack.c.bf16 %v8667_v14, %v8666_v26 }
0x5634   :  { %10760 = vtanh.f32 %v3986_v46  ;;  %v8665_v51 = vmul.f32 -1.442695, %v3986_v46 }
0x5635   :  { %10282 = vmatprep.subr.bf16.mxu0 %v10281_v44 }
0x5636   :  { %10762 = vpow2.f32 %v8665_v51  ;;  %10284 = vmatpush3.bf16.msra.mxu0 %v10281_v44 }
0x5637   :  { %10286 = vmatprep.subr.bf16.mxu0 %v10285_v13 }
0x5639   :  { %v4454_v48 = vpop.f32.mrb[40].mxu1 }
0x563a   :  { %10288 = vmatpush3.bf16.msra.mxu0 %v10285_v13  ;;  %v9677_v57 = vpop.f32.mrb[41].mxu1 }
0x563b   :  { %10313 = vmatprep.subr.bf16.mxu0 %v11088_v3 }
0x563e   :  { %v10761_v21 = vpop.eup %10760 }
0x563f   :  { %3996 = vrot.lane.b32.xlu0 %v10761_v21, %s11091_s0 }
0x5640   :  { %v10763_v36 = vpop.eup %10762 }
0x5641   :  { %v3990_v15 = vadd.f32 1.0, %v10763_v36 }
0x5643   :  { %10764 = vrcp.f32 %v3990_v15 }
0x564d   :  { %v10765_v37 = vpop.eup %10764 }
0x564e   :  { %v3994_v16 = vmul.f32 %v10765_v37, %v3901_v33  ;;  %v8671_v33 = vld [vmem:[%s13053_s3 + $0x2] ss:$0 sm:$0xff] }
0x56b1   :  { %v3997_v19 = vpop.permute.xlu0 %3996 }
0x56b2   :  { %v3999_v12 = vmul.f32 %v10765_v37, %v3997_v19 }
0x56b4   :  { %4001 = vrot.lane.b32.xlu1 %v3999_v12, %s11092_s11 }
0x5726   :  { %v4002_v17 = vpop.permute.xlu1 %4001 }
0x5727   :  { %v4004_v49 = vadd.f32 %v4002_v17, %v3994_v16 }
0x5729   :  { %10766 = vtanh.f32 %v4004_v49 }
0x5733   :  { %v10767_v24 = vpop.eup %10766 }
0x5734   :  { %4007 = vrot.lane.b32.xlu0 %v10767_v24, %s11091_s0 }
0x57a6   :  { %v4008_v11 = vpop.permute.xlu0 %4007 }
0x57a7   :  { %v4010_v56 = vmul.f32 %v10765_v37, %v4008_v11 }
0x57a9   :  { %4012 = vrot.lane.b32.xlu1 %v4010_v56, %s11092_s11 }
0x581b   :  { %v4013_v27 = vpop.permute.xlu1 %4012 }
0x581c   :  { %4015 = vst.msk [vmem:[#allocation5 + $0x78] sm:$0xff] %vm72_vm0, %v4013_v27 }
0x5823   :  { %v4017_v30 = vld [vmem:[#allocation5 + $0x78] sm:$0xff] }
0x5824   :  { %v4018_v40 = vsel %vm44_vm3, %v4016_v29, %v4017_v30  ;;  %v4078_v2 = vsel %vm44_vm3, %v4017_v30, %v4016_v29 }
0x5825   :  { %4019 = vst.msk [vmem:[#allocation4] sm:$0xff] %vm72_vm0, %v4018_v40  ;;  %4079 = vst.msk [vmem:[#allocation4 + $0x78] sm:$0xff] %vm72_vm0, %v4078_v2 }
0x582c   :  { %v4080_v23 = vld [vmem:[#allocation4] sm:$0xff]  ;;  %v4095_v9 = vld [vmem:[#allocation4 + $0x78] sm:$0xff] }
0x582d   :  { %9643 = vmatprep.mubr.msk.f32.mxu0 %vm72_vm0, %v4080_v23 }
0x582e   :  { %9644 = vmatmul.mubr.msk.f32.vlgmr.msra.gmra.mrb[56].mxu0 %vm72_vm0, %v4081_v31 }
0x582f   :  { %9646 = vmatprep.mubr.msk.f32.mxu0 %vm72_vm0, %v4082_v45  ;;  %10315 = vmatpush3.bf16.msra.mxu0 %v12119_v43 }
0x5830   :  { %10316 = vmatprep.subr.bf16.mxu0 %v11088_v3 }
0x5832   :  { %9647 = vmatmul.mubr.msk.f32.gmra.mrb[58].mxu0 %vm72_vm0, %v4083_v61 }
0x5833   :  { %9649 = vmatprep.mubr.msk.f32.mxu0 %vm72_vm0, %v4084_v1  ;;  %10318 = vmatpush3.bf16.msra.mxu0 %v12129_v39 }
0x5834   :  { %10325 = vmatprep.subr.bf16.mxu0 %v11088_v3 }
0x5836   :  { %9650 = vmatmul.mubr.msk.f32.gmra.mrb[60].mxu0 %vm72_vm0, %v4085_v59 }
0x5837   :  { %9652 = vmatprep.mubr.msk.f32.mxu0 %vm72_vm0, %v4086_v7 }
0x583a   :  { %9653 = vmatmul.mubr.msk.f32.gmra.mrb[62].mxu0 %vm72_vm0, %v4087_v50 }
0x583b   :  { %9655 = vmatprep.mubr.msk.f32.mxu0 %vm72_vm0, %v4088_v53 }
0x583e   :  { %9656 = vmatmul.mubr.msk.f32.gmra.mrb[64].mxu0 %vm72_vm0, %v4089_v60 }
0x583f   :  { %9658 = vmatprep.mubr.msk.f32.mxu0 %vm72_vm0, %v4090_v47 }
0x5842   :  { %9659 = vmatmul.mubr.msk.f32.gmra.mrb[66].mxu0 %vm72_vm0, %v4091_v55 }
0x5843   :  { %9661 = vmatprep.mubr.msk.f32.mxu0 %vm72_vm0, %v4092_v63 }
0x5846   :  { %9662 = vmatmul.mubr.msk.f32.gmra.mrb[68].mxu0 %vm72_vm0, %v4093_v18 }
0x5847   :  { %9664 = vmatprep.mubr.msk.f32.mxu0 %vm72_vm0, %v4094_v54 }
0x584a   :  { %9665 = vmatmul.mubr.msk.f32.gmra.mrb[70].mxu0 %vm72_vm0, %v4095_v9 }
0x584b   :  { %9719 = vmatprep.mubr.msk.f32.mxu0 %vm11089_vm1, %v11090_v4 }
0x5901   :  { %v9645_v20 = vpop.f32.mrb[56].mxu0 }
0x5902   :  { %v12172_v28 = vadd.f32 %v9645_v20, %v8671_v33  ;;  %v4223_v5 = vpop.f32.mrb[57].mxu0 }
0x5903   :  { %v12246_v31 = vadd.f32 %v8671_v33, %v4223_v5 }
0x5905   :  { %v9648_v34 = vpop.f32.mrb[58].mxu0 }
0x5906   :  { %v12174_v32 = vadd.f32 %v9648_v34, %v8671_v33  ;;  %v4233_v25 = vpop.f32.mrb[59].mxu0 }
0x5907   :  { %v12176_v35 = vadd.f32 %v8671_v33, %v4233_v25 }
0x5909   :  { %v9651_v38 = vpop.f32.mrb[60].mxu0 }
0x590a   :  { %v12178_v41 = vadd.f32 %v9651_v38, %v8671_v33  ;;  %v4243_v46 = vpop.f32.mrb[61].mxu0 }
0x590b   :  { %v12180_v10 = vadd.f32 %v8671_v33, %v4243_v46 }
0x590d   :  { %v9654_v21 = vpop.f32.mrb[62].mxu0 }
0x590e   :  { %v12182_v51 = vadd.f32 %v9654_v21, %v8671_v33  ;;  %v4253_v36 = vpop.f32.mrb[63].mxu0 }
0x590f   :  { %v12184_v15 = vadd.f32 %v8671_v33, %v4253_v36 }
0x5911   :  { %v9657_v37 = vpop.f32.mrb[64].mxu0 }
0x5912   :  { %v12186_v19 = vadd.f32 %v9657_v37, %v8671_v33  ;;  %v4263_v12 = vpop.f32.mrb[65].mxu0 }
0x5913   :  { %v12188_v16 = vadd.f32 %v8671_v33, %v4263_v12 }
0x5914   :  { %v4344_v17 = vsel %vm11275_vm2, %v12184_v15, %v12186_v19  ;;  %v4356_v49 = vsel %vm11275_vm2, %v12186_v19, %v12184_v15 }
0x5915   :  { %v9660_v24 = vpop.f32.mrb[66].mxu0  ;;  %v4348_v26 = vsel %vm11275_vm2, %v12182_v51, %v12188_v16  ;;  %v4352_v14 = vsel %vm11275_vm2, %v12188_v16, %v12182_v51 }
0x5916   :  { %v12206_v0 = vadd.f32 %v9660_v24, %v8671_v33  ;;  %v4273_v44 = vpop.f32.mrb[67].mxu0 }
0x5917   :  { %v12208_v62 = vadd.f32 %v8671_v33, %v4273_v44 }
0x5918   :  { %v4336_v13 = vsel %vm11275_vm2, %v12180_v10, %v12206_v0  ;;  %v4364_v11 = vsel %vm11275_vm2, %v12206_v0, %v12180_v10 }
0x5919   :  { %v9663_v56 = vpop.f32.mrb[68].mxu0  ;;  %v4340_v22 = vsel %vm11275_vm2, %v12178_v41, %v12208_v62  ;;  %v4360_v58 = vsel %vm11275_vm2, %v12208_v62, %v12178_v41 }
0x591a   :  { %v12226_v6 = vadd.f32 %v9663_v56, %v8671_v33  ;;  %v4283_v8 = vpop.f32.mrb[69].mxu0 }
0x591b   :  { %v12228_v27 = vadd.f32 %v8671_v33, %v4283_v8 }
0x591c   :  { %v4328_v29 = vsel %vm11275_vm2, %v12176_v35, %v12226_v6  ;;  %v4372_v30 = vsel %vm11275_vm2, %v12226_v6, %v12176_v35 }
0x591d   :  { %v9666_v40 = vpop.f32.mrb[70].mxu0  ;;  %v4332_v2 = vsel %vm11275_vm2, %v12174_v32, %v12228_v27  ;;  %v4368_v23 = vsel %vm11275_vm2, %v12228_v27, %v12174_v32 }
0x591e   :  { %v12248_v45 = vadd.f32 %v9666_v40, %v8671_v33  ;;  %v4293_v61 = vpop.f32.mrb[71].mxu0 }
0x591f   :  { %v12250_v1 = vadd.f32 %v8671_v33, %v4293_v61 }
0x5920   :  { %v4320_v59 = vsel %vm11275_vm2, %v12246_v31, %v12248_v45  ;;  %v4380_v7 = vsel %vm11275_vm2, %v12248_v45, %v12246_v31  ;;  %v8723_v45 = vld [vmem:[%s13050_s1 + $0x60] sm:$0xff] }
0x5921   :  { %v4458_v50 = vadd.f32 %v4454_v48, %v4320_v59  ;;  %v4324_v53 = vsel %vm11275_vm2, %v12172_v28, %v12250_v1  ;;  %v4376_v60 = vsel %vm11275_vm2, %v12250_v1, %v12172_v28 }
0x5923   :  { %10768 = vtanh.f32 %v4458_v50  ;;  %v8692_v55 = vmul.f32 -1.442695, %v4458_v50 }
0x5925   :  { %10770 = vpow2.f32 %v8692_v55 }
0x592d   :  { %v10769_v47 = vpop.eup %10768 }
0x592e   :  { %4468 = vrot.lane.b32.xlu0 %v10769_v47, %s11091_s0 }
0x592f   :  { %v10771_v63 = vpop.eup %10770 }
0x5930   :  { %v4462_v18 = vadd.f32 1.0, %v10771_v63 }
0x5932   :  { %10772 = vrcp.f32 %v4462_v18 }
0x593c   :  { %v10773_v54 = vpop.eup %10772 }
0x593d   :  { %v4466_v57 = vmul.f32 0.0, %v10773_v54 }
0x59a0   :  { %v4469_v9 = vpop.permute.xlu0 %4468 }
0x59a1   :  { %v4471_v48 = vmul.f32 %v10773_v54, %v4469_v9 }
0x59a3   :  { %4473 = vrot.lane.b32.xlu1 %v4471_v48, %s11092_s11 }
0x5a15   :  { %v4474_v33 = vpop.permute.xlu1 %4473 }
0x5a16   :  { %v4476_v20 = vadd.f32 %v4474_v33, %v4466_v57 }
0x5a18   :  { %10774 = vtanh.f32 %v4476_v20 }
0x5a22   :  { %v10775_v5 = vpop.eup %10774 }
0x5a23   :  { %4479 = vrot.lane.b32.xlu0 %v10775_v5, %s11091_s0 }
0x5a95   :  { %v4480_v34 = vpop.permute.xlu0 %4479 }
0x5a96   :  { %v4482_v25 = vmul.f32 %v10773_v54, %v4480_v34 }
0x5a98   :  { %4484 = vrot.lane.b32.xlu1 %v4482_v25, %s11092_s11 }
0x5b0a   :  { %v4485_v38 = vpop.permute.xlu1 %4484 }
0x5b0b   :  { %4487 = vst.msk [vmem:[#allocation5] sm:$0xff] %vm72_vm0, %v4485_v38  ;;  %9687 = vmatmul.mubr.msk.f32.vlgmr.msra.gmra.mrb[42].mxu1 %vm72_vm0, %v4485_v38 }
0x5b0c   :  { %10303 = vmatpush3.bf16.msra.mxu1 %v12119_v43  ;;  %9697 = vmatprep.mubr.msk.f32.mxu1 %vm11089_vm1, %v11090_v4 }
0x5b0d   :  { %10304 = vmatprep.subr.bf16.mxu1 %v11088_v3 }
0x5b10   :  { %10306 = vmatpush3.bf16.msra.mxu1 %v12129_v39 }
0x5b11   :  { %10307 = vmatprep.subr.bf16.mxu1 %v11088_v3 }
0x5bde   :  { %v4557_v46 = vpop.f32.mrb[42].mxu1 }
0x5bdf   :  { %v4561_v21 = vadd.f32 %v4557_v46, %v4324_v53  ;;  %v9688_v36 = vpop.f32.mrb[43].mxu1 }
0x5be1   :  { %10776 = vtanh.f32 %v4561_v21  ;;  %v8694_v12 = vmul.f32 -1.442695, %v4561_v21 }
0x5be3   :  { %10778 = vpow2.f32 %v8694_v12 }
0x5beb   :  { %v10777_v37 = vpop.eup %10776 }
0x5bec   :  { %4571 = vrot.lane.b32.xlu0 %v10777_v37, %s11091_s0 }
0x5bed   :  { %v10779_v24 = vpop.eup %10778 }
0x5bee   :  { %v4565_v44 = vadd.f32 1.0, %v10779_v24 }
0x5bf0   :  { %10780 = vrcp.f32 %v4565_v44 }
0x5bfa   :  { %v10781_v56 = vpop.eup %10780 }
0x5bfb   :  { %v4569_v61 = vmul.f32 %v10781_v56, %v4476_v20 }
0x5c5e   :  { %v4572_v8 = vpop.permute.xlu0 %4571 }
0x5c5f   :  { %v4574_v40 = vmul.f32 %v10781_v56, %v4572_v8 }
0x5c61   :  { %4576 = vrot.lane.b32.xlu1 %v4574_v40, %s11092_s11 }
0x5cd3   :  { %v4577_v59 = vpop.permute.xlu1 %4576 }
0x5cd4   :  { %v4579_v50 = vadd.f32 %v4577_v59, %v4569_v61 }
0x5cd6   :  { %10782 = vtanh.f32 %v4579_v50 }
0x5ce0   :  { %v10783_v53 = vpop.eup %10782 }
0x5ce1   :  { %4582 = vrot.lane.b32.xlu0 %v10783_v53, %s11091_s0 }
0x5d53   :  { %v4583_v47 = vpop.permute.xlu0 %4582 }
0x5d54   :  { %v4585_v55 = vmul.f32 %v10781_v56, %v4583_v47 }
0x5d56   :  { %4587 = vrot.lane.b32.xlu1 %v4585_v55, %s11092_s11 }
0x5dc8   :  { %v4588_v63 = vpop.permute.xlu1 %4587 }
0x5dc9   :  { %4590 = vst.msk [vmem:[#allocation5 + $0x8] sm:$0xff] %vm72_vm0, %v4588_v63  ;;  %9698 = vmatmul.mubr.msk.f32.vlgmr.msra.gmra.mrb[44].mxu1 %vm72_vm0, %v4588_v63 }
0x5dca   :  { %10309 = vmatpush3.bf16.msra.mxu1 %v12119_v43  ;;  %9708 = vmatprep.mubr.msk.f32.mxu1 %vm11089_vm1, %v11090_v4 }
0x5dcb   :  { %10310 = vmatprep.subr.bf16.mxu1 %v11088_v3 }
0x5dce   :  { %10312 = vmatpush3.bf16.msra.mxu1 %v12129_v39 }
0x5dcf   :  { %10319 = vmatprep.subr.bf16.mxu1 %v11088_v3 }
0x5e9c   :  { %v4660_v18 = vpop.f32.mrb[44].mxu1 }
0x5e9d   :  { %v4664_v54 = vadd.f32 %v4660_v18, %v4328_v29  ;;  %v9699_v9 = vpop.f32.mrb[45].mxu1 }
0x5e9f   :  { %10784 = vtanh.f32 %v4664_v54  ;;  %v8696_v57 = vmul.f32 -1.442695, %v4664_v54 }
0x5ea1   :  { %10786 = vpow2.f32 %v8696_v57 }
0x5ea9   :  { %v10785_v48 = vpop.eup %10784 }
0x5eaa   :  { %4674 = vrot.lane.b32.xlu0 %v10785_v48, %s11091_s0 }
0x5eab   :  { %v10787_v33 = vpop.eup %10786 }
0x5eac   :  { %v4668_v20 = vadd.f32 1.0, %v10787_v33 }
0x5eae   :  { %10788 = vrcp.f32 %v4668_v20 }
0x5eb8   :  { %v10789_v5 = vpop.eup %10788 }
0x5eb9   :  { %v4672_v38 = vmul.f32 %v10789_v5, %v4579_v50 }
0x5f1c   :  { %v4675_v34 = vpop.permute.xlu0 %4674 }
0x5f1d   :  { %v4677_v25 = vmul.f32 %v10789_v5, %v4675_v34 }
0x5f1f   :  { %4679 = vrot.lane.b32.xlu1 %v4677_v25, %s11092_s11 }
0x5f91   :  { %v4680_v46 = vpop.permute.xlu1 %4679 }
0x5f92   :  { %v4682_v21 = vadd.f32 %v4680_v46, %v4672_v38 }
0x5f94   :  { %10790 = vtanh.f32 %v4682_v21 }
0x5f9e   :  { %v10791_v29 = vpop.eup %10790 }
0x5f9f   :  { %4685 = vrot.lane.b32.xlu0 %v10791_v29, %s11091_s0 }
0x6011   :  { %v4686_v36 = vpop.permute.xlu0 %4685 }
0x6012   :  { %v4688_v37 = vmul.f32 %v10789_v5, %v4686_v36 }
0x6014   :  { %4690 = vrot.lane.b32.xlu1 %v4688_v37, %s11092_s11 }
0x6086   :  { %v4691_v12 = vpop.permute.xlu1 %4690 }
0x6087   :  { %4693 = vst.msk [vmem:[#allocation5 + $0x10] sm:$0xff] %vm72_vm0, %v4691_v12  ;;  %9709 = vmatmul.mubr.msk.f32.vlgmr.msra.gmra.mrb[46].mxu1 %vm72_vm0, %v4691_v12 }
0x6088   :  { %10321 = vmatpush3.bf16.msra.mxu1 %v12119_v43  ;;  %9730 = vmatprep.mubr.msk.f32.mxu1 %vm11089_vm1, %v11090_v4 }
0x6089   :  { %10322 = vmatprep.subr.bf16.mxu1 %v11088_v3 }
0x608c   :  { %10324 = vmatpush3.bf16.msra.mxu1 %v12129_v39 }
0x608d   :  { %10331 = vmatprep.subr.bf16.mxu1 %v11088_v3 }
0x615a   :  { %v4763_v24 = vpop.f32.mrb[46].mxu1 }
0x615b   :  { %v4767_v44 = vadd.f32 %v4763_v24, %v4332_v2  ;;  %v9710_v56 = vpop.f32.mrb[47].mxu1 }
0x615d   :  { %10792 = vtanh.f32 %v4767_v44  ;;  %v8698_v40 = vmul.f32 -1.442695, %v4767_v44 }
0x615f   :  { %10794 = vpow2.f32 %v8698_v40 }
0x6167   :  { %v10793_v8 = vpop.eup %10792 }
0x6168   :  { %4777 = vrot.lane.b32.xlu0 %v10793_v8, %s11091_s0 }
0x6169   :  { %v10795_v61 = vpop.eup %10794 }
0x616a   :  { %v4771_v59 = vadd.f32 1.0, %v10795_v61 }
0x616c   :  { %10796 = vrcp.f32 %v4771_v59 }
0x6176   :  { %v10797_v50 = vpop.eup %10796 }
0x6177   :  { %v4775_v55 = vmul.f32 %v10797_v50, %v4682_v21 }
0x61da   :  { %v4778_v53 = vpop.permute.xlu0 %4777 }
0x61db   :  { %v4780_v47 = vmul.f32 %v10797_v50, %v4778_v53 }
0x61dd   :  { %4782 = vrot.lane.b32.xlu1 %v4780_v47, %s11092_s11 }
0x624f   :  { %v4783_v63 = vpop.permute.xlu1 %4782 }
0x6250   :  { %v4785_v18 = vadd.f32 %v4783_v63, %v4775_v55 }
0x6252   :  { %10798 = vtanh.f32 %v4785_v18 }
0x625c   :  { %v10799_v2 = vpop.eup %10798 }
0x625d   :  { %4788 = vrot.lane.b32.xlu0 %v10799_v2, %s11091_s0 }
0x62cf   :  { %v4789_v54 = vpop.permute.xlu0 %4788 }
0x62d0   :  { %v4791_v9 = vmul.f32 %v10797_v50, %v4789_v54 }
0x62d2   :  { %4793 = vrot.lane.b32.xlu1 %v4791_v9, %s11092_s11 }
0x6344   :  { %v4794_v48 = vpop.permute.xlu1 %4793 }
0x6345   :  { %4796 = vst.msk [vmem:[#allocation5 + $0x18] sm:$0xff] %vm72_vm0, %v4794_v48  ;;  %9720 = vmatmul.mubr.msk.f32.vlgmr.msra.gmra.mrb[72].mxu0 %vm72_vm0, %v4794_v48 }
0x6346   :  { %10327 = vmatpush3.bf16.msra.mxu0 %v12119_v43  ;;  %9741 = vmatprep.mubr.msk.f32.mxu0 %vm11089_vm1, %v11090_v4 }
0x6347   :  { %10328 = vmatprep.subr.bf16.mxu0 %v11088_v3 }
0x634a   :  { %10330 = vmatpush3.bf16.msra.mxu0 %v12129_v39 }
0x634b   :  { %10337 = vmatprep.subr.bf16.mxu0 %v11088_v3 }
0x6418   :  { %v4866_v57 = vpop.f32.mrb[72].mxu0 }
0x6419   :  { %v4870_v33 = vadd.f32 %v4866_v57, %v4336_v13  ;;  %v9721_v20 = vpop.f32.mrb[73].mxu0 }
0x641b   :  { %10800 = vtanh.f32 %v4870_v33  ;;  %v8700_v34 = vmul.f32 -1.442695, %v4870_v33 }
0x641d   :  { %10802 = vpow2.f32 %v8700_v34 }
0x6425   :  { %v10801_v5 = vpop.eup %10800 }
0x6426   :  { %4880 = vrot.lane.b32.xlu0 %v10801_v5, %s11091_s0 }
0x6427   :  { %v10803_v25 = vpop.eup %10802 }
0x6428   :  { %v4874_v38 = vadd.f32 1.0, %v10803_v25 }
0x642a   :  { %10804 = vrcp.f32 %v4874_v38 }
0x6434   :  { %v10805_v46 = vpop.eup %10804 }
0x6435   :  { %v4878_v36 = vmul.f32 %v10805_v46, %v4785_v18 }
0x6498   :  { %v4881_v21 = vpop.permute.xlu0 %4880 }
0x6499   :  { %v4883_v29 = vmul.f32 %v10805_v46, %v4881_v21 }
0x649b   :  { %4885 = vrot.lane.b32.xlu1 %v4883_v29, %s11092_s11 }
0x650d   :  { %v4886_v37 = vpop.permute.xlu1 %4885 }
0x650e   :  { %v4888_v12 = vadd.f32 %v4886_v37, %v4878_v36 }
0x6510   :  { %10806 = vtanh.f32 %v4888_v12 }
0x651a   :  { %v10807_v13 = vpop.eup %10806 }
0x651b   :  { %4891 = vrot.lane.b32.xlu0 %v10807_v13, %s11091_s0 }
0x658d   :  { %v4892_v24 = vpop.permute.xlu0 %4891 }
0x658e   :  { %v4894_v44 = vmul.f32 %v10805_v46, %v4892_v24 }
0x6590   :  { %4896 = vrot.lane.b32.xlu1 %v4894_v44, %s11092_s11 }
0x6602   :  { %v4897_v56 = vpop.permute.xlu1 %4896 }
0x6603   :  { %4899 = vst.msk [vmem:[#allocation5 + $0x20] sm:$0xff] %vm72_vm0, %v4897_v56  ;;  %9731 = vmatmul.mubr.msk.f32.vlgmr.msra.gmra.mrb[48].mxu1 %vm72_vm0, %v4897_v56 }
0x6604   :  { %10333 = vmatpush3.bf16.msra.mxu1 %v12119_v43  ;;  %9752 = vmatprep.mubr.msk.f32.mxu1 %vm11089_vm1, %v11090_v4 }
0x6605   :  { %10334 = vmatprep.subr.bf16.mxu1 %v11088_v3 }
0x6608   :  { %10336 = vmatpush3.bf16.msra.mxu1 %v12129_v39 }
0x6609   :  { %10343 = vmatprep.subr.bf16.mxu1 %v11088_v3 }
0x66d6   :  { %v4969_v8 = vpop.f32.mrb[48].mxu1 }
0x66d7   :  { %v4973_v40 = vadd.f32 %v4969_v8, %v4340_v22  ;;  %v9732_v61 = vpop.f32.mrb[49].mxu1 }
0x66d9   :  { %10808 = vtanh.f32 %v4973_v40  ;;  %v8702_v50 = vmul.f32 -1.442695, %v4973_v40 }
0x66db   :  { %10810 = vpow2.f32 %v8702_v50 }
0x66e3   :  { %v10809_v59 = vpop.eup %10808 }
0x66e4   :  { %4983 = vrot.lane.b32.xlu0 %v10809_v59, %s11091_s0 }
0x66e5   :  { %v10811_v53 = vpop.eup %10810 }
0x66e6   :  { %v4977_v47 = vadd.f32 1.0, %v10811_v53 }
0x66e8   :  { %10812 = vrcp.f32 %v4977_v47 }
0x66f2   :  { %v10813_v55 = vpop.eup %10812 }
0x66f3   :  { %v4981_v2 = vmul.f32 %v10813_v55, %v4888_v12 }
0x6756   :  { %v4984_v63 = vpop.permute.xlu0 %4983 }
0x6757   :  { %v4986_v18 = vmul.f32 %v10813_v55, %v4984_v63 }
0x6759   :  { %4988 = vrot.lane.b32.xlu1 %v4986_v18, %s11092_s11 }
0x67cb   :  { %v4989_v54 = vpop.permute.xlu1 %4988 }
0x67cc   :  { %v4991_v9 = vadd.f32 %v4989_v54, %v4981_v2 }
0x67ce   :  { %10814 = vtanh.f32 %v4991_v9 }
0x67d8   :  { %v10815_v22 = vpop.eup %10814 }
0x67d9   :  { %4994 = vrot.lane.b32.xlu0 %v10815_v22, %s11091_s0 }
0x684b   :  { %v4995_v48 = vpop.permute.xlu0 %4994 }
0x684c   :  { %v4997_v57 = vmul.f32 %v10813_v55, %v4995_v48 }
0x684e   :  { %4999 = vrot.lane.b32.xlu1 %v4997_v57, %s11092_s11 }
0x68c0   :  { %v5000_v33 = vpop.permute.xlu1 %4999 }
0x68c1   :  { %5002 = vst.msk [vmem:[#allocation5 + $0x28] sm:$0xff] %vm72_vm0, %v5000_v33  ;;  %9742 = vmatmul.mubr.msk.f32.vlgmr.msra.gmra.mrb[74].mxu0 %vm72_vm0, %v5000_v33 }
0x68c2   :  { %10339 = vmatpush3.bf16.msra.mxu0 %v12119_v43  ;;  %9763 = vmatprep.mubr.msk.f32.mxu0 %vm11089_vm1, %v11090_v4 }
0x68c3   :  { %10340 = vmatprep.subr.bf16.mxu0 %v11088_v3 }
0x68c6   :  { %10342 = vmatpush3.bf16.msra.mxu0 %v12129_v39 }
0x68c7   :  { %10349 = vmatprep.subr.bf16.mxu0 %v11088_v3 }
0x6994   :  { %v5072_v20 = vpop.f32.mrb[74].mxu0 }
0x6995   :  { %v5076_v5 = vadd.f32 %v5072_v20, %v4344_v17  ;;  %v9743_v34 = vpop.f32.mrb[75].mxu0 }
0x6997   :  { %10816 = vtanh.f32 %v5076_v5  ;;  %v8704_v38 = vmul.f32 -1.442695, %v5076_v5 }
0x6999   :  { %10818 = vpow2.f32 %v8704_v38 }
0x69a1   :  { %v10817_v25 = vpop.eup %10816 }
0x69a2   :  { %5086 = vrot.lane.b32.xlu0 %v10817_v25, %s11091_s0 }
0x69a3   :  { %v10819_v46 = vpop.eup %10818 }
0x69a4   :  { %v5080_v21 = vadd.f32 1.0, %v10819_v46 }
0x69a6   :  { %10820 = vrcp.f32 %v5080_v21 }
0x69b0   :  { %v10821_v29 = vpop.eup %10820 }
0x69b1   :  { %v5084_v12 = vmul.f32 %v10821_v29, %v4991_v9 }
0x6a14   :  { %v5087_v36 = vpop.permute.xlu0 %5086 }
0x6a15   :  { %v5089_v37 = vmul.f32 %v10821_v29, %v5087_v36 }
0x6a17   :  { %5091 = vrot.lane.b32.xlu1 %v5089_v37, %s11092_s11 }
0x6a89   :  { %v5092_v13 = vpop.permute.xlu1 %5091 }
0x6a8a   :  { %v5094_v24 = vadd.f32 %v5092_v13, %v5084_v12 }
0x6a8c   :  { %10822 = vtanh.f32 %v5094_v24 }
0x6a96   :  { %v10823_v17 = vpop.eup %10822 }
0x6a97   :  { %5097 = vrot.lane.b32.xlu0 %v10823_v17, %s11091_s0 }
0x6b09   :  { %v5098_v44 = vpop.permute.xlu0 %5097 }
0x6b0a   :  { %v5100_v56 = vmul.f32 %v10821_v29, %v5098_v44 }
0x6b0c   :  { %5102 = vrot.lane.b32.xlu1 %v5100_v56, %s11092_s11 }
0x6b7e   :  { %v5103_v8 = vpop.permute.xlu1 %5102 }
0x6b7f   :  { %5105 = vst.msk [vmem:[#allocation5 + $0x30] sm:$0xff] %vm72_vm0, %v5103_v8  ;;  %9753 = vmatmul.mubr.msk.f32.vlgmr.msra.gmra.mrb[50].mxu1 %vm72_vm0, %v5103_v8 }
0x6b80   :  { %10345 = vmatpush3.bf16.msra.mxu1 %v12119_v43  ;;  %9774 = vmatprep.mubr.msk.f32.mxu1 %vm11089_vm1, %v11090_v4 }
0x6b81   :  { %10346 = vmatprep.subr.bf16.mxu1 %v11088_v3 }
0x6b84   :  { %10348 = vmatpush3.bf16.msra.mxu1 %v12129_v39 }
0x6b85   :  { %10355 = vmatprep.subr.bf16.mxu1 %v11088_v3 }
0x6c52   :  { %v5175_v40 = vpop.f32.mrb[50].mxu1 }
0x6c53   :  { %v5179_v61 = vadd.f32 %v5175_v40, %v4348_v26  ;;  %v9754_v59 = vpop.f32.mrb[51].mxu1 }
0x6c55   :  { %10824 = vtanh.f32 %v5179_v61  ;;  %v8706_v53 = vmul.f32 -1.442695, %v5179_v61 }
0x6c57   :  { %10826 = vpow2.f32 %v8706_v53 }
0x6c5f   :  { %v10825_v50 = vpop.eup %10824 }
0x6c60   :  { %5189 = vrot.lane.b32.xlu0 %v10825_v50, %s11091_s0 }
0x6c61   :  { %v10827_v47 = vpop.eup %10826 }
0x6c62   :  { %v5183_v55 = vadd.f32 1.0, %v10827_v47 }
0x6c64   :  { %10828 = vrcp.f32 %v5183_v55 }
0x6c6e   :  { %v10829_v63 = vpop.eup %10828 }
0x6c6f   :  { %v5187_v54 = vmul.f32 %v10829_v63, %v5094_v24 }
0x6cd2   :  { %v5190_v18 = vpop.permute.xlu0 %5189 }
0x6cd3   :  { %v5192_v2 = vmul.f32 %v10829_v63, %v5190_v18 }
0x6cd5   :  { %5194 = vrot.lane.b32.xlu1 %v5192_v2, %s11092_s11 }
0x6d47   :  { %v5195_v9 = vpop.permute.xlu1 %5194 }
0x6d48   :  { %v5197_v22 = vadd.f32 %v5195_v9, %v5187_v54 }
0x6d4a   :  { %10830 = vtanh.f32 %v5197_v22 }
0x6d54   :  { %v10831_v26 = vpop.eup %10830 }
0x6d55   :  { %5200 = vrot.lane.b32.xlu0 %v10831_v26, %s11091_s0 }
0x6dc7   :  { %v5201_v48 = vpop.permute.xlu0 %5200 }
0x6dc8   :  { %v5203_v57 = vmul.f32 %v10829_v63, %v5201_v48 }
0x6dca   :  { %5205 = vrot.lane.b32.xlu1 %v5203_v57, %s11092_s11  ;;  %v6057_v57 = vld [vmem:[#allocation5 + $0x30] sm:$0xff] }
0x6e3c   :  { %v5206_v33 = vpop.permute.xlu1 %5205 }
0x6e3d   :  { %5208 = vst.msk [vmem:[#allocation5 + $0x38] sm:$0xff] %vm72_vm0, %v5206_v33  ;;  %9764 = vmatmul.mubr.msk.f32.vlgmr.msra.gmra.mrb[76].mxu0 %vm72_vm0, %v5206_v33 }
0x6e3e   :  { %10351 = vmatpush3.bf16.msra.mxu0 %v12119_v43  ;;  %9785 = vmatprep.mubr.msk.f32.mxu0 %vm11089_vm1, %v11090_v4 }
0x6e3f   :  { %10352 = vmatprep.subr.bf16.mxu0 %v11088_v3 }
0x6e42   :  { %10354 = vmatpush3.bf16.msra.mxu0 %v12129_v39 }
0x6e43   :  { %10361 = vmatprep.subr.bf16.mxu0 %v11088_v3 }
0x6e44   :  { %v6061_v44 = vld [vmem:[#allocation5 + $0x38] sm:$0xff] }
0x6f10   :  { %v5278_v20 = vpop.f32.mrb[76].mxu0 }
0x6f11   :  { %v5282_v5 = vadd.f32 %v5278_v20, %v4352_v14  ;;  %v9765_v34 = vpop.f32.mrb[77].mxu0 }
0x6f13   :  { %10832 = vtanh.f32 %v5282_v5  ;;  %v8708_v38 = vmul.f32 -1.442695, %v5282_v5 }
0x6f15   :  { %10834 = vpow2.f32 %v8708_v38 }
0x6f1d   :  { %v10833_v25 = vpop.eup %10832 }
0x6f1e   :  { %5292 = vrot.lane.b32.xlu0 %v10833_v25, %s11091_s0 }
0x6f1f   :  { %v10835_v46 = vpop.eup %10834 }
0x6f20   :  { %v5286_v21 = vadd.f32 1.0, %v10835_v46 }
0x6f22   :  { %10836 = vrcp.f32 %v5286_v21 }
0x6f2c   :  { %v10837_v29 = vpop.eup %10836 }
0x6f2d   :  { %v5290_v12 = vmul.f32 %v10837_v29, %v5197_v22 }
0x6f90   :  { %v5293_v36 = vpop.permute.xlu0 %5292 }
0x6f91   :  { %v5295_v37 = vmul.f32 %v10837_v29, %v5293_v36 }
0x6f93   :  { %5297 = vrot.lane.b32.xlu1 %v5295_v37, %s11092_s11 }
0x7005   :  { %v5298_v13 = vpop.permute.xlu1 %5297 }
0x7006   :  { %v5300_v24 = vadd.f32 %v5298_v13, %v5290_v12 }
0x7008   :  { %10838 = vtanh.f32 %v5300_v24 }
0x7012   :  { %v10839_v51 = vpop.eup %10838 }
0x7013   :  { %5303 = vrot.lane.b32.xlu0 %v10839_v51, %s11091_s0 }
0x7085   :  { %v5304_v16 = vpop.permute.xlu0 %5303 }
0x7086   :  { %v5306_v14 = vmul.f32 %v10837_v29, %v5304_v16 }
0x7088   :  { %5308 = vrot.lane.b32.xlu1 %v5306_v14, %s11092_s11 }
0x70fa   :  { %v5309_v17 = vpop.permute.xlu1 %5308 }
0x70fb   :  { %5311 = vst.msk [vmem:[#allocation5 + $0x40] sm:$0xff] %vm72_vm0, %v5309_v17  ;;  %9775 = vmatmul.mubr.msk.f32.vlgmr.msra.gmra.mrb[52].mxu1 %vm72_vm0, %v5309_v17  ;;  %v6053_v17 = vld [vmem:[#allocation5 + $0x28] sm:$0xff] }
0x70fc   :  { %10357 = vmatpush3.bf16.msra.mxu1 %v12119_v43  ;;  %9796 = vmatprep.mubr.msk.f32.mxu1 %vm11089_vm1, %v11090_v4 }
0x70fd   :  { %10358 = vmatprep.subr.bf16.mxu1 %v11088_v3 }
0x7100   :  { %10360 = vmatpush3.bf16.msra.mxu1 %v12129_v39 }
0x7101   :  { %10367 = vmatprep.subr.bf16.mxu1 %v11088_v3 }
0x7102   :  { %v6062_v56 = vld [vmem:[#allocation5 + $0x40] sm:$0xff] }
0x7103   :  { %v6063_v8 = vsel %vm44_vm3, %v6061_v44, %v6062_v56  ;;  %v6067_v40 = vsel %vm44_vm3, %v6062_v56, %v6061_v44 }
0x7104   :  { %6064 = vst.msk [vmem:[#allocation4 + $0x38] sm:$0xff] %vm72_vm0, %v6063_v8  ;;  %6068 = vst.msk [vmem:[#allocation4 + $0x40] sm:$0xff] %vm72_vm0, %v6067_v40 }
0x71ce   :  { %v5381_v61 = vpop.f32.mrb[52].mxu1 }
0x71cf   :  { %v5385_v59 = vadd.f32 %v5381_v61, %v4356_v49  ;;  %v9776_v50 = vpop.f32.mrb[53].mxu1 }
0x71d1   :  { %10840 = vtanh.f32 %v5385_v59  ;;  %v8710_v47 = vmul.f32 -1.442695, %v5385_v59 }
0x71d3   :  { %10842 = vpow2.f32 %v8710_v47 }
0x71db   :  { %v10841_v53 = vpop.eup %10840 }
0x71dc   :  { %5395 = vrot.lane.b32.xlu0 %v10841_v53, %s11091_s0 }
0x71dd   :  { %v10843_v55 = vpop.eup %10842 }
0x71de   :  { %v5389_v63 = vadd.f32 1.0, %v10843_v55 }
0x71e0   :  { %10844 = vrcp.f32 %v5389_v63 }
0x71ea   :  { %v10845_v18 = vpop.eup %10844 }
0x71eb   :  { %v5393_v9 = vmul.f32 %v10845_v18, %v5300_v24 }
0x724e   :  { %v5396_v2 = vpop.permute.xlu0 %5395 }
0x724f   :  { %v5398_v54 = vmul.f32 %v10845_v18, %v5396_v2 }
0x7251   :  { %5400 = vrot.lane.b32.xlu1 %v5398_v54, %s11092_s11 }
0x72c3   :  { %v5401_v22 = vpop.permute.xlu1 %5400 }
0x72c4   :  { %v5403_v26 = vadd.f32 %v5401_v22, %v5393_v9 }
0x72c6   :  { %10846 = vtanh.f32 %v5403_v26 }
0x72d0   :  { %v10847_v15 = vpop.eup %10846 }
0x72d1   :  { %5406 = vrot.lane.b32.xlu0 %v10847_v15, %s11091_s0  ;;  %v6049_v15 = vld [vmem:[#allocation5 + $0x20] sm:$0xff] }
0x7343   :  { %v5407_v19 = vpop.permute.xlu0 %5406 }
0x7344   :  { %v5409_v49 = vmul.f32 %v10845_v18, %v5407_v19 }
0x7346   :  { %5411 = vrot.lane.b32.xlu1 %v5409_v49, %s11092_s11 }
0x73b8   :  { %v5412_v48 = vpop.permute.xlu1 %5411 }
0x73b9   :  { %5414 = vst.msk [vmem:[#allocation5 + $0x48] sm:$0xff] %vm72_vm0, %v5412_v48  ;;  %9786 = vmatmul.mubr.msk.f32.vlgmr.msra.gmra.mrb[78].mxu0 %vm72_vm0, %v5412_v48 }
0x73ba   :  { %10363 = vmatpush3.bf16.msra.mxu0 %v12119_v43  ;;  %9807 = vmatprep.mubr.msk.f32.mxu0 %vm11089_vm1, %v11090_v4 }
0x73bb   :  { %10364 = vmatprep.subr.bf16.mxu0 %v11088_v3 }
0x73be   :  { %10366 = vmatpush3.bf16.msra.mxu0 %v12129_v39 }
0x73bf   :  { %10373 = vmatprep.subr.bf16.mxu0 %v11088_v3 }
0x73c0   :  { %v6058_v33 = vld [vmem:[#allocation5 + $0x48] sm:$0xff] }
0x73c1   :  { %v6059_v20 = vsel %vm44_vm3, %v6057_v57, %v6058_v33  ;;  %v6071_v5 = vsel %vm44_vm3, %v6058_v33, %v6057_v57 }
0x73c2   :  { %6060 = vst.msk [vmem:[#allocation4 + $0x30] sm:$0xff] %vm72_vm0, %v6059_v20  ;;  %6072 = vst.msk [vmem:[#allocation4 + $0x48] sm:$0xff] %vm72_vm0, %v6071_v5 }
0x748c   :  { %v5484_v34 = vpop.f32.mrb[78].mxu0 }
0x748d   :  { %v5488_v25 = vadd.f32 %v5484_v34, %v4360_v58  ;;  %v9787_v38 = vpop.f32.mrb[79].mxu0 }
0x748f   :  { %10848 = vtanh.f32 %v5488_v25  ;;  %v8712_v21 = vmul.f32 -1.442695, %v5488_v25 }
0x7491   :  { %10850 = vpow2.f32 %v8712_v21 }
0x7499   :  { %v10849_v46 = vpop.eup %10848 }
0x749a   :  { %5498 = vrot.lane.b32.xlu0 %v10849_v46, %s11091_s0 }
0x749b   :  { %v10851_v29 = vpop.eup %10850 }
0x749c   :  { %v5492_v36 = vadd.f32 1.0, %v10851_v29 }
0x749e   :  { %10852 = vrcp.f32 %v5492_v36 }
0x74a8   :  { %v10853_v37 = vpop.eup %10852 }
0x74a9   :  { %v5496_v24 = vmul.f32 %v10853_v37, %v5403_v26 }
0x750c   :  { %v5499_v12 = vpop.permute.xlu0 %5498 }
0x750d   :  { %v5501_v13 = vmul.f32 %v10853_v37, %v5499_v12 }
0x750f   :  { %5503 = vrot.lane.b32.xlu1 %v5501_v13, %s11092_s11 }
0x7581   :  { %v5504_v51 = vpop.permute.xlu1 %5503 }
0x7582   :  { %v5506_v16 = vadd.f32 %v5504_v51, %v5496_v24  ;;  %v6045_v24 = vld [vmem:[#allocation5 + $0x18] sm:$0xff] }
0x7584   :  { %10854 = vtanh.f32 %v5506_v16 }
0x758e   :  { %v10855_v41 = vpop.eup %10854 }
0x758f   :  { %5509 = vrot.lane.b32.xlu0 %v10855_v41, %s11091_s0 }
0x7601   :  { %v5510_v62 = vpop.permute.xlu0 %5509 }
0x7602   :  { %v5512_v58 = vmul.f32 %v10853_v37, %v5510_v62 }
0x7604   :  { %5514 = vrot.lane.b32.xlu1 %v5512_v58, %s11092_s11 }
0x7676   :  { %v5515_v14 = vpop.permute.xlu1 %5514 }
0x7677   :  { %5517 = vst.msk [vmem:[#allocation5 + $0x50] sm:$0xff] %vm72_vm0, %v5515_v14  ;;  %9797 = vmatmul.mubr.msk.f32.vlgmr.msra.gmra.mrb[54].mxu1 %vm72_vm0, %v5515_v14 }
0x7678   :  { %10369 = vmatpush3.bf16.msra.mxu1 %v12119_v43  ;;  %9818 = vmatprep.mubr.msk.f32.mxu1 %vm11089_vm1, %v11090_v4 }
0x7679   :  { %10370 = vmatprep.subr.bf16.mxu1 %v11088_v3 }
0x767c   :  { %10372 = vmatpush3.bf16.msra.mxu1 %v12129_v39 }
0x767d   :  { %10379 = vmatprep.subr.bf16.mxu1 %v11088_v3 }
0x767e   :  { %v6054_v44 = vld [vmem:[#allocation5 + $0x50] sm:$0xff] }
0x767f   :  { %v6055_v56 = vsel %vm44_vm3, %v6053_v17, %v6054_v44  ;;  %v6075_v8 = vsel %vm44_vm3, %v6054_v44, %v6053_v17 }
0x7680   :  { %6056 = vst.msk [vmem:[#allocation4 + $0x28] sm:$0xff] %vm72_vm0, %v6055_v56  ;;  %6076 = vst.msk [vmem:[#allocation4 + $0x50] sm:$0xff] %vm72_vm0, %v6075_v8 }
0x774a   :  { %v5587_v40 = vpop.f32.mrb[54].mxu1 }
0x774b   :  { %v5591_v61 = vadd.f32 %v5587_v40, %v4364_v11  ;;  %v9798_v59 = vpop.f32.mrb[55].mxu1 }
0x774d   :  { %10856 = vtanh.f32 %v5591_v61  ;;  %v8714_v53 = vmul.f32 -1.442695, %v5591_v61 }
0x774f   :  { %10858 = vpow2.f32 %v8714_v53 }
0x7757   :  { %v10857_v50 = vpop.eup %10856 }
0x7758   :  { %5601 = vrot.lane.b32.xlu0 %v10857_v50, %s11091_s0 }
0x7759   :  { %v10859_v47 = vpop.eup %10858 }
0x775a   :  { %v5595_v55 = vadd.f32 1.0, %v10859_v47  ;;  %v6041_v47 = vld [vmem:[#allocation5 + $0x10] sm:$0xff] }
0x775c   :  { %10860 = vrcp.f32 %v5595_v55 }
0x7766   :  { %v10861_v63 = vpop.eup %10860 }
0x7767   :  { %v5599_v54 = vmul.f32 %v10861_v63, %v5506_v16 }
0x77ca   :  { %v5602_v18 = vpop.permute.xlu0 %5601 }
0x77cb   :  { %v5604_v2 = vmul.f32 %v10861_v63, %v5602_v18 }
0x77cd   :  { %5606 = vrot.lane.b32.xlu1 %v5604_v2, %s11092_s11 }
0x783f   :  { %v5607_v9 = vpop.permute.xlu1 %5606 }
0x7840   :  { %v5609_v22 = vadd.f32 %v5607_v9, %v5599_v54 }
0x7842   :  { %10862 = vtanh.f32 %v5609_v22 }
0x784c   :  { %v10863_v10 = vpop.eup %10862 }
0x784d   :  { %5612 = vrot.lane.b32.xlu0 %v10863_v10, %s11091_s0 }
0x78bf   :  { %v5613_v0 = vpop.permute.xlu0 %5612 }
0x78c0   :  { %v5615_v11 = vmul.f32 %v10861_v63, %v5613_v0 }
0x78c2   :  { %5617 = vrot.lane.b32.xlu1 %v5615_v11, %s11092_s11 }
0x7934   :  { %v5618_v26 = vpop.permute.xlu1 %5617 }
0x7935   :  { %5620 = vst.msk [vmem:[#allocation5 + $0x58] sm:$0xff] %vm72_vm0, %v5618_v26  ;;  %9808 = vmatmul.mubr.msk.f32.vlgmr.msra.gmra.mrb[80].mxu0 %vm72_vm0, %v5618_v26 }
0x7936   :  { %10375 = vmatpush3.bf16.msra.mxu0 %v12119_v43  ;;  %9829 = vmatprep.mubr.msk.f32.mxu0 %vm11089_vm1, %v11090_v4 }
0x7937   :  { %10376 = vmatprep.subr.bf16.mxu0 %v11088_v3 }
0x793a   :  { %10378 = vmatpush3.bf16.msra.mxu0 %v12129_v39 }
0x793c   :  { %v6050_v19 = vld [vmem:[#allocation5 + $0x58] sm:$0xff] }
0x793d   :  { %v6051_v49 = vsel %vm44_vm3, %v6049_v15, %v6050_v19  ;;  %v6079_v48 = vsel %vm44_vm3, %v6050_v19, %v6049_v15 }
0x793e   :  { %6052 = vst.msk [vmem:[#allocation4 + $0x20] sm:$0xff] %vm72_vm0, %v6051_v49  ;;  %6080 = vst.msk [vmem:[#allocation4 + $0x58] sm:$0xff] %vm72_vm0, %v6079_v48 }
0x7a08   :  { %v5690_v57 = vpop.f32.mrb[80].mxu0 }
0x7a09   :  { %v5694_v33 = vadd.f32 %v5690_v57, %v4368_v23  ;;  %v9809_v20 = vpop.f32.mrb[81].mxu0 }
0x7a0a   :  { %v6037_v20 = vld [vmem:[#allocation5 + $0x8] sm:$0xff] }
0x7a0b   :  { %10864 = vtanh.f32 %v5694_v33  ;;  %v8716_v34 = vmul.f32 -1.442695, %v5694_v33 }
0x7a0d   :  { %10866 = vpow2.f32 %v8716_v34 }
0x7a15   :  { %v10865_v5 = vpop.eup %10864 }
0x7a16   :  { %5704 = vrot.lane.b32.xlu0 %v10865_v5, %s11091_s0 }
0x7a17   :  { %v10867_v25 = vpop.eup %10866 }
0x7a18   :  { %v5698_v38 = vadd.f32 1.0, %v10867_v25 }
0x7a1a   :  { %10868 = vrcp.f32 %v5698_v38 }
0x7a24   :  { %v10869_v46 = vpop.eup %10868 }
0x7a25   :  { %v5702_v36 = vmul.f32 %v10869_v46, %v5609_v22 }
0x7a88   :  { %v5705_v21 = vpop.permute.xlu0 %5704 }
0x7a89   :  { %v5707_v29 = vmul.f32 %v10869_v46, %v5705_v21 }
0x7a8b   :  { %5709 = vrot.lane.b32.xlu1 %v5707_v29, %s11092_s11 }
0x7afd   :  { %v5710_v37 = vpop.permute.xlu1 %5709 }
0x7afe   :  { %v5712_v12 = vadd.f32 %v5710_v37, %v5702_v36 }
0x7b00   :  { %10870 = vtanh.f32 %v5712_v12 }
0x7b0a   :  { %v10871_v32 = vpop.eup %10870 }
0x7b0b   :  { %5715 = vrot.lane.b32.xlu0 %v10871_v32, %s11091_s0 }
0x7b7d   :  { %v5716_v27 = vpop.permute.xlu0 %5715 }
0x7b7e   :  { %v5718_v23 = vmul.f32 %v10869_v46, %v5716_v27 }
0x7b80   :  { %5720 = vrot.lane.b32.xlu1 %v5718_v23, %s11092_s11 }
0x7bf2   :  { %v5721_v13 = vpop.permute.xlu1 %5720 }
0x7bf3   :  { %5723 = vst.msk [vmem:[#allocation5 + $0x60] sm:$0xff] %vm72_vm0, %v5721_v13  ;;  %9819 = vmatmul.mubr.msk.f32.vlgmr.msra.gmra.mrb[56].mxu1 %vm72_vm0, %v5721_v13 }
0x7bf4   :  { %10381 = vmatpush3.bf16.msra.mxu1 %v12119_v43  ;;  %9840 = vmatprep.mubr.msk.f32.mxu1 %vm11089_vm1, %v11090_v4 }
0x7bf5   :  { %10382 = vmatprep.subr.bf16.mxu1 %v11088_v3 }
0x7bf8   :  { %10384 = vmatpush3.bf16.msra.mxu1 %v12129_v39 }
0x7bf9   :  { %10393 = vmatprep.subr.bf16.mxu1 %v11088_v3 }
0x7bfa   :  { %v6046_v51 = vld [vmem:[#allocation5 + $0x60] sm:$0xff] }
0x7bfb   :  { %v6047_v16 = vsel %vm44_vm3, %v6045_v24, %v6046_v51  ;;  %v6083_v41 = vsel %vm44_vm3, %v6046_v51, %v6045_v24 }
0x7bfc   :  { %6048 = vst.msk [vmem:[#allocation4 + $0x18] sm:$0xff] %vm72_vm0, %v6047_v16  ;;  %6084 = vst.msk [vmem:[#allocation4 + $0x60] sm:$0xff] %vm72_vm0, %v6083_v41  ;;  %v8725_v16 = vld [vmem:[%s13050_s1 + $0x70] sm:$0xff] }
0x7cc6   :  { %v5793_v43 = vpop.f32.mrb[56].mxu1 }
0x7cc7   :  { %v5797_v39 = vadd.f32 %v5793_v43, %v4372_v30  ;;  %v9820_v62 = vpop.f32.mrb[57].mxu1  ;;  %v8726_v43 = vld [vmem:[%s13050_s1 + $0x78] sm:$0xff] }
0x7cc9   :  { %10872 = vtanh.f32 %v5797_v39  ;;  %v8718_v14 = vmul.f32 -1.442695, %v5797_v39  ;;  %v10389_v39 = vpack.c.bf16 %v8726_v43, %v8725_v16 }
0x7ccb   :  { %10874 = vpow2.f32 %v8718_v14  ;;  %v8745_v14 = vld [vmem:[%s13052_s2 + $0x60] sm:$0xff] }
0x7cd3   :  { %v10873_v58 = vpop.eup %10872 }
0x7cd4   :  { %5807 = vrot.lane.b32.xlu0 %v10873_v58, %s11091_s0 }
0x7cd5   :  { %v10875_v17 = vpop.eup %10874 }
0x7cd6   :  { %v5801_v44 = vadd.f32 1.0, %v10875_v17  ;;  %v8746_v17 = vld [vmem:[%s13052_s2 + $0x68] sm:$0xff] }
0x7cd8   :  { %10876 = vrcp.f32 %v5801_v44  ;;  %v12572_v44 = vpack.c.bf16 %v8746_v17, %v8745_v14 }
0x7ce2   :  { %v10877_v56 = vpop.eup %10876 }
0x7ce3   :  { %v5805_v61 = vmul.f32 %v10877_v56, %v5712_v12 }
0x7d46   :  { %v5808_v8 = vpop.permute.xlu0 %5807 }
0x7d47   :  { %v5810_v40 = vmul.f32 %v10877_v56, %v5808_v8  ;;  %v8748_v8 = vld [vmem:[%s13052_s2 + $0x78] sm:$0xff] }
0x7d49   :  { %5812 = vrot.lane.b32.xlu1 %v5810_v40, %s11092_s11 }
0x7dbb   :  { %v5813_v59 = vpop.permute.xlu1 %5812 }
0x7dbc   :  { %v5815_v50 = vadd.f32 %v5813_v59, %v5805_v61  ;;  %v6033_v59 = vld [vmem:[#allocation5] sm:$0xff] }
0x7dbe   :  { %10878 = vtanh.f32 %v5815_v50 }
0x7dc8   :  { %v10879_v35 = vpop.eup %10878 }
0x7dc9   :  { %5818 = vrot.lane.b32.xlu0 %v10879_v35, %s11091_s0 }
0x7e3b   :  { %v5819_v6 = vpop.permute.xlu0 %5818 }
0x7e3c   :  { %v5821_v30 = vmul.f32 %v10877_v56, %v5819_v6  ;;  %v8747_v56 = vld [vmem:[%s13052_s2 + $0x70] sm:$0xff] }
0x7e3d   :  { %v12582_v40 = vpack.c.bf16 %v8748_v8, %v8747_v56 }
0x7e3e   :  { %5823 = vrot.lane.b32.xlu1 %v5821_v30, %s11092_s11 }
0x7eb0   :  { %v5824_v53 = vpop.permute.xlu1 %5823 }
0x7eb1   :  { %5826 = vst.msk [vmem:[#allocation5 + $0x68] sm:$0xff] %vm72_vm0, %v5824_v53  ;;  %9830 = vmatmul.mubr.msk.f32.vlgmr.msra.gmra.mrb[82].mxu0 %vm72_vm0, %v5824_v53 }
0x7eb8   :  { %v6042_v55 = vld [vmem:[#allocation5 + $0x68] sm:$0xff] }
0x7eb9   :  { %v6043_v63 = vsel %vm44_vm3, %v6041_v47, %v6042_v55  ;;  %v6087_v18 = vsel %vm44_vm3, %v6042_v55, %v6041_v47  ;;  %v6100_v55 = vld [vmem:[#allocation4 + $0x18] sm:$0xff] }
0x7eba   :  { %6044 = vst.msk [vmem:[#allocation4 + $0x10] sm:$0xff] %vm72_vm0, %v6043_v63  ;;  %6088 = vst.msk [vmem:[#allocation4 + $0x68] sm:$0xff] %vm72_vm0, %v6087_v18  ;;  %v6101_v63 = vld [vmem:[#allocation4 + $0x20] sm:$0xff]  ;;  %v6102_v18 = vld [vmem:[#allocation4 + $0x28] sm:$0xff] }
0x7ec1   :  { %v6099_v47 = vld [vmem:[#allocation4 + $0x10] sm:$0xff] }
0x7f84   :  { %v5896_v2 = vpop.f32.mrb[82].mxu0 }
0x7f85   :  { %v5900_v54 = vadd.f32 %v5896_v2, %v4376_v60  ;;  %v9831_v9 = vpop.f32.mrb[83].mxu0  ;;  %v6103_v2 = vld [vmem:[#allocation4 + $0x30] sm:$0xff] }
0x7f86   :  { %v6105_v9 = vld [vmem:[#allocation4 + $0x40] sm:$0xff] }
0x7f87   :  { %10880 = vtanh.f32 %v5900_v54  ;;  %v8720_v10 = vmul.f32 -1.442695, %v5900_v54  ;;  %v6104_v54 = vld [vmem:[#allocation4 + $0x38] sm:$0xff] }
0x7f89   :  { %10882 = vpow2.f32 %v8720_v10  ;;  %v6107_v10 = vld [vmem:[#allocation4 + $0x50] sm:$0xff] }
0x7f91   :  { %v10881_v22 = vpop.eup %10880 }
0x7f92   :  { %5910 = vrot.lane.b32.xlu0 %v10881_v22, %s11091_s0  ;;  %v6106_v22 = vld [vmem:[#allocation4 + $0x48] sm:$0xff] }
0x7f93   :  { %v10883_v0 = vpop.eup %10882 }
0x7f94   :  { %v5904_v11 = vadd.f32 1.0, %v10883_v0  ;;  %v6108_v0 = vld [vmem:[#allocation4 + $0x58] sm:$0xff] }
0x7f96   :  { %10884 = vrcp.f32 %v5904_v11  ;;  %v6109_v11 = vld [vmem:[#allocation4 + $0x60] sm:$0xff] }
0x7fa0   :  { %v10885_v26 = vpop.eup %10884 }
0x7fa1   :  { %v5908_v49 = vmul.f32 %v10885_v26, %v5815_v50 }
0x8004   :  { %v5911_v15 = vpop.permute.xlu0 %5910 }
0x8005   :  { %v5913_v19 = vmul.f32 %v10885_v26, %v5911_v15 }
0x8007   :  { %5915 = vrot.lane.b32.xlu1 %v5913_v19, %s11092_s11 }
0x8079   :  { %v5916_v48 = vpop.permute.xlu1 %5915 }
0x807a   :  { %v5918_v57 = vadd.f32 %v5916_v48, %v5908_v49 }
0x807c   :  { %10886 = vtanh.f32 %v5918_v57 }
0x8086   :  { %v10887_v28 = vpop.eup %10886 }
0x8087   :  { %5921 = vrot.lane.b32.xlu0 %v10887_v28, %s11091_s0 }
0x80f9   :  { %v5922_v1 = vpop.permute.xlu0 %5921 }
0x80fa   :  { %v5924_v60 = vmul.f32 %v10885_v26, %v5922_v1  ;;  %v6110_v26 = vld [vmem:[#allocation4 + $0x68] sm:$0xff] }
0x80fc   :  { %5926 = vrot.lane.b32.xlu1 %v5924_v60, %s11092_s11 }
0x816e   :  { %v5927_v33 = vpop.permute.xlu1 %5926 }
0x816f   :  { %5929 = vst.msk [vmem:[#allocation5 + $0x70] sm:$0xff] %vm72_vm0, %v5927_v33  ;;  %9841 = vmatmul.mubr.msk.f32.vlgmr.msra.gmra.mrb[58].mxu1 %vm72_vm0, %v5927_v33 }
0x8170   :  { %9883 = vmatprep.mubr.msk.f32.mxu1 %vm11089_vm1, %v11090_v4  ;;  %10395 = vmatpush3.bf16.msra.mxu1 %v12572_v44 }
0x8171   :  { %10396 = vmatprep.subr.bf16.mxu1 %v11088_v3 }
0x8174   :  { %10398 = vmatpush3.bf16.msra.mxu1 %v12582_v40 }
0x8175   :  { %10399 = vmatprep.subr.bf16.mxu1 %v11088_v3 }
0x8176   :  { %v6038_v5 = vld [vmem:[#allocation5 + $0x70] sm:$0xff] }
0x8177   :  { %v6039_v34 = vsel %vm44_vm3, %v6037_v20, %v6038_v5  ;;  %v6091_v25 = vsel %vm44_vm3, %v6038_v5, %v6037_v20  ;;  %9884 = vmatmul.mubr.f32.vlgmr.msra.gmra.mrb[60].mxu1 %v11090_v4 }
0x8178   :  { %6040 = vst.msk [vmem:[#allocation4 + $0x8] sm:$0xff] %vm72_vm0, %v6039_v34  ;;  %6092 = vst.msk [vmem:[#allocation4 + $0x70] sm:$0xff] %vm72_vm0, %v6091_v25  ;;  %10401 = vmatpush3.bf16.msra.mxu1 %v12572_v44  ;;  %9894 = vmatprep.mubr.msk.f32.mxu1 %vm11089_vm1, %v11090_v4 }
0x8179   :  { %10402 = vmatprep.subr.bf16.mxu1 %v11088_v3 }
0x817c   :  { %10404 = vmatpush3.bf16.msra.mxu1 %v12582_v40 }
0x817d   :  { %10405 = vmatprep.subr.bf16.mxu1 %v11088_v3 }
0x817f   :  { %v6098_v53 = vld [vmem:[#allocation4 + $0x8] sm:$0xff]  ;;  %v6111_v15 = vld [vmem:[#allocation4 + $0x70] sm:$0xff] }
0x8242   :  { %v5999_v38 = vpop.f32.mrb[58].mxu1 }
0x8243   :  { %v6003_v46 = vadd.f32 %v5999_v38, %v4380_v7  ;;  %v9842_v21 = vpop.f32.mrb[59].mxu1  ;;  %v8724_v7 = vld [vmem:[%s13050_s1 + $0x68] sm:$0xff] }
0x8244   :  { %v10385_v41 = vpack.c.bf16 %v8724_v7, %v8723_v45 }
0x8245   :  { %10888 = vtanh.f32 %v6003_v46  ;;  %v8722_v36 = vmul.f32 -1.442695, %v6003_v46 }
0x8246   :  { %10386 = vmatprep.subr.bf16.mxu0 %v10385_v41 }
0x8247   :  { %10890 = vpow2.f32 %v8722_v36  ;;  %10388 = vmatpush3.bf16.msra.mxu0 %v10385_v41 }
0x8248   :  { %10390 = vmatprep.subr.bf16.mxu0 %v10389_v39 }
0x824a   :  { %v6471_v49 = vpop.f32.mrb[60].mxu1 }
0x824b   :  { %10392 = vmatpush3.bf16.msra.mxu0 %v10389_v39  ;;  %v9885_v48 = vpop.f32.mrb[61].mxu1 }
0x824c   :  { %10417 = vmatprep.subr.bf16.mxu0 %v11088_v3 }
0x824f   :  { %v10889_v29 = vpop.eup %10888 }
0x8250   :  { %6013 = vrot.lane.b32.xlu0 %v10889_v29, %s11091_s0 }
0x8251   :  { %v10891_v37 = vpop.eup %10890 }
0x8252   :  { %v6007_v12 = vadd.f32 1.0, %v10891_v37 }
0x8254   :  { %10892 = vrcp.f32 %v6007_v12 }
0x825e   :  { %v10893_v32 = vpop.eup %10892 }
0x825f   :  { %v6011_v13 = vmul.f32 %v10893_v32, %v5918_v57  ;;  %v8728_v57 = vld [vmem:[%s13053_s3 + $0x3] ss:$0 sm:$0xff] }
0x82c2   :  { %v6014_v27 = vpop.permute.xlu0 %6013 }
0x82c3   :  { %v6016_v23 = vmul.f32 %v10893_v32, %v6014_v27 }
0x82c5   :  { %6018 = vrot.lane.b32.xlu1 %v6016_v23, %s11092_s11 }
0x8337   :  { %v6019_v24 = vpop.permute.xlu1 %6018 }
0x8338   :  { %v6021_v51 = vadd.f32 %v6019_v24, %v6011_v13 }
0x833a   :  { %10894 = vtanh.f32 %v6021_v51 }
0x8344   :  { %v10895_v31 = vpop.eup %10894 }
0x8345   :  { %6024 = vrot.lane.b32.xlu0 %v10895_v31, %s11091_s0 }
0x83b7   :  { %v6025_v62 = vpop.permute.xlu0 %6024 }
0x83b8   :  { %v6027_v58 = vmul.f32 %v10893_v32, %v6025_v62 }
0x83ba   :  { %6029 = vrot.lane.b32.xlu1 %v6027_v58, %s11092_s11 }
0x842c   :  { %v6030_v61 = vpop.permute.xlu1 %6029 }
0x842d   :  { %6032 = vst.msk [vmem:[#allocation5 + $0x78] sm:$0xff] %vm72_vm0, %v6030_v61 }
0x8434   :  { %v6034_v50 = vld [vmem:[#allocation5 + $0x78] sm:$0xff] }
0x8435   :  { %v6035_v35 = vsel %vm44_vm3, %v6033_v59, %v6034_v50  ;;  %v6095_v6 = vsel %vm44_vm3, %v6034_v50, %v6033_v59 }
0x8436   :  { %6036 = vst.msk [vmem:[#allocation4] sm:$0xff] %vm72_vm0, %v6035_v35  ;;  %6096 = vst.msk [vmem:[#allocation4 + $0x78] sm:$0xff] %vm72_vm0, %v6095_v6 }
0x843d   :  { %v6097_v30 = vld [vmem:[#allocation4] sm:$0xff]  ;;  %v6112_v19 = vld [vmem:[#allocation4 + $0x78] sm:$0xff] }
0x843e   :  { %9851 = vmatprep.mubr.msk.f32.mxu0 %vm72_vm0, %v6097_v30 }
0x843f   :  { %9852 = vmatmul.mubr.msk.f32.vlgmr.msra.gmra.mrb[84].mxu0 %vm72_vm0, %v6098_v53 }
0x8440   :  { %9854 = vmatprep.mubr.msk.f32.mxu0 %vm72_vm0, %v6099_v47  ;;  %10419 = vmatpush3.bf16.msra.mxu0 %v12572_v44 }
0x8441   :  { %10420 = vmatprep.subr.bf16.mxu0 %v11088_v3 }
0x8443   :  { %9855 = vmatmul.mubr.msk.f32.gmra.mrb[86].mxu0 %vm72_vm0, %v6100_v55 }
0x8444   :  { %9857 = vmatprep.mubr.msk.f32.mxu0 %vm72_vm0, %v6101_v63  ;;  %10422 = vmatpush3.bf16.msra.mxu0 %v12582_v40 }
0x8445   :  { %10429 = vmatprep.subr.bf16.mxu0 %v11088_v3 }
0x8447   :  { %9858 = vmatmul.mubr.msk.f32.gmra.mrb[88].mxu0 %vm72_vm0, %v6102_v18 }
0x8448   :  { %9860 = vmatprep.mubr.msk.f32.mxu0 %vm72_vm0, %v6103_v2 }
0x844b   :  { %9861 = vmatmul.mubr.msk.f32.gmra.mrb[90].mxu0 %vm72_vm0, %v6104_v54 }
0x844c   :  { %9863 = vmatprep.mubr.msk.f32.mxu0 %vm72_vm0, %v6105_v9 }
0x844f   :  { %9864 = vmatmul.mubr.msk.f32.gmra.mrb[92].mxu0 %vm72_vm0, %v6106_v22 }
0x8450   :  { %9866 = vmatprep.mubr.msk.f32.mxu0 %vm72_vm0, %v6107_v10 }
0x8453   :  { %9867 = vmatmul.mubr.msk.f32.gmra.mrb[94].mxu0 %vm72_vm0, %v6108_v0 }
0x8454   :  { %9869 = vmatprep.mubr.msk.f32.mxu0 %vm72_vm0, %v6109_v11 }
0x8457   :  { %9870 = vmatmul.mubr.msk.f32.gmra.mrb[96].mxu0 %vm72_vm0, %v6110_v26 }
0x8458   :  { %9872 = vmatprep.mubr.msk.f32.mxu0 %vm72_vm0, %v6111_v15 }
0x845b   :  { %9873 = vmatmul.mubr.msk.f32.gmra.mrb[98].mxu0 %vm72_vm0, %v6112_v19 }
0x845c   :  { %9927 = vmatprep.mubr.msk.f32.mxu0 %vm11089_vm1, %v11090_v4 }
0x8512   :  { %v9853_v28 = vpop.f32.mrb[84].mxu0 }
0x8513   :  { %v12625_v1 = vadd.f32 %v9853_v28, %v8728_v57  ;;  %v6240_v60 = vpop.f32.mrb[85].mxu0 }
0x8514   :  { %v12699_v53 = vadd.f32 %v8728_v57, %v6240_v60 }
0x8516   :  { %v9856_v33 = vpop.f32.mrb[86].mxu0 }
0x8517   :  { %v12627_v20 = vadd.f32 %v9856_v33, %v8728_v57  ;;  %v6250_v5 = vpop.f32.mrb[87].mxu0 }
0x8518   :  { %v12629_v34 = vadd.f32 %v8728_v57, %v6250_v5 }
0x851a   :  { %v9859_v25 = vpop.f32.mrb[88].mxu0 }
0x851b   :  { %v12631_v38 = vadd.f32 %v9859_v25, %v8728_v57  ;;  %v6260_v46 = vpop.f32.mrb[89].mxu0 }
0x851c   :  { %v12633_v21 = vadd.f32 %v8728_v57, %v6260_v46 }
0x851e   :  { %v9862_v29 = vpop.f32.mrb[90].mxu0 }
0x851f   :  { %v12635_v36 = vadd.f32 %v9862_v29, %v8728_v57  ;;  %v6270_v37 = vpop.f32.mrb[91].mxu0 }
0x8520   :  { %v12637_v12 = vadd.f32 %v8728_v57, %v6270_v37 }
0x8522   :  { %v9865_v32 = vpop.f32.mrb[92].mxu0 }
0x8523   :  { %v12639_v27 = vadd.f32 %v9865_v32, %v8728_v57  ;;  %v6280_v23 = vpop.f32.mrb[93].mxu0 }
0x8524   :  { %v12641_v13 = vadd.f32 %v8728_v57, %v6280_v23 }
0x8525   :  { %v6361_v24 = vsel %vm11275_vm2, %v12637_v12, %v12639_v27  ;;  %v6373_v51 = vsel %vm11275_vm2, %v12639_v27, %v12637_v12 }
0x8526   :  { %v9868_v31 = vpop.f32.mrb[94].mxu0  ;;  %v6365_v45 = vsel %vm11275_vm2, %v12635_v36, %v12641_v13  ;;  %v6369_v7 = vsel %vm11275_vm2, %v12641_v13, %v12635_v36 }
0x8527   :  { %v12659_v16 = vadd.f32 %v9868_v31, %v8728_v57  ;;  %v6290_v41 = vpop.f32.mrb[95].mxu0 }
0x8528   :  { %v12661_v43 = vadd.f32 %v8728_v57, %v6290_v41 }
0x8529   :  { %v6353_v39 = vsel %vm11275_vm2, %v12633_v21, %v12659_v16  ;;  %v6381_v62 = vsel %vm11275_vm2, %v12659_v16, %v12633_v21 }
0x852a   :  { %v9871_v58 = vpop.f32.mrb[96].mxu0  ;;  %v6357_v14 = vsel %vm11275_vm2, %v12631_v38, %v12661_v43  ;;  %v6377_v17 = vsel %vm11275_vm2, %v12661_v43, %v12631_v38 }
0x852b   :  { %v12679_v56 = vadd.f32 %v9871_v58, %v8728_v57  ;;  %v6300_v8 = vpop.f32.mrb[97].mxu0 }
0x852c   :  { %v12681_v61 = vadd.f32 %v8728_v57, %v6300_v8 }
0x852d   :  { %v6345_v59 = vsel %vm11275_vm2, %v12629_v34, %v12679_v56  ;;  %v6389_v50 = vsel %vm11275_vm2, %v12679_v56, %v12629_v34 }
0x852e   :  { %v9874_v35 = vpop.f32.mrb[98].mxu0  ;;  %v6349_v6 = vsel %vm11275_vm2, %v12627_v20, %v12681_v61  ;;  %v6385_v30 = vsel %vm11275_vm2, %v12681_v61, %v12627_v20 }
0x852f   :  { %v12701_v47 = vadd.f32 %v9874_v35, %v8728_v57  ;;  %v6310_v55 = vpop.f32.mrb[99].mxu0 }
0x8530   :  { %v12703_v63 = vadd.f32 %v8728_v57, %v6310_v55 }
0x8531   :  { %v6337_v18 = vsel %vm11275_vm2, %v12699_v53, %v12701_v47  ;;  %v6397_v2 = vsel %vm11275_vm2, %v12701_v47, %v12699_v53  ;;  %v8068_v53 = vmul.f32 0.0, %v8780_v52 }
0x8532   :  { %v6475_v54 = vadd.f32 %v6471_v49, %v6337_v18  ;;  %v6341_v9 = vsel %vm11275_vm2, %v12625_v1, %v12703_v63  ;;  %v6393_v22 = vsel %vm11275_vm2, %v12703_v63, %v12625_v1 }
0x8534   :  { %10896 = vtanh.f32 %v6475_v54  ;;  %v8749_v0 = vmul.f32 -1.442695, %v6475_v54 }
0x8536   :  { %10898 = vpow2.f32 %v8749_v0 }
0x853e   :  { %v10897_v10 = vpop.eup %10896 }
0x853f   :  { %6485 = vrot.lane.b32.xlu0 %v10897_v10, %s11091_s0 }
0x8540   :  { %v10899_v11 = vpop.eup %10898 }
0x8541   :  { %v6479_v26 = vadd.f32 1.0, %v10899_v11 }
0x8543   :  { %10900 = vrcp.f32 %v6479_v26 }
0x854d   :  { %v10901_v15 = vpop.eup %10900 }
0x854e   :  { %v6483_v48 = vmul.f32 0.0, %v10901_v15 }
0x85b1   :  { %v6486_v19 = vpop.permute.xlu0 %6485 }
0x85b2   :  { %v6488_v49 = vmul.f32 %v10901_v15, %v6486_v19 }
0x85b4   :  { %6490 = vrot.lane.b32.xlu1 %v6488_v49, %s11092_s11 }
0x8626   :  { %v6491_v57 = vpop.permute.xlu1 %6490 }
0x8627   :  { %v6493_v28 = vadd.f32 %v6491_v57, %v6483_v48 }
0x8629   :  { %10902 = vtanh.f32 %v6493_v28 }
0x8633   :  { %v10903_v60 = vpop.eup %10902 }
0x8634   :  { %6496 = vrot.lane.b32.xlu0 %v10903_v60, %s11091_s0 }
0x86a6   :  { %v6497_v33 = vpop.permute.xlu0 %6496 }
0x86a7   :  { %v6499_v5 = vmul.f32 %v10901_v15, %v6497_v33 }
0x86a9   :  { %6501 = vrot.lane.b32.xlu1 %v6499_v5, %s11092_s11 }
0x871b   :  { %v6502_v25 = vpop.permute.xlu1 %6501 }
0x871c   :  { %6504 = vst.msk [vmem:[#allocation5] sm:$0xff] %vm72_vm0, %v6502_v25  ;;  %9895 = vmatmul.mubr.msk.f32.vlgmr.msra.gmra.mrb[62].mxu1 %vm72_vm0, %v6502_v25 }
0x871d   :  { %10407 = vmatpush3.bf16.msra.mxu1 %v12572_v44  ;;  %9905 = vmatprep.mubr.msk.f32.mxu1 %vm11089_vm1, %v11090_v4 }
0x871e   :  { %10408 = vmatprep.subr.bf16.mxu1 %v11088_v3 }
0x8721   :  { %10410 = vmatpush3.bf16.msra.mxu1 %v12582_v40 }
0x8722   :  { %10411 = vmatprep.subr.bf16.mxu1 %v11088_v3 }
0x87ef   :  { %v6574_v46 = vpop.f32.mrb[62].mxu1 }
0x87f0   :  { %v6578_v29 = vadd.f32 %v6574_v46, %v6341_v9  ;;  %v9896_v37 = vpop.f32.mrb[63].mxu1 }
0x87f2   :  { %10904 = vtanh.f32 %v6578_v29  ;;  %v8751_v23 = vmul.f32 -1.442695, %v6578_v29 }
0x87f4   :  { %10906 = vpow2.f32 %v8751_v23 }
0x87fc   :  { %v10905_v32 = vpop.eup %10904 }
0x87fd   :  { %6588 = vrot.lane.b32.xlu0 %v10905_v32, %s11091_s0 }
0x87fe   :  { %v10907_v31 = vpop.eup %10906 }
0x87ff   :  { %v6582_v41 = vadd.f32 1.0, %v10907_v31 }
0x8801   :  { %10908 = vrcp.f32 %v6582_v41 }
0x880b   :  { %v10909_v58 = vpop.eup %10908 }
0x880c   :  { %v6586_v55 = vmul.f32 %v10909_v58, %v6493_v28 }
0x886f   :  { %v6589_v8 = vpop.permute.xlu0 %6588 }
0x8870   :  { %v6591_v35 = vmul.f32 %v10909_v58, %v6589_v8 }
0x8872   :  { %6593 = vrot.lane.b32.xlu1 %v6591_v35, %s11092_s11 }
0x88e4   :  { %v6594_v18 = vpop.permute.xlu1 %6593 }
0x88e5   :  { %v6596_v54 = vadd.f32 %v6594_v18, %v6586_v55 }
0x88e7   :  { %10910 = vtanh.f32 %v6596_v54 }
0x88f1   :  { %v10911_v9 = vpop.eup %10910 }
0x88f2   :  { %6599 = vrot.lane.b32.xlu0 %v10911_v9, %s11091_s0 }
0x8964   :  { %v6600_v10 = vpop.permute.xlu0 %6599 }
0x8965   :  { %v6602_v0 = vmul.f32 %v10909_v58, %v6600_v10 }
0x8967   :  { %6604 = vrot.lane.b32.xlu1 %v6602_v0, %s11092_s11 }
0x89d9   :  { %v6605_v11 = vpop.permute.xlu1 %6604 }
0x89da   :  { %6607 = vst.msk [vmem:[#allocation5 + $0x8] sm:$0xff] %vm72_vm0, %v6605_v11  ;;  %9906 = vmatmul.mubr.msk.f32.vlgmr.msra.gmra.mrb[64].mxu1 %vm72_vm0, %v6605_v11 }
0x89db   :  { %10413 = vmatpush3.bf16.msra.mxu1 %v12572_v44  ;;  %9916 = vmatprep.mubr.msk.f32.mxu1 %vm11089_vm1, %v11090_v4 }
0x89dc   :  { %10414 = vmatprep.subr.bf16.mxu1 %v11088_v3 }
0x89df   :  { %10416 = vmatpush3.bf16.msra.mxu1 %v12582_v40 }
0x89e0   :  { %10423 = vmatprep.subr.bf16.mxu1 %v11088_v3 }
0x8aad   :  { %v6677_v26 = vpop.f32.mrb[64].mxu1 }
0x8aae   :  { %v6681_v15 = vadd.f32 %v6677_v26, %v6345_v59  ;;  %v9907_v19 = vpop.f32.mrb[65].mxu1 }
0x8ab0   :  { %10912 = vtanh.f32 %v6681_v15  ;;  %v8753_v48 = vmul.f32 -1.442695, %v6681_v15 }
0x8ab2   :  { %10914 = vpow2.f32 %v8753_v48 }
0x8aba   :  { %v10913_v49 = vpop.eup %10912 }
0x8abb   :  { %6691 = vrot.lane.b32.xlu0 %v10913_v49, %s11091_s0 }
0x8abc   :  { %v10915_v57 = vpop.eup %10914 }
0x8abd   :  { %v6685_v28 = vadd.f32 1.0, %v10915_v57 }
0x8abf   :  { %10916 = vrcp.f32 %v6685_v28 }
0x8ac9   :  { %v10917_v60 = vpop.eup %10916 }
0x8aca   :  { %v6689_v25 = vmul.f32 %v10917_v60, %v6596_v54 }
0x8b2d   :  { %v6692_v33 = vpop.permute.xlu0 %6691 }
0x8b2e   :  { %v6694_v5 = vmul.f32 %v10917_v60, %v6692_v33 }
0x8b30   :  { %6696 = vrot.lane.b32.xlu1 %v6694_v5, %s11092_s11 }
0x8ba2   :  { %v6697_v46 = vpop.permute.xlu1 %6696 }
0x8ba3   :  { %v6699_v29 = vadd.f32 %v6697_v46, %v6689_v25 }
0x8ba5   :  { %10918 = vtanh.f32 %v6699_v29 }
0x8baf   :  { %v10919_v59 = vpop.eup %10918 }
0x8bb0   :  { %6702 = vrot.lane.b32.xlu0 %v10919_v59, %s11091_s0 }
0x8c22   :  { %v6703_v37 = vpop.permute.xlu0 %6702 }
0x8c23   :  { %v6705_v32 = vmul.f32 %v10917_v60, %v6703_v37 }
0x8c25   :  { %6707 = vrot.lane.b32.xlu1 %v6705_v32, %s11092_s11 }
0x8c97   :  { %v6708_v23 = vpop.permute.xlu1 %6707 }
0x8c98   :  { %6710 = vst.msk [vmem:[#allocation5 + $0x10] sm:$0xff] %vm72_vm0, %v6708_v23  ;;  %9917 = vmatmul.mubr.msk.f32.vlgmr.msra.gmra.mrb[66].mxu1 %vm72_vm0, %v6708_v23 }
0x8c99   :  { %10425 = vmatpush3.bf16.msra.mxu1 %v12572_v44  ;;  %9938 = vmatprep.mubr.msk.f32.mxu1 %vm11089_vm1, %v11090_v4 }
0x8c9a   :  { %10426 = vmatprep.subr.bf16.mxu1 %v11088_v3 }
0x8c9d   :  { %10428 = vmatpush3.bf16.msra.mxu1 %v12582_v40 }
0x8c9e   :  { %10435 = vmatprep.subr.bf16.mxu1 %v11088_v3 }
0x8d6b   :  { %v6780_v31 = vpop.f32.mrb[66].mxu1 }
0x8d6c   :  { %v6784_v41 = vadd.f32 %v6780_v31, %v6349_v6  ;;  %v9918_v58 = vpop.f32.mrb[67].mxu1 }
0x8d6e   :  { %10920 = vtanh.f32 %v6784_v41  ;;  %v8755_v35 = vmul.f32 -1.442695, %v6784_v41 }
0x8d70   :  { %10922 = vpow2.f32 %v8755_v35 }
0x8d78   :  { %v10921_v8 = vpop.eup %10920 }
0x8d79   :  { %6794 = vrot.lane.b32.xlu0 %v10921_v8, %s11091_s0 }
0x8d7a   :  { %v10923_v55 = vpop.eup %10922 }
0x8d7b   :  { %v6788_v18 = vadd.f32 1.0, %v10923_v55 }
0x8d7d   :  { %10924 = vrcp.f32 %v6788_v18 }
0x8d87   :  { %v10925_v54 = vpop.eup %10924 }
0x8d88   :  { %v6792_v0 = vmul.f32 %v10925_v54, %v6699_v29 }
0x8deb   :  { %v6795_v9 = vpop.permute.xlu0 %6794 }
0x8dec   :  { %v6797_v10 = vmul.f32 %v10925_v54, %v6795_v9 }
0x8dee   :  { %6799 = vrot.lane.b32.xlu1 %v6797_v10, %s11092_s11 }
0x8e60   :  { %v6800_v11 = vpop.permute.xlu1 %6799 }
0x8e61   :  { %v6802_v26 = vadd.f32 %v6800_v11, %v6792_v0 }
0x8e63   :  { %10926 = vtanh.f32 %v6802_v26 }
0x8e6d   :  { %v10927_v6 = vpop.eup %10926 }
0x8e6e   :  { %6805 = vrot.lane.b32.xlu0 %v10927_v6, %s11091_s0 }
0x8ee0   :  { %v6806_v15 = vpop.permute.xlu0 %6805 }
0x8ee1   :  { %v6808_v19 = vmul.f32 %v10925_v54, %v6806_v15 }
0x8ee3   :  { %6810 = vrot.lane.b32.xlu1 %v6808_v19, %s11092_s11 }
0x8f55   :  { %v6811_v49 = vpop.permute.xlu1 %6810 }
0x8f56   :  { %6813 = vst.msk [vmem:[#allocation5 + $0x18] sm:$0xff] %vm72_vm0, %v6811_v49  ;;  %9928 = vmatmul.mubr.msk.f32.vlgmr.msra.gmra.mrb[100].mxu0 %vm72_vm0, %v6811_v49 }
0x8f57   :  { %10431 = vmatpush3.bf16.msra.mxu0 %v12572_v44  ;;  %9949 = vmatprep.mubr.msk.f32.mxu0 %vm11089_vm1, %v11090_v4 }
0x8f58   :  { %10432 = vmatprep.subr.bf16.mxu0 %v11088_v3 }
0x8f5b   :  { %10434 = vmatpush3.bf16.msra.mxu0 %v12582_v40 }
0x8f5c   :  { %10441 = vmatprep.subr.bf16.mxu0 %v11088_v3 }
0x9029   :  { %v6883_v48 = vpop.f32.mrb[100].mxu0 }
0x902a   :  { %v6887_v57 = vadd.f32 %v6883_v48, %v6353_v39  ;;  %v9929_v28 = vpop.f32.mrb[101].mxu0 }
0x902c   :  { %10928 = vtanh.f32 %v6887_v57  ;;  %v8757_v33 = vmul.f32 -1.442695, %v6887_v57 }
0x902e   :  { %10930 = vpow2.f32 %v8757_v33 }
0x9036   :  { %v10929_v60 = vpop.eup %10928 }
0x9037   :  { %6897 = vrot.lane.b32.xlu0 %v10929_v60, %s11091_s0 }
0x9038   :  { %v10931_v5 = vpop.eup %10930 }
0x9039   :  { %v6891_v25 = vadd.f32 1.0, %v10931_v5 }
0x903b   :  { %10932 = vrcp.f32 %v6891_v25 }
0x9045   :  { %v10933_v46 = vpop.eup %10932 }
0x9046   :  { %v6895_v37 = vmul.f32 %v10933_v46, %v6802_v26 }
0x90a9   :  { %v6898_v29 = vpop.permute.xlu0 %6897 }
0x90aa   :  { %v6900_v59 = vmul.f32 %v10933_v46, %v6898_v29 }
0x90ac   :  { %6902 = vrot.lane.b32.xlu1 %v6900_v59, %s11092_s11 }
0x911e   :  { %v6903_v32 = vpop.permute.xlu1 %6902 }
0x911f   :  { %v6905_v23 = vadd.f32 %v6903_v32, %v6895_v37 }
0x9121   :  { %10934 = vtanh.f32 %v6905_v23 }
0x912b   :  { %v10935_v39 = vpop.eup %10934 }
0x912c   :  { %6908 = vrot.lane.b32.xlu0 %v10935_v39, %s11091_s0 }
0x919e   :  { %v6909_v31 = vpop.permute.xlu0 %6908 }
0x919f   :  { %v6911_v41 = vmul.f32 %v10933_v46, %v6909_v31 }
0x91a1   :  { %6913 = vrot.lane.b32.xlu1 %v6911_v41, %s11092_s11 }
0x9213   :  { %v6914_v58 = vpop.permute.xlu1 %6913 }
0x9214   :  { %6916 = vst.msk [vmem:[#allocation5 + $0x20] sm:$0xff] %vm72_vm0, %v6914_v58  ;;  %9939 = vmatmul.mubr.msk.f32.vlgmr.msra.gmra.mrb[68].mxu1 %vm72_vm0, %v6914_v58 }
0x9215   :  { %10437 = vmatpush3.bf16.msra.mxu1 %v12572_v44  ;;  %9960 = vmatprep.mubr.msk.f32.mxu1 %vm11089_vm1, %v11090_v4 }
0x9216   :  { %10438 = vmatprep.subr.bf16.mxu1 %v11088_v3 }
0x9219   :  { %10440 = vmatpush3.bf16.msra.mxu1 %v12582_v40 }
0x921a   :  { %10447 = vmatprep.subr.bf16.mxu1 %v11088_v3 }
0x92e7   :  { %v6986_v8 = vpop.f32.mrb[68].mxu1 }
0x92e8   :  { %v6990_v35 = vadd.f32 %v6986_v8, %v6357_v14  ;;  %v9940_v55 = vpop.f32.mrb[69].mxu1 }
0x92ea   :  { %10936 = vtanh.f32 %v6990_v35  ;;  %v8759_v54 = vmul.f32 -1.442695, %v6990_v35 }
0x92ec   :  { %10938 = vpow2.f32 %v8759_v54 }
0x92f4   :  { %v10937_v18 = vpop.eup %10936 }
0x92f5   :  { %7000 = vrot.lane.b32.xlu0 %v10937_v18, %s11091_s0 }
0x92f6   :  { %v10939_v9 = vpop.eup %10938 }
0x92f7   :  { %v6994_v10 = vadd.f32 1.0, %v10939_v9 }
0x92f9   :  { %10940 = vrcp.f32 %v6994_v10 }
0x9303   :  { %v10941_v0 = vpop.eup %10940 }
0x9304   :  { %v6998_v6 = vmul.f32 %v10941_v0, %v6905_v23 }
0x9367   :  { %v7001_v11 = vpop.permute.xlu0 %7000 }
0x9368   :  { %v7003_v26 = vmul.f32 %v10941_v0, %v7001_v11 }
0x936a   :  { %7005 = vrot.lane.b32.xlu1 %v7003_v26, %s11092_s11 }
0x93dc   :  { %v7006_v15 = vpop.permute.xlu1 %7005 }
0x93dd   :  { %v7008_v19 = vadd.f32 %v7006_v15, %v6998_v6 }
0x93df   :  { %10942 = vtanh.f32 %v7008_v19 }
0x93e9   :  { %v10943_v14 = vpop.eup %10942 }
0x93ea   :  { %7011 = vrot.lane.b32.xlu0 %v10943_v14, %s11091_s0 }
0x945c   :  { %v7012_v49 = vpop.permute.xlu0 %7011 }
0x945d   :  { %v7014_v48 = vmul.f32 %v10941_v0, %v7012_v49 }
0x945f   :  { %7016 = vrot.lane.b32.xlu1 %v7014_v48, %s11092_s11 }
0x94d1   :  { %v7017_v57 = vpop.permute.xlu1 %7016 }
0x94d2   :  { %7019 = vst.msk [vmem:[#allocation5 + $0x28] sm:$0xff] %vm72_vm0, %v7017_v57  ;;  %9950 = vmatmul.mubr.msk.f32.vlgmr.msra.gmra.mrb[102].mxu0 %vm72_vm0, %v7017_v57 }
0x94d3   :  { %10443 = vmatpush3.bf16.msra.mxu0 %v12572_v44  ;;  %9971 = vmatprep.mubr.msk.f32.mxu0 %vm11089_vm1, %v11090_v4 }
0x94d4   :  { %10444 = vmatprep.subr.bf16.mxu0 %v11088_v3 }
0x94d7   :  { %10446 = vmatpush3.bf16.msra.mxu0 %v12582_v40 }
0x94d8   :  { %10453 = vmatprep.subr.bf16.mxu0 %v11088_v3 }
0x95a5   :  { %v7089_v28 = vpop.f32.mrb[102].mxu0 }
0x95a6   :  { %v7093_v60 = vadd.f32 %v7089_v28, %v6361_v24  ;;  %v9951_v33 = vpop.f32.mrb[103].mxu0 }
0x95a8   :  { %10944 = vtanh.f32 %v7093_v60  ;;  %v8761_v25 = vmul.f32 -1.442695, %v7093_v60 }
0x95aa   :  { %10946 = vpow2.f32 %v8761_v25 }
0x95b2   :  { %v10945_v5 = vpop.eup %10944 }
0x95b3   :  { %7103 = vrot.lane.b32.xlu0 %v10945_v5, %s11091_s0 }
0x95b4   :  { %v10947_v46 = vpop.eup %10946 }
0x95b5   :  { %v7097_v29 = vadd.f32 1.0, %v10947_v46 }
0x95b7   :  { %10948 = vrcp.f32 %v7097_v29 }
0x95c1   :  { %v10949_v59 = vpop.eup %10948 }
0x95c2   :  { %v7101_v23 = vmul.f32 %v10949_v59, %v7008_v19 }
0x9625   :  { %v7104_v37 = vpop.permute.xlu0 %7103 }
0x9626   :  { %v7106_v32 = vmul.f32 %v10949_v59, %v7104_v37 }
0x9628   :  { %7108 = vrot.lane.b32.xlu1 %v7106_v32, %s11092_s11 }
0x969a   :  { %v7109_v39 = vpop.permute.xlu1 %7108 }
0x969b   :  { %v7111_v31 = vadd.f32 %v7109_v39, %v7101_v23 }
0x969d   :  { %10950 = vtanh.f32 %v7111_v31 }
0x96a7   :  { %v10951_v24 = vpop.eup %10950 }
0x96a8   :  { %7114 = vrot.lane.b32.xlu0 %v10951_v24, %s11091_s0 }
0x971a   :  { %v7115_v41 = vpop.permute.xlu0 %7114 }
0x971b   :  { %v7117_v58 = vmul.f32 %v10949_v59, %v7115_v41 }
0x971d   :  { %7119 = vrot.lane.b32.xlu1 %v7117_v58, %s11092_s11 }
0x978f   :  { %v7120_v8 = vpop.permute.xlu1 %7119 }
0x9790   :  { %7122 = vst.msk [vmem:[#allocation5 + $0x30] sm:$0xff] %vm72_vm0, %v7120_v8  ;;  %9961 = vmatmul.mubr.msk.f32.vlgmr.msra.gmra.mrb[70].mxu1 %vm72_vm0, %v7120_v8 }
0x9791   :  { %10449 = vmatpush3.bf16.msra.mxu1 %v12572_v44  ;;  %9982 = vmatprep.mubr.msk.f32.mxu1 %vm11089_vm1, %v11090_v4 }
0x9792   :  { %10450 = vmatprep.subr.bf16.mxu1 %v11088_v3 }
0x9795   :  { %10452 = vmatpush3.bf16.msra.mxu1 %v12582_v40 }
0x9796   :  { %10459 = vmatprep.subr.bf16.mxu1 %v11088_v3 }
0x9863   :  { %v7192_v35 = vpop.f32.mrb[70].mxu1 }
0x9864   :  { %v7196_v55 = vadd.f32 %v7192_v35, %v6365_v45  ;;  %v9962_v18 = vpop.f32.mrb[71].mxu1 }
0x9866   :  { %10952 = vtanh.f32 %v7196_v55  ;;  %v8763_v9 = vmul.f32 -1.442695, %v7196_v55 }
0x9868   :  { %10954 = vpow2.f32 %v8763_v9 }
0x9870   :  { %v10953_v54 = vpop.eup %10952 }
0x9871   :  { %7206 = vrot.lane.b32.xlu0 %v10953_v54, %s11091_s0 }
0x9872   :  { %v10955_v10 = vpop.eup %10954 }
0x9873   :  { %v7200_v0 = vadd.f32 1.0, %v10955_v10 }
0x9875   :  { %10956 = vrcp.f32 %v7200_v0 }
0x987f   :  { %v10957_v11 = vpop.eup %10956 }
0x9880   :  { %v7204_v15 = vmul.f32 %v10957_v11, %v7111_v31 }
0x98e3   :  { %v7207_v26 = vpop.permute.xlu0 %7206 }
0x98e4   :  { %v7209_v6 = vmul.f32 %v10957_v11, %v7207_v26 }
0x98e6   :  { %7211 = vrot.lane.b32.xlu1 %v7209_v6, %s11092_s11 }
0x9958   :  { %v7212_v19 = vpop.permute.xlu1 %7211 }
0x9959   :  { %v7214_v14 = vadd.f32 %v7212_v19, %v7204_v15 }
0x995b   :  { %10958 = vtanh.f32 %v7214_v14 }
0x9965   :  { %v10959_v45 = vpop.eup %10958 }
0x9966   :  { %7217 = vrot.lane.b32.xlu0 %v10959_v45, %s11091_s0 }
0x99d8   :  { %v7218_v49 = vpop.permute.xlu0 %7217 }
0x99d9   :  { %v7220_v48 = vmul.f32 %v10957_v11, %v7218_v49 }
0x99db   :  { %7222 = vrot.lane.b32.xlu1 %v7220_v48, %s11092_s11 }
0x9a4d   :  { %v7223_v57 = vpop.permute.xlu1 %7222 }
0x9a4e   :  { %7225 = vst.msk [vmem:[#allocation5 + $0x38] sm:$0xff] %vm72_vm0, %v7223_v57  ;;  %9972 = vmatmul.mubr.msk.f32.vlgmr.msra.gmra.mrb[104].mxu0 %vm72_vm0, %v7223_v57 }
0x9a4f   :  { %10455 = vmatpush3.bf16.msra.mxu0 %v12572_v44  ;;  %9993 = vmatprep.mubr.msk.f32.mxu0 %vm11089_vm1, %v11090_v4 }
0x9a50   :  { %10456 = vmatprep.subr.bf16.mxu0 %v11088_v3 }
0x9a53   :  { %10458 = vmatpush3.bf16.msra.mxu0 %v12582_v40 }
0x9a54   :  { %10465 = vmatprep.subr.bf16.mxu0 %v11088_v3 }
0x9b21   :  { %v7295_v28 = vpop.f32.mrb[104].mxu0 }
0x9b22   :  { %v7299_v60 = vadd.f32 %v7295_v28, %v6369_v7  ;;  %v9973_v33 = vpop.f32.mrb[105].mxu0 }
0x9b24   :  { %10960 = vtanh.f32 %v7299_v60  ;;  %v8765_v25 = vmul.f32 -1.442695, %v7299_v60 }
0x9b26   :  { %10962 = vpow2.f32 %v8765_v25 }
0x9b2e   :  { %v10961_v5 = vpop.eup %10960 }
0x9b2f   :  { %7309 = vrot.lane.b32.xlu0 %v10961_v5, %s11091_s0 }
0x9b30   :  { %v10963_v46 = vpop.eup %10962 }
0x9b31   :  { %v7303_v29 = vadd.f32 1.0, %v10963_v46 }
0x9b33   :  { %10964 = vrcp.f32 %v7303_v29 }
0x9b3d   :  { %v10965_v59 = vpop.eup %10964 }
0x9b3e   :  { %v7307_v23 = vmul.f32 %v10965_v59, %v7214_v14 }
0x9ba1   :  { %v7310_v37 = vpop.permute.xlu0 %7309 }
0x9ba2   :  { %v7312_v32 = vmul.f32 %v10965_v59, %v7310_v37 }
0x9ba4   :  { %7314 = vrot.lane.b32.xlu1 %v7312_v32, %s11092_s11 }
0x9c16   :  { %v7315_v39 = vpop.permute.xlu1 %7314 }
0x9c17   :  { %v7317_v31 = vadd.f32 %v7315_v39, %v7307_v23 }
0x9c19   :  { %10966 = vtanh.f32 %v7317_v31 }
0x9c23   :  { %v10967_v36 = vpop.eup %10966 }
0x9c24   :  { %7320 = vrot.lane.b32.xlu0 %v10967_v36, %s11091_s0 }
0x9c96   :  { %v7321_v13 = vpop.permute.xlu0 %7320 }
0x9c97   :  { %v7323_v7 = vmul.f32 %v10965_v59, %v7321_v13 }
0x9c99   :  { %7325 = vrot.lane.b32.xlu1 %v7323_v7, %s11092_s11 }
0x9d0b   :  { %v7326_v24 = vpop.permute.xlu1 %7325 }
0x9d0c   :  { %7328 = vst.msk [vmem:[#allocation5 + $0x40] sm:$0xff] %vm72_vm0, %v7326_v24  ;;  %9983 = vmatmul.mubr.msk.f32.vlgmr.msra.gmra.mrb[72].mxu1 %vm72_vm0, %v7326_v24 }
0x9d0d   :  { %10461 = vmatpush3.bf16.msra.mxu1 %v12572_v44  ;;  %10004 = vmatprep.mubr.msk.f32.mxu1 %vm11089_vm1, %v11090_v4 }
0x9d0e   :  { %10462 = vmatprep.subr.bf16.mxu1 %v11088_v3 }
0x9d11   :  { %10464 = vmatpush3.bf16.msra.mxu1 %v12582_v40 }
0x9d12   :  { %10471 = vmatprep.subr.bf16.mxu1 %v11088_v3 }
0x9ddf   :  { %v7398_v41 = vpop.f32.mrb[72].mxu1 }
0x9de0   :  { %v7402_v58 = vadd.f32 %v7398_v41, %v6373_v51  ;;  %v9984_v8 = vpop.f32.mrb[73].mxu1 }
0x9de2   :  { %10968 = vtanh.f32 %v7402_v58  ;;  %v8767_v55 = vmul.f32 -1.442695, %v7402_v58 }
0x9de4   :  { %10970 = vpow2.f32 %v8767_v55 }
0x9dec   :  { %v10969_v35 = vpop.eup %10968 }
0x9ded   :  { %7412 = vrot.lane.b32.xlu0 %v10969_v35, %s11091_s0 }
0x9dee   :  { %v10971_v18 = vpop.eup %10970 }
0x9def   :  { %v7406_v54 = vadd.f32 1.0, %v10971_v18 }
0x9df1   :  { %10972 = vrcp.f32 %v7406_v54 }
0x9dfb   :  { %v10973_v9 = vpop.eup %10972 }
0x9dfc   :  { %v7410_v11 = vmul.f32 %v10973_v9, %v7317_v31 }
0x9e5f   :  { %v7413_v10 = vpop.permute.xlu0 %7412 }
0x9e60   :  { %v7415_v0 = vmul.f32 %v10973_v9, %v7413_v10 }
0x9e62   :  { %7417 = vrot.lane.b32.xlu1 %v7415_v0, %s11092_s11 }
0x9ed4   :  { %v7418_v26 = vpop.permute.xlu1 %7417 }
0x9ed5   :  { %v7420_v6 = vadd.f32 %v7418_v26, %v7410_v11 }
0x9ed7   :  { %10974 = vtanh.f32 %v7420_v6 }
0x9ee1   :  { %v10975_v12 = vpop.eup %10974 }
0x9ee2   :  { %7423 = vrot.lane.b32.xlu0 %v10975_v12, %s11091_s0 }
0x9f54   :  { %v7424_v27 = vpop.permute.xlu0 %7423 }
0x9f55   :  { %v7426_v51 = vmul.f32 %v10973_v9, %v7424_v27 }
0x9f57   :  { %7428 = vrot.lane.b32.xlu1 %v7426_v51, %s11092_s11 }
0x9fc9   :  { %v7429_v15 = vpop.permute.xlu1 %7428 }
0x9fca   :  { %7431 = vst.msk [vmem:[#allocation5 + $0x48] sm:$0xff] %vm72_vm0, %v7429_v15  ;;  %9994 = vmatmul.mubr.msk.f32.vlgmr.msra.gmra.mrb[106].mxu0 %vm72_vm0, %v7429_v15 }
0x9fcb   :  { %10467 = vmatpush3.bf16.msra.mxu0 %v12572_v44  ;;  %10015 = vmatprep.mubr.msk.f32.mxu0 %vm11089_vm1, %v11090_v4 }
0x9fcc   :  { %10468 = vmatprep.subr.bf16.mxu0 %v11088_v3 }
0x9fcf   :  { %10470 = vmatpush3.bf16.msra.mxu0 %v12582_v40 }
0x9fd0   :  { %10477 = vmatprep.subr.bf16.mxu0 %v11088_v3 }
0xa09d   :  { %v7501_v19 = vpop.f32.mrb[106].mxu0 }
0xa09e   :  { %v7505_v14 = vadd.f32 %v7501_v19, %v6377_v17  ;;  %v9995_v45 = vpop.f32.mrb[107].mxu0 }
0xa0a0   :  { %10976 = vtanh.f32 %v7505_v14  ;;  %v8769_v48 = vmul.f32 -1.442695, %v7505_v14 }
0xa0a2   :  { %10978 = vpow2.f32 %v8769_v48 }
0xa0aa   :  { %v10977_v49 = vpop.eup %10976 }
0xa0ab   :  { %7515 = vrot.lane.b32.xlu0 %v10977_v49, %s11091_s0 }
0xa0ac   :  { %v10979_v57 = vpop.eup %10978 }
0xa0ad   :  { %v7509_v28 = vadd.f32 1.0, %v10979_v57 }
0xa0af   :  { %10980 = vrcp.f32 %v7509_v28 }
0xa0b9   :  { %v10981_v60 = vpop.eup %10980 }
0xa0ba   :  { %v7513_v25 = vmul.f32 %v10981_v60, %v7420_v6 }
0xa11d   :  { %v7516_v33 = vpop.permute.xlu0 %7515 }
0xa11e   :  { %v7518_v5 = vmul.f32 %v10981_v60, %v7516_v33 }
0xa120   :  { %7520 = vrot.lane.b32.xlu1 %v7518_v5, %s11092_s11 }
0xa192   :  { %v7521_v46 = vpop.permute.xlu1 %7520 }
0xa193   :  { %v7523_v29 = vadd.f32 %v7521_v46, %v7513_v25 }
0xa195   :  { %10982 = vtanh.f32 %v7523_v29 }
0xa19f   :  { %v10983_v38 = vpop.eup %10982 }
0xa1a0   :  { %7526 = vrot.lane.b32.xlu0 %v10983_v38, %s11091_s0  ;;  %v8056_v38 = vld [vmem:[%s13054_s4] sm:$0xff] }
0xa212   :  { %v7527_v43 = vpop.permute.xlu0 %7526 }
0xa213   :  { %v7529_v17 = vmul.f32 %v10981_v60, %v7527_v43  ;;  %v8057_v43 = vld [vmem:[%s13054_s4 + $0x8] sm:$0xff] }
0xa215   :  { %7531 = vrot.lane.b32.xlu1 %v7529_v17, %s11092_s11  ;;  %v10490_v17 = vpack.c.bf16 %v8057_v43, %v8056_v38  ;;  %v8054_v38 = vld [vmem:[#allocation5] sm:$0xff] }
0xa287   :  { %v7532_v59 = vpop.permute.xlu1 %7531 }
0xa288   :  { %7534 = vst.msk [vmem:[#allocation5 + $0x50] sm:$0xff] %vm72_vm0, %v7532_v59  ;;  %10005 = vmatmul.mubr.msk.f32.vlgmr.msra.gmra.mrb[74].mxu1 %vm72_vm0, %v7532_v59  ;;  %v8058_v59 = vld [vmem:[%s13054_s4 + $0x10] sm:$0xff] }
0xa289   :  { %10473 = vmatpush3.bf16.msra.mxu1 %v12572_v44  ;;  %10026 = vmatprep.mubr.msk.f32.mxu1 %vm11089_vm1, %v11090_v4 }
0xa28a   :  { %10474 = vmatprep.subr.bf16.mxu1 %v11088_v3 }
0xa28d   :  { %10476 = vmatpush3.bf16.msra.mxu1 %v12582_v40 }
0xa28e   :  { %10483 = vmatprep.subr.bf16.mxu1 %v11088_v3 }
0xa35b   :  { %v7604_v37 = vpop.f32.mrb[74].mxu1 }
0xa35c   :  { %v7608_v32 = vadd.f32 %v7604_v37, %v6381_v62  ;;  %v10006_v23 = vpop.f32.mrb[75].mxu1  ;;  %v8059_v37 = vld [vmem:[%s13054_s4 + $0x18] sm:$0xff] }
0xa35d   :  { %v10493_v23 = vpack.c.bf16 %v8059_v37, %v8058_v59 }
0xa35e   :  { %10984 = vtanh.f32 %v7608_v32  ;;  %v8771_v31 = vmul.f32 -1.442695, %v7608_v32 }
0xa360   :  { %10986 = vpow2.f32 %v8771_v31  ;;  %v8050_v31 = vld [vmem:[#allocation5 + $0x38] sm:$0xff] }
0xa368   :  { %v10985_v39 = vpop.eup %10984 }
0xa369   :  { %7618 = vrot.lane.b32.xlu0 %v10985_v39, %s11091_s0  ;;  %v8051_v39 = vld [vmem:[#allocation5 + $0x40] sm:$0xff] }
0xa36a   :  { %v10987_v36 = vpop.eup %10986 }
0xa36b   :  { %v7612_v13 = vadd.f32 1.0, %v10987_v36  ;;  %v8052_v36 = vsel %vm44_vm3, %v8050_v31, %v8051_v39  ;;  %v8789_v39 = vld [vmem:[%s13055_s6 + $0x1] ss:$0 sm:$0xff]  ;;  %v8788_v31 = vld [vmem:[%s13057_s5] ss:$0 sm:$0xff] }
0xa36d   :  { %10988 = vrcp.f32 %v7612_v13 }
0xa377   :  { %v10989_v7 = vpop.eup %10988 }
0xa378   :  { %v7616_v58 = vmul.f32 %v10989_v7, %v7523_v29 }
0xa3db   :  { %v7619_v24 = vpop.permute.xlu0 %7618 }
0xa3dc   :  { %v7621_v41 = vmul.f32 %v10989_v7, %v7619_v24 }
0xa3de   :  { %7623 = vrot.lane.b32.xlu1 %v7621_v41, %s11092_s11 }
0xa450   :  { %v7624_v8 = vpop.permute.xlu1 %7623 }
0xa451   :  { %v7626_v35 = vadd.f32 %v7624_v8, %v7616_v58 }
0xa453   :  { %10990 = vtanh.f32 %v7626_v35 }
0xa45d   :  { %v10991_v21 = vpop.eup %10990 }
0xa45e   :  { %7629 = vrot.lane.b32.xlu0 %v10991_v21, %s11091_s0 }
0xa4d0   :  { %v7630_v16 = vpop.permute.xlu0 %7629 }
0xa4d1   :  { %v7632_v62 = vmul.f32 %v10989_v7, %v7630_v16 }
0xa4d3   :  { %7634 = vrot.lane.b32.xlu1 %v7632_v62, %s11092_s11 }
0xa545   :  { %v7635_v55 = vpop.permute.xlu1 %7634 }
0xa546   :  { %7637 = vst.msk [vmem:[#allocation5 + $0x58] sm:$0xff] %vm72_vm0, %v7635_v55  ;;  %10016 = vmatmul.mubr.msk.f32.vlgmr.msra.gmra.mrb[108].mxu0 %vm72_vm0, %v7635_v55 }
0xa547   :  { %10479 = vmatpush3.bf16.msra.mxu0 %v12572_v44  ;;  %10037 = vmatprep.mubr.msk.f32.mxu0 %vm11089_vm1, %v11090_v4 }
0xa548   :  { %10480 = vmatprep.subr.bf16.mxu0 %v11088_v3 }
0xa54b   :  { %10482 = vmatpush3.bf16.msra.mxu0 %v12582_v40 }
0xa54c   :  { %10489 = vmatprep.subr.bf16.mxu0 %v11088_v3 }
0xa619   :  { %v7707_v18 = vpop.f32.mrb[108].mxu0 }
0xa61a   :  { %v7711_v54 = vadd.f32 %v7707_v18, %v6385_v30  ;;  %v10017_v9 = vpop.f32.mrb[109].mxu0 }
0xa61c   :  { %10992 = vtanh.f32 %v7711_v54  ;;  %v8773_v0 = vmul.f32 -1.442695, %v7711_v54 }
0xa61e   :  { %10994 = vpow2.f32 %v8773_v0 }
0xa626   :  { %v10993_v10 = vpop.eup %10992 }
0xa627   :  { %7721 = vrot.lane.b32.xlu0 %v10993_v10, %s11091_s0 }
0xa628   :  { %v10995_v11 = vpop.eup %10994 }
0xa629   :  { %v7715_v26 = vadd.f32 1.0, %v10995_v11 }
0xa62b   :  { %10996 = vrcp.f32 %v7715_v26 }
0xa635   :  { %v10997_v6 = vpop.eup %10996 }
0xa636   :  { %v7719_v51 = vmul.f32 %v10997_v6, %v7626_v35 }
0xa699   :  { %v7722_v12 = vpop.permute.xlu0 %7721 }
0xa69a   :  { %v7724_v27 = vmul.f32 %v10997_v6, %v7722_v12 }
0xa69c   :  { %7726 = vrot.lane.b32.xlu1 %v7724_v27, %s11092_s11 }
0xa70e   :  { %v7727_v15 = vpop.permute.xlu1 %7726 }
0xa70f   :  { %v7729_v19 = vadd.f32 %v7727_v15, %v7719_v51 }
0xa711   :  { %10998 = vtanh.f32 %v7729_v19 }
0xa71b   :  { %v10999_v20 = vpop.eup %10998 }
0xa71c   :  { %7732 = vrot.lane.b32.xlu0 %v10999_v20, %s11091_s0  ;;  %v8782_v20 = vld [vmem:[%s13056_s7] ss:$0 sm:$0xff] }
0xa78e   :  { %v7733_v61 = vpop.permute.xlu0 %7732 }
0xa78f   :  { %v7735_v30 = vmul.f32 %v10997_v6, %v7733_v61 }
0xa791   :  { %7737 = vrot.lane.b32.xlu1 %v7735_v30, %s11092_s11 }
0xa803   :  { %v7738_v14 = vpop.permute.xlu1 %7737 }
0xa804   :  { %7740 = vst.msk [vmem:[#allocation5 + $0x60] sm:$0xff] %vm72_vm0, %v7738_v14  ;;  %10027 = vmatmul.mubr.msk.f32.vlgmr.msra.gmra.mrb[76].mxu1 %vm72_vm0, %v7738_v14 }
0xa805   :  { %10485 = vmatpush3.bf16.msra.mxu1 %v12572_v44  ;;  %10048 = vmatprep.mubr.msk.f32.mxu1 %vm11089_vm1, %v11090_v4 }
0xa806   :  { %10486 = vmatprep.subr.bf16.mxu1 %v11088_v3 }
0xa809   :  { %10488 = vmatpush3.bf16.msra.mxu1 %v12582_v40 }
0xa80a   :  { %10495 = vmatprep.subr.bf16.mxu1 %v11088_v3 }
0xa8d7   :  { %v7810_v45 = vpop.f32.mrb[76].mxu1 }
0xa8d8   :  { %v7814_v49 = vadd.f32 %v7810_v45, %v6389_v50  ;;  %v10028_v48 = vpop.f32.mrb[77].mxu1 }
0xa8da   :  { %11000 = vtanh.f32 %v7814_v49  ;;  %v8775_v44 = vmul.f32 -1.442695, %v7814_v49 }
0xa8dc   :  { %11002 = vpow2.f32 %v8775_v44 }
0xa8e4   :  { %v11001_v57 = vpop.eup %11000 }
0xa8e5   :  { %7824 = vrot.lane.b32.xlu0 %v11001_v57, %s11091_s0 }
0xa8e6   :  { %v11003_v28 = vpop.eup %11002 }
0xa8e7   :  { %v7818_v60 = vadd.f32 1.0, %v11003_v28 }
0xa8e9   :  { %11004 = vrcp.f32 %v7818_v60 }
0xa8f3   :  { %v11005_v40 = vpop.eup %11004 }
0xa8f4   :  { %v7822_v25 = vmul.f32 %v11005_v40, %v7729_v19 }
0xa957   :  { %v7825_v33 = vpop.permute.xlu0 %7824 }
0xa958   :  { %v7827_v5 = vmul.f32 %v11005_v40, %v7825_v33 }
0xa95a   :  { %7829 = vrot.lane.b32.xlu1 %v7827_v5, %s11092_s11 }
0xa9cc   :  { %v7830_v46 = vpop.permute.xlu1 %7829 }
0xa9cd   :  { %v7832_v29 = vadd.f32 %v7830_v46, %v7822_v25 }
0xa9cf   :  { %11006 = vtanh.f32 %v7832_v29 }
0xa9d9   :  { %v11007_v34 = vpop.eup %11006 }
0xa9da   :  { %7835 = vrot.lane.b32.xlu0 %v11007_v34, %s11091_s0 }
0xaa4c   :  { %v7836_v56 = vpop.permute.xlu0 %7835 }
0xaa4d   :  { %v7838_v50 = vmul.f32 %v11005_v40, %v7836_v56  ;;  %v11095_v56 = vmov 3  }
0xaa4e   :  { %10510 = vset.pattern.permute.xlu1 %v11095_v56  ;;  %10511 = vset.pattern.permute.xlu0 %v11095_v56 }
0xaa4f   :  { %7840 = vrot.lane.b32.xlu1 %v7838_v50, %s11092_s11 }
0xaac1   :  { %v7841_v32 = vpop.permute.xlu1 %7840 }
0xaac2   :  { %7843 = vst.msk [vmem:[#allocation5 + $0x68] sm:$0xff] %vm72_vm0, %v7841_v32  ;;  %10038 = vmatmul.mubr.msk.f32.vlgmr.msra.gmra.mrb[110].mxu0 %vm72_vm0, %v7841_v32 }
0xaac3   :  { %10491 = vmatpush3.bf16.msra.mxu0 %v10490_v17  ;;  %10059 = vmatprep.mubr.msk.f32.mxu0 %vm11089_vm1, %v11090_v4 }
0xaac4   :  { %10492 = vmatprep.subr.bf16.mxu0 %v11088_v3 }
0xaac7   :  { %10494 = vmatpush3.bf16.msra.mxu0 %v10493_v23 }
0xaaca   :  { %10060 = vmatmul.mubr.msk.f32.vlgmr.msra.gmra.mrb[112].mxu0 %vm72_vm0, %v8052_v36  ;;  %v8295_v36 = vmul.f32 0.0, %v8789_v39 }
0xab95   :  { %v7913_v13 = vpop.f32.mrb[110].mxu0 }
0xab96   :  { %v7917_v7 = vadd.f32 %v7913_v13, %v6393_v22  ;;  %v10039_v24 = vpop.f32.mrb[111].mxu0 }
0xab98   :  { %11008 = vtanh.f32 %v7917_v7  ;;  %v8777_v35 = vmul.f32 -1.442695, %v7917_v7 }
0xab9a   :  { %11010 = vpow2.f32 %v8777_v35 }
0xab9d   :  { %v8138_v41 = vpop.f32.mrb[112].mxu0 }
0xab9e   :  { %v10061_v58 = vpop.f32.mrb[113].mxu0  ;;  %v8139_v47 = vadd.f32 %v8138_v41, %v8068_v53  ;;  %v8790_v41 = vld [vmem:[%s13056_s7 + $0x1] ss:$0 sm:$0xff] }
0xaba0   :  { %v8148_v14 = vadd.f32 %v8782_v20, %v8139_v47 }
0xaba2   :  { %v11009_v8 = vpop.eup %11008  ;;  %v8783_v48 = vmul.f32 -1.442695, %v8148_v14 }
0xaba3   :  { %7927 = vrot.lane.b32.xlu0 %v11009_v8, %s11091_s0 }
0xaba4   :  { %v11011_v21 = vpop.eup %11010 }
0xaba5   :  { %v7921_v16 = vadd.f32 1.0, %v11011_v21 }
0xaba7   :  { %11012 = vrcp.f32 %v7921_v16 }
0xabb1   :  { %v11013_v62 = vpop.eup %11012 }
0xabb2   :  { %v7925_v54 = vmul.f32 %v11013_v62, %v7832_v29 }
0xac15   :  { %v7928_v55 = vpop.permute.xlu0 %7927 }
0xac16   :  { %v7930_v18 = vmul.f32 %v11013_v62, %v7928_v55 }
0xac18   :  { %7932 = vrot.lane.b32.xlu1 %v7930_v18, %s11092_s11 }
0xac8a   :  { %v7933_v1 = vpop.permute.xlu1 %7932 }
0xac8b   :  { %v7935_v63 = vadd.f32 %v7933_v1, %v7925_v54 }
0xac8d   :  { %11014 = vtanh.f32 %v7935_v63 }
0xac97   :  { %v11015_v22 = vpop.eup %11014 }
0xac98   :  { %7938 = vrot.lane.b32.xlu0 %v11015_v22, %s11091_s0 }
0xad0a   :  { %v7939_v9 = vpop.permute.xlu0 %7938 }
0xad0b   :  { %v7941_v10 = vmul.f32 %v11013_v62, %v7939_v9 }
0xad0d   :  { %7943 = vrot.lane.b32.xlu1 %v7941_v10, %s11092_s11 }
0xad7f   :  { %v7944_v0 = vpop.permute.xlu1 %7943 }
0xad80   :  { %7946 = vst.msk [vmem:[#allocation5 + $0x70] sm:$0xff] %vm72_vm0, %v7944_v0  ;;  %10049 = vmatmul.mubr.msk.f32.vlgmr.msra.gmra.mrb[78].mxu1 %vm72_vm0, %v7944_v0 }
0xad81   :  { %10497 = vmatpush3.bf16.msra.mxu1 %v10490_v17  ;;  %10070 = vmatprep.mubr.msk.f32.mxu1 %vm11089_vm1, %v11090_v4 }
0xad82   :  { %10498 = vmatprep.subr.bf16.mxu1 %v11088_v3 }
0xad85   :  { %10500 = vmatpush3.bf16.msra.mxu1 %v10493_v23 }
0xae53   :  { %v8016_v11 = vpop.f32.mrb[78].mxu1 }
0xae54   :  { %v8020_v26 = vadd.f32 %v8016_v11, %v6397_v2  ;;  %v10050_v6 = vpop.f32.mrb[79].mxu1 }
0xae56   :  { %11016 = vtanh.f32 %v8020_v26  ;;  %v8779_v27 = vmul.f32 -1.442695, %v8020_v26 }
0xae58   :  { %11018 = vpow2.f32 %v8779_v27 }
0xae60   :  { %v11017_v12 = vpop.eup %11016 }
0xae61   :  { %8030 = vrot.lane.b32.xlu0 %v11017_v12, %s11091_s0 }
0xae62   :  { %v11019_v51 = vpop.eup %11018 }
0xae63   :  { %v8024_v15 = vadd.f32 1.0, %v11019_v51 }
0xae65   :  { %11020 = vrcp.f32 %v8024_v15 }
0xae6f   :  { %v11021_v4 = vpop.eup %11020 }
0xae70   :  { %v8028_v2 = vmul.f32 %v11021_v4, %v7935_v63 }
0xaed3   :  { %v8031_v3 = vpop.permute.xlu0 %8030 }
0xaed4   :  { %v8033_v19 = vmul.f32 %v11021_v4, %v8031_v3 }
0xaed6   :  { %8035 = vrot.lane.b32.xlu1 %v8033_v19, %s11092_s11 }
0xaf48   :  { %v8036_v61 = vpop.permute.xlu1 %8035 }
0xaf49   :  { %v8038_v30 = vadd.f32 %v8036_v61, %v8028_v2  ;;  %v8797_v61 = vld [vmem:[%s13055_s6 + $0x2] ss:$0 sm:$0xff] }
0xaf4b   :  { %11022 = vtanh.f32 %v8038_v30  ;;  %v8796_v30 = vld [vmem:[%s13057_s5 + $0x1] ss:$0 sm:$0xff] }
0xaf4c   :  { %11024 = vtanh.f32 %v8148_v14  ;;  %v8385_v14 = vmul.f32 0.0, %v8797_v61 }
0xaf4d   :  { %11026 = vpow2.f32 %v8783_v48 }
0xaf55   :  { %v11023_v45 = vpop.eup %11022 }
0xaf56   :  { %8041 = vrot.lane.b32.xlu0 %v11023_v45, %s11091_s0  ;;  %v11025_v49 = vpop.eup %11024  ;;  %s11096_s0 = smov 2  }
0xaf57   :  { %v11027_v57 = vpop.eup %11026 }
0xaf58   :  { %v8152_v44 = vadd.f32 1.0, %v11027_v57 }
0xaf5a   :  { %8158 = vrot.lane.b32.xlu0 %v11025_v49, %s11093_s10  ;;  %11028 = vrcp.f32 %v8152_v44 }
0xaf64   :  { %v11029_v40 = vpop.eup %11028 }
0xaf65   :  { %v8156_v46 = vmul.f32 0.0, %v11029_v40 }
0xafc8   :  { %v8042_v28 = vpop.permute.xlu0 %8041 }
0xafc9   :  { %v8044_v60 = vmul.f32 %v11021_v4, %v8042_v28  ;;  %v8798_v28 = vld [vmem:[%s13056_s7 + $0x2] ss:$0 sm:$0xff] }
0xafcb   :  { %8046 = vrot.lane.b32.xlu1 %v8044_v60, %s11092_s11 }
0xafcc   :  { %v8159_v33 = vpop.permute.xlu0 %8158 }
0xafcd   :  { %v8161_v5 = vmul.f32 %v11029_v40, %v8159_v33 }
0xafcf   :  { %8163 = vrot.lane.b32.xlu1 %v8161_v5, %s11094_s12 }
0xb03d   :  { %v8047_v25 = vpop.permute.xlu1 %8046 }
0xb03e   :  { %8049 = vst.msk [vmem:[#allocation5 + $0x78] sm:$0xff] %vm72_vm0, %v8047_v25 }
0xb041   :  { %v8164_v29 = vpop.permute.xlu1 %8163 }
0xb042   :  { %v8166_v34 = vadd.f32 %v8164_v29, %v8156_v46 }
0xb044   :  { %11030 = vtanh.f32 %v8166_v34 }
0xb045   :  { %v8053_v50 = vld [vmem:[#allocation5 + $0x78] sm:$0xff] }
0xb046   :  { %v8055_v43 = vsel %vm44_vm3, %v8053_v50, %v8054_v38 }
0xb047   :  { %10071 = vmatmul.mubr.msk.f32.vlgmr.msra.gmra.mrb[80].mxu1 %vm72_vm0, %v8055_v43 }
0xb04e   :  { %v11031_v17 = vpop.eup %11030 }
0xb04f   :  { %8169 = vrot.lane.b32.xlu0 %v11031_v17, %s11096_s0 }
0xb0c1   :  { %v8170_v59 = vpop.permute.xlu0 %8169 }
0xb0c2   :  { %v8172_v37 = vmul.f32 %v11029_v40, %v8170_v59 }
0xb0c4   :  { %8175 = vperm.xlu1 %10510, %v8172_v37  }
0xb11a   :  { %v8248_v32 = vpop.f32.mrb[80].mxu1 }
0xb11b   :  { %v10072_v23 = vpop.f32.mrb[81].mxu1 }
0xb143   :  { %v8176_v13 = vpop.permute.xlu1 %8175 }
0xb144   :  { %v8178_v7 = vmul.f32 %v8780_v52, %v8176_v13  ;;  %v8288_v24 = vmul.f32 %v8788_v31, %v8176_v13 }
0xb146   :  { %v8249_v58 = vadd.f32 %v8248_v32, %v8178_v7  ;;  %v8296_v8 = vadd.f32 %v8295_v36, %v8288_v24 }
0xb148   :  { %v8252_v35 = vadd.f32 %v8782_v20, %v8249_v58  ;;  %v8303_v21 = vadd.f32 %v8790_v41, %v8296_v8 }
0xb14a   :  { %11032 = vtanh.f32 %v8252_v35  ;;  %v8785_v55 = vmul.f32 -1.442695, %v8252_v35  ;;  %v8791_v18 = vmul.f32 -1.442695, %v8303_v21 }
0xb14b   :  { %11034 = vtanh.f32 %v8303_v21 }
0xb14c   :  { %11036 = vpow2.f32 %v8785_v55  ;;  %v8805_v55 = vld [vmem:[%s13055_s6 + $0x3] ss:$0 sm:$0xff] }
0xb14d   :  { %11038 = vpow2.f32 %v8791_v18  ;;  %v8804_v18 = vld [vmem:[%s13057_s5 + $0x2] ss:$0 sm:$0xff] }
0xb154   :  { %v11033_v16 = vpop.eup %11032 }
0xb155   :  { %v11035_v62 = vpop.eup %11034  ;;  %8262 = vrot.lane.b32.xlu0 %v11033_v16, %s11093_s10 }
0xb156   :  { %8313 = vrot.lane.b32.xlu1 %v11035_v62, %s11093_s10  ;;  %v11037_v54 = vpop.eup %11036 }
0xb157   :  { %v11039_v1 = vpop.eup %11038  ;;  %v8256_v63 = vadd.f32 1.0, %v11037_v54  ;;  %v8475_v54 = vmul.f32 0.0, %v8805_v55 }
0xb158   :  { %v8307_v22 = vadd.f32 1.0, %v11039_v1 }
0xb159   :  { %11040 = vrcp.f32 %v8256_v63 }
0xb15a   :  { %11042 = vrcp.f32 %v8307_v22 }
0xb163   :  { %v11041_v9 = vpop.eup %11040 }
0xb164   :  { %v11043_v0 = vpop.eup %11042  ;;  %v8260_v12 = vmul.f32 %v11041_v9, %v8166_v34 }
0xb165   :  { %v8311_v27 = vmul.f32 0.0, %v11043_v0 }
0xb1c7   :  { %v8263_v10 = vpop.permute.xlu0 %8262 }
0xb1c8   :  { %v8314_v11 = vpop.permute.xlu1 %8313  ;;  %v8265_v26 = vmul.f32 %v11041_v9, %v8263_v10 }
0xb1c9   :  { %v8316_v6 = vmul.f32 %v11043_v0, %v8314_v11 }
0xb1ca   :  { %8267 = vrot.lane.b32.xlu0 %v8265_v26, %s11094_s12 }
0xb1cb   :  { %8318 = vrot.lane.b32.xlu1 %v8316_v6, %s11094_s12 }
0xb23c   :  { %v8268_v51 = vpop.permute.xlu0 %8267 }
0xb23d   :  { %v8319_v15 = vpop.permute.xlu1 %8318  ;;  %v8270_v4 = vadd.f32 %v8268_v51, %v8260_v12 }
0xb23e   :  { %v8321_v3 = vadd.f32 %v8319_v15, %v8311_v27 }
0xb23f   :  { %11044 = vtanh.f32 %v8270_v4 }
0xb240   :  { %11046 = vtanh.f32 %v8321_v3 }
0xb249   :  { %v11045_v19 = vpop.eup %11044 }
0xb24a   :  { %v11047_v52 = vpop.eup %11046  ;;  %8273 = vrot.lane.b32.xlu0 %v11045_v19, %s11096_s0 }
0xb24b   :  { %8324 = vrot.lane.b32.xlu1 %v11047_v52, %s11096_s0 }
0xb2bc   :  { %v8274_v53 = vpop.permute.xlu0 %8273 }
0xb2bd   :  { %v8325_v47 = vpop.permute.xlu1 %8324  ;;  %v8276_v2 = vmul.f32 %v11041_v9, %v8274_v53 }
0xb2be   :  { %v8327_v20 = vmul.f32 %v11043_v0, %v8325_v47  ;;  %v8806_v0 = vld [vmem:[%s13056_s7 + $0x3] ss:$0 sm:$0xff] }
0xb2bf   :  { %8330 = vperm.xlu0 %10511, %v8276_v2  }
0xb2c0   :  { %8336 = vperm.xlu1 %10510, %v8327_v20  }
0xb33e   :  { %v8331_v45 = vpop.permute.xlu0 %8330 }
0xb33f   :  { %v8337_v49 = vpop.permute.xlu1 %8336  ;;  %v8333_v48 = vmul.f32 %v8788_v31, %v8331_v45 }
0xb340   :  { %v8339_v57 = vmul.f32 %v8789_v39, %v8337_v49  ;;  %v8378_v44 = vmul.f32 %v8796_v30, %v8337_v49 }
0xb342   :  { %v8386_v60 = vadd.f32 %v8385_v14, %v8378_v44  ;;  %v8340_v40 = vadd.f32 %v8339_v57, %v8333_v48 }
0xb344   :  { %v8393_v33 = vadd.f32 %v8798_v28, %v8386_v60  ;;  %v8341_v5 = vadd.f32 %v8790_v41, %v8340_v40 }
0xb346   :  { %11048 = vtanh.f32 %v8393_v33  ;;  %v8799_v29 = vmul.f32 -1.442695, %v8393_v33  ;;  %v8792_v34 = vmul.f32 -1.442695, %v8341_v5 }
0xb347   :  { %11050 = vtanh.f32 %v8341_v5 }
0xb348   :  { %11052 = vpow2.f32 %v8799_v29 }
0xb349   :  { %11054 = vpow2.f32 %v8792_v34 }
0xb350   :  { %v11049_v25 = vpop.eup %11048 }
0xb351   :  { %v11051_v46 = vpop.eup %11050  ;;  %8403 = vrot.lane.b32.xlu0 %v11049_v25, %s11093_s10 }
0xb352   :  { %8351 = vrot.lane.b32.xlu1 %v11051_v46, %s11093_s10  ;;  %v11053_v56 = vpop.eup %11052 }
0xb353   :  { %v11055_v50 = vpop.eup %11054  ;;  %v8397_v38 = vadd.f32 1.0, %v11053_v56 }
0xb354   :  { %v8345_v43 = vadd.f32 1.0, %v11055_v50 }
0xb355   :  { %11056 = vrcp.f32 %v8397_v38 }
0xb356   :  { %11058 = vrcp.f32 %v8345_v43 }
0xb35f   :  { %v11057_v17 = vpop.eup %11056 }
0xb360   :  { %v11059_v37 = vpop.eup %11058  ;;  %v8401_v31 = vmul.f32 0.0, %v11057_v17 }
0xb361   :  { %v8349_v36 = vmul.f32 %v11059_v37, %v8321_v3 }
0xb3c3   :  { %v8404_v59 = vpop.permute.xlu0 %8403 }
0xb3c4   :  { %v8352_v32 = vpop.permute.xlu1 %8351  ;;  %v8406_v23 = vmul.f32 %v11057_v17, %v8404_v59 }
0xb3c5   :  { %v8354_v39 = vmul.f32 %v11059_v37, %v8352_v32 }
0xb3c6   :  { %8408 = vrot.lane.b32.xlu0 %v8406_v23, %s11094_s12 }
0xb3c7   :  { %8356 = vrot.lane.b32.xlu1 %v8354_v39, %s11094_s12 }
0xb438   :  { %v8409_v13 = vpop.permute.xlu0 %8408 }
0xb439   :  { %v8357_v7 = vpop.permute.xlu1 %8356  ;;  %v8411_v24 = vadd.f32 %v8409_v13, %v8401_v31 }
0xb43a   :  { %v8359_v41 = vadd.f32 %v8357_v7, %v8349_v36 }
0xb43b   :  { %11060 = vtanh.f32 %v8411_v24 }
0xb43c   :  { %11062 = vtanh.f32 %v8359_v41 }
0xb445   :  { %v11061_v58 = vpop.eup %11060 }
0xb446   :  { %v11063_v8 = vpop.eup %11062  ;;  %8414 = vrot.lane.b32.xlu0 %v11061_v58, %s11096_s0 }
0xb447   :  { %8362 = vrot.lane.b32.xlu1 %v11063_v8, %s11096_s0 }
0xb4b8   :  { %v8415_v35 = vpop.permute.xlu0 %8414 }
0xb4b9   :  { %v8363_v21 = vpop.permute.xlu1 %8362  ;;  %v8417_v16 = vmul.f32 %v11057_v17, %v8415_v35 }
0xb4ba   :  { %v8365_v62 = vmul.f32 %v11059_v37, %v8363_v21 }
0xb4bb   :  { %8426 = vperm.xlu0 %10511, %v8417_v16  }
0xb4bc   :  { %8420 = vperm.xlu1 %10510, %v8365_v62  }
0xb53a   :  { %v8427_v1 = vpop.permute.xlu0 %8426 }
0xb53b   :  { %v8421_v63 = vpop.permute.xlu1 %8420  ;;  %v8429_v22 = vmul.f32 %v8797_v61, %v8427_v1  ;;  %v8468_v9 = vmul.f32 %v8804_v18, %v8427_v1 }
0xb53c   :  { %v8423_v10 = vmul.f32 %v8796_v30, %v8421_v63 }
0xb53d   :  { %v8476_v11 = vadd.f32 %v8475_v54, %v8468_v9 }
0xb53e   :  { %v8430_v26 = vadd.f32 %v8429_v22, %v8423_v10 }
0xb53f   :  { %v8483_v6 = vadd.f32 %v8806_v0, %v8476_v11 }
0xb540   :  { %v8431_v12 = vadd.f32 %v8798_v28, %v8430_v26 }
0xb541   :  { %11064 = vtanh.f32 %v8483_v6  ;;  %v8807_v15 = vmul.f32 -1.442695, %v8483_v6 }
0xb542   :  { %11066 = vtanh.f32 %v8431_v12  ;;  %v8800_v4 = vmul.f32 -1.442695, %v8431_v12 }
0xb543   :  { %11068 = vpow2.f32 %v8807_v15 }
0xb544   :  { %11070 = vpow2.f32 %v8800_v4 }
0xb54b   :  { %v11065_v27 = vpop.eup %11064 }
0xb54c   :  { %v11067_v51 = vpop.eup %11066  ;;  %8493 = vrot.lane.b32.xlu0 %v11065_v27, %s11093_s10 }
0xb54d   :  { %8441 = vrot.lane.b32.xlu1 %v11067_v51, %s11093_s10  ;;  %v11069_v3 = vpop.eup %11068 }
0xb54e   :  { %v11071_v19 = vpop.eup %11070  ;;  %v8487_v52 = vadd.f32 1.0, %v11069_v3 }
0xb54f   :  { %v8435_v53 = vadd.f32 1.0, %v11071_v19 }
0xb550   :  { %11072 = vrcp.f32 %v8487_v52 }
0xb551   :  { %11074 = vrcp.f32 %v8435_v53 }
0xb55a   :  { %v11073_v47 = vpop.eup %11072 }
0xb55b   :  { %v11075_v20 = vpop.eup %11074  ;;  %v8491_v45 = vmul.f32 0.0, %v11073_v47 }
0xb55c   :  { %v8439_v48 = vmul.f32 %v11075_v20, %v8411_v24 }
0xb5be   :  { %v8494_v2 = vpop.permute.xlu0 %8493 }
0xb5bf   :  { %v8496_v61 = vmul.f32 %v11073_v47, %v8494_v2  ;;  %v8442_v30 = vpop.permute.xlu1 %8441 }
0xb5c0   :  { %v8444_v14 = vmul.f32 %v11075_v20, %v8442_v30 }
0xb5c1   :  { %8498 = vrot.lane.b32.xlu0 %v8496_v61, %s11094_s12 }
0xb5c2   :  { %8446 = vrot.lane.b32.xlu1 %v8444_v14, %s11094_s12 }
0xb633   :  { %v8499_v49 = vpop.permute.xlu0 %8498 }
0xb634   :  { %v8501_v57 = vadd.f32 %v8499_v49, %v8491_v45  ;;  %v8447_v44 = vpop.permute.xlu1 %8446 }
0xb635   :  { %v8449_v28 = vadd.f32 %v8447_v44, %v8439_v48 }
0xb636   :  { %11076 = vtanh.f32 %v8501_v57 }
0xb637   :  { %11078 = vtanh.f32 %v8449_v28 }
0xb640   :  { %v11077_v60 = vpop.eup %11076 }
0xb641   :  { %v11079_v40 = vpop.eup %11078  ;;  %8504 = vrot.lane.b32.xlu0 %v11077_v60, %s11096_s0 }
0xb642   :  { %8452 = vrot.lane.b32.xlu1 %v11079_v40, %s11096_s0 }
0xb6b3   :  { %v8505_v33 = vpop.permute.xlu0 %8504 }
0xb6b4   :  { %v8507_v5 = vmul.f32 %v11073_v47, %v8505_v33  ;;  %v8453_v25 = vpop.permute.xlu1 %8452 }
0xb6b5   :  { %v8455_v46 = vmul.f32 %v11075_v20, %v8453_v25 }
0xb6b6   :  { %8516 = vperm.xlu0 %10511, %v8507_v5  }
0xb6b7   :  { %8510 = vperm.xlu1 %10510, %v8455_v46  }
0xb735   :  { %v8517_v29 = vpop.permute.xlu0 %8516 }
0xb736   :  { %v8519_v34 = vmul.f32 %v8805_v55, %v8517_v29  ;;  %v8511_v56 = vpop.permute.xlu1 %8510  ;;  %v8547_v8 = vsel %vm8546_vm4, %v8517_v29, 0.0 }
0xb737   :  { %v8513_v50 = vmul.f32 %v8804_v18, %v8511_v56 }
0xb739   :  { %v8520_v38 = vadd.f32 %v8519_v34, %v8513_v50 }
0xb73b   :  { %v8521_v43 = vadd.f32 %v8806_v0, %v8520_v38 }
0xb73d   :  { %11080 = vtanh.f32 %v8521_v43  ;;  %v8808_v59 = vmul.f32 -1.442695, %v8521_v43 }
0xb73f   :  { %11082 = vpow2.f32 %v8808_v59 }
0xb747   :  { %v11081_v17 = vpop.eup %11080 }
0xb748   :  { %8531 = vrot.lane.b32.xlu1 %v11081_v17, %s11093_s10 }
0xb749   :  { %v11083_v37 = vpop.eup %11082 }
0xb74a   :  { %v8525_v32 = vadd.f32 1.0, %v11083_v37 }
0xb74c   :  { %11084 = vrcp.f32 %v8525_v32 }
0xb756   :  { %v11085_v23 = vpop.eup %11084 }
0xb757   :  { %v8529_v36 = vmul.f32 %v11085_v23, %v8501_v57 }
0xb7ba   :  { %v8532_v39 = vpop.permute.xlu1 %8531 }
0xb7bb   :  { %v8534_v31 = vmul.f32 %v11085_v23, %v8532_v39 }
0xb7bd   :  { %8536 = vrot.lane.b32.xlu0 %v8534_v31, %s11094_s12 }
0xb82f   :  { %v8537_v13 = vpop.permute.xlu0 %8536 }
0xb830   :  { %v8539_v7 = vadd.f32 %v8537_v13, %v8529_v36 }
0xb832   :  { %11086 = vtanh.f32 %v8539_v7 }
0xb83c   :  { %v11087_v24 = vpop.eup %11086 }
0xb83d   :  { %8542 = vrot.lane.b32.xlu1 %v11087_v24, %s11096_s0 }
0xb8af   :  { %v8543_v41 = vpop.permute.xlu1 %8542 }
0xb8b0   :  { %v8545_v58 = vmul.f32 %v11085_v23, %v8543_v41 }
0xb8b2   :  { %8551 = vperm.xlu0 %10511, %v8545_v58  }
0xb931   :  { %v8552_v35 = vpop.permute.xlu0 %8551 }
0xb932   :  { %v8554_v21 = vsel %vm8548_vm5, %v8552_v35, %v8547_v8 }
0xb933   :  { %8556 = vst.msk [vmem:[%s13058_s8] sm:$0xff] %vm8555_vm6, %v8554_v21 }

</bundles_post_ra>
